<compile_context>
chip_gen: v5e
topology: v5e:2x2
jax: 0.10.0
libtpu: 0.0.40
codegen_flags: <defaults>
</compile_context>

<pallas_src>
import functools

import jax
import jax.numpy as jnp
from jax import lax
from jax.experimental import pallas as pl
from jax.experimental.pallas import tpu as pltpu

MSA_SCALAR = 5.0   # mBloSA "c" parameter (non-trainable scalar)


def _dot(a, b):
    """Single-pass MXU matmul: bf16 operands, f32 accumulation."""
    return jnp.dot(a.astype(jnp.bfloat16), b.astype(jnp.bfloat16),
                   preferred_element_type=jnp.float32)


# ---------------------------------------------------------------------------
# In-kernel building blocks
# ---------------------------------------------------------------------------
def _sigmoid_k(x):
    """Numerically stable, exact sigmoid (no approx reciprocal)."""
    z = jnp.exp(-jnp.abs(x))
    r = 1.0 / (1.0 + z)
    return jnp.where(x >= 0, r, z * r)


def _fw_mask01(n):
    """0/1 'fw' mask: valid where key j > query i (last query row is all-zero)."""
    ii = lax.broadcasted_iota(jnp.int32, (n, n), 0)
    jj = lax.broadcasted_iota(jnp.int32, (n, n), 1)
    return (jj > ii).astype(jnp.float32)


def _msa_rowsum(scores, mask01):
    """sum_j softmax_j(masked scores), per (query, channel).

    scores: (..., S_i, S_j, d); mask01: (S, S) broadcast over leading/channel dims.
    Scores are tanh-bounded, so no max pass is needed; the mask is a multiply; the
    row-sum of the softmax is reassociated as (sum_j p)/clamp(sum_j p) — exactly 1 for
    rows with a valid key, exactly 0 for the fully-masked last query row.
    """
    p = jnp.exp(scores) * mask01
    denom = jnp.sum(p, axis=-2)                       # (..., S_i, d)
    return denom / jnp.maximum(denom, 1e-30)


def mblosa_kernel(x_ref,
                  wx_ref, mb_ref,        # fused x-side weights [mW1|mW2|f1x|f2x], mSA bias
                  wh_ref, s2tb1_ref,     # fused h-side weights [s2tW1|f1h|f2h], s2t bias1
                  s2tw_ref, s2tb_ref,    # s2t second projection
                  gw_ref, gb_ref,        # block gate [gW1; gW2], gate bias
                  we_ref, fb_ref,        # fusion E-branch [f1e|f2e], fusion bias [f1b|f2b]
                  o_ref, *, m, r, d, c):
    xb = x_ref[0]                                            # (m, r, d) f32
    x2 = xb.reshape(m * r, d)
    inv_c = 1.0 / c

    # ---- fused x projections: [x@m_W1 | x@m_W2 | x@f_W1_x | x@f_W2_x] ----
    wx = wx_ref[...]                                         # (d, 4d) bf16
    xw = _dot(x2, wx)                                        # (m*r, 4d) f32
    xi = xw[:, :d].reshape(m, r, d)
    xj = xw[:, d:2 * d].reshape(m, r, d)
    x_fus = xw[:, 2 * d:]                                    # (m*r, 2d)

    mb = mb_ref[...]                                         # (1, d)

    # ---- mSA within each block -> h (reference weights f by x at the *query* index) ----
    scores = c * jnp.tanh((xi[:, :, None, :] + xj[:, None, :, :]
                           + mb[None, None, :, :]) * inv_c)  # (m, r, r, d)
    h = xb * _msa_rowsum(scores, _fw_mask01(r)[None, :, :, None])   # (m, r, d)
    h2 = h.reshape(m * r, d)

    # ---- fused h projections: [h@s2t_W1 | h@f_W1_h | h@f_W2_h] ----
    hw = _dot(h2, wh_ref[...])                               # (m*r, 3d)
    f1 = jnp.maximum(hw[:, :d] + s2tb1_ref[...], 0.0)
    h_fus = hw[:, d:]                                        # (m*r, 2d)

    # ---- source2token self-attention (s2tSA) -> v  (unbounded logits: keep max pass) ----
    logits = (_dot(f1, s2tw_ref[...]) + s2tb_ref[...]).reshape(m, r, d)
    lm = jnp.max(logits, axis=-2, keepdims=True)
    lp = jnp.exp(logits - lm)
    attn = lp / jnp.sum(lp, axis=-2, keepdims=True)
    v = jnp.sum(attn * h, axis=-2)                           # (m, d)

    # ---- mSA over blocks (reuses m_W1/m_W2: matmul against full wx, slice the result) ----
    vw = _dot(v, wx)                                         # (m, 4d); slices 128-aligned
    scores_b = c * jnp.tanh((vw[:, None, :d] + vw[None, :, d:2 * d]
                             + mb[None, :, :]) * inv_c)      # (m, m, d)
    o = v * _msa_rowsum(scores_b, _fw_mask01(m)[:, :, None]) # (m, d)

    # ---- block-level gate: sigmoid(o@g_W1 + v@g_W2 + g_b) (no lane-axis concat) ----
    gw = gw_ref[...]                                         # (2d, d) bf16
    G = _sigmoid_k(_dot(o, gw[:d]) + _dot(v, gw[d:]) + gb_ref[...])
    e = G * o + (1.0 - G) * v                                # (m, d)

    # ---- fusion gate; E-branch hoisted to block granularity (saves r x FLOPs) ----
    e_fus = _dot(e, we_ref[...]) + fb_ref[...]               # (m, 2d)
    pre = (x_fus + h_fus).reshape(m, r, 2 * d) + e_fus[:, None, :]
    pre = pre.reshape(m * r, 2 * d)
    fusion = jnp.maximum(pre[:, :d], 0.0)
    Gf = _sigmoid_k(pre[:, d:])
    u = Gf * fusion + (1.0 - Gf) * x2                        # (m*r, d)

    o_ref[0] = u.astype(o_ref.dtype)


# ---------------------------------------------------------------------------
# Wrapper: lane padding, weight packing, blocking, BlockSpecs
# ---------------------------------------------------------------------------
def _round_up(v, mult):
    return ((v + mult - 1) // mult) * mult


def _pack_weights(params, dp):
    """Zero-pad each weight/bias to dp lanes and concatenate groups into wide bf16
    matmul operands (biases stay f32).  Zero padding is numerically exact."""
    bf16, f32 = jnp.bfloat16, jnp.float32

    def pw(name):                                   # (d_in, d_out) -> (dp, dp)
        w = params[name].astype(f32)
        return jnp.pad(w, ((0, dp - w.shape[0]), (0, dp - w.shape[1])))

    def pb(name):                                   # (1, d) -> (1, dp)
        b = params[name].astype(f32)
        return jnp.pad(b, ((0, 0), (0, dp - b.shape[1])))

    wx = jnp.concatenate([pw('m_W1'), pw('m_W2'),
                          pw('f_W1_x'), pw('f_W2_x')], axis=1).astype(bf16)
    wh = jnp.concatenate([pw('s2t_W1_w'), pw('f_W1_h'), pw('f_W2_h')], axis=1).astype(bf16)
    gw = jnp.concatenate([pw('g_W1'), pw('g_W2')], axis=0).astype(bf16)
    we = jnp.concatenate([pw('f_W1_e'), pw('f_W2_e')], axis=1).astype(bf16)
    fb = jnp.concatenate([pb('f_W1_b'), pb('f_W2_b')], axis=1)
    return [wx, pb('m_b'),
            wh, pb('s2t_W1_b'),
            pw('s2t_W_w').astype(bf16), pb('s2t_W_b'),
            gw, pb('g_b'),
            we, fb]


def mblosa_forward(x, params, block_size):
    B, n, d = x.shape
    r = block_size
    pad_len = (-n) % r
    npad = n + pad_len
    m = npad // r
    dp = _round_up(d, 128)                           # lane-dense layout: d -> multiple of 128

    xp = jnp.pad(x.astype(jnp.float32), ((0, 0), (0, pad_len), (0, dp - d)))
    xb = xp.reshape(B, m, r, dp)

    weights = _pack_weights(params, dp)

    in_specs = [pl.BlockSpec((1, m, r, dp), lambda b: (b, 0, 0, 0))]
    for w in weights:
        in_specs.append(pl.BlockSpec(w.shape, lambda b, nd=w.ndim: (0,) * nd))

    kernel = functools.partial(mblosa_kernel, m=m, r=r, d=dp, c=MSA_SCALAR)
    out = pl.pallas_call(
        kernel,
        out_shape=jax.ShapeDtypeStruct((B, npad, dp), jnp.float32),
        grid=(B,),
        in_specs=in_specs,
        out_specs=pl.BlockSpec((1, npad, dp), lambda b: (b, 0, 0)),
        compiler_params=pltpu.CompilerParams(
            dimension_semantics=("parallel",),       # batch steps independent (megacore)
            vmem_limit_bytes=32 * 1024 * 1024),
    )(xb, *weights)
    return out[:, :n, :d]


# ---------------------------------------------------------------------------
# Deterministic parameter init (synthetic; Linear weights stored (in, out))
# ---------------------------------------------------------------------------
def init_params(key, d):
    ks = jax.random.split(key, 16)

    def lin(k, fan_in, shape):
        bound = 1.0 / (fan_in ** 0.5)
        return jax.random.uniform(k, shape, jnp.float32, -bound, bound)

    return {
        'm_W1': lin(ks[0], d, (d, d)),
        'm_W2': lin(ks[1], d, (d, d)),
        'm_b': jnp.zeros((1, d), jnp.float32),
        's2t_W1_w': lin(ks[2], d, (d, d)),
        's2t_W1_b': lin(ks[3], d, (1, d)),
        's2t_W_w': lin(ks[4], d, (d, d)),
        's2t_W_b': lin(ks[5], d, (1, d)),
        'g_W1': lin(ks[6], d, (d, d)),
        'g_W2': lin(ks[7], d, (d, d)),
        'g_b': jnp.zeros((1, d), jnp.float32),
        # f_W1 / f_W2 take concat([x, h, E]) (3d -> d); split along the input dim.
        'f_W1_x': lin(ks[8], 3 * d, (d, d)),
        'f_W1_h': lin(ks[9], 3 * d, (d, d)),
        'f_W1_e': lin(ks[10], 3 * d, (d, d)),
        'f_W1_b': lin(ks[11], 3 * d, (1, d)),
        'f_W2_x': lin(ks[12], 3 * d, (d, d)),
        'f_W2_h': lin(ks[13], 3 * d, (d, d)),
        'f_W2_e': lin(ks[14], 3 * d, (d, d)),
        'f_W2_b': lin(ks[15], 3 * d, (1, d)),
    }


# ---------------------------------------------------------------------------
# Pure-JAX reference (mirrors the PyTorch code structure) for validation.
# Uses the same bf16-operand matmuls as the kernel so the comparison isolates
# kernel-implementation correctness from MXU rounding.
# ---------------------------------------------------------------------------
def ref_msa(x, p, c):
    S = x.shape[-2]
    xi = _dot(x, p['m_W1'])[..., :, None, :]
    xj = _dot(x, p['m_W2'])[..., None, :, :]
    f = c * jnp.tanh((xi + xj + p['m_b'][0]) / c)
    ii = jnp.arange(S)[:, None]
    jj = jnp.arange(S)[None, :]
    M = jnp.where(ii >= jj, -jnp.inf, 0.0)                  # 'fw' mask (post-transpose)
    f = (f + M[:, :, None])[..., : S - 1, :, :]
    f = jax.nn.softmax(f, axis=-2)
    pad = jnp.zeros(x.shape[:-2] + (1, S, x.shape[-1]), jnp.float32)
    f = jnp.concatenate([f, pad], axis=-3)
    return jnp.sum(f * x[..., :, None, :], axis=-2)


def ref_s2t(x, p):
    f = jnp.maximum(_dot(x, p['s2t_W1_w']) + p['s2t_W1_b'][0], 0.0)
    f = jax.nn.softmax(_dot(f, p['s2t_W_w']) + p['s2t_W_b'][0], axis=-2)
    return jnp.sum(f * x, axis=-2)


def ref_mblosa(x, p, r):
    B, n, d = x.shape
    c = MSA_SCALAR
    pad_len = (-n) % r
    if pad_len:
        x = jnp.concatenate([x, jnp.zeros((B, pad_len, d), x.dtype)], axis=1)
    m = x.shape[1] // r
    xb = x.reshape(B, m, r, d)
    h = ref_msa(xb, p, c)
    v = ref_s2t(h, p)
    o = ref_msa(v, p, c)
    G = jax.nn.sigmoid(_dot(o, p['g_W1']) + _dot(v, p['g_W2']) + p['g_b'][0])
    e = G * o + (1.0 - G) * v
    E = jnp.repeat(e, r, axis=1)[:, :n]
    xf = xb.reshape(B, m * r, d)[:, :n]
    hf = h.reshape(B, m * r, d)[:, :n]
    fusion = jnp.maximum(_dot(xf, p['f_W1_x']) + _dot(hf, p['f_W1_h'])
                         + _dot(E, p['f_W1_e']) + p['f_W1_b'][0], 0.0)
    Gf = jax.nn.sigmoid(_dot(xf, p['f_W2_x']) + _dot(hf, p['f_W2_h'])
                        + _dot(E, p['f_W2_e']) + p['f_W2_b'][0])
    return Gf * fusion + (1.0 - Gf) * xf


if __name__ == "__main__":
    B, n, d, r = 2, 60, 32, 8            # seq not a multiple of block_size -> pad path
    key = jax.random.PRNGKey(0)
    kx, kp = jax.random.split(key)
    x = jax.random.normal(kx, (B, n, d), jnp.float32)
    params = init_params(kp, d)

    u = mblosa_forward(x, params, block_size=r)
    u = jax.block_until_ready(u)

    u_ref = ref_mblosa(x, params, r)
    assert u.shape == (B, n, d)
    assert bool(jnp.all(jnp.isfinite(u)))
    err = float(jnp.max(jnp.abs(u - u_ref)))
    # Kernel and reference share bf16 MXU operands and exact softmax/sigmoid divisions;
    # typical diff is ~1e-5.  5e-3 leaves margin for rare bf16 operand-rounding
    # divergence between the two numerically-equivalent formulations.
    assert bool(jnp.allclose(u, u_ref, rtol=5e-3, atol=5e-3)), f"max abs diff {err}"
    print("KERNEL_OK")
</pallas_src>

<mosaic_0001>
module attributes {stable_mosaic.version = 11 : i64} {
  func.func @mblosa_kernel(%arg0: i32, %arg1: memref<1x8x8x128xf32, #tpu.memory_space<vmem>>, %arg2: memref<128x512xbf16, #tpu.memory_space<vmem>>, %arg3: memref<1x128xf32, #tpu.memory_space<vmem>>, %arg4: memref<128x384xbf16, #tpu.memory_space<vmem>>, %arg5: memref<1x128xf32, #tpu.memory_space<vmem>>, %arg6: memref<128x128xbf16, #tpu.memory_space<vmem>>, %arg7: memref<1x128xf32, #tpu.memory_space<vmem>>, %arg8: memref<256x128xbf16, #tpu.memory_space<vmem>>, %arg9: memref<1x128xf32, #tpu.memory_space<vmem>>, %arg10: memref<128x256xbf16, #tpu.memory_space<vmem>>, %arg11: memref<1x256xf32, #tpu.memory_space<vmem>>, %arg12: memref<1x64x128xf32, #tpu.memory_space<vmem>>) attributes {dimension_semantics = [#tpu.dimension_semantics<parallel>], iteration_bounds = array<i64: 2>, scalar_prefetch = 0 : i64, scratch_operands = 0 : i64, tpu.core_type = #tpu.core_type<tc>, window_params = [{transform_indices = @transform_0, window_bounds = array<i64: 1, 8, 8, 128>}, {pipeline_mode = #tpu.pipeline_mode<synchronous>, transform_indices = @transform_1, window_bounds = array<i64: 128, 512>}, {pipeline_mode = #tpu.pipeline_mode<synchronous>, transform_indices = @transform_2, window_bounds = array<i64: 1, 128>}, {pipeline_mode = #tpu.pipeline_mode<synchronous>, transform_indices = @transform_3, window_bounds = array<i64: 128, 384>}, {pipeline_mode = #tpu.pipeline_mode<synchronous>, transform_indices = @transform_4, window_bounds = array<i64: 1, 128>}, {pipeline_mode = #tpu.pipeline_mode<synchronous>, transform_indices = @transform_5, window_bounds = array<i64: 128, 128>}, {pipeline_mode = #tpu.pipeline_mode<synchronous>, transform_indices = @transform_6, window_bounds = array<i64: 1, 128>}, {pipeline_mode = #tpu.pipeline_mode<synchronous>, transform_indices = @transform_7, window_bounds = array<i64: 256, 128>}, {pipeline_mode = #tpu.pipeline_mode<synchronous>, transform_indices = @transform_8, window_bounds = array<i64: 1, 128>}, {pipeline_mode = #tpu.pipeline_mode<synchronous>, transform_indices = @transform_9, window_bounds = array<i64: 128, 256>}, {pipeline_mode = #tpu.pipeline_mode<synchronous>, transform_indices = @transform_10, window_bounds = array<i64: 1, 256>}, {transform_indices = @transform_11, window_bounds = array<i64: 1, 64, 128>}]} {
    %c0 = arith.constant 0 : index
    %c0_0 = arith.constant 0 : index
    %c0_1 = arith.constant 0 : index
    %c0_2 = arith.constant 0 : index
    %0 = vector.load %arg1[%c0, %c0_0, %c0_1, %c0_2] : memref<1x8x8x128xf32, #tpu.memory_space<vmem>>, vector<1x8x8x128xf32>
    %1 = vector.shape_cast %0 : vector<1x8x8x128xf32> to vector<8x8x128xf32>
    %2 = vector.shape_cast %1 : vector<8x8x128xf32> to vector<64x128xf32>
    %c0_3 = arith.constant 0 : index
    %c0_4 = arith.constant 0 : index
    %3 = vector.load %arg2[%c0_3, %c0_4] : memref<128x512xbf16, #tpu.memory_space<vmem>>, vector<128x512xbf16>
    %4 = arith.truncf %2 : vector<64x128xf32> to vector<64x128xbf16>
    %cst = arith.constant dense<0.000000e+00> : vector<64x512xf32>
    %5 = tpu.matmul %4, %3, %cst {dimension_numbers = #tpu.dot_dimension_numbers<[1], [0], [0], [1], [0, 0, 1, 1], [], []>} : vector<64x128xbf16>, vector<128x512xbf16>, vector<64x512xf32> -> vector<64x512xf32>
    %6 = vector.extract_strided_slice %5 {offsets = [0, 0], sizes = [64, 128], strides = [1, 1]} : vector<64x512xf32> to vector<64x128xf32>
    %7 = vector.shape_cast %6 : vector<64x128xf32> to vector<8x8x128xf32>
    %8 = vector.extract_strided_slice %5 {offsets = [0, 128], sizes = [64, 128], strides = [1, 1]} : vector<64x512xf32> to vector<64x128xf32>
    %9 = vector.shape_cast %8 : vector<64x128xf32> to vector<8x8x128xf32>
    %10 = vector.extract_strided_slice %5 {offsets = [0, 256], sizes = [64, 256], strides = [1, 1]} : vector<64x512xf32> to vector<64x256xf32>
    %c0_5 = arith.constant 0 : index
    %c0_6 = arith.constant 0 : index
    %11 = vector.load %arg3[%c0_5, %c0_6] : memref<1x128xf32, #tpu.memory_space<vmem>>, vector<1x128xf32>
    %12 = vector.shape_cast %7 : vector<8x8x128xf32> to vector<8x8x1x128xf32>
    %13 = vector.shape_cast %9 : vector<8x8x128xf32> to vector<8x1x8x128xf32>
    %14 = vector.broadcast %12 : vector<8x8x1x128xf32> to vector<8x8x8x128xf32>
    %15 = vector.broadcast %13 : vector<8x1x8x128xf32> to vector<8x8x8x128xf32>
    %16 = arith.addf %14, %15 : vector<8x8x8x128xf32>
    %17 = vector.shape_cast %11 : vector<1x128xf32> to vector<1x1x1x128xf32>
    %18 = vector.broadcast %17 : vector<1x1x1x128xf32> to vector<8x8x8x128xf32>
    %19 = arith.addf %16, %18 : vector<8x8x8x128xf32>
    %cst_7 = arith.constant 2.000000e-01 : f32
    %20 = vector.broadcast %cst_7 : f32 to vector<8x8x8x128xf32>
    %21 = arith.mulf %19, %20 : vector<8x8x8x128xf32>
    %22 = math.tanh %21 : vector<8x8x8x128xf32>
    %cst_8 = arith.constant 5.000000e+00 : f32
    %23 = vector.broadcast %cst_8 : f32 to vector<8x8x8x128xf32>
    %24 = arith.mulf %23, %22 : vector<8x8x8x128xf32>
    %25 = tpu.iota {dimensions = array<i32: 0>} : vector<8x8xi32>
    %26 = tpu.iota {dimensions = array<i32: 1>} : vector<8x8xi32>
    %27 = arith.cmpi sgt, %26, %25 : vector<8x8xi32>
    %28 = arith.extui %27 : vector<8x8xi1> to vector<8x8xi32>
    %29 = arith.sitofp %28 : vector<8x8xi32> to vector<8x8xf32>
    %30 = vector.shape_cast %29 : vector<8x8xf32> to vector<1x8x8x1xf32>
    %31 = math.exp %24 : vector<8x8x8x128xf32>
    %32 = vector.broadcast %30 : vector<1x8x8x1xf32> to vector<8x8x8x128xf32>
    %33 = arith.mulf %31, %32 : vector<8x8x8x128xf32>
    %cst_9 = arith.constant dense<0.000000e+00> : vector<8x8x128xf32>
    %34 = vector.multi_reduction <add>, %33, %cst_9 [2] : vector<8x8x8x128xf32> to vector<8x8x128xf32>
    %cst_10 = arith.constant 1.000000e-30 : f32
    %35 = vector.broadcast %cst_10 : f32 to vector<8x8x128xf32>
    %36 = arith.maximumf %34, %35 : vector<8x8x128xf32>
    %37 = arith.divf %34, %36 : vector<8x8x128xf32>
    %38 = arith.mulf %1, %37 : vector<8x8x128xf32>
    %39 = vector.shape_cast %38 : vector<8x8x128xf32> to vector<64x128xf32>
    %c0_11 = arith.constant 0 : index
    %c0_12 = arith.constant 0 : index
    %40 = vector.load %arg4[%c0_11, %c0_12] : memref<128x384xbf16, #tpu.memory_space<vmem>>, vector<128x384xbf16>
    %41 = arith.truncf %39 : vector<64x128xf32> to vector<64x128xbf16>
    %cst_13 = arith.constant dense<0.000000e+00> : vector<64x384xf32>
    %42 = tpu.matmul %41, %40, %cst_13 {dimension_numbers = #tpu.dot_dimension_numbers<[1], [0], [0], [1], [0, 0, 1, 1], [], []>} : vector<64x128xbf16>, vector<128x384xbf16>, vector<64x384xf32> -> vector<64x384xf32>
    %43 = vector.extract_strided_slice %42 {offsets = [0, 0], sizes = [64, 128], strides = [1, 1]} : vector<64x384xf32> to vector<64x128xf32>
    %c0_14 = arith.constant 0 : index
    %c0_15 = arith.constant 0 : index
    %44 = vector.load %arg5[%c0_14, %c0_15] : memref<1x128xf32, #tpu.memory_space<vmem>>, vector<1x128xf32>
    %45 = vector.broadcast %44 : vector<1x128xf32> to vector<64x128xf32>
    %46 = arith.addf %43, %45 : vector<64x128xf32>
    %cst_16 = arith.constant 0.000000e+00 : f32
    %47 = vector.broadcast %cst_16 : f32 to vector<64x128xf32>
    %48 = arith.maximumf %46, %47 : vector<64x128xf32>
    %49 = vector.extract_strided_slice %42 {offsets = [0, 128], sizes = [64, 256], strides = [1, 1]} : vector<64x384xf32> to vector<64x256xf32>
    %c0_17 = arith.constant 0 : index
    %c0_18 = arith.constant 0 : index
    %50 = vector.load %arg6[%c0_17, %c0_18] : memref<128x128xbf16, #tpu.memory_space<vmem>>, vector<128x128xbf16>
    %51 = arith.truncf %48 : vector<64x128xf32> to vector<64x128xbf16>
    %cst_19 = arith.constant dense<0.000000e+00> : vector<64x128xf32>
    %52 = tpu.matmul %51, %50, %cst_19 {dimension_numbers = #tpu.dot_dimension_numbers<[1], [0], [0], [1], [0, 0, 1, 1], [], []>} : vector<64x128xbf16>, vector<128x128xbf16>, vector<64x128xf32> -> vector<64x128xf32>
    %c0_20 = arith.constant 0 : index
    %c0_21 = arith.constant 0 : index
    %53 = vector.load %arg7[%c0_20, %c0_21] : memref<1x128xf32, #tpu.memory_space<vmem>>, vector<1x128xf32>
    %54 = vector.broadcast %53 : vector<1x128xf32> to vector<64x128xf32>
    %55 = arith.addf %52, %54 : vector<64x128xf32>
    %56 = vector.shape_cast %55 : vector<64x128xf32> to vector<8x8x128xf32>
    %cst_22 = arith.constant dense<0xFF800000> : vector<8x128xf32>
    %57 = vector.multi_reduction <maximumf>, %56, %cst_22 [1] : vector<8x8x128xf32> to vector<8x128xf32>
    %58 = vector.shape_cast %57 : vector<8x128xf32> to vector<8x1x128xf32>
    %59 = vector.broadcast %58 : vector<8x1x128xf32> to vector<8x8x128xf32>
    %60 = arith.subf %56, %59 : vector<8x8x128xf32>
    %61 = math.exp %60 : vector<8x8x128xf32>
    %cst_23 = arith.constant dense<0.000000e+00> : vector<8x128xf32>
    %62 = vector.multi_reduction <add>, %61, %cst_23 [1] : vector<8x8x128xf32> to vector<8x128xf32>
    %63 = vector.shape_cast %62 : vector<8x128xf32> to vector<8x1x128xf32>
    %64 = vector.broadcast %63 : vector<8x1x128xf32> to vector<8x8x128xf32>
    %65 = arith.divf %61, %64 : vector<8x8x128xf32>
    %66 = arith.mulf %65, %38 : vector<8x8x128xf32>
    %cst_24 = arith.constant dense<0.000000e+00> : vector<8x128xf32>
    %67 = vector.multi_reduction <add>, %66, %cst_24 [1] : vector<8x8x128xf32> to vector<8x128xf32>
    %68 = arith.truncf %67 : vector<8x128xf32> to vector<8x128xbf16>
    %cst_25 = arith.constant dense<0.000000e+00> : vector<8x512xf32>
    %69 = tpu.matmul %68, %3, %cst_25 {dimension_numbers = #tpu.dot_dimension_numbers<[1], [0], [0], [1], [0, 0, 1, 1], [], []>} : vector<8x128xbf16>, vector<128x512xbf16>, vector<8x512xf32> -> vector<8x512xf32>
    %70 = vector.extract_strided_slice %69 {offsets = [0, 0], sizes = [8, 128], strides = [1, 1]} : vector<8x512xf32> to vector<8x128xf32>
    %71 = vector.shape_cast %70 : vector<8x128xf32> to vector<8x1x128xf32>
    %72 = vector.extract_strided_slice %69 {offsets = [0, 128], sizes = [8, 128], strides = [1, 1]} : vector<8x512xf32> to vector<8x128xf32>
    %73 = vector.shape_cast %72 : vector<8x128xf32> to vector<1x8x128xf32>
    %74 = vector.broadcast %71 : vector<8x1x128xf32> to vector<8x8x128xf32>
    %75 = vector.broadcast %73 : vector<1x8x128xf32> to vector<8x8x128xf32>
    %76 = arith.addf %74, %75 : vector<8x8x128xf32>
    %77 = vector.shape_cast %11 : vector<1x128xf32> to vector<1x1x128xf32>
    %78 = vector.broadcast %77 : vector<1x1x128xf32> to vector<8x8x128xf32>
    %79 = arith.addf %76, %78 : vector<8x8x128xf32>
    %cst_26 = arith.constant 2.000000e-01 : f32
    %80 = vector.broadcast %cst_26 : f32 to vector<8x8x128xf32>
    %81 = arith.mulf %79, %80 : vector<8x8x128xf32>
    %82 = math.tanh %81 : vector<8x8x128xf32>
    %cst_27 = arith.constant 5.000000e+00 : f32
    %83 = vector.broadcast %cst_27 : f32 to vector<8x8x128xf32>
    %84 = arith.mulf %83, %82 : vector<8x8x128xf32>
    %85 = tpu.iota {dimensions = array<i32: 0>} : vector<8x8xi32>
    %86 = tpu.iota {dimensions = array<i32: 1>} : vector<8x8xi32>
    %87 = arith.cmpi sgt, %86, %85 : vector<8x8xi32>
    %88 = arith.extui %87 : vector<8x8xi1> to vector<8x8xi32>
    %89 = arith.sitofp %88 : vector<8x8xi32> to vector<8x8xf32>
    %90 = vector.shape_cast %89 : vector<8x8xf32> to vector<8x8x1xf32>
    %91 = math.exp %84 : vector<8x8x128xf32>
    %92 = vector.broadcast %90 : vector<8x8x1xf32> to vector<8x8x128xf32>
    %93 = arith.mulf %91, %92 : vector<8x8x128xf32>
    %cst_28 = arith.constant dense<0.000000e+00> : vector<8x128xf32>
    %94 = vector.multi_reduction <add>, %93, %cst_28 [1] : vector<8x8x128xf32> to vector<8x128xf32>
    %cst_29 = arith.constant 1.000000e-30 : f32
    %95 = vector.broadcast %cst_29 : f32 to vector<8x128xf32>
    %96 = arith.maximumf %94, %95 : vector<8x128xf32>
    %97 = arith.divf %94, %96 : vector<8x128xf32>
    %98 = arith.mulf %67, %97 : vector<8x128xf32>
    %c0_30 = arith.constant 0 : index
    %c0_31 = arith.constant 0 : index
    %99 = vector.load %arg8[%c0_30, %c0_31] : memref<256x128xbf16, #tpu.memory_space<vmem>>, vector<256x128xbf16>
    %100 = vector.extract_strided_slice %99 {offsets = [0, 0], sizes = [128, 128], strides = [1, 1]} : vector<256x128xbf16> to vector<128x128xbf16>
    %101 = arith.truncf %98 : vector<8x128xf32> to vector<8x128xbf16>
    %cst_32 = arith.constant dense<0.000000e+00> : vector<8x128xf32>
    %102 = tpu.matmul %101, %100, %cst_32 {dimension_numbers = #tpu.dot_dimension_numbers<[1], [0], [0], [1], [0, 0, 1, 1], [], []>} : vector<8x128xbf16>, vector<128x128xbf16>, vector<8x128xf32> -> vector<8x128xf32>
    %103 = vector.extract_strided_slice %99 {offsets = [128, 0], sizes = [128, 128], strides = [1, 1]} : vector<256x128xbf16> to vector<128x128xbf16>
    %104 = arith.truncf %67 : vector<8x128xf32> to vector<8x128xbf16>
    %cst_33 = arith.constant dense<0.000000e+00> : vector<8x128xf32>
    %105 = tpu.matmul %104, %103, %cst_33 {dimension_numbers = #tpu.dot_dimension_numbers<[1], [0], [0], [1], [0, 0, 1, 1], [], []>} : vector<8x128xbf16>, vector<128x128xbf16>, vector<8x128xf32> -> vector<8x128xf32>
    %106 = arith.addf %102, %105 : vector<8x128xf32>
    %c0_34 = arith.constant 0 : index
    %c0_35 = arith.constant 0 : index
    %107 = vector.load %arg9[%c0_34, %c0_35] : memref<1x128xf32, #tpu.memory_space<vmem>>, vector<1x128xf32>
    %108 = vector.broadcast %107 : vector<1x128xf32> to vector<8x128xf32>
    %109 = arith.addf %106, %108 : vector<8x128xf32>
    %110 = math.absf %109 : vector<8x128xf32>
    %cst_36 = arith.constant 0.000000e+00 : f32
    %111 = vector.broadcast %cst_36 : f32 to vector<8x128xf32>
    %112 = arith.subf %111, %110 : vector<8x128xf32>
    %113 = math.exp %112 : vector<8x128xf32>
    %cst_37 = arith.constant 1.000000e+00 : f32
    %114 = vector.broadcast %cst_37 : f32 to vector<8x128xf32>
    %115 = arith.addf %114, %113 : vector<8x128xf32>
    %cst_38 = arith.constant 1.000000e+00 : f32
    %116 = vector.broadcast %cst_38 : f32 to vector<8x128xf32>
    %117 = arith.divf %116, %115 : vector<8x128xf32>
    %cst_39 = arith.constant 0.000000e+00 : f32
    %118 = vector.broadcast %cst_39 : f32 to vector<8x128xf32>
    %119 = arith.cmpf oge, %109, %118 : vector<8x128xf32>
    %120 = arith.mulf %113, %117 : vector<8x128xf32>
    %121 = arith.select %119, %117, %120 : vector<8x128xi1>, vector<8x128xf32>
    %122 = arith.mulf %121, %98 : vector<8x128xf32>
    %cst_40 = arith.constant 1.000000e+00 : f32
    %123 = vector.broadcast %cst_40 : f32 to vector<8x128xf32>
    %124 = arith.subf %123, %121 : vector<8x128xf32>
    %125 = arith.mulf %124, %67 : vector<8x128xf32>
    %126 = arith.addf %122, %125 : vector<8x128xf32>
    %c0_41 = arith.constant 0 : index
    %c0_42 = arith.constant 0 : index
    %127 = vector.load %arg10[%c0_41, %c0_42] : memref<128x256xbf16, #tpu.memory_space<vmem>>, vector<128x256xbf16>
    %128 = arith.truncf %126 : vector<8x128xf32> to vector<8x128xbf16>
    %cst_43 = arith.constant dense<0.000000e+00> : vector<8x256xf32>
    %129 = tpu.matmul %128, %127, %cst_43 {dimension_numbers = #tpu.dot_dimension_numbers<[1], [0], [0], [1], [0, 0, 1, 1], [], []>} : vector<8x128xbf16>, vector<128x256xbf16>, vector<8x256xf32> -> vector<8x256xf32>
    %c0_44 = arith.constant 0 : index
    %c0_45 = arith.constant 0 : index
    %130 = vector.load %arg11[%c0_44, %c0_45] : memref<1x256xf32, #tpu.memory_space<vmem>>, vector<1x256xf32>
    %131 = vector.broadcast %130 : vector<1x256xf32> to vector<8x256xf32>
    %132 = arith.addf %129, %131 : vector<8x256xf32>
    %133 = arith.addf %10, %49 : vector<64x256xf32>
    %134 = vector.shape_cast %133 : vector<64x256xf32> to vector<8x8x256xf32>
    %135 = vector.shape_cast %132 : vector<8x256xf32> to vector<8x1x256xf32>
    %136 = vector.broadcast %135 : vector<8x1x256xf32> to vector<8x8x256xf32>
    %137 = arith.addf %134, %136 : vector<8x8x256xf32>
    %138 = vector.shape_cast %137 : vector<8x8x256xf32> to vector<64x256xf32>
    %139 = vector.extract_strided_slice %138 {offsets = [0, 0], sizes = [64, 128], strides = [1, 1]} : vector<64x256xf32> to vector<64x128xf32>
    %cst_46 = arith.constant 0.000000e+00 : f32
    %140 = vector.broadcast %cst_46 : f32 to vector<64x128xf32>
    %141 = arith.maximumf %139, %140 : vector<64x128xf32>
    %142 = vector.extract_strided_slice %138 {offsets = [0, 128], sizes = [64, 128], strides = [1, 1]} : vector<64x256xf32> to vector<64x128xf32>
    %143 = math.absf %142 : vector<64x128xf32>
    %cst_47 = arith.constant 0.000000e+00 : f32
    %144 = vector.broadcast %cst_47 : f32 to vector<64x128xf32>
    %145 = arith.subf %144, %143 : vector<64x128xf32>
    %146 = math.exp %145 : vector<64x128xf32>
    %cst_48 = arith.constant 1.000000e+00 : f32
    %147 = vector.broadcast %cst_48 : f32 to vector<64x128xf32>
    %148 = arith.addf %147, %146 : vector<64x128xf32>
    %cst_49 = arith.constant 1.000000e+00 : f32
    %149 = vector.broadcast %cst_49 : f32 to vector<64x128xf32>
    %150 = arith.divf %149, %148 : vector<64x128xf32>
    %cst_50 = arith.constant 0.000000e+00 : f32
    %151 = vector.broadcast %cst_50 : f32 to vector<64x128xf32>
    %152 = arith.cmpf oge, %142, %151 : vector<64x128xf32>
    %153 = arith.mulf %146, %150 : vector<64x128xf32>
    %154 = arith.select %152, %150, %153 : vector<64x128xi1>, vector<64x128xf32>
    %155 = arith.mulf %154, %141 : vector<64x128xf32>
    %cst_51 = arith.constant 1.000000e+00 : f32
    %156 = vector.broadcast %cst_51 : f32 to vector<64x128xf32>
    %157 = arith.subf %156, %154 : vector<64x128xf32>
    %158 = arith.mulf %157, %2 : vector<64x128xf32>
    %159 = arith.addf %155, %158 : vector<64x128xf32>
    %c0_52 = arith.constant 0 : index
    %c0_53 = arith.constant 0 : index
    %c0_54 = arith.constant 0 : index
    %160 = vector.load %arg12[%c0_52, %c0_53, %c0_54] : memref<1x64x128xf32, #tpu.memory_space<vmem>>, vector<1x64x128xf32>
    %161 = vector.shape_cast %160 : vector<1x64x128xf32> to vector<64x128xf32>
    %162 = vector.shape_cast %159 : vector<64x128xf32> to vector<1x64x128xf32>
    tpu.vector_store %arg12[%c0_52, %c0_53, %c0_54], %162 {strides = array<i32>} : memref<1x64x128xf32, #tpu.memory_space<vmem>>, vector<1x64x128xf32>,
    return
  }
  func.func @transform_0(%arg0: i32) -> (i32, i32, i32, i32) {
    %c0_i32 = arith.constant 0 : i32
    %c0_i32_0 = arith.constant 0 : i32
    %c0_i32_1 = arith.constant 0 : i32
    %c0_i32_2 = arith.constant 0 : i32
    return %arg0, %c0_i32, %c0_i32_0, %c0_i32_1 : i32, i32, i32, i32
  }
  func.func @transform_1(%arg0: i32) -> (i32, i32) {
    %c0_i32 = arith.constant 0 : i32
    %c0_i32_0 = arith.constant 0 : i32
    %c0_i32_1 = arith.constant 0 : i32
    return %c0_i32, %c0_i32_0 : i32, i32
  }
  func.func @transform_2(%arg0: i32) -> (i32, i32) {
    %c0_i32 = arith.constant 0 : i32
    %c0_i32_0 = arith.constant 0 : i32
    %c0_i32_1 = arith.constant 0 : i32
    return %c0_i32, %c0_i32_0 : i32, i32
  }
  func.func @transform_3(%arg0: i32) -> (i32, i32) {
    %c0_i32 = arith.constant 0 : i32
    %c0_i32_0 = arith.constant 0 : i32
    %c0_i32_1 = arith.constant 0 : i32
    return %c0_i32, %c0_i32_0 : i32, i32
  }
  func.func @transform_4(%arg0: i32) -> (i32, i32) {
    %c0_i32 = arith.constant 0 : i32
    %c0_i32_0 = arith.constant 0 : i32
    %c0_i32_1 = arith.constant 0 : i32
    return %c0_i32, %c0_i32_0 : i32, i32
  }
  func.func @transform_5(%arg0: i32) -> (i32, i32) {
    %c0_i32 = arith.constant 0 : i32
    %c0_i32_0 = arith.constant 0 : i32
    %c0_i32_1 = arith.constant 0 : i32
    return %c0_i32, %c0_i32_0 : i32, i32
  }
  func.func @transform_6(%arg0: i32) -> (i32, i32) {
    %c0_i32 = arith.constant 0 : i32
    %c0_i32_0 = arith.constant 0 : i32
    %c0_i32_1 = arith.constant 0 : i32
    return %c0_i32, %c0_i32_0 : i32, i32
  }
  func.func @transform_7(%arg0: i32) -> (i32, i32) {
    %c0_i32 = arith.constant 0 : i32
    %c0_i32_0 = arith.constant 0 : i32
    %c0_i32_1 = arith.constant 0 : i32
    return %c0_i32, %c0_i32_0 : i32, i32
  }
  func.func @transform_8(%arg0: i32) -> (i32, i32) {
    %c0_i32 = arith.constant 0 : i32
    %c0_i32_0 = arith.constant 0 : i32
    %c0_i32_1 = arith.constant 0 : i32
    return %c0_i32, %c0_i32_0 : i32, i32
  }
  func.func @transform_9(%arg0: i32) -> (i32, i32) {
    %c0_i32 = arith.constant 0 : i32
    %c0_i32_0 = arith.constant 0 : i32
    %c0_i32_1 = arith.constant 0 : i32
    return %c0_i32, %c0_i32_0 : i32, i32
  }
  func.func @transform_10(%arg0: i32) -> (i32, i32) {
    %c0_i32 = arith.constant 0 : i32
    %c0_i32_0 = arith.constant 0 : i32
    %c0_i32_1 = arith.constant 0 : i32
    return %c0_i32, %c0_i32_0 : i32, i32
  }
  func.func @transform_11(%arg0: i32) -> (i32, i32, i32) {
    %c0_i32 = arith.constant 0 : i32
    %c0_i32_0 = arith.constant 0 : i32
    %c0_i32_1 = arith.constant 0 : i32
    return %arg0, %c0_i32, %c0_i32_0 : i32, i32, i32
  }
}

</mosaic_0001>

<bundles_post_ra>
// kernel: tpu_custom_call.1
= control target key start
LH: loop header
LB: loop body
LE: loop exit
PB: predicated region body
PF: predicated region fallthrough
CT: control target
= control target key end

     0   :  { %s10124_s0 = inlined_call_operand.hbm [shape: f32[2,8,8,128], index: 0, kind: input, shape index: {}]   ;;  %s10125_s1 = inlined_call_operand.hbm [shape: bf16[128,512], index: 1, kind: input, shape index: {}]   ;;  %s10126_s2 = inlined_call_operand.vmem [shape: f32[1,128], index: 2, kind: input, shape index: {}]   ;;  %s10127_s3 = inlined_call_operand.hbm [shape: bf16[128,384], index: 3, kind: input, shape index: {}]   ;;  %s10128_s4 = inlined_call_operand.hbm [shape: f32[1,128], index: 4, kind: input, shape index: {}]   ;;  %s10129_s5 = inlined_call_operand.hbm [shape: bf16[128,128], index: 5, kind: input, shape index: {}]   ;;  %s10130_s6 = inlined_call_operand.vmem [shape: f32[1,128], index: 6, kind: input, shape index: {}]   ;;  %s10131_s7 = inlined_call_operand.hbm [shape: bf16[256,128], index: 7, kind: input, shape index: {}]   ;;  %s10132_s8 = inlined_call_operand.vmem [shape: f32[1,128], index: 8, kind: input, shape index: {}]   ;;  %s10133_s9 = inlined_call_operand.hbm [shape: bf16[128,256], index: 9, kind: input, shape index: {}]   ;;  %s10134_s10 = inlined_call_operand.vmem [shape: f32[1,256], index: 10, kind: input, shape index: {}]   ;;  %s10135_s11 = inlined_call_operand.hbm [shape: f32[2,64,128], index: 11, kind: output, shape index: {}]  }
   0x1   :  { %10202 = sst [smem:[#allocation95_spill]] %s10125_s1 }
   0x2   :  { %10203 = sst [smem:[#allocation96_spill]] %s10127_s3 }
   0x3   :  { %10204 = sst [smem:[#allocation97_spill]] %s10128_s4 }
   0x4   :  { %10205 = sst [smem:[#allocation98_spill]] %s10129_s5 }
   0x5   :  { %10206 = sst [smem:[#allocation99_spill]] %s10134_s10 }
   0x6   :  { %10207 = sst [smem:[#allocation100_spill]] %s10135_s11 }
   0x7   :  { %16 = vsyncpa [#allocation3], 0 }
   0x8   :  { %18 = vsyncpa [#allocation3 + $0x1], 0 }
   0x9   :  { %19 = vsyncpa [#allocation6], 0 }
   0xa   :  { %20 = vsyncpa [#allocation9], 0 }
   0xb   :  { %21 = vsyncpa [#allocation12], 0 }
   0xc   :  { %22 = vsyncpa [#allocation4], 0 }
   0xd   :  { %24 = vsyncpa [#allocation4 + $0x1], 0  ;;  %s6525_s17 = smov 0   ;;  %s6527_s18 = smov 0  }
   0xe   :  { %s6529_s19 = smov 0   ;;  %s6531_s20 = smov 0  }
   0xf LB: > { %s10208_s1 = sld [smem:[#allocation95_spill]]  ;;  %s6549_s24 = sadd.s32 4294967295, %s6446_s20   ;;  %s6446_s20 = sphi %s6531_s20, %s10779_s20   ;;  %s6442_s19 = sphi %s6529_s19, %s10778_s19   ;;  %s6438_s18 = sphi %s6527_s18, %s10777_s18   ;;  %s6434_s17 = sphi %s6525_s17, %s10776_s17  }
  0x10   : > { %p4988_p0 = scmp.ge.s32.totalorder %s6446_s20, 1  ;;  %p51_p1 = scmp.eq.s32.totalorder %s6549_s24, 0 }
  0x11   : > { %p297_p2 = scmp.lt.s32.totalorder %s6446_s20, 3  ;;  %s6448_s26 = smov [#allocation5]  }
  0x12   : > { %s310_s27 = sshll.u32 %s6448_s26, 4  ;;  %s10210_s4 = sld [smem:[#allocation97_spill]]  ;;  %s311_s27 = int_to_ptr.vmem [resolvable:$true] %s310_s27 }
  0x13   : > { %p6554_p3 = pnand %p4988_p0, %p297_p2  ;;  %s6449_s13 = smov [#allocation8]  }
  0x14   : > { %s342_s14 = sshll.u32 %s6449_s13, 4  ;;  %s6450_s15 = smov 256   ;;  %s343_s14 = int_to_ptr.vmem [resolvable:$true] %s342_s14 }
  0x15   : > { %s308_s23 = sshll.u32 %s10208_s1, 4  ;;  %p5524_p4 = pneg %p6554_p3  ;;  %s309_s23 = int_to_ptr.hbm [resolvable:$true] %s308_s23 }
  0x16   : > { %s6451_s16 = smov 16   ;;  %s368_s26 = sshll.u32 %s10131_s7, 4  ;;  %s369_s26 = int_to_ptr.hbm [resolvable:$true] %s368_s26 }
  0x17   : > { %p6566_p6 = pnand %p5524_p4, %p51_p1  ;;  %s6452_s28 = smov [#allocation11]  }
  0x18   : > { %s340_s30 = sshll.u32 %s10210_s4, 4  ;;  %s370_s29 = sshll.u32 %s6452_s28, 4  ;;  %s341_s30 = int_to_ptr.hbm [resolvable:$true] %s340_s30  ;;  %s371_s29 = int_to_ptr.vmem [resolvable:$true] %s370_s29 }
  0x19   : > { %5527 = dma.hbm_to_vmem [thread:$0]  (!%p6566_p6), %s309_s23, 4096, %s311_s27, [#allocation6], %s6450_s15, %s6450_s15, %s6451_s16  }
  0x1a   : > { %5533 = dma.hbm_to_vmem [thread:$0]  (!%p6566_p6), %s341_s30, 16, %s343_s14, [#allocation9]  }
  0x1b   : > { %s10212_s3 = sld [smem:[#allocation96_spill]]  ;;  %s6453_s11 = smov 64  }
  0x1c   : > { %s6454_s10 = smov 4   ;;  %s6455_s23 = smov [#allocation7]  }
  0x1d   : > { %5539 = dma.hbm_to_vmem [thread:$0]  (!%p6566_p6), %s369_s26, 2048, %s371_s29, [#allocation12], %s6453_s11, %s6453_s11, %s6454_s10  }
  0x1e   : > { %s327_s27 = sshll.u32 %s6455_s23, 4  ;;  %s6456_s30 = smov 192   ;;  %s328_s27 = int_to_ptr.vmem [resolvable:$true] %s327_s27 }
  0x1f   : > { %s6457_s14 = smov 12   ;;  %s10213_s5 = sld [smem:[#allocation98_spill]] }
  0x20   : > { %s6458_s4 = smov [#allocation10]   ;;  %s385_s28 = sshll.u32 %s10133_s9, 4  ;;  %s386_s28 = int_to_ptr.hbm [resolvable:$true] %s385_s28 }
  0x21   : > { %s325_s13 = sshll.u32 %s10212_s3, 4  ;;  %s353_s21 = sshll.u32 %s6458_s4, 4  ;;  %s326_s13 = int_to_ptr.hbm [resolvable:$true] %s325_s13  ;;  %s354_s21 = int_to_ptr.vmem [resolvable:$true] %s353_s21 }
  0x22   : > { %5530 = dma.hbm_to_vmem [thread:$0]  (!%p6566_p6), %s326_s13, 3072, %s328_s27, [#allocation6], %s6456_s30, %s6456_s30, %s6457_s14  }
  0x23   : > { %s6459_s29 = smov [#allocation13]   ;;  %s10137_s23 = smov 128  }
  0x24   : > { %s387_s13 = sshll.u32 %s6459_s29, 4  ;;  %s10138_s27 = smov 8   ;;  %s388_s13 = int_to_ptr.vmem [resolvable:$true] %s387_s13 }
  0x25   : > { %s351_s1 = sshll.u32 %s10213_s5, 4  ;;  %s4987_s30 = sadd.s32 4294967294, %s6446_s20   ;;  %s352_s1 = int_to_ptr.hbm [resolvable:$true] %s351_s1 }
  0x26   : > { %5536 = dma.hbm_to_vmem [thread:$0]  (!%p6566_p6), %s352_s1, 1024, %s354_s21, [#allocation9], %s6453_s11, %s6453_s11, %s6454_s10  }
  0x27   : > { %5542 = dma.hbm_to_vmem [thread:$0]  (!%p6566_p6), %s386_s28, 2048, %s388_s13, [#allocation12], %s10137_s23, %s10137_s23, %s10138_s27  }
  0x28   : > { %s6599_s14 = sadd.s32 1, %s6446_s20   ;;  %s37_s11 = sadd.s32 1, %s6442_s19 }
  0x29   : > { %s34_s10 = ssub.s32 %s6446_s20, %s6599_s14  ;;  %p44_p8 = scmp.ne.s32.totalorder %s6442_s19, %s6438_s18 }
  0x2a   : > { %p35_p7 = scmp.eq.s32.totalorder %s34_s10, 0  ;;  %p45_p9 = scmp.eq.s32.totalorder %s6446_s20, 0 }
  0x2b   : > { %p50_p10 = scmp.ne.s32.totalorder %s6438_s18, %s6434_s17  ;;  %p284_p13 = scmp.eq.s32.totalorder %s6549_s24, 1 }
  0x2c   : > { %s6610_s15 = scalar_select %p35_p7, %s6442_s19, %s37_s11  }
  0x2d   : > { %p6612_p11 = por %p45_p9, %p44_p8  ;;  %p6618_p12 = por %p51_p1, %p50_p10 }
  0x2e   : > { %p290_p0 = scmp.eq.s32.totalorder %s4987_s30, 1  ;;  %p5557_p2 = scmp.lt.s32.totalorder %s6446_s20, 2 }
  0x2f   : > { %s404_s1 = sand.u32 1, %s6442_s19   ;;  %p6625_p4 = por %p284_p13, %p44_p8 }
  0x30   : > { %p6629_p6 = por %p290_p0, %p50_p10  ;;  %s4996_s22 = sshll.u32 %s404_s1, 6 }
  0x31   : > { %s5398_s26 = sshll.u32 %s6446_s20, 6  ;;  %s408_s10 = scalar_lea.vmem [#allocation2], %s4996_s22 }
  0x32   : > { %s413_s13 = scalar_lea.hbm %s10124_s0, %s5398_s26  ;;  %s416_s11 = sshll.u32 %s408_s10, 4  ;;  %s417_s11 = int_to_ptr.vmem [resolvable:$true] %s416_s11 }
  0x33   : > { %s414_s23 = sshll.u32 %s413_s13, 4  ;;  %p6639_p7 = pnand %p5557_p2, %p6612_p11  ;;  %s415_s23 = int_to_ptr.hbm [resolvable:$true] %s414_s23 }
  0x34   : > { %s405_s27 = scalar_lea.sflag [#allocation3], %s404_s1  ;;  %s6338_s3 = sshra.s32 %s415_s23, 4  ;;  %s6339_s3 = int_to_ptr.hbm [resolvable:$true] %s6338_s3 }
  0x35   : > { %s6340_s5 = scalar_lea.hbm %s6339_s3, 64  ;;  %p6342_p9 = pneg %p6639_p7 }
  0x36   : > { %p6341_p8 = scmp.ne.s32.totalorder %s6339_s3, %s6340_s5  ;;  %s6345_s28 = scalar_lea.hbm %s10124_s0, 128 }
  0x37   : > { %p6346_p11 = scmp.lt.s32.totalorder %s6339_s3, %s10124_s0  ;;  %p6347_p0 = scmp.lt.s32.totalorder %s6345_s28, %s6340_s5 }
  0x38   : > { %p6343_p10 = pnand %p6342_p9, %p6341_p8 }
  0x39   : > { %p6348_p2 = por %p6347_p0, %p6346_p11 }
  0x3a   : > { %p6344_p13 = pneg %p6343_p10 }
  0x3c   : > { %p6349_p5 = pnand %p6348_p2, %p6344_p13 }
  0x3e   : > { %6352 = shalt.err (!%p6349_p5)
}
  0x3f   : > { %s10219_s1 = smov 8   ;;  %s10220_s13 = smov 128  }
  0x40   : > { %5546 = dma.hbm_to_vmem [thread:$0]  (!%p6639_p7), %s415_s23, 1024, %s417_s11, %s405_s27, %s10220_s13, %s10220_s13, %s10219_s1  }
  0x41   : > { %428 = sbr.rel (%p6554_p3) target bundleno = 1735 (0x6c7), region = 64 }
  0x46   : > { %s6659_s10 = sand.u32 1, %s6438_s18  }
  0x47   : > { %s5000_s3 = sshll.u32 %s6659_s10, 6  ;;  %s431_s5 = scalar_lea.sflag [#allocation3], %s6659_s10 }
  0x48   : > { %s6665_s22 = scalar_lea.vmem [#allocation2], %s5000_s3 }
  0x49   : > { %6413 = dma.done.wait (%p6618_p12), %s431_s5, 1024  }
  0x4a   : > { %6415 = vsyncadd (%p6618_p12), %s431_s5, 4294966272 }
  0x4b   : > { %6417 = dma.done.wait (%p51_p1), [#allocation6], 7168  }
  0x4c   : > { %6419 = vsyncadd (%p51_p1), [#allocation6], 4294960128 }
  0x4d   : > { %6421 = dma.done.wait (%p51_p1), [#allocation9], 1040  }
  0x4e   : > { %6423 = vsyncadd (%p51_p1), [#allocation9], 4294966256 }
  0x4f   : > { %6425 = dma.done.wait (%p51_p1), [#allocation12], 4096  }
  0x50   : > { %6427 = vsyncadd (%p51_p1), [#allocation12], 4294963200  ;;  %v5122_v0 = vld [vmem:[#allocation5 + $0xe0] sm:$0xf]  ;;  %v5429_v1 = vld [vmem:[#allocation5 + $0xec] sm:$0xf0]  ;;  %v1340_v35 = vlaneseq }
  0x51   : > { %v5427_v2 = vld [vmem:[#allocation5 + $0xe4] sm:$0xf]  ;;  %v6683_v3 = vor.u32 %v5429_v1, %v5122_v0  ;;  %v5124_v4 = vld [vmem:[#allocation5 + $0xf0] sm:$0xf0]  ;;  %v5106_v5 = vld [vmem:[#allocation5 + $0xc0] sm:$0xf] }
  0x52   : > { %v5425_v6 = vld [vmem:[#allocation5 + $0xcc] sm:$0xf0]  ;;  %v6685_v7 = vor.u32 %v5427_v2, %v5124_v4  ;;  %v5423_v8 = vld [vmem:[#allocation5 + $0xc4] sm:$0xf]  ;;  %v5108_v9 = vld [vmem:[#allocation5 + $0xd0] sm:$0xf0] }
  0x53   : > { %708 = vmatpush.bf16.msra.mxu0 %v6683_v3  ;;  %v6688_v10 = vor.u32 %v5425_v6, %v5106_v5  ;;  %v6691_v11 = vor.u32 %v5423_v8, %v5108_v9  ;;  %v5090_v12 = vld [vmem:[#allocation5 + $0xa0] sm:$0xf]  ;;  %v5421_v13 = vld [vmem:[#allocation5 + $0xac] sm:$0xf0]  ;;  %v5419_v14 = vld [vmem:[#allocation5 + $0xa4] sm:$0xf] }
  0x54   : > { %10221 = vst [vmem:[#allocation20_spill] sm:$0xff] %v6685_v7  ;;  %737 = vmatpush.bf16.msra.mxu1 %v6685_v7  ;;  %v5092_v15 = vld [vmem:[#allocation5 + $0xb0] sm:$0xf0]  ;;  %v6694_v16 = vor.u32 %v5421_v13, %v5090_v12  ;;  %v5074_v18 = vld [vmem:[#allocation5 + $0x80] sm:$0xf]  ;;  %v1341_v41 = vshrl.u32 %v1340_v35, 7 }
  0x55   : > { %10222 = vst [vmem:[#allocation21_spill] sm:$0xff] %v6691_v11  ;;  %v6697_v17 = vor.u32 %v5419_v14, %v5092_v15  ;;  %v5417_v19 = vld [vmem:[#allocation5 + $0x8c] sm:$0xf0]  ;;  %v5415_v20 = vld [vmem:[#allocation5 + $0x84] sm:$0xf]  ;;  %v1343_v42 = vand.u32 127, %v1340_v35 }
  0x56   : > { %v5076_v21 = vld [vmem:[#allocation5 + $0x90] sm:$0xf0]  ;;  %v6700_v22 = vor.u32 %v5417_v19, %v5074_v18  ;;  %v5058_v23 = vld [vmem:[#allocation5 + $0x60] sm:$0xf]  ;;  %v5413_v24 = vld [vmem:[#allocation5 + $0x6c] sm:$0xf0]  ;;  %5625 = vset.pattern.permute.xlu1 %v1341_v41  ;;  %5614 = vset.pattern.permute.xlu0 %v1341_v41 }
  0x57   : > { %709 = vmatpush.bf16.msra.mxu0 %v6688_v10  ;;  %10223 = vst [vmem:[#allocation22_spill] sm:$0xff] %v6697_v17  ;;  %v6703_v25 = vor.u32 %v5415_v20, %v5076_v21  ;;  %v5411_v26 = vld [vmem:[#allocation5 + $0x64] sm:$0xf]  ;;  %v5060_v27 = vld [vmem:[#allocation5 + $0x70] sm:$0xf0]  ;;  %v6706_v28 = vor.u32 %v5413_v24, %v5058_v23  ;;  %vm1344_vm0 = vcmp.gt.s32.totalorder %v1343_v42, %v1341_v41  ;;  %v6462_v48 = vmov 0.0  }
  0x58   : > { %738 = vmatpush.bf16.msra.mxu1 %v6691_v11  ;;  %10224 = vst [vmem:[#allocation23_spill] sm:$0xff] %v6700_v22  ;;  %v6709_v29 = vor.u32 %v5411_v26, %v5060_v27  ;;  %v5042_v30 = vld [vmem:[#allocation5 + $0x40] sm:$0xf]  ;;  %v5409_v31 = vld [vmem:[#allocation5 + $0x4c] sm:$0xf0]  ;;  %v5136_v49 = vsel %vm1344_vm0, 1.0, %v6462_v48 }
  0x59   : > { %10225 = vst [vmem:[#allocation24_spill] sm:$0xff] %v6703_v25  ;;  %v5407_v32 = vld [vmem:[#allocation5 + $0x44] sm:$0xf]  ;;  %v5044_v33 = vld [vmem:[#allocation5 + $0x50] sm:$0xf0]  ;;  %v6712_v34 = vor.u32 %v5409_v31, %v5042_v30  ;;  %v1375_v51 = vperm.slane %v5136_v49, 4 }
  0x5a   : > { %10226 = vst [vmem:[#allocation25_spill] sm:$0xff] %v6706_v28  ;;  %v6715_v36 = vor.u32 %v5407_v32, %v5044_v33  ;;  %v5026_v37 = vld [vmem:[#allocation5 + $0x20] sm:$0xf]  ;;  %v5405_v38 = vld [vmem:[#allocation5 + $0x2c] sm:$0xf0]  ;;  %v1382_v52 = vperm.slane %v5136_v49, 5 }
  0x5b   : > { %710 = vmatpush.bf16.msra.mxu0 %v6694_v16  ;;  %10227 = vst [vmem:[#allocation26_spill] sm:$0xff] %v6709_v29  ;;  %v5403_v39 = vld [vmem:[#allocation5 + $0x24] sm:$0xf]  ;;  %v5028_v40 = vld [vmem:[#allocation5 + $0x30] sm:$0xf0]  ;;  %v6718_v43 = vor.u32 %v5405_v38, %v5026_v37  ;;  %v1347_v53 = vperm.slane %v5136_v49, 0 }
  0x5c   : > { %739 = vmatpush.bf16.msra.mxu1 %v6697_v17  ;;  %10228 = vst [vmem:[#allocation27_spill] sm:$0xff] %v6712_v34  ;;  %v5010_v44 = vld [vmem:[#allocation5] sm:$0xf]  ;;  %v6721_v45 = vor.u32 %v5403_v39, %v5028_v40  ;;  %v5401_v46 = vld [vmem:[#allocation5 + $0xc] sm:$0xf0]  ;;  %v1354_v54 = vperm.slane %v5136_v49, 1  ;;  %v5626_v58 = vpack.i.bf16 %v1382_v52, %v1375_v51 }
  0x5d   : > { %10229 = vst [vmem:[#allocation28_spill] sm:$0xff] %v6715_v36  ;;  %v5399_v47 = vld [vmem:[#allocation5 + $0x4] sm:$0xf]  ;;  %v5012_v50 = vld [vmem:[#allocation5 + $0x10] sm:$0xf0]  ;;  %v6724_v55 = vor.u32 %v5401_v46, %v5010_v44  ;;  %v505_v57 = vld [vmem:[%s6665_s22 + $0x8] sm:$0xff] }
  0x5e   : > { %10230 = vst [vmem:[#allocation29_spill] sm:$0xff] %v6718_v43  ;;  %v504_v56 = vld [vmem:[%s6665_s22] sm:$0xff]  ;;  %v6729_v59 = vor.u32 %v5399_v47, %v5012_v50  ;;  %v5615_v60 = vpack.i.bf16 %v1354_v54, %v1347_v53  ;;  %5627 = vperm.xlu1 %5625, %v5626_v58   ;;  %v1389_v62 = vperm.slane %v5136_v49, 6  ;;  %v1396_v63 = vperm.slane %v5136_v49, 7  ;;  %v506_v5 = vld [vmem:[%s6665_s22 + $0x10] sm:$0xff]  ;;  %v507_v6 = vld [vmem:[%s6665_s22 + $0x18] sm:$0xff] }
  0x5f   : > { %711 = vmatpush.bf16.msra.mxu0 %v6700_v22  ;;  %10231 = vst [vmem:[#allocation30_spill] sm:$0xff] %v6721_v45  ;;  %v6731_v61 = vpack.c.bf16 %v505_v57, %v504_v56  ;;  %v1361_v0 = vperm.slane %v5136_v49, 2  ;;  %v1368_v1 = vperm.slane %v5136_v49, 3  ;;  %v6739_v8 = vpack.c.bf16 %v507_v6, %v506_v5  ;;  %v5130_v9 = vld [vmem:[#allocation5 + $0xe8] sm:$0xf]  ;;  %v508_v23 = vld [vmem:[%s6665_s22 + $0x20] sm:$0xff] }
  0x60   : > { %740 = vmatpush.bf16.msra.mxu1 %v6703_v25  ;;  %10232 = vst [vmem:[#allocation31_spill] sm:$0xff] %v6724_v55  ;;  %5616 = vperm.xlu0 %5614, %v5615_v60   ;;  %v5631_v2 = vpack.i.bf16 %v1396_v63, %v1389_v62  ;;  %v5430_v12 = vld [vmem:[#allocation5 + $0xf4] sm:$0xf0]  ;;  %v5114_v13 = vld [vmem:[#allocation5 + $0xc8] sm:$0xf]  ;;  %v510_v27 = vld [vmem:[%s6665_s22 + $0x30] sm:$0xff] }
  0x61   : > { %10233 = vst [vmem:[#allocation32_spill] sm:$0xff] %v6729_v59  ;;  %v5620_v4 = vpack.i.bf16 %v1368_v1, %v1361_v0  ;;  %v5131_v14 = vor.u32 %v5430_v12, %v5130_v9  ;;  %v5426_v15 = vld [vmem:[#allocation5 + $0xd4] sm:$0xf0]  ;;  %v5098_v19 = vld [vmem:[#allocation5 + $0xa8] sm:$0xf]  ;;  %s10732_s5 = sld [smem:[#allocation99_spill]] }
  0x62   : > { %10234 = vst [vmem:[#allocation33_spill] sm:$0xff] %v6731_v61  ;;  %v5115_v18 = vor.u32 %v5426_v15, %v5114_v13  ;;  %v5422_v20 = vld [vmem:[#allocation5 + $0xb4] sm:$0xf0]  ;;  %v509_v24 = vld [vmem:[%s6665_s22 + $0x28] sm:$0xff]  ;;  %v6758_v56 = vld [vmem:[%s10126_s2] ss:$0 sm:$0xff] }
  0x63   : > { %712 = vmatpush.bf16.msra.mxu0 %v6706_v28  ;;  %10235 = vst [vmem:[#allocation34_spill] sm:$0xff] %v6739_v8  ;;  %766 = vmatpush.bf16.msra.mxu2 %v5131_v14  ;;  %v5099_v21 = vor.u32 %v5422_v20, %v5098_v19  ;;  %v6745_v26 = vpack.c.bf16 %v509_v24, %v508_v23  ;;  %v511_v30 = vld [vmem:[%s6665_s22 + $0x38] sm:$0xff]  ;;  %v5082_v32 = vld [vmem:[#allocation5 + $0x88] sm:$0xf]  ;;  %s5495_s25 = sshll.u32 %s6549_s24, 6  ;;  %s503_s24 = scalar_lea.vmem [#allocation14], %s5000_s3 }
  0x64   : > { %741 = vmatpush.bf16.msra.mxu1 %v6709_v29  ;;  %v6751_v31 = vpack.c.bf16 %v511_v30, %v510_v27  ;;  %v5418_v33 = vld [vmem:[#allocation5 + $0x94] sm:$0xf0]  ;;  %v5066_v37 = vld [vmem:[#allocation5 + $0x68] sm:$0xf]  ;;  %s10774_s16 = sld [smem:[#allocation100_spill]]  ;;  %s4854_s30 = sshll.u32 %s503_s24, 4  ;;  %s4855_s30 = int_to_ptr.vmem [resolvable:$true] %s4854_s30 }
  0x65   : > { %10236 = vst [vmem:[#allocation35_spill] sm:$0xff] %v6745_v26  ;;  %v5083_v35 = vor.u32 %v5418_v33, %v5082_v32  ;;  %v5414_v38 = vld [vmem:[#allocation5 + $0x74] sm:$0xf0]  ;;  %v5050_v40 = vld [vmem:[#allocation5 + $0x48] sm:$0xf]  ;;  %s4842_s3 = scalar_lea.sflag [#allocation4], %s6659_s10 }
  0x66   : > { %5632 = vperm.xlu1 %5625, %v5631_v2   ;;  %10237 = vst [vmem:[#allocation36_spill] sm:$0xff] %v6751_v31  ;;  %v5067_v39 = vor.u32 %v5414_v38, %v5066_v37  ;;  %v5410_v41 = vld [vmem:[#allocation5 + $0x54] sm:$0xf0]  ;;  %v5034_v44 = vld [vmem:[#allocation5 + $0x28] sm:$0xf] }
  0x67   : > { %713 = vmatpush.bf16.msra.mxu0 %v6712_v34  ;;  %767 = vmatpush.bf16.msra.mxu2 %v5115_v18  ;;  %v5051_v42 = vor.u32 %v5410_v41, %v5050_v40  ;;  %v5406_v46 = vld [vmem:[#allocation5 + $0x34] sm:$0xf0] }
  0x68   : > { %742 = vmatpush.bf16.msra.mxu1 %v6715_v36  ;;  %5621 = vperm.xlu0 %5614, %v5620_v4   ;;  %v5035_v47 = vor.u32 %v5406_v46, %v5034_v44 }
  0x6a   : > { %s4853_s11 = scalar_lea.hbm %s10774_s16, %s5495_s25  ;;  %s6388_s13 = scalar_lea.hbm %s10774_s16, 128 }
  0x6b   : > { %714 = vmatpush.bf16.msra.mxu0 %v6718_v43  ;;  %768 = vmatpush.bf16.msra.mxu2 %v5099_v21  ;;  %s4856_s26 = sshll.u32 %s4853_s11, 4  ;;  %s4857_s26 = int_to_ptr.hbm [resolvable:$true] %s4856_s26 }
  0x6c   : > { %743 = vmatpush.bf16.msra.mxu1 %v6721_v45  ;;  %s6382_s28 = sshra.s32 %s4857_s26, 4  ;;  %s6383_s28 = int_to_ptr.hbm [resolvable:$true] %s6382_s28 }
  0x6d   : > { %s6384_s29 = scalar_lea.hbm %s6383_s28, 64  ;;  %p6389_p12 = scmp.lt.s32.totalorder %s6383_s28, %s10774_s16 }
  0x6e   : > { %p6385_p1 = scmp.ne.s32.totalorder %s6383_s28, %s6384_s29  ;;  %p6390_p7 = scmp.lt.s32.totalorder %s6388_s13, %s6384_s29 }
  0x6f   : > { %715 = vmatpush.bf16.msra.mxu0 %v6724_v55  ;;  %769 = vmatpush.bf16.msra.mxu2 %v5083_v35 }
  0x70   : > { %744 = vmatpush.bf16.msra.mxu1 %v6729_v59  ;;  %p6386_p3 = pnand %p6385_p1, %p6625_p4  ;;  %p6391_p8 = por %p6390_p7, %p6389_p12 }
  0x72   : > { %716 = vmatmul.bf16.vlgmr.msra.gmra.mxu0 %v6731_v61  ;;  %p6387_p5 = pneg %p6386_p3 }
  0x73   : > { %745 = vmatmul.bf16.vlgmr.msra.gmra.mxu1 %v6731_v61  ;;  %770 = vmatpush.bf16.msra.mxu2 %v5067_v39 }
  0x74   : > { %p6392_p9 = pnand %p6391_p8, %p6387_p5 }
  0x77   : > { %771 = vmatpush.bf16.msra.mxu2 %v5051_v42 }
  0x7b   : > { %772 = vmatpush.bf16.msra.mxu2 %v5035_v47 }
  0x82   : > { %721 = vmatmul.bf16.gmra.mxu0 %v6739_v8 }
  0x83   : > { %750 = vmatmul.bf16.gmra.mxu1 %v6739_v8 }
  0x92   : > { %726 = vmatmul.bf16.gmra.mxu0 %v6745_v26 }
  0x93   : > { %755 = vmatmul.bf16.gmra.mxu1 %v6745_v26 }
  0xa2   : > { %731 = vmatmul.bf16.gmra.mxu0 %v6751_v31 }
  0xa3   : > { %760 = vmatmul.bf16.gmra.mxu1 %v6751_v31 }
  0xef   : > { %v717_v48 = vpop.f32.mrf.mxu0 }
  0xf0   : > { %v833_v49 = vrot.slane %v717_v48, 1  ;;  %v834_v50 = vrot.slane %v717_v48, 2  ;;  %v835_v51 = vrot.slane %v717_v48, 3  ;;  %v836_v52 = vrot.slane %v717_v48, 4  ;;  %v746_v63 = vpop.f32.mrf.mxu1 }
  0xf1   : > { %v837_v53 = vrot.slane %v717_v48, 5  ;;  %v889_v54 = vperm.slane %v717_v48, 0  ;;  %v838_v0 = vrot.slane %v717_v48, 6  ;;  %v839_v2 = vrot.slane %v717_v48, 7 }
  0xf2   : > { %v890_v57 = vperm.slane %v833_v49, 0  ;;  %v891_v58 = vperm.slane %v834_v50, 0  ;;  %v892_v60 = vperm.slane %v835_v51, 0  ;;  %v893_v62 = vperm.slane %v836_v52, 0 }
  0xf3   : > { %v1017_v1 = vadd.f32 %v889_v54, %v746_v63  ;;  %v894_v9 = vperm.slane %v837_v53, 0  ;;  %v895_v19 = vperm.slane %v838_v0, 0  ;;  %v896_v21 = vperm.slane %v839_v2, 0 }
  0xf4   : > { %v1018_v4 = vadd.f32 %v890_v57, %v746_v63  ;;  %v1019_v5 = vadd.f32 %v891_v58, %v746_v63  ;;  %v1020_v6 = vadd.f32 %v892_v60, %v746_v63  ;;  %v1021_v13 = vadd.f32 %v893_v62, %v746_v63 }
  0xf5   : > { %v1084_v12 = vadd.f32 %v6758_v56, %v1017_v1  ;;  %v1022_v24 = vadd.f32 %v894_v9, %v746_v63  ;;  %v1023_v35 = vadd.f32 %v895_v19, %v746_v63  ;;  %v1024_v37 = vadd.f32 %v896_v21, %v746_v63 }
  0xf6   : > { %v1085_v14 = vadd.f32 %v6758_v56, %v1018_v4  ;;  %v1086_v15 = vadd.f32 %v6758_v56, %v1019_v5  ;;  %v1087_v18 = vadd.f32 %v6758_v56, %v1020_v6  ;;  %v1088_v32 = vadd.f32 %v6758_v56, %v1021_v13 }
  0xf7   : > { %v1148_v20 = vmul.f32 0.2, %v1084_v12  ;;  %v719_v30 = vpop.f32.mrf.mxu0  ;;  %v1089_v39 = vadd.f32 %v6758_v56, %v1022_v24  ;;  %v1090_v46 = vadd.f32 %v6758_v56, %v1023_v35  ;;  %v1091_v48 = vadd.f32 %v6758_v56, %v1024_v37 }
  0xf8   : > { %v1149_v23 = vmul.f32 0.2, %v1085_v14  ;;  %v1150_v27 = vmul.f32 0.2, %v1086_v15  ;;  %v1151_v33 = vmul.f32 0.2, %v1087_v18  ;;  %v748_v50 = vpop.f32.mrf.mxu1 }
  0xf9   : > { %5640 = vtanh.f32 %v1148_v20  ;;  %v840_v38 = vrot.slane %v719_v30, 1  ;;  %v841_v40 = vrot.slane %v719_v30, 2  ;;  %v897_v41 = vperm.slane %v719_v30, 0 }
  0xfa   : > { %5642 = vtanh.f32 %v1149_v23  ;;  %v1152_v42 = vmul.f32 0.2, %v1088_v32  ;;  %v842_v44 = vrot.slane %v719_v30, 3  ;;  %v1153_v52 = vmul.f32 0.2, %v1089_v39 }
  0xfb   : > { %5644 = vtanh.f32 %v1150_v27  ;;  %v898_v49 = vperm.slane %v840_v38, 0  ;;  %v899_v53 = vperm.slane %v841_v40, 0  ;;  %v1025_v54 = vadd.f32 %v897_v41, %v748_v50 }
  0xfc   : > { %5646 = vtanh.f32 %v1151_v33  ;;  %v900_v57 = vperm.slane %v842_v44, 0  ;;  %v1154_v60 = vmul.f32 0.2, %v1090_v46  ;;  %v843_v63 = vrot.slane %v719_v30, 4 }
  0xfd   : > { %5648 = vtanh.f32 %v1152_v42  ;;  %v1155_v1 = vmul.f32 0.2, %v1091_v48  ;;  %v844_v4 = vrot.slane %v719_v30, 5  ;;  %v1026_v5 = vadd.f32 %v898_v49, %v748_v50 }
  0xfe   : > { %5650 = vtanh.f32 %v1153_v52  ;;  %v845_v6 = vrot.slane %v719_v30, 6  ;;  %v1027_v9 = vadd.f32 %v899_v53, %v748_v50  ;;  %v1092_v12 = vadd.f32 %v6758_v56, %v1025_v54 }
  0xff   : > { %v5641_v47 = vpop.eup %5640  ;;  %v846_v14 = vrot.slane %v719_v30, 7  ;;  %v1028_v15 = vadd.f32 %v900_v57, %v748_v50  ;;  %v901_v20 = vperm.slane %v843_v63, 0  ;;  %5652 = vtanh.f32 %v1154_v60  ;;  %v6771_v37 = vpop.f32.mrf.mxu0 }
 0x100   : > { %v5643_v51 = vpop.eup %5642  ;;  %v1276_v62 = vmul.f32 5.0, %v5641_v47  ;;  %v902_v24 = vperm.slane %v844_v4, 0  ;;  %v1093_v27 = vadd.f32 %v6758_v56, %v1026_v5  ;;  %5654 = vtanh.f32 %v1155_v1 }
 0x101   : > { %v5645_v58 = vpop.eup %5644  ;;  %v1277_v2 = vmul.f32 5.0, %v5643_v51  ;;  %v903_v32 = vperm.slane %v845_v6, 0  ;;  %v1094_v33 = vadd.f32 %v6758_v56, %v1027_v9  ;;  %v1156_v35 = vmul.f32 0.2, %v1092_v12 }
 0x102   : > { %v5647_v0 = vpop.eup %5646  ;;  %v1278_v13 = vmul.f32 5.0, %v5645_v58  ;;  %v1403_v19 = vmul.f32 1.442695, %v1276_v62  ;;  %v904_v39 = vperm.slane %v846_v14, 0  ;;  %v1095_v30 = vadd.f32 %v6758_v56, %v1028_v15  ;;  %v6786_v15 = vpop.f32.mrf.mxu1 }
 0x103   : > { %v1279_v18 = vmul.f32 5.0, %v5647_v0  ;;  %v5649_v21 = vpop.eup %5648  ;;  %v1405_v23 = vmul.f32 1.442695, %v1277_v2  ;;  %v1029_v44 = vadd.f32 %v901_v20, %v748_v50  ;;  %v1030_v46 = vadd.f32 %v902_v24, %v748_v50 }
 0x104   : > { %v1407_v38 = vmul.f32 1.442695, %v1278_v13  ;;  %v5651_v40 = vpop.eup %5650  ;;  %v1280_v41 = vmul.f32 5.0, %v5649_v21  ;;  %5656 = vpow2.f32 %v1403_v19  ;;  %v1157_v47 = vmul.f32 0.2, %v1093_v27 }
 0x105   : > { %v1409_v42 = vmul.f32 1.442695, %v1279_v18  ;;  %5658 = vpow2.f32 %v1405_v23  ;;  %v847_v48 = vrot.slane %v6771_v37, 1  ;;  %v1031_v49 = vadd.f32 %v903_v32, %v748_v50  ;;  %v5653_v52 = vpop.eup %5652 }
 0x106   : > { %v1158_v51 = vmul.f32 0.2, %v1094_v33  ;;  %5660 = vtanh.f32 %v1156_v35  ;;  %v1281_v53 = vmul.f32 5.0, %v5651_v40  ;;  %v1032_v54 = vadd.f32 %v904_v39, %v748_v50  ;;  %v5655_v58 = vpop.eup %5654 }
 0x107   : > { %5662 = vpow2.f32 %v1407_v38  ;;  %v1159_v57 = vmul.f32 0.2, %v1095_v30  ;;  %v1411_v60 = vmul.f32 1.442695, %v1280_v41  ;;  %v1096_v62 = vadd.f32 %v6758_v56, %v1029_v44 }
 0x108   : > { %5664 = vpow2.f32 %v1409_v42  ;;  %v905_v63 = vperm.slane %v6771_v37, 0  ;;  %v1097_v0 = vadd.f32 %v6758_v56, %v1030_v46  ;;  %v848_v1 = vrot.slane %v6771_v37, 2 }
 0x109   : > { %5666 = vtanh.f32 %v1157_v47  ;;  %v906_v2 = vperm.slane %v847_v48, 0  ;;  %v1282_v5 = vmul.f32 5.0, %v5653_v52  ;;  %v1098_v6 = vadd.f32 %v6758_v56, %v1031_v49 }
 0x10a   : > { %v6779_v4 = vpop.eup %5656  ;;  %5668 = vtanh.f32 %v1158_v51  ;;  %v849_v50 = vrot.slane %v6771_v37, 3  ;;  %v1283_v12 = vmul.f32 5.0, %v5655_v58  ;;  %v1413_v13 = vmul.f32 1.442695, %v1281_v53 }
 0x10b   : > { %v6783_v9 = vpop.eup %5658  ;;  %5670 = vtanh.f32 %v1159_v57  ;;  %v850_v14 = vrot.slane %v6771_v37, 4  ;;  %v1099_v19 = vadd.f32 %v6758_v56, %v1032_v54  ;;  %v1160_v20 = vmul.f32 0.2, %v1096_v62 }
 0x10c   : > { %v5661_v18 = vpop.eup %5660  ;;  %v851_v21 = vrot.slane %v6771_v37, 5  ;;  %v1033_v23 = vadd.f32 %v905_v63, %v6786_v15  ;;  %5672 = vpow2.f32 %v1411_v60  ;;  %v1161_v27 = vmul.f32 0.2, %v1097_v0  ;;  %v5018_v63 = vld [vmem:[#allocation5 + $0x8] sm:$0xf] }
 0x10d   : > { %v6791_v24 = vpop.eup %5662  ;;  %v907_v32 = vperm.slane %v848_v1, 0  ;;  %v1034_v33 = vadd.f32 %v906_v2, %v6786_v15  ;;  %v1415_v38 = vmul.f32 1.442695, %v1282_v5  ;;  %v1162_v39 = vmul.f32 0.2, %v1098_v6 }
 0x10e   : > { %v6794_v35 = vpop.eup %5664  ;;  %v852_v30 = vrot.slane %v6771_v37, 6  ;;  %v908_v40 = vperm.slane %v849_v50, 0  ;;  %5674 = vpow2.f32 %v1413_v13  ;;  %v1417_v42 = vmul.f32 1.442695, %v1283_v12  ;;  %v5402_v0 = vld [vmem:[#allocation5 + $0x14] sm:$0xf0] }
 0x10f   : > { %v5667_v41 = vpop.eup %5666  ;;  %v1284_v44 = vmul.f32 5.0, %v5661_v18  ;;  %v909_v46 = vperm.slane %v850_v14, 0  ;;  %v1163_v48 = vmul.f32 0.2, %v1099_v19  ;;  %5676 = vtanh.f32 %v1160_v20  ;;  %v5223_v50 = vld [vmem:[#allocation7 + $0xa8] sm:$0xf] }
 0x110   : > { %v5669_v47 = vpop.eup %5668  ;;  %v910_v49 = vperm.slane %v851_v21, 0  ;;  %v1100_v51 = vadd.f32 %v6758_v56, %v1033_v23  ;;  %5678 = vtanh.f32 %v1161_v27  ;;  %v853_v53 = vrot.slane %v6771_v37, 7  ;;  %v5453_v14 = vld [vmem:[#allocation7 + $0xb0] sm:$0xf0]  ;;  %v6809_v23 = vpop.f32.mrf.mxu0 }
 0x111   : > { %v5671_v52 = vpop.eup %5670  ;;  %v1035_v54 = vadd.f32 %v907_v32, %v6786_v15  ;;  %v1101_v57 = vadd.f32 %v6758_v56, %v1034_v33  ;;  %5680 = vtanh.f32 %v1162_v39  ;;  %v1285_v58 = vmul.f32 5.0, %v5667_v41 }
 0x112   : > { %v911_v60 = vperm.slane %v852_v30, 0  ;;  %v1036_v62 = vadd.f32 %v908_v40, %v6786_v15  ;;  %v6802_v1 = vpop.eup %5672  ;;  %5682 = vpow2.f32 %v1415_v38  ;;  %v1286_v2 = vmul.f32 5.0, %v5669_v47 }
 0x113   : > { %v1419_v5 = vmul.f32 1.442695, %v1284_v44  ;;  %v1037_v6 = vadd.f32 %v909_v46, %v6786_v15  ;;  %5684 = vtanh.f32 %v1163_v48  ;;  %v1287_v37 = vmul.f32 5.0, %v5671_v52 }
 0x114   : > { %v1038_v12 = vadd.f32 %v910_v49, %v6786_v15  ;;  %v1164_v13 = vmul.f32 0.2, %v1100_v51  ;;  %v6806_v18 = vpop.eup %5674  ;;  %5686 = vpow2.f32 %v1417_v42  ;;  %v912_v19 = vperm.slane %v853_v53, 0 }
 0x115   : > { %v1102_v20 = vadd.f32 %v6758_v56, %v1035_v54  ;;  %v1165_v21 = vmul.f32 0.2, %v1101_v57  ;;  %v5677_v27 = vpop.eup %5676  ;;  %v1421_v32 = vmul.f32 1.442695, %v1285_v58  ;;  %v1039_v33 = vadd.f32 %v911_v60, %v6786_v15 }
 0x116   : > { %v1103_v38 = vadd.f32 %v6758_v56, %v1036_v62  ;;  %v5019_v39 = vor.u32 %v5402_v0, %v5018_v63  ;;  %v5679_v30 = vpop.eup %5678  ;;  %5688 = vpow2.f32 %v1419_v5  ;;  %v1423_v40 = vmul.f32 1.442695, %v1286_v2 }
 0x117   : > { %v1104_v41 = vadd.f32 %v6758_v56, %v1037_v6  ;;  %v5224_v44 = vor.u32 %v5453_v14, %v5223_v50  ;;  %v5681_v42 = vpop.eup %5680  ;;  %v1425_v46 = vmul.f32 1.442695, %v1287_v37  ;;  %v1105_v47 = vadd.f32 %v6758_v56, %v1038_v12 }
 0x118   : > { %5690 = vtanh.f32 %v1164_v13  ;;  %773 = vmatpush.bf16.msra.mxu2 %v5019_v39  ;;  %v854_v48 = vrot.slane %v6809_v23, 1  ;;  %v6816_v49 = vpop.eup %5682  ;;  %v1040_v51 = vadd.f32 %v912_v19, %v6786_v15  ;;  %v1166_v52 = vmul.f32 0.2, %v1102_v20 }
 0x119   : > { %5692 = vtanh.f32 %v1165_v21  ;;  %3310 = vmatpush.bf16.msrb.mxu0 %v5224_v44  ;;  %v855_v53 = vrot.slane %v6809_v23, 2  ;;  %v5685_v54 = vpop.eup %5684  ;;  %v1288_v57 = vmul.f32 5.0, %v5677_v27  ;;  %v1289_v58 = vmul.f32 5.0, %v5679_v30  ;;  %v753_v27 = vpop.f32.mrf.mxu1 }
 0x11a   : > { %5694 = vpow2.f32 %v1421_v32  ;;  %v1167_v60 = vmul.f32 0.2, %v1103_v38  ;;  %v6820_v62 = vpop.eup %5686  ;;  %v1290_v63 = vmul.f32 5.0, %v5681_v42  ;;  %v1168_v0 = vmul.f32 0.2, %v1104_v41 }
 0x11b   : > { %10238 = vst [vmem:[#allocation37_spill] sm:$0xff] %v6820_v62  ;;  %5696 = vpow2.f32 %v1423_v40  ;;  %774 = vmatmul.bf16.vlgmr.msra.gmra.mxu2 %v6731_v61  ;;  %v913_v2 = vperm.slane %v6809_v23, 0  ;;  %v1106_v15 = vadd.f32 %v6758_v56, %v1039_v33  ;;  %v1169_v5 = vmul.f32 0.2, %v1105_v47 }
 0x11c   : > { %5698 = vpow2.f32 %v1425_v46  ;;  %v914_v6 = vperm.slane %v854_v48, 0  ;;  %v6825_v50 = vpop.eup %5688  ;;  %v1291_v37 = vmul.f32 5.0, %v5685_v54  ;;  %v1107_v12 = vadd.f32 %v6758_v56, %v1040_v51 }
 0x11d   : > { %10239 = vst [vmem:[#allocation38_spill] sm:$0xff] %v6825_v50  ;;  %5700 = vtanh.f32 %v1166_v52  ;;  %v915_v13 = vperm.slane %v855_v53, 0  ;;  %v1427_v19 = vmul.f32 1.442695, %v1288_v57  ;;  %v1429_v20 = vmul.f32 1.442695, %v1289_v58 }
 0x11e   : > { %v5691_v14 = vpop.eup %5690  ;;  %5702 = vtanh.f32 %v1167_v60  ;;  %v856_v21 = vrot.slane %v6809_v23, 3  ;;  %v1431_v38 = vmul.f32 1.442695, %v1290_v63  ;;  %v857_v33 = vrot.slane %v6809_v23, 4 }
 0x11f   : > { %v5693_v32 = vpop.eup %5692  ;;  %5704 = vtanh.f32 %v1168_v0  ;;  %v1041_v39 = vadd.f32 %v913_v2, %v753_v27  ;;  %v858_v40 = vrot.slane %v6809_v23, 5  ;;  %v859_v41 = vrot.slane %v6809_v23, 6 }
 0x120   : > { %v6830_v30 = vpop.eup %5694  ;;  %5706 = vtanh.f32 %v1169_v5  ;;  %v1042_v44 = vadd.f32 %v914_v6, %v753_v27  ;;  %v1433_v46 = vmul.f32 1.442695, %v1291_v37  ;;  %v1292_v47 = vmul.f32 5.0, %v5691_v14 }
 0x121   : > { %10240 = vst [vmem:[#allocation39_spill] sm:$0xff] %v6830_v30  ;;  %v6834_v42 = vpop.eup %5696  ;;  %v860_v48 = vrot.slane %v6809_v23, 7  ;;  %v1043_v51 = vadd.f32 %v915_v13, %v753_v27  ;;  %5708 = vpow2.f32 %v1427_v19  ;;  %v1170_v53 = vmul.f32 0.2, %v1106_v15  ;;  %v5139_v30 = vld [vmem:[#allocation7] sm:$0xf] }
 0x122   : > { %10241 = vst [vmem:[#allocation40_spill] sm:$0xff] %v6834_v42  ;;  %v6837_v52 = vpop.eup %5698  ;;  %v1293_v54 = vmul.f32 5.0, %v5693_v32  ;;  %v916_v57 = vperm.slane %v856_v21, 0  ;;  %5710 = vpow2.f32 %v1429_v20  ;;  %v1171_v60 = vmul.f32 0.2, %v1107_v12 }
 0x123   : > { %10242 = vst [vmem:[#allocation41_spill] sm:$0xff] %v6837_v52  ;;  %v5701_v58 = vpop.eup %5700  ;;  %v917_v63 = vperm.slane %v857_v33, 0  ;;  %v1108_v0 = vadd.f32 %v6758_v56, %v1041_v39  ;;  %5712 = vpow2.f32 %v1431_v38  ;;  %v918_v5 = vperm.slane %v858_v40, 0  ;;  %v5211_v32 = vld [vmem:[#allocation7 + $0x90] sm:$0xf] }
 0x124   : > { %v5703_v2 = vpop.eup %5702  ;;  %v919_v6 = vperm.slane %v859_v41, 0  ;;  %v1109_v37 = vadd.f32 %v6758_v56, %v1042_v44  ;;  %5714 = vpow2.f32 %v1433_v46  ;;  %v1435_v13 = vmul.f32 1.442695, %v1292_v47  ;;  %v5450_v40 = vld [vmem:[#allocation7 + $0x98] sm:$0xf0] }
 0x125   : > { %v5705_v23 = vpop.eup %5704  ;;  %v920_v14 = vperm.slane %v860_v48, 0  ;;  %v1110_v15 = vadd.f32 %v6758_v56, %v1043_v51  ;;  %5716 = vtanh.f32 %v1170_v53  ;;  %v1294_v21 = vmul.f32 5.0, %v5701_v58  ;;  %v6844_v48 = vpop.f32.mrf.mxu0 }
 0x126   : > { %v5707_v19 = vpop.eup %5706  ;;  %v1437_v20 = vmul.f32 1.442695, %v1293_v54  ;;  %v1044_v12 = vadd.f32 %v916_v57, %v753_v27  ;;  %5718 = vtanh.f32 %v1171_v60  ;;  %v1295_v33 = vmul.f32 5.0, %v5703_v2 }
 0x127   : > { %v1045_v39 = vadd.f32 %v917_v63, %v753_v27  ;;  %v1172_v38 = vmul.f32 0.2, %v1108_v0  ;;  %v6842_v41 = vpop.eup %5708  ;;  %v1296_v44 = vmul.f32 5.0, %v5705_v23  ;;  %v1046_v59 = vadd.f32 %v918_v5, %v753_v27 }
 0x128   : > { %10243 = vst [vmem:[#allocation42_spill] sm:$0xff] %v6842_v41  ;;  %v1047_v46 = vadd.f32 %v919_v6, %v753_v27  ;;  %v1173_v47 = vmul.f32 0.2, %v1109_v37  ;;  %v6846_v51 = vpop.eup %5710  ;;  %v1297_v53 = vmul.f32 5.0, %v5707_v19  ;;  %5720 = vpow2.f32 %v1435_v13 }
 0x129   : > { %10244 = vst [vmem:[#allocation43_spill] sm:$0xff] %v6846_v51  ;;  %v1048_v54 = vadd.f32 %v920_v14, %v753_v27  ;;  %v1174_v57 = vmul.f32 0.2, %v1110_v15  ;;  %v6848_v58 = vpop.eup %5712  ;;  %5722 = vpow2.f32 %v1437_v20  ;;  %v1439_v60 = vmul.f32 1.442695, %v1294_v21 }
 0x12a   : > { %10245 = vst [vmem:[#allocation44_spill] sm:$0xff] %v6848_v58  ;;  %v1111_v63 = vadd.f32 %v6758_v56, %v1044_v12  ;;  %v5212_v0 = vor.u32 %v5450_v40, %v5211_v32  ;;  %v6851_v2 = vpop.eup %5714  ;;  %v1441_v5 = vmul.f32 1.442695, %v1295_v33  ;;  %v1112_v6 = vadd.f32 %v6758_v56, %v1045_v39 }
 0x12b   : > { %10246 = vst [vmem:[#allocation45_spill] sm:$0xff] %v6851_v2  ;;  %5724 = vtanh.f32 %v1172_v38  ;;  %v861_v37 = vrot.slane %v6844_v48, 1  ;;  %779 = vmatmul.bf16.gmra.mxu2 %v6739_v8  ;;  %v5717_v23 = vpop.eup %5716  ;;  %v1443_v27 = vmul.f32 1.442695, %v1296_v44  ;;  %v1113_v13 = vadd.f32 %v6758_v56, %v1046_v59  ;;  %v5454_v2 = vld [vmem:[#allocation7 + $0xb8] sm:$0xf0] }
 0x12c   : > { %5726 = vtanh.f32 %v1173_v47  ;;  %3311 = vmatpush.bf16.msrb.mxu0 %v5212_v0  ;;  %v862_v14 = vrot.slane %v6844_v48, 2  ;;  %v5719_v15 = vpop.eup %5718  ;;  %v1445_v19 = vmul.f32 1.442695, %v1297_v53  ;;  %v1114_v21 = vadd.f32 %v6758_v56, %v1047_v46  ;;  %v6867_v0 = vpop.f32.mrf.mxu1 }
 0x12d   : > { %5728 = vtanh.f32 %v1174_v57  ;;  %v863_v20 = vrot.slane %v6844_v48, 3  ;;  %v1175_v12 = vmul.f32 0.2, %v1111_v63  ;;  %v864_v32 = vrot.slane %v6844_v48, 4 }
 0x12e   : > { %5730 = vpow2.f32 %v1439_v60  ;;  %v921_v33 = vperm.slane %v6844_v48, 0  ;;  %v6862_v39 = vpop.eup %5720  ;;  %v1298_v59 = vmul.f32 5.0, %v5717_v23  ;;  %v1176_v38 = vmul.f32 0.2, %v1112_v6 }
 0x12f   : > { %10247 = vst [vmem:[#allocation46_spill] sm:$0xff] %v6862_v39  ;;  %5732 = vpow2.f32 %v1441_v5  ;;  %v922_v40 = vperm.slane %v861_v37, 0  ;;  %v6864_v44 = vpop.eup %5722  ;;  %v1299_v47 = vmul.f32 5.0, %v5719_v15  ;;  %v1177_v46 = vmul.f32 0.2, %v1113_v13 }
 0x130   : > { %10248 = vst [vmem:[#allocation47_spill] sm:$0xff] %v6864_v44  ;;  %5734 = vpow2.f32 %v1443_v27  ;;  %v923_v53 = vperm.slane %v862_v14, 0  ;;  %v1115_v60 = vadd.f32 %v6758_v56, %v1048_v54  ;;  %v924_v63 = vperm.slane %v863_v20, 0 }
 0x131   : > { %v5725_v57 = vpop.eup %5724  ;;  %5736 = vpow2.f32 %v1445_v19  ;;  %v1178_v36 = vmul.f32 0.2, %v1114_v21  ;;  %v925_v23 = vperm.slane %v864_v32, 0  ;;  %v1049_v5 = vadd.f32 %v921_v33, %v6867_v0 }
 0x132   : > { %v5727_v45 = vpop.eup %5726  ;;  %5738 = vtanh.f32 %v1175_v12  ;;  %v1447_v37 = vmul.f32 1.442695, %v1298_v59  ;;  %v1300_v15 = vmul.f32 5.0, %v5725_v57  ;;  %v1050_v27 = vadd.f32 %v922_v40, %v6867_v0 }
 0x133   : > { %v5729_v6 = vpop.eup %5728  ;;  %5740 = vtanh.f32 %v1176_v38  ;;  %v1449_v14 = vmul.f32 1.442695, %v1299_v47  ;;  %v1301_v54 = vmul.f32 5.0, %v5727_v45  ;;  %v1051_v19 = vadd.f32 %v923_v53, %v6867_v0 }
 0x134   : > { %v6871_v13 = vpop.eup %5730  ;;  %5742 = vtanh.f32 %v1177_v46  ;;  %v1179_v21 = vmul.f32 0.2, %v1115_v60  ;;  %v1302_v12 = vmul.f32 5.0, %v5729_v6  ;;  %v865_v32 = vrot.slane %v6844_v48, 5 }
 0x135   : > { %10249 = vst [vmem:[#allocation48_spill] sm:$0xff] %v6871_v13  ;;  %v6874_v20 = vpop.eup %5732  ;;  %v1052_v33 = vadd.f32 %v924_v63, %v6867_v0  ;;  %5744 = vtanh.f32 %v1178_v36  ;;  %v866_v38 = vrot.slane %v6844_v48, 6  ;;  %v1053_v40 = vadd.f32 %v925_v23, %v6867_v0 }
 0x136   : > { %10250 = vst [vmem:[#allocation49_spill] sm:$0xff] %v6874_v20  ;;  %v6878_v59 = vpop.eup %5734  ;;  %v1116_v47 = vadd.f32 %v6758_v56, %v1049_v5  ;;  %5746 = vpow2.f32 %v1447_v37  ;;  %v1451_v46 = vmul.f32 1.442695, %v1300_v15  ;;  %v867_v53 = vrot.slane %v6844_v48, 7  ;;  %v5199_v20 = vld [vmem:[#allocation7 + $0x78] sm:$0xf] }
 0x137   : > { %10251 = vst [vmem:[#allocation50_spill] sm:$0xff] %v6878_v59  ;;  %v6883_v45 = vpop.eup %5736  ;;  %v1117_v57 = vadd.f32 %v6758_v56, %v1050_v27  ;;  %5748 = vpow2.f32 %v1449_v14  ;;  %v1453_v63 = vmul.f32 1.442695, %v1301_v54  ;;  %v1118_v6 = vadd.f32 %v6758_v56, %v1051_v19  ;;  %v5447_v5 = vld [vmem:[#allocation7 + $0x80] sm:$0xf0] }
 0x138   : > { %10252 = vst [vmem:[#allocation51_spill] sm:$0xff] %v6883_v45  ;;  %v5739_v60 = vpop.eup %5738  ;;  %5750 = vtanh.f32 %v1179_v21  ;;  %v1455_v59 = vmul.f32 1.442695, %v1302_v12  ;;  %v1119_v23 = vadd.f32 %v6758_v56, %v1052_v33  ;;  %v926_v45 = vperm.slane %v865_v32, 0 }
 0x139   : > { %v5741_v36 = vpop.eup %5740  ;;  %v927_v37 = vperm.slane %v866_v38, 0  ;;  %v1120_v15 = vadd.f32 %v6758_v56, %v1053_v40  ;;  %v1180_v48 = vmul.f32 0.2, %v1116_v47  ;;  %v1303_v44 = vmul.f32 5.0, %v5739_v60 }
 0x13a   : > { %v5743_v13 = vpop.eup %5742  ;;  %5752 = vpow2.f32 %v1451_v46  ;;  %v928_v27 = vperm.slane %v867_v53, 0  ;;  %v1181_v14 = vmul.f32 0.2, %v1117_v57  ;;  %v1304_v19 = vmul.f32 5.0, %v5741_v36  ;;  %v729_v46 = vpop.f32.mrf.mxu0 }
 0x13b   : > { %784 = vmatmul.bf16.gmra.mxu2 %v6745_v26  ;;  %v5745_v54 = vpop.eup %5744  ;;  %5754 = vpow2.f32 %v1453_v63  ;;  %v1182_v21 = vmul.f32 0.2, %v1118_v6  ;;  %v5200_v12 = vor.u32 %v5447_v5, %v5199_v20  ;;  %v1305_v39 = vmul.f32 5.0, %v5743_v13 }
 0x13c   : > { %v6891_v33 = vpop.eup %5746  ;;  %5756 = vpow2.f32 %v1455_v59  ;;  %v1183_v32 = vmul.f32 0.2, %v1119_v23  ;;  %v1054_v40 = vadd.f32 %v926_v45, %v6867_v0  ;;  %v1184_v47 = vmul.f32 0.2, %v1120_v15 }
 0x13d   : > { %10253 = vst [vmem:[#allocation52_spill] sm:$0xff] %v6891_v33  ;;  %v6893_v38 = vpop.eup %5748  ;;  %5758 = vtanh.f32 %v1180_v48  ;;  %3312 = vmatpush.bf16.msrb.mxu0 %v5200_v12  ;;  %v1306_v57 = vmul.f32 5.0, %v5745_v54  ;;  %v1457_v60 = vmul.f32 1.442695, %v1303_v44  ;;  %v1055_v63 = vadd.f32 %v927_v37, %v6867_v0 }
 0x13e   : > { %10254 = vst [vmem:[#allocation53_spill] sm:$0xff] %v6893_v38  ;;  %v5751_v53 = vpop.eup %5750  ;;  %5760 = vtanh.f32 %v1181_v14  ;;  %v1459_v20 = vmul.f32 1.442695, %v1304_v19  ;;  %v1056_v6 = vadd.f32 %v928_v27, %v6867_v0  ;;  %v1461_v59 = vmul.f32 1.442695, %v1305_v39 }
 0x13f   : > { %5762 = vtanh.f32 %v1182_v21  ;;  %v868_v36 = vrot.slane %v729_v46, 1  ;;  %v1307_v23 = vmul.f32 5.0, %v5751_v53  ;;  %v1121_v5 = vadd.f32 %v6758_v56, %v1054_v40 }
 0x140   : > { %v6898_v13 = vpop.eup %5752  ;;  %5764 = vtanh.f32 %v1183_v32  ;;  %v869_v15 = vrot.slane %v729_v46, 2  ;;  %v1463_v37 = vmul.f32 1.442695, %v1306_v57  ;;  %v1122_v48 = vadd.f32 %v6758_v56, %v1055_v63 }
 0x141   : > { %v6900_v45 = vpop.eup %5754  ;;  %5766 = vtanh.f32 %v1184_v47  ;;  %v870_v0 = vrot.slane %v729_v46, 3  ;;  %v1123_v39 = vadd.f32 %v6758_v56, %v1056_v6  ;;  %v871_v14 = vrot.slane %v729_v46, 4 }
 0x142   : > { %v6903_v44 = vpop.eup %5756  ;;  %5768 = vpow2.f32 %v1457_v60  ;;  %v929_v54 = vperm.slane %v729_v46, 0  ;;  %v872_v21 = vrot.slane %v729_v46, 5  ;;  %v873_v12 = vrot.slane %v729_v46, 6 }
 0x143   : > { %10255 = vst [vmem:[#allocation54_spill] sm:$0xff] %v6903_v44  ;;  %v5759_v27 = vpop.eup %5758  ;;  %5770 = vpow2.f32 %v1459_v20  ;;  %v930_v32 = vperm.slane %v868_v36, 0  ;;  %v1465_v47 = vmul.f32 1.442695, %v1307_v23  ;;  %v1185_v53 = vmul.f32 0.2, %v1121_v5  ;;  %v758_v20 = vpop.f32.mrf.mxu1 }
 0x144   : > { %v5761_v19 = vpop.eup %5760  ;;  %5772 = vpow2.f32 %v1461_v59  ;;  %v874_v44 = vrot.slane %v729_v46, 7  ;;  %v931_v60 = vperm.slane %v869_v15, 0  ;;  %v1186_v63 = vmul.f32 0.2, %v1122_v48  ;;  %v5187_v48 = vld [vmem:[#allocation7 + $0x60] sm:$0xf] }
 0x145   : > { %v5763_v40 = vpop.eup %5762  ;;  %5774 = vpow2.f32 %v1463_v37  ;;  %v1308_v38 = vmul.f32 5.0, %v5759_v27  ;;  %v932_v33 = vperm.slane %v870_v0, 0  ;;  %v1187_v6 = vmul.f32 0.2, %v1123_v39 }
 0x146   : > { %v5765_v57 = vpop.eup %5764  ;;  %v1309_v29 = vmul.f32 5.0, %v5761_v19  ;;  %v933_v8 = vperm.slane %v871_v14, 0  ;;  %v1057_v55 = vadd.f32 %v929_v54, %v758_v20  ;;  %v1310_v25 = vmul.f32 5.0, %v5763_v40  ;;  %v5444_v54 = vld [vmem:[#allocation7 + $0x68] sm:$0xf0] }
 0x147   : > { %v5767_v26 = vpop.eup %5766  ;;  %v934_v36 = vperm.slane %v872_v21, 0  ;;  %v935_v43 = vperm.slane %v873_v12, 0  ;;  %v1058_v23 = vadd.f32 %v930_v32, %v758_v20  ;;  %5776 = vtanh.f32 %v1185_v53 }
 0x148   : > { %v6907_v59 = vpop.eup %5768  ;;  %v1311_v46 = vmul.f32 5.0, %v5765_v57  ;;  %v936_v15 = vperm.slane %v874_v44, 0  ;;  %v1059_v37 = vadd.f32 %v931_v60, %v758_v20  ;;  %5778 = vtanh.f32 %v1186_v63 }
 0x149   : > { %10256 = vst [vmem:[#allocation55_spill] sm:$0xff] %v6907_v59  ;;  %v6909_v5 = vpop.eup %5770  ;;  %v1312_v27 = vmul.f32 5.0, %v5767_v26  ;;  %v1467_v39 = vmul.f32 1.442695, %v1308_v38  ;;  %v1060_v14 = vadd.f32 %v932_v33, %v758_v20  ;;  %5780 = vtanh.f32 %v1187_v6  ;;  %v5628_v6 = vpop.permute.xlu1 %5627  ;;  %v5231_v59 = vld [vmem:[#allocation7 + $0xb0] sm:$0xf] }
 0x14a   : > { %10257 = vst [vmem:[#allocation56_spill] sm:$0xff] %v6909_v5  ;;  %v6911_v0 = vpop.eup %5772  ;;  %v1469_v19 = vmul.f32 1.442695, %v1309_v29  ;;  %v1061_v21 = vadd.f32 %v933_v8, %v758_v20  ;;  %v1124_v12 = vadd.f32 %v6758_v56, %v1057_v55  ;;  %5782 = vpow2.f32 %v1465_v47 }
 0x14b   : > { %10258 = vst [vmem:[#allocation57_spill] sm:$0xff] %v6911_v0  ;;  %789 = vmatmul.bf16.gmra.mxu2 %v6751_v31  ;;  %v6915_v32 = vpop.eup %5774  ;;  %v1471_v44 = vmul.f32 1.442695, %v1310_v25  ;;  %v1062_v40 = vadd.f32 %v934_v36, %v758_v20  ;;  %v1125_v53 = vadd.f32 %v6758_v56, %v1058_v23  ;;  %v1473_v60 = vmul.f32 1.442695, %v1311_v46  ;;  %v761_v11 = vpop.f32.mrf.mxu1 }
 0x14c   : > { %10259 = vst [vmem:[#allocation58_spill] sm:$0xff] %v6915_v32  ;;  %v1063_v57 = vadd.f32 %v935_v43, %v758_v20  ;;  %v1126_v26 = vadd.f32 %v6758_v56, %v1059_v37  ;;  %v5188_v33 = vor.u32 %v5444_v54, %v5187_v48  ;;  %5784 = vpow2.f32 %v1467_v39  ;;  %v5225_v0 = vld [vmem:[#allocation7 + $0xb4] sm:$0xf0] }
 0x14d   : > { %v1475_v38 = vmul.f32 1.442695, %v1312_v27  ;;  %v1064_v63 = vadd.f32 %v936_v15, %v758_v20  ;;  %v1127_v29 = vadd.f32 %v6758_v56, %v1060_v14  ;;  %v5777_v8 = vpop.eup %5776  ;;  %5786 = vpow2.f32 %v1469_v19 }
 0x14e   : > { %v1128_v55 = vadd.f32 %v6758_v56, %v1061_v21  ;;  %v1188_v47 = vmul.f32 0.2, %v1124_v12  ;;  %3313 = vmatpush.bf16.msrb.mxu0 %v5188_v33  ;;  %v5779_v25 = vpop.eup %5778  ;;  %5788 = vpow2.f32 %v1471_v44  ;;  %v1129_v36 = vadd.f32 %v6758_v56, %v1062_v40  ;;  %v5617_v33 = vpop.permute.xlu0 %5616 }
 0x14f   : > { %v1189_v43 = vmul.f32 0.2, %v1125_v53  ;;  %v5781_v23 = vpop.eup %5780  ;;  %5790 = vpow2.f32 %v1473_v60  ;;  %v1130_v46 = vadd.f32 %v6758_v56, %v1063_v57  ;;  %v1190_v37 = vmul.f32 0.2, %v1126_v26  ;;  %v732_v60 = vpop.f32.mrf.mxu0 }
 0x150   : > { %v6923_v20 = vpop.eup %5782  ;;  %5792 = vpow2.f32 %v1475_v38  ;;  %v1131_v15 = vadd.f32 %v6758_v56, %v1064_v63  ;;  %v1191_v48 = vmul.f32 0.2, %v1127_v29  ;;  %v1313_v27 = vmul.f32 5.0, %v5777_v8  ;;  %v5175_v63 = vld [vmem:[#allocation7 + $0x48] sm:$0xf] }
 0x151   : > { %10260 = vst [vmem:[#allocation59_spill] sm:$0xff] %v6923_v20  ;;  %v1192_v39 = vmul.f32 0.2, %v1128_v55  ;;  %5794 = vtanh.f32 %v1188_v47  ;;  %v1314_v54 = vmul.f32 5.0, %v5779_v25  ;;  %v1315_v19 = vmul.f32 5.0, %v5781_v23 }
 0x152   : > { %v6926_v14 = vpop.eup %5784  ;;  %v1193_v21 = vmul.f32 0.2, %v1129_v36  ;;  %5796 = vtanh.f32 %v1189_v43  ;;  %v1194_v44 = vmul.f32 0.2, %v1130_v46  ;;  %v1195_v53 = vmul.f32 0.2, %v1131_v15  ;;  %v6942_v43 = vpop.permute.xlu1 %5632 }
 0x153   : > { %v6928_v12 = vpop.eup %5786  ;;  %5798 = vtanh.f32 %v1190_v37  ;;  %v6934_v57 = vunpack.i.h.bf16 %v5628_v6  ;;  %v6936_v26 = vunpack.i.l.bf16 %v5628_v6  ;;  %v1477_v38 = vmul.f32 1.442695, %v1313_v27  ;;  %v5441_v29 = vld [vmem:[#allocation7 + $0x50] sm:$0xf0] }
 0x154   : > { %v6930_v40 = vpop.eup %5788  ;;  %5800 = vtanh.f32 %v1191_v48  ;;  %v6940_v55 = vunpack.i.h.bf16 %v5617_v33  ;;  %v1479_v47 = vmul.f32 1.442695, %v1314_v54  ;;  %v1481_v25 = vmul.f32 1.442695, %v1315_v19  ;;  %v5428_v54 = vld [vmem:[#allocation5 + $0xec] sm:$0xf] }
 0x155   : > { %10261 = vst [vmem:[#allocation60_spill] sm:$0xff] %v6930_v40  ;;  %v6932_v56 = vpop.eup %5790  ;;  %5802 = vtanh.f32 %v1192_v39  ;;  %v875_v23 = vrot.slane %v732_v60, 1  ;;  %v876_v46 = vrot.slane %v732_v60, 2  ;;  %v877_v6 = vrot.slane %v732_v60, 3  ;;  %v5132_v19 = vld [vmem:[#allocation5 + $0xf8] sm:$0xf0] }
 0x156   : > { %10262 = vst [vmem:[#allocation61_spill] sm:$0xff] %v6932_v56  ;;  %v6938_v8 = vpop.eup %5792  ;;  %5804 = vtanh.f32 %v1193_v21  ;;  %v878_v15 = vrot.slane %v732_v60, 4  ;;  %v879_v48 = vrot.slane %v732_v60, 5  ;;  %v5176_v27 = vor.u32 %v5441_v29, %v5175_v63 }
 0x157   : > { %10263 = vst [vmem:[#allocation62_spill] sm:$0xff] %v6934_v57  ;;  %v5795_v36 = vpop.eup %5794  ;;  %5806 = vtanh.f32 %v1194_v44  ;;  %v881_v56 = vrot.slane %v732_v60, 7  ;;  %v937_v40 = vperm.slane %v732_v60, 0  ;;  %v6944_v20 = vunpack.i.l.bf16 %v5617_v33 }
 0x158   : > { %10264 = vst [vmem:[#allocation63_spill] sm:$0xff] %v6936_v26  ;;  %v5797_v37 = vpop.eup %5796  ;;  %5808 = vtanh.f32 %v1195_v53  ;;  %v6947_v44 = vunpack.i.h.bf16 %v6942_v43  ;;  %v1316_v32 = vmul.f32 5.0, %v5795_v36  ;;  %3314 = vmatpush.bf16.msrb.mxu0 %v5176_v27  ;;  %v5452_v53 = vld [vmem:[#allocation7 + $0xac] sm:$0xf]  ;;  %v939_v29 = vperm.slane %v876_v46, 0 }
 0x159   : > { %10265 = vst [vmem:[#allocation64_spill] sm:$0xff] %v6938_v8  ;;  %v5799_v39 = vpop.eup %5798  ;;  %5810 = vpow2.f32 %v1477_v38  ;;  %v880_v8 = vrot.slane %v732_v60, 6  ;;  %v1317_v63 = vmul.f32 5.0, %v5797_v37  ;;  %v938_v38 = vperm.slane %v875_v23, 0 }
 0x15a   : > { %10266 = vst [vmem:[#allocation65_spill] sm:$0xff] %v6940_v55  ;;  %v5801_v21 = vpop.eup %5800  ;;  %5812 = vpow2.f32 %v1479_v47  ;;  %v1318_v31 = vmul.f32 5.0, %v5799_v39  ;;  %v940_v17 = vperm.slane %v877_v6, 0  ;;  %v941_v34 = vperm.slane %v878_v15, 0 }
 0x15b   : > { %10267 = vst [vmem:[#allocation66_spill] sm:$0xff] %v6944_v20  ;;  %v5803_v5 = vpop.eup %5802  ;;  %5814 = vpow2.f32 %v1481_v25  ;;  %v942_v33 = vperm.slane %v879_v48, 0  ;;  %v1319_v7 = vmul.f32 5.0, %v5801_v21  ;;  %v943_v47 = vperm.slane %v880_v8, 0 }
 0x15c   : > { %10268 = vst [vmem:[#allocation67_spill] sm:$0xff] %v6947_v44  ;;  %v5805_v60 = vpop.eup %5804  ;;  %v944_v36 = vperm.slane %v881_v56, 0  ;;  %v1065_v27 = vadd.f32 %v937_v40, %v761_v11  ;;  %v1320_v51 = vmul.f32 5.0, %v5803_v5  ;;  %v1483_v41 = vmul.f32 1.442695, %v1316_v32 }
 0x15d   : > { %v5807_v28 = vpop.eup %5806  ;;  %v5135_v25 = vor.u32 %v5428_v54, %v5132_v19  ;;  %v5228_v37 = vor.u32 %v5452_v53, %v5225_v0  ;;  %v1321_v46 = vmul.f32 5.0, %v5805_v60  ;;  %v1485_v61 = vmul.f32 1.442695, %v1317_v63 }
 0x15e   : > { %v5809_v58 = vpop.eup %5808  ;;  %v1066_v39 = vadd.f32 %v938_v38, %v761_v11  ;;  %v5232_v6 = vor.u32 %v5454_v2, %v5231_v59  ;;  %v1322_v48 = vmul.f32 5.0, %v5807_v28  ;;  %v1487_v52 = vmul.f32 1.442695, %v1318_v31  ;;  %v6958_v2 = vld [vmem:[%s10126_s2] ss:$0 sm:$0xff] }
 0x15f   : > { %v6949_v23 = vpop.eup %5810  ;;  %v1067_v42 = vadd.f32 %v939_v29, %v761_v11  ;;  %v1068_v21 = vadd.f32 %v940_v17, %v761_v11  ;;  %795 = vmatpush.bf16.msra.mxu3 %v5135_v25  ;;  %3339 = vmatpush.bf16.msrb.mxu1 %v5228_v37  ;;  %v1323_v5 = vmul.f32 5.0, %v5809_v58  ;;  %v1489_v32 = vmul.f32 1.442695, %v1319_v7 }
 0x160   : > { %10269 = vst [vmem:[#allocation68_spill] sm:$0xff] %v6949_v23  ;;  %v6951_v15 = vpop.eup %5812  ;;  %v1069_v56 = vadd.f32 %v941_v34, %v761_v11  ;;  %v1070_v0 = vadd.f32 %v942_v33, %v761_v11  ;;  %3368 = vmatpush.bf16.msrb.mxu2 %v5232_v6  ;;  %5816 = vpow2.f32 %v1483_v41  ;;  %v1491_v8 = vmul.f32 1.442695, %v1320_v51  ;;  %v5622_v34 = vpop.permute.xlu0 %5621  ;;  %v7025_v23 = vld [vmem:[#allocation7 + $0x64] sm:$0xf] }
 0x161   : > { %10270 = vst [vmem:[#allocation69_spill] sm:$0xff] %v6951_v15  ;;  %v6953_v40 = vpop.eup %5814  ;;  %v1071_v54 = vadd.f32 %v943_v47, %v761_v11  ;;  %v1132_v28 = vadd.f32 %v6958_v2, %v1065_v27  ;;  %v6962_v17 = vunpack.i.l.bf16 %v6942_v43  ;;  %5818 = vpow2.f32 %v1485_v61  ;;  %v6982_v47 = vpop.f32.mrf.mxu0  ;;  %v5116_v27 = vld [vmem:[#allocation5 + $0xd8] sm:$0xf0] }
 0x162   : > { %10271 = vst [vmem:[#allocation70_spill] sm:$0xff] %v6953_v40  ;;  %v1493_v31 = vmul.f32 1.442695, %v1321_v46  ;;  %v1133_v7 = vadd.f32 %v6958_v2, %v1066_v39  ;;  %5820 = vpow2.f32 %v1487_v52  ;;  %v1495_v58 = vmul.f32 1.442695, %v1322_v48  ;;  %v763_v40 = vpop.f32.mrf.mxu1 }
 0x163   : > { %10272 = vst [vmem:[#allocation71_spill] sm:$0xff] %v6962_v17  ;;  %v1072_v41 = vadd.f32 %v944_v36, %v761_v11  ;;  %v1134_v51 = vadd.f32 %v6958_v2, %v1067_v42  ;;  %5822 = vpow2.f32 %v1489_v32  ;;  %v1497_v59 = vmul.f32 1.442695, %v1323_v5  ;;  %v5424_v36 = vld [vmem:[#allocation5 + $0xcc] sm:$0xf] }
 0x164   : > { %v1135_v19 = vadd.f32 %v6958_v2, %v1068_v21  ;;  %v1136_v53 = vadd.f32 %v6958_v2, %v1069_v56  ;;  %5824 = vpow2.f32 %v1491_v8  ;;  %v1137_v43 = vadd.f32 %v6958_v2, %v1070_v0 }
 0x165   : > { %v1138_v61 = vadd.f32 %v6958_v2, %v1071_v54  ;;  %v1196_v63 = vmul.f32 0.2, %v1132_v28  ;;  %v6970_v38 = vunpack.i.h.bf16 %v5622_v34  ;;  %v6972_v29 = vunpack.i.l.bf16 %v5622_v34  ;;  %v5449_v28 = vld [vmem:[#allocation7 + $0x94] sm:$0xf] }
 0x166   : > { %5826 = vpow2.f32 %v1493_v31  ;;  %v1197_v11 = vmul.f32 0.2, %v1133_v7  ;;  %v5817_v52 = vpop.eup %5816  ;;  %v6976_v42 = vmul.f32 %v6898_v13, %v6944_v20  ;;  %v6980_v60 = vmul.f32 %v6900_v45, %v6940_v55  ;;  %v5213_v31 = vld [vmem:[#allocation7 + $0x9c] sm:$0xf0] }
 0x167   : > { %10273 = vst [vmem:[#allocation72_spill] sm:$0xff] %v6970_v38  ;;  %5828 = vpow2.f32 %v1495_v58  ;;  %v1198_v33 = vmul.f32 0.2, %v1134_v51  ;;  %v5819_v25 = vpop.eup %5818  ;;  %v6986_v37 = vmul.f32 %v6926_v14, %v6944_v20  ;;  %v1139_v46 = vadd.f32 %v6958_v2, %v1072_v41  ;;  %v5219_v51 = vld [vmem:[#allocation7 + $0x98] sm:$0xf] }
 0x168   : > { %10274 = vst [vmem:[#allocation73_spill] sm:$0xff] %v6972_v29  ;;  %5830 = vpow2.f32 %v1497_v59  ;;  %v1199_v13 = vmul.f32 0.2, %v1135_v19  ;;  %v6989_v39 = vpop.eup %5820  ;;  %v1200_v6 = vmul.f32 0.2, %v1136_v53  ;;  %v882_v5 = vrot.slane %v6982_v47, 1 }
 0x169   : > { %10275 = vst [vmem:[#allocation74_spill] sm:$0xff] %v6976_v42  ;;  %v1201_v45 = vmul.f32 0.2, %v1137_v43  ;;  %v1202_v48 = vmul.f32 0.2, %v1138_v61  ;;  %5832 = vtanh.f32 %v1196_v63  ;;  %v6991_v21 = vpop.eup %5822  ;;  %v883_v32 = vrot.slane %v6982_v47, 2 }
 0x16a   : > { %10276 = vst [vmem:[#allocation75_spill] sm:$0xff] %v6980_v60  ;;  %5834 = vtanh.f32 %v1197_v11  ;;  %v5119_v56 = vor.u32 %v5424_v36, %v5116_v27  ;;  %v6995_v14 = vpop.eup %5824  ;;  %v884_v0 = vrot.slane %v6982_v47, 3  ;;  %v885_v8 = vrot.slane %v6982_v47, 4  ;;  %v5451_v59 = vld [vmem:[#allocation7 + $0xa0] sm:$0xf0] }
 0x16b   : > { %10277 = vst [vmem:[#allocation76_spill] sm:$0xff] %v6986_v37  ;;  %5836 = vtanh.f32 %v1198_v33  ;;  %v886_v54 = vrot.slane %v6982_v47, 5  ;;  %v1203_v34 = vmul.f32 0.2, %v1139_v46  ;;  %v887_v58 = vrot.slane %v6982_v47, 6 }
 0x16c   : > { %10278 = vst [vmem:[#allocation77_spill] sm:$0xff] %v6989_v39  ;;  %v7000_v7 = vpop.eup %5826  ;;  %5838 = vtanh.f32 %v1199_v13  ;;  %v888_v41 = vrot.slane %v6982_v47, 7  ;;  %796 = vmatpush.bf16.msra.mxu3 %v5119_v56  ;;  %v5420_v19 = vld [vmem:[#allocation5 + $0xac] sm:$0xf]  ;;  %v5100_v53 = vld [vmem:[#allocation5 + $0xb8] sm:$0xf0]  ;;  %v7008_v61 = vmul.f32 %v6928_v12, %v6940_v55  ;;  %v7011_v63 = vmul.f32 %v5817_v52, %v6944_v20 }
 0x16d   : > { %10279 = vst [vmem:[#allocation78_spill] sm:$0xff] %v6991_v21  ;;  %v7004_v43 = vpop.eup %5828  ;;  %5840 = vtanh.f32 %v1200_v6  ;;  %v945_v11 = vperm.slane %v6982_v47, 0  ;;  %v7014_v33 = vld [vmem:[#allocation7 + $0x7c] sm:$0xf]  ;;  %v7016_v36 = vld [vmem:[#allocation7 + $0x84] sm:$0xf0]  ;;  %v7021_v46 = vmul.f32 %v5819_v25, %v6940_v55  ;;  %v5216_v25 = vor.u32 %v5449_v28, %v5213_v31 }
 0x16e   : > { %10280 = vst [vmem:[#allocation79_spill] sm:$0xff] %v6995_v14  ;;  %v7018_v27 = vpop.eup %5830  ;;  %5842 = vtanh.f32 %v1201_v45  ;;  %v946_v13 = vperm.slane %v882_v5, 0  ;;  %v947_v56 = vperm.slane %v883_v32, 0  ;;  %v5163_v12 = vld [vmem:[#allocation7 + $0x30] sm:$0xf]  ;;  %v948_v6 = vperm.slane %v884_v0, 0 }
 0x16f   : > { %10281 = vst [vmem:[#allocation80_spill] sm:$0xff] %v7000_v7  ;;  %v7023_v7 = vld [vmem:[#allocation7 + $0x80] sm:$0xf]  ;;  %v5833_v52 = vpop.eup %5832  ;;  %5844 = vtanh.f32 %v1202_v48  ;;  %v949_v47 = vperm.slane %v885_v8, 0  ;;  %v5448_v14 = vld [vmem:[#allocation7 + $0x88] sm:$0xf0]  ;;  %v1073_v32 = vadd.f32 %v945_v11, %v763_v40  ;;  %v5220_v15 = vor.u32 %v5451_v59, %v5219_v51  ;;  %3340 = vmatpush.bf16.msrb.mxu1 %v5216_v25 }
 0x170   : > { %10282 = vst [vmem:[#allocation81_spill] sm:$0xff] %v7004_v43  ;;  %v5438_v43 = vld [vmem:[#allocation7 + $0x38] sm:$0xf0]  ;;  %v5835_v21 = vpop.eup %5834  ;;  %5846 = vtanh.f32 %v1203_v34  ;;  %v951_v39 = vperm.slane %v887_v58, 0  ;;  %v5103_v37 = vor.u32 %v5420_v19, %v5100_v53  ;;  %v7027_v48 = vld [vmem:[#allocation7 + $0x6c] sm:$0xf0]  ;;  %v1074_v34 = vadd.f32 %v946_v13, %v763_v40 }
 0x171   : > { %10283 = vst [vmem:[#allocation82_spill] sm:$0xff] %v7008_v61  ;;  %v5084_v45 = vld [vmem:[#allocation5 + $0x98] sm:$0xf0]  ;;  %v5837_v5 = vpop.eup %5836  ;;  %v5164_v61 = vor.u32 %v5438_v43, %v5163_v12  ;;  %v5151_v0 = vld [vmem:[#allocation7 + $0x18] sm:$0xf]  ;;  %v1324_v60 = vmul.f32 5.0, %v5833_v52  ;;  %v1075_v58 = vadd.f32 %v947_v56, %v763_v40  ;;  %v5204_v28 = vor.u32 %v7014_v33, %v7016_v36  ;;  %3369 = vmatpush.bf16.msrb.mxu2 %v5220_v15 }
 0x172   : > { %10284 = vst [vmem:[#allocation83_spill] sm:$0xff] %v7011_v63  ;;  %v950_v63 = vperm.slane %v886_v54, 0  ;;  %v5435_v8 = vld [vmem:[#allocation7 + $0x20] sm:$0xf0]  ;;  %v5839_v54 = vpop.eup %5838  ;;  %v5195_v31 = vld [vmem:[#allocation7 + $0x68] sm:$0xf]  ;;  %v1076_v59 = vadd.f32 %v948_v6, %v763_v40  ;;  %v1077_v19 = vadd.f32 %v949_v47, %v763_v40  ;;  %v5208_v53 = vor.u32 %v5448_v14, %v7023_v7  ;;  %797 = vmatpush.bf16.msra.mxu3 %v5103_v37 }
 0x173   : > { %10285 = vst [vmem:[#allocation84_spill] sm:$0xff] %v7018_v27  ;;  %v952_v27 = vperm.slane %v888_v41, 0  ;;  %v5445_v41 = vld [vmem:[#allocation7 + $0x70] sm:$0xf0]  ;;  %v5841_v11 = vpop.eup %5840  ;;  %v1325_v51 = vmul.f32 5.0, %v5835_v21  ;;  %3315 = vmatpush.bf16.msrb.mxu0 %v5164_v61  ;;  %v1326_v52 = vmul.f32 5.0, %v5837_v5  ;;  %v5152_v25 = vor.u32 %v5435_v8, %v5151_v0  ;;  %3341 = vmatpush.bf16.msrb.mxu1 %v5204_v28 }
 0x174   : > { %10286 = vst [vmem:[#allocation85_spill] sm:$0xff] %v7021_v46  ;;  %v5416_v46 = vld [vmem:[#allocation5 + $0x8c] sm:$0xf]  ;;  %v5068_v12 = vld [vmem:[#allocation5 + $0x78] sm:$0xf0]  ;;  %v5843_v42 = vpop.eup %5842  ;;  %v1078_v13 = vadd.f32 %v950_v63, %v763_v40  ;;  %v1327_v22 = vmul.f32 5.0, %v5839_v54  ;;  %v1079_v50 = vadd.f32 %v951_v39, %v763_v40  ;;  %v1140_v6 = vadd.f32 %v6958_v2, %v1073_v32 }
 0x175   : > { %v5412_v43 = vld [vmem:[#allocation5 + $0x6c] sm:$0xf]  ;;  %v5087_v56 = vor.u32 %v5416_v46, %v5084_v45  ;;  %v5845_v36 = vpop.eup %5844  ;;  %v1080_v21 = vadd.f32 %v952_v27, %v763_v40  ;;  %v5177_v61 = vld [vmem:[#allocation7 + $0x54] sm:$0xf0]  ;;  %v1328_v14 = vmul.f32 5.0, %v5841_v11  ;;  %v1141_v62 = vadd.f32 %v6958_v2, %v1074_v34  ;;  %3370 = vmatpush.bf16.msrb.mxu2 %v5208_v53 }
 0x176   : > { %v5432_v33 = vld [vmem:[#allocation7 + $0x8] sm:$0xf0]  ;;  %v5847_v47 = vpop.eup %5846  ;;  %v1499_v7 = vmul.f32 1.442695, %v1324_v60  ;;  %v5192_v37 = vor.u32 %v7025_v23, %v7027_v48  ;;  %v5183_v63 = vld [vmem:[#allocation7 + $0x50] sm:$0xf]  ;;  %v5196_v5 = vor.u32 %v5445_v41, %v5195_v31  ;;  %v1142_v0 = vadd.f32 %v6958_v2, %v1075_v58 }
 0x177   : > { %v5440_v15 = vld [vmem:[#allocation7 + $0x4c] sm:$0xf]  ;;  %v1329_v46 = vmul.f32 5.0, %v5843_v42  ;;  %v1501_v45 = vmul.f32 1.442695, %v1325_v51  ;;  %3316 = vmatpush.bf16.msrb.mxu0 %v5152_v25  ;;  %v5140_v39 = vor.u32 %v5432_v33, %v5139_v30  ;;  %v1330_v27 = vmul.f32 5.0, %v5845_v36  ;;  %798 = vmatpush.bf16.msra.mxu3 %v5087_v56 }
 0x178   : > { %v5442_v40 = vld [vmem:[#allocation7 + $0x58] sm:$0xf0]  ;;  %v1503_v32 = vmul.f32 1.442695, %v1326_v52  ;;  %v5071_v60 = vor.u32 %v5412_v43, %v5068_v12  ;;  %v5408_v8 = vld [vmem:[#allocation5 + $0x4c] sm:$0xf]  ;;  %v1143_v28 = vadd.f32 %v6958_v2, %v1076_v59  ;;  %v1144_v23 = vadd.f32 %v6958_v2, %v1077_v19  ;;  %3342 = vmatpush.bf16.msrb.mxu1 %v5192_v37 }
 0x179   : > { %v1331_v54 = vmul.f32 5.0, %v5847_v47  ;;  %v1505_v34 = vmul.f32 1.442695, %v1327_v22  ;;  %v5052_v42 = vld [vmem:[#allocation5 + $0x58] sm:$0xf0]  ;;  %5848 = vpow2.f32 %v1499_v7  ;;  %v1145_v31 = vadd.f32 %v6958_v2, %v1078_v13  ;;  %3371 = vmatpush.bf16.msrb.mxu2 %v5196_v5 }
 0x17a   : > { %v1507_v48 = vmul.f32 1.442695, %v1328_v14  ;;  %v5180_v30 = vor.u32 %v5440_v15, %v5177_v61  ;;  %v5437_v41 = vld [vmem:[#allocation7 + $0x34] sm:$0xf]  ;;  %v5165_v11 = vld [vmem:[#allocation7 + $0x3c] sm:$0xf0]  ;;  %5850 = vpow2.f32 %v1501_v45  ;;  %v5184_v53 = vor.u32 %v5442_v40, %v5183_v63 }
 0x17b   : > { %v1509_v58 = vmul.f32 1.442695, %v1329_v46  ;;  %v7040_v51 = vmul.f32 0.2, %v1140_v6  ;;  %v5171_v22 = vld [vmem:[#allocation7 + $0x38] sm:$0xf]  ;;  %3317 = vmatpush.bf16.msrb.mxu0 %v5140_v39  ;;  %5852 = vpow2.f32 %v1503_v32  ;;  %799 = vmatpush.bf16.msra.mxu3 %v5071_v60  ;;  %v5055_v43 = vor.u32 %v5408_v8, %v5052_v42 }
 0x17c   : > { %v1511_v59 = vmul.f32 1.442695, %v1330_v27  ;;  %v7042_v19 = vmul.f32 0.2, %v1141_v62  ;;  %v5439_v12 = vld [vmem:[#allocation7 + $0x40] sm:$0xf0]  ;;  %5854 = vpow2.f32 %v1505_v34  ;;  %v7046_v13 = vadd.f32 %v6958_v2, %v1079_v50  ;;  %3343 = vmatpush.bf16.msrb.mxu1 %v5180_v30 }
 0x17d   : > { %v1513_v52 = vmul.f32 1.442695, %v1331_v54  ;;  %v7049_v56 = vadd.f32 %v6958_v2, %v1080_v21  ;;  %v5404_v25 = vld [vmem:[#allocation5 + $0x2c] sm:$0xf]  ;;  %v5036_v33 = vld [vmem:[#allocation5 + $0x38] sm:$0xf0]  ;;  %5856 = vpow2.f32 %v1507_v48  ;;  %v5168_v36 = vor.u32 %v5437_v41, %v5165_v11  ;;  %3372 = vmatpush.bf16.msrb.mxu2 %v5184_v53 }
 0x17e   : > { %v5434_v62 = vld [vmem:[#allocation7 + $0x1c] sm:$0xf]  ;;  %v1531_v6 = vmul.f32 %v6779_v4, %v6944_v20  ;;  %5858 = vpow2.f32 %v1509_v58  ;;  %v5172_v15 = vor.u32 %v5439_v12, %v5171_v22  ;;  %v5153_v50 = vld [vmem:[#allocation7 + $0x24] sm:$0xf0]  ;;  %v5159_v61 = vld [vmem:[#allocation7 + $0x20] sm:$0xf]  ;;  %v1533_v2 = vmul.f32 %v6791_v24, %v6972_v29 }
 0x17f   : > { %3847 = vmatpush.bf16.msra.mxu0 %v6683_v3  ;;  %10287 = vst [vmem:[#allocation86_spill] sm:$0xff] %v7049_v56  ;;  %v1532_v3 = vmul.f32 %v6783_v9, %v6940_v55  ;;  %v5436_v47 = vld [vmem:[#allocation7 + $0x28] sm:$0xf0]  ;;  %v1534_v21 = vmul.f32 %v6794_v35, %v6970_v38  ;;  %v7059_v14 = vpop.eup %5848  ;;  %5860 = vpow2.f32 %v1511_v59  ;;  %v7061_v7 = vmul.f32 0.2, %v1142_v0  ;;  %800 = vmatpush.bf16.msra.mxu3 %v5055_v43 }
 0x180   : > { %10288 = vst [vmem:[#allocation87_spill] sm:$0xff] %v7059_v14  ;;  %v5039_v4 = vor.u32 %v5404_v25, %v5036_v33  ;;  %v5400_v9 = vld [vmem:[#allocation5 + $0xc] sm:$0xf]  ;;  %v5020_v37 = vld [vmem:[#allocation5 + $0x18] sm:$0xf0]  ;;  %v1535_v63 = vmul.f32 %v6802_v1, %v6936_v26  ;;  %v7066_v46 = vpop.eup %5850  ;;  %5862 = vpow2.f32 %v1513_v52  ;;  %3344 = vmatpush.bf16.msrb.mxu1 %v5168_v36  ;;  %v5156_v40 = vor.u32 %v5434_v62, %v5153_v50 }
 0x181   : > { %10289 = vst [vmem:[#allocation88_spill] sm:$0xff] %v7066_v46  ;;  %v7068_v24 = vmul.f32 0.2, %v1143_v28  ;;  %v7070_v35 = vmul.f32 0.2, %v1144_v23  ;;  %v7074_v5 = vpop.eup %5852  ;;  %v5160_v39 = vor.u32 %v5436_v47, %v5159_v61  ;;  %v1595_v27 = vrot.slane %v1531_v6, 4  ;;  %3373 = vmatpush.bf16.msrb.mxu2 %v5172_v15 }
 0x182   : > { %v7072_v45 = vmul.f32 0.2, %v1145_v31  ;;  %10290 = vst [vmem:[#allocation89_spill] sm:$0xff] %v7074_v5  ;;  %v1601_v32 = vrot.slane %v1532_v3, 4  ;;  %v7076_v0 = vpop.eup %5854  ;;  %v5431_v1 = vld [vmem:[#allocation7 + $0x4] sm:$0xf]  ;;  %v1536_v8 = vmul.f32 %v6806_v18, %v6934_v57  ;;  %v1537_v48 = vmul.f32 %v6816_v49, %v6962_v17 }
 0x183   : > { %3848 = vmatpush.bf16.msra.mxu0 %v6688_v10  ;;  %10291 = vst [vmem:[#allocation90_spill] sm:$0xff] %v7076_v0  ;;  %v5023_v10 = vor.u32 %v5400_v9, %v5020_v37  ;;  %v5141_v60 = vld [vmem:[#allocation7 + $0xc] sm:$0xf0]  ;;  %v1607_v54 = vrot.slane %v1533_v2, 4  ;;  %v1613_v34 = vrot.slane %v1534_v21, 4  ;;  %v7080_v28 = vpop.eup %5856  ;;  %801 = vmatpush.bf16.msra.mxu3 %v5039_v4  ;;  %v1596_v31 = vadd.f32 %v1595_v27, %v1531_v6  ;;  %v10299_v50 = vld [vmem:[#allocation23_spill] sm:$0xff] }
 0x184   : > { %10292 = vst [vmem:[#allocation91_spill] sm:$0xff] %v7080_v28  ;;  %v5147_v23 = vld [vmem:[#allocation7 + $0x8] sm:$0xf]  ;;  %v5433_v42 = vld [vmem:[#allocation7 + $0x10] sm:$0xf0]  ;;  %v1602_v30 = vadd.f32 %v1601_v32, %v1532_v3  ;;  %v1619_v41 = vrot.slane %v1535_v63, 4  ;;  %v7085_v11 = vpop.eup %5858  ;;  %5864 = vtanh.f32 %v7040_v51  ;;  %3345 = vmatpush.bf16.msrb.mxu1 %v5156_v40  ;;  %v5144_v43 = vor.u32 %v5431_v1, %v5141_v60 }
 0x185   : > { %10293 = vst [vmem:[#allocation92_spill] sm:$0xff] %v7085_v11  ;;  %v10294_v18 = vld [vmem:[#allocation37_spill] sm:$0xff]  ;;  %v1608_v53 = vadd.f32 %v1607_v54, %v1533_v2  ;;  %v1614_v22 = vadd.f32 %v1613_v34, %v1534_v21  ;;  %v7090_v59 = vpop.eup %5860  ;;  %v1597_v12 = vrot.slane %v1596_v31, 2  ;;  %3374 = vmatpush.bf16.msrb.mxu2 %v5160_v39  ;;  %v1625_v62 = vrot.slane %v1536_v8, 4  ;;  %v10298_v6 = vld [vmem:[#allocation38_spill] sm:$0xff]  ;;  %v10300_v61 = vld [vmem:[#allocation39_spill] sm:$0xff] }
 0x186   : > { %v1538_v58 = vmul.f32 %v10294_v18, %v6947_v44  ;;  %10295 = vst [vmem:[#allocation37_spill] sm:$0xff] %v7090_v59  ;;  %v1603_v49 = vrot.slane %v1602_v30, 2  ;;  %v1620_v52 = vadd.f32 %v1619_v41, %v1535_v63  ;;  %v7092_v25 = vpop.eup %5862  ;;  %v7095_v51 = vmul.f32 0.2, %v7046_v13  ;;  %v10301_v9 = vld [vmem:[#allocation40_spill] sm:$0xff]  ;;  %v10302_v37 = vld [vmem:[#allocation41_spill] sm:$0xff] }
 0x187   : > { %3849 = vmatpush.bf16.msra.mxu0 %v6694_v16  ;;  %10296 = vst [vmem:[#allocation93_spill] sm:$0xff] %v7092_v25  ;;  %v5148_v16 = vor.u32 %v5433_v42, %v5147_v23  ;;  %v1609_v33 = vrot.slane %v1608_v53, 2  ;;  %v1615_v36 = vrot.slane %v1614_v22, 2  ;;  %5866 = vtanh.f32 %v7042_v19  ;;  %802 = vmatpush.bf16.msra.mxu3 %v5023_v10  ;;  %v10303_v27 = vld [vmem:[#allocation33_spill] sm:$0xff]  ;;  %v10304_v32 = vld [vmem:[#allocation42_spill] sm:$0xff]  ;;  %v10305_v54 = vld [vmem:[#allocation43_spill] sm:$0xff] }
 0x188   : > { %10297 = vst [vmem:[#allocation94_spill] sm:$0xff] %v7095_v51  ;;  %v1539_v3 = vmul.f32 %v10298_v6, %v6944_v20  ;;  %v1631_v15 = vrot.slane %v1537_v48, 4  ;;  %v1540_v47 = vmul.f32 %v10300_v61, %v6940_v55  ;;  %v1598_v2 = vadd.f32 %v1597_v12, %v1596_v31  ;;  %3346 = vmatpush.bf16.msrb.mxu1 %v5144_v43  ;;  %v10306_v23 = vld [vmem:[#allocation44_spill] sm:$0xff]  ;;  %v10309_v41 = vld [vmem:[#allocation45_spill] sm:$0xff] }
 0x189   : > { %v1604_v21 = vadd.f32 %v1603_v49, %v1602_v30  ;;  %v1637_v4 = vrot.slane %v1538_v58, 4  ;;  %v1541_v13 = vmul.f32 %v10301_v9, %v6972_v29  ;;  %v1542_v19 = vmul.f32 %v10302_v37, %v6970_v38  ;;  %3375 = vmatpush.bf16.msrb.mxu2 %v5148_v16  ;;  %v10307_v30 = vld [vmem:[#allocation20_spill] sm:$0xff]  ;;  %v10311_v9 = vld [vmem:[#allocation21_spill] sm:$0xff]  ;;  %v10312_v37 = vld [vmem:[#allocation27_spill] sm:$0xff] }
 0x18a   : > { %v7107_v63 = vadd.f32 %v1609_v33, %v1608_v53  ;;  %v1621_v40 = vrot.slane %v1620_v52, 2  ;;  %v7109_v39 = vpop.eup %5864  ;;  %5868 = vtanh.f32 %v7061_v7  ;;  %803 = vmatmul.bf16.vlgmr.msra.gmra.mxu3 %v10303_v27  ;;  %v1543_v10 = vmul.f32 %v10304_v32, %v6936_v26  ;;  %v10308_v7 = vld [vmem:[#allocation25_spill] sm:$0xff] }
 0x18b   : > { %3850 = vmatpush.bf16.msra.mxu0 %v10299_v50  ;;  %v7115_v1 = vadd.f32 %v1615_v36, %v1614_v22  ;;  %v1626_v60 = vadd.f32 %v1625_v62, %v1536_v8  ;;  %5870 = vtanh.f32 %v7068_v24  ;;  %v1544_v34 = vmul.f32 %v10305_v54, %v6934_v57 }
 0x18c   : > { %v1545_v42 = vmul.f32 %v10306_v23, %v6962_v17  ;;  %v1632_v31 = vadd.f32 %v1631_v15, %v1537_v48  ;;  %3860 = vmatpush.bf16.msra.mxu1 %v10307_v30  ;;  %v1546_v18 = vmul.f32 %v10309_v41, %v6947_v44  ;;  %v1599_v53 = vrot.slane %v1598_v2, 1 }
 0x18d   : > { %v1605_v22 = vrot.slane %v1604_v21, 1  ;;  %v1638_v43 = vadd.f32 %v1637_v4, %v1538_v58  ;;  %v7126_v8 = vpop.eup %5866  ;;  %v1611_v24 = vrot.slane %v7107_v63, 1  ;;  %v1622_v12 = vadd.f32 %v1621_v40, %v1620_v52 }
 0x18e   : > { %10310 = vst [vmem:[#allocation38_spill] sm:$0xff] %v7126_v8  ;;  %v1643_v49 = vrot.slane %v1539_v3, 4  ;;  %v1649_v16 = vrot.slane %v1540_v47, 4  ;;  %v1617_v33 = vrot.slane %v7115_v1, 1  ;;  %v1627_v48 = vrot.slane %v1626_v60, 2 }
 0x18f   : > { %3851 = vmatpush.bf16.msra.mxu0 %v10308_v7  ;;  %v1655_v36 = vrot.slane %v1541_v13, 4  ;;  %v1661_v62 = vrot.slane %v1542_v19, 4  ;;  %v1633_v6 = vrot.slane %v1632_v31, 2  ;;  %v1667_v61 = vrot.slane %v1543_v10, 4 }
 0x190   : > { %v1644_v15 = vadd.f32 %v1643_v49, %v1539_v3  ;;  %v1650_v50 = vadd.f32 %v1649_v16, %v1540_v47  ;;  %3861 = vmatpush.bf16.msra.mxu1 %v10311_v9  ;;  %v7132_v58 = vpop.eup %5868  ;;  %v7134_v4 = vadd.f32 %v1599_v53, %v1598_v2  ;;  %v1639_v52 = vrot.slane %v1638_v43, 2  ;;  %v10315_v2 = vld [vmem:[#allocation22_spill] sm:$0xff]  ;;  %v10316_v53 = vld [vmem:[#allocation29_spill] sm:$0xff] }
 0x191   : > { %10313 = vst [vmem:[#allocation23_spill] sm:$0xff] %v7132_v58  ;;  %v1656_v40 = vadd.f32 %v1655_v36, %v1541_v13  ;;  %v1662_v27 = vadd.f32 %v1661_v62, %v1542_v19  ;;  %v7136_v32 = vpop.eup %5870  ;;  %v7138_v54 = vadd.f32 %v1605_v22, %v1604_v21  ;;  %v1668_v3 = vadd.f32 %v1667_v61, %v1543_v10 }
 0x192   : > { %10314 = vst [vmem:[#allocation39_spill] sm:$0xff] %v7136_v32  ;;  %v1645_v23 = vrot.slane %v1644_v15, 2  ;;  %v1651_v30 = vrot.slane %v1650_v50, 2  ;;  %v1673_v41 = vrot.slane %v1544_v34, 4  ;;  %v1679_v49 = vrot.slane %v1545_v42, 4 }
 0x193   : > { %3852 = vmatpush.bf16.msra.mxu0 %v10312_v37  ;;  %v1657_v47 = vrot.slane %v1656_v40, 2  ;;  %v1663_v7 = vrot.slane %v1662_v27, 2  ;;  %v1628_v16 = vadd.f32 %v1627_v48, %v1626_v60  ;;  %v1634_v9 = vadd.f32 %v1633_v6, %v1632_v31 }
 0x194   : > { %v1669_v37 = vrot.slane %v1668_v3, 2  ;;  %v1685_v25 = vrot.slane %v1546_v18, 4  ;;  %3862 = vmatpush.bf16.msra.mxu1 %v10315_v2  ;;  %v1640_v13 = vadd.f32 %v1639_v52, %v1638_v43  ;;  %v1646_v19 = vadd.f32 %v1645_v23, %v1644_v15  ;;  %v10317_v2 = vld [vmem:[#allocation24_spill] sm:$0xff]  ;;  %v10318_v43 = vld [vmem:[#allocation31_spill] sm:$0xff] }
 0x195   : > { %v1674_v36 = vadd.f32 %v1673_v41, %v1544_v34  ;;  %v1680_v21 = vadd.f32 %v1679_v49, %v1545_v42  ;;  %v1623_v22 = vrot.slane %v1622_v12, 1  ;;  %v1652_v62 = vadd.f32 %v1651_v30, %v1650_v50  ;;  %v10319_v30 = vld [vmem:[#allocation34_spill] sm:$0xff] }
 0x196   : > { %v1658_v59 = vadd.f32 %v1657_v47, %v1656_v40  ;;  %v1686_v10 = vadd.f32 %v1685_v25, %v1546_v18  ;;  %v1664_v61 = vadd.f32 %v1663_v7, %v1662_v27  ;;  %v1670_v11 = vadd.f32 %v1669_v37, %v1668_v3 }
 0x197   : > { %3853 = vmatpush.bf16.msra.mxu0 %v10316_v53  ;;  %v1675_v28 = vrot.slane %v1674_v36, 2  ;;  %v1681_v0 = vrot.slane %v1680_v21, 2  ;;  %v7143_v60 = vadd.f32 %v1611_v24, %v7107_v63  ;;  %v1629_v31 = vrot.slane %v1628_v16, 1 }
 0x198   : > { %v1635_v48 = vrot.slane %v1634_v9, 1  ;;  %v1687_v6 = vrot.slane %v1686_v10, 2  ;;  %3863 = vmatpush.bf16.msra.mxu1 %v10317_v2  ;;  %v1641_v34 = vrot.slane %v1640_v13, 1  ;;  %v1647_v42 = vrot.slane %v1646_v19, 1 }
 0x199   : > { %v1676_v15 = vadd.f32 %v1675_v28, %v1674_v36  ;;  %v1682_v50 = vadd.f32 %v1681_v0, %v1680_v21  ;;  %v1653_v52 = vrot.slane %v1652_v62, 1  ;;  %v1659_v25 = vrot.slane %v1658_v59, 1  ;;  %v10320_v0 = vld [vmem:[#allocation26_spill] sm:$0xff] }
 0x19a   : > { %v1688_v18 = vadd.f32 %v1687_v6, %v1686_v10  ;;  %v7148_v40 = vmax.f32 %v7134_v4, 1e-30  ;;  %v7151_v63 = vadd.f32 %v1617_v33, %v7115_v1  ;;  %v7153_v24 = vadd.f32 %v1623_v22, %v1622_v12  ;;  %808 = vmatmul.bf16.gmra.mxu3 %v10319_v30 }
 0x19b   : > { %3854 = vmatpush.bf16.msra.mxu0 %v10318_v43  ;;  %v1665_v27 = vrot.slane %v1664_v61, 1  ;;  %v1671_v23 = vrot.slane %v1670_v11, 1  ;;  %v1677_v3 = vrot.slane %v1676_v15, 1  ;;  %v1683_v47 = vrot.slane %v1682_v50, 1 }
 0x19c   : > { %v7157_v28 = vmax.f32 %v7138_v54, 1e-30  ;;  %5872 = vrcp.f32 %v7148_v40  ;;  %3864 = vmatpush.bf16.msra.mxu1 %v10320_v0  ;;  %v7161_v7 = vadd.f32 %v1629_v31, %v1628_v16  ;;  %v7163_v41 = vadd.f32 %v1635_v48, %v1634_v9 }
 0x19d   : > { %v7165_v1 = vadd.f32 %v1641_v34, %v1640_v13  ;;  %v1689_v12 = vrot.slane %v1688_v18, 1  ;;  %v7167_v33 = vadd.f32 %v1647_v42, %v1646_v19  ;;  %v7169_v49 = vadd.f32 %v1653_v52, %v1652_v62  ;;  %v10322_v52 = vld [vmem:[#allocation30_spill] sm:$0xff] }
 0x19e   : > { %v7171_v37 = vadd.f32 %v1659_v25, %v1658_v59  ;;  %v7174_v53 = vmax.f32 %v7143_v60, 1e-30  ;;  %5874 = vtanh.f32 %v7070_v35  ;;  %v7177_v36 = vadd.f32 %v1665_v27, %v1664_v61  ;;  %v10321_v59 = vld [vmem:[#allocation28_spill] sm:$0xff] }
 0x19f   : > { %v7179_v16 = vadd.f32 %v1671_v23, %v1670_v11  ;;  %v7182_v9 = vmax.f32 %v7151_v63, 1e-30  ;;  %v7184_v13 = vadd.f32 %v1677_v3, %v1676_v15  ;;  %v7186_v19 = vadd.f32 %v1683_v47, %v1682_v50 }
 0x1a0   : > { %v7189_v21 = vmax.f32 %v7153_v24, 1e-30  ;;  %5876 = vrcp.f32 %v7157_v28  ;;  %3865 = vmatpush.bf16.msra.mxu1 %v10321_v59  ;;  %v7193_v22 = vadd.f32 %v1689_v12, %v1688_v18  ;;  %v7196_v35 = vmax.f32 %v7161_v7, 1e-30 }
 0x1a1   : > { %v7199_v11 = vmax.f32 %v7163_v41, 1e-30  ;;  %v7202_v62 = vmax.f32 %v7165_v1, 1e-30  ;;  %v7207_v61 = vmax.f32 %v7167_v33, 1e-30  ;;  %5878 = vrcp.f32 %v7174_v53 }
 0x1a2   : > { %v7204_v10 = vpop.eup %5872  ;;  %v7210_v31 = vmax.f32 %v7169_v49, 1e-30  ;;  %v7213_v48 = vmax.f32 %v7171_v37, 1e-30  ;;  %v7217_v6 = vmax.f32 %v7177_v36, 1e-30  ;;  %5880 = vrcp.f32 %v7182_v9 }
 0x1a3   : > { %v7220_v2 = vmax.f32 %v7179_v16, 1e-30  ;;  %v2044_v43 = vmul.f32 %v7204_v10, %v7148_v40  ;;  %v2052_v34 = vand.u32 2147483647, %v7148_v40  ;;  %v7226_v42 = vmax.f32 %v7184_v13, 1e-30 }
 0x1a4   : > { %v7229_v15 = vmax.f32 %v7186_v19, 1e-30  ;;  %v2054_v50 = vand.u32 2147483648, %v7148_v40  ;;  %3866 = vmatpush.bf16.msra.mxu1 %v10322_v52  ;;  %v7234_v25 = vpop.eup %5874  ;;  %v7237_v18 = vmax.f32 %v7193_v22, 1e-30  ;;  %vm2048_vm1 = vweird.f32 %v7148_v40 }
 0x1a5   : > { %10323 = vst [vmem:[#allocation40_spill] sm:$0xff] %v7234_v25  ;;  %v2045_v27 = vsub.f32 1.0, %v2044_v43  ;;  %v2067_v23 = vand.u32 2147483647, %v7157_v28  ;;  %vm2063_vm2 = vweird.f32 %v7157_v28  ;;  %v2069_v3 = vand.u32 2147483648, %v7157_v28 }
 0x1a6   : > { %v7241_v30 = vpop.eup %5876  ;;  %v2084_v47 = vand.u32 2147483648, %v7174_v53  ;;  %5882 = vrcp.f32 %v7189_v21  ;;  %vm7248_vm3 = vcmp.eq.f32.partialorder %v2052_v34, 8.507059e+37  ;;  %vm2078_vm4 = vweird.f32 %v7174_v53  ;;  %v10326_v34 = vld [vmem:[#allocation32_spill] sm:$0xff] }
 0x1a7   : > { %v2046_v0 = vmul.f32 %v7204_v10, %v2045_v27  ;;  %v2059_v59 = vmul.f32 %v7241_v30, %v7157_v28  ;;  %v2082_v43 = vand.u32 2147483647, %v7174_v53  ;;  %v7256_v52 = vpop.eup %5878  ;;  %vm2049_vm5 = vweird.f32 %v7204_v10 }
 0x1a8   : > { %v2055_v5 = vor.u32 1.1754944e-38, %v2054_v50  ;;  %v2099_v44 = vand.u32 2147483648, %v7182_v9  ;;  %5884 = vrcp.f32 %v7196_v35  ;;  %3867 = vmatpush.bf16.msra.mxu1 %v10326_v34  ;;  %vm7263_vm6 = vcmp.eq.f32.partialorder %v2067_v23, 8.507059e+37  ;;  %v7269_v14 = vpop.eup %5880  ;;  %vm7289_vm10 = vmor %vm2048_vm1, %vm2049_vm5 }
 0x1a9   : > { %v2047_v27 = vadd.f32 %v7204_v10, %v2046_v0  ;;  %v2060_v25 = vsub.f32 1.0, %v2059_v59  ;;  %v2074_v46 = vmul.f32 %v7256_v52, %v7174_v53  ;;  %v2070_v17 = vor.u32 1.1754944e-38, %v2069_v3  ;;  %v10331_v3 = vld [vmem:[#allocation35_spill] sm:$0xff] }
 0x1aa   : > { %v2085_v50 = vor.u32 1.1754944e-38, %v2084_v47  ;;  %v2097_v58 = vand.u32 2147483647, %v7182_v9  ;;  %v2114_v8 = vand.u32 2147483648, %v7189_v21  ;;  %vm2064_vm7 = vweird.f32 %v7241_v30  ;;  %813 = vmatmul.bf16.gmra.mxu3 %v10331_v3 }
 0x1ab   : > { %v2061_v34 = vmul.f32 %v7241_v30, %v2060_v25  ;;  %v2075_v0 = vsub.f32 1.0, %v2074_v46  ;;  %vm7275_vm8 = vcmp.eq.f32.partialorder %v2082_v43, 8.507059e+37  ;;  %v2089_v59 = vmul.f32 %v7269_v14, %v7182_v9  ;;  %vm7305_vm13 = vmor %vm2063_vm2, %vm2064_vm7 }
 0x1ac   : > { %vm2093_vm9 = vweird.f32 %v7182_v9  ;;  %v7283_v47 = vpop.eup %5882  ;;  %vm2079_vm11 = vweird.f32 %v7256_v52  ;;  %v2100_v46 = vor.u32 1.1754944e-38, %v2099_v44  ;;  %vm2108_vm12 = vweird.f32 %v7189_v21 }
 0x1ad   : > { %v2112_v43 = vand.u32 2147483647, %v7189_v21  ;;  %v2051_v3 = vsel %vm7289_vm10, %v7204_v10, %v2047_v27  ;;  %v2062_v57 = vadd.f32 %v7241_v30, %v2061_v34  ;;  %v2076_v51 = vmul.f32 %v7256_v52, %v2075_v0  ;;  %vm7329_vm15 = vmor %vm2078_vm4, %vm2079_vm11 }
 0x1ae   : > { %v2090_v40 = vsub.f32 1.0, %v2089_v59  ;;  %v5885_v56 = vpop.eup %5884  ;;  %v2104_v26 = vmul.f32 %v7283_v47, %v7189_v21  ;;  %v2115_v38 = vor.u32 1.1754944e-38, %v2114_v8  ;;  %v2127_v10 = vand.u32 2147483647, %v7196_v35 }
 0x1af   : > { %5886 = vrcp.f32 %v7199_v11  ;;  %v2066_v27 = vsel %vm7305_vm13, %v7241_v30, %v2062_v57  ;;  %v2077_v34 = vadd.f32 %v7256_v52, %v2076_v51  ;;  %vm7318_vm14 = vcmp.eq.f32.partialorder %v2097_v58, 8.507059e+37  ;;  %v10352_v51 = vld [vmem:[#allocation36_spill] sm:$0xff] }
 0x1b0   : > { %v2091_v28 = vmul.f32 %v7269_v14, %v2090_v40  ;;  %v2119_v59 = vmul.f32 %v5885_v56, %v7196_v35  ;;  %v2056_v8 = vsel %vm7248_vm3, %v2055_v5, %v2051_v3  ;;  %v2105_v57 = vsub.f32 1.0, %v2104_v26 }
 0x1b1   : > { %vm7333_vm0 = vcmp.eq.f32.partialorder %v2112_v43, 8.507059e+37  ;;  %vm2123_vm1 = vweird.f32 %v7196_v35  ;;  %v2129_v58 = vand.u32 2147483648, %v7196_v35  ;;  %v2081_v5 = vsel %vm7329_vm15, %v7256_v52, %v2077_v34 }
 0x1b2   : > { %v2092_v30 = vadd.f32 %v7269_v14, %v2091_v28  ;;  %vm2094_vm2 = vweird.f32 %v7269_v14  ;;  %v2120_v53 = vsub.f32 1.0, %v2119_v59  ;;  %v2071_v26 = vsel %vm7263_vm6, %v2070_v17, %v2066_v27 }
 0x1b3   : > { %v2106_v12 = vmul.f32 %v7283_v47, %v2105_v57  ;;  %vm2109_vm3 = vweird.f32 %v7283_v47  ;;  %vm7348_vm4 = vcmp.eq.f32.partialorder %v2127_v10, 8.507059e+37  ;;  %vm2124_vm5 = vweird.f32 %v5885_v56  ;;  %vm7358_vm6 = vmor %vm2093_vm9, %vm2094_vm2 }
 0x1b4   : > { %v2121_v3 = vmul.f32 %v5885_v56, %v2120_v53  ;;  %v2142_v52 = vand.u32 2147483647, %v7199_v11  ;;  %5888 = vrcp.f32 %v7202_v62  ;;  %v2086_v44 = vsel %vm7275_vm8, %v2085_v50, %v2081_v5  ;;  %vm7372_vm7 = vmor %vm2108_vm12, %vm2109_vm3 }
 0x1b5   : > { %v5887_v40 = vpop.eup %5886  ;;  %v2107_v32 = vadd.f32 %v7283_v47, %v2106_v12  ;;  %v2130_v10 = vor.u32 1.1754944e-38, %v2129_v58  ;;  %v2144_v27 = vand.u32 2147483648, %v7199_v11  ;;  %v7365_v34 = vmul.f32 %v2056_v8, %v7134_v4  ;;  %vm7386_vm8 = vmor %vm2123_vm1, %vm2124_vm5 }
 0x1b6   : > { %v2096_v28 = vsel %vm7358_vm6, %v7269_v14, %v2092_v30  ;;  %v2122_v50 = vadd.f32 %v5885_v56, %v2121_v3  ;;  %v2134_v23 = vmul.f32 %v5887_v40, %v7199_v11  ;;  %v7378_v59 = vmul.f32 %v2071_v26, %v7138_v54 }
 0x1b7   : > { %v2111_v4 = vsel %vm7372_vm7, %v7283_v47, %v2107_v32  ;;  %vm2138_vm9 = vweird.f32 %v7199_v11  ;;  %5890 = vrcp.f32 %v7207_v61  ;;  %v7393_v21 = vmul.f32 %v2086_v44, %v7143_v60 }
 0x1b8   : > { %v2126_v54 = vsel %vm7386_vm8, %v5885_v56, %v2122_v50  ;;  %v2135_v8 = vsub.f32 1.0, %v2134_v23  ;;  %vm7397_vm10 = vcmp.eq.f32.partialorder %v2142_v52, 8.507059e+37  ;;  %v2101_v35 = vsel %vm7318_vm14, %v2100_v46, %v2096_v28 }
 0x1b9   : > { %v2145_v25 = vor.u32 1.1754944e-38, %v2144_v27  ;;  %vm2153_vm11 = vweird.f32 %v7202_v62  ;;  %v2157_v57 = vand.u32 2147483647, %v7202_v62  ;;  %v2116_v60 = vsel %vm7333_vm0, %v2115_v38, %v2111_v4 }
 0x1ba   : > { %v5889_v58 = vpop.eup %5888  ;;  %v2136_v5 = vmul.f32 %v5887_v40, %v2135_v8  ;;  %vm2139_vm12 = vweird.f32 %v5887_v40  ;;  %v2159_v56 = vand.u32 2147483648, %v7202_v62  ;;  %v2131_v30 = vsel %vm7348_vm4, %v2130_v10, %v2126_v54  ;;  %818 = vmatmul.bf16.gmra.mxu3 %v10352_v51 }
 0x1bb   : > { %v2149_v53 = vmul.f32 %v5889_v58, %v7202_v62  ;;  %v2172_v46 = vand.u32 2147483647, %v7207_v61  ;;  %5892 = vrcp.f32 %v7210_v31  ;;  %v7414_v0 = vmul.f32 %v2101_v35, %v7151_v63  ;;  %vm7424_vm14 = vmor %vm2138_vm9, %vm2139_vm12 }
 0x1bc   : > { %v2137_v26 = vadd.f32 %v5887_v40, %v2136_v5  ;;  %vm2168_vm13 = vweird.f32 %v7207_v61  ;;  %v2174_v38 = vand.u32 2147483648, %v7207_v61  ;;  %v7420_v43 = vmul.f32 %v2116_v60, %v7153_v24 }
 0x1bd   : > { %v5891_v12 = vpop.eup %5890  ;;  %v2150_v52 = vsub.f32 1.0, %v2149_v53  ;;  %vm7428_vm15 = vcmp.eq.f32.partialorder %v2157_v57, 8.507059e+37  ;;  %5894 = vrcp.f32 %v7213_v48  ;;  %v7434_v44 = vmul.f32 %v2131_v30, %v7161_v7 }
 0x1be   : > { %v2141_v24 = vsel %vm7424_vm14, %v5887_v40, %v2137_v26  ;;  %v2160_v17 = vor.u32 1.1754944e-38, %v2159_v56  ;;  %v2164_v11 = vmul.f32 %v5891_v12, %v7207_v61  ;;  %vm2154_vm0 = vweird.f32 %v5889_v58 }
 0x1bf   : > { %v2151_v32 = vmul.f32 %v5889_v58, %v2150_v52  ;;  %vm7439_vm1 = vcmp.eq.f32.partialorder %v2172_v46, 8.507059e+37  ;;  %v2189_v27 = vand.u32 2147483648, %v7210_v31  ;;  %v2175_v9 = vor.u32 1.1754944e-38, %v2174_v38  ;;  %vm7453_vm3 = vmor %vm2153_vm11, %vm2154_vm0 }
 0x1c0   : > { %v2165_v28 = vsub.f32 1.0, %v2164_v11  ;;  %vm2183_vm2 = vweird.f32 %v7210_v31  ;;  %v2187_v7 = vand.u32 2147483647, %v7210_v31  ;;  %5896 = vrcp.f32 %v7217_v6 }
 0x1c1   : > { %v5893_v40 = vpop.eup %5892  ;;  %v2146_v50 = vsel %vm7397_vm10, %v2145_v25, %v2141_v24  ;;  %v2152_v23 = vadd.f32 %v5889_v58, %v2151_v32  ;;  %v2202_v4 = vand.u32 2147483647, %v7213_v48  ;;  %v2204_v14 = vand.u32 2147483648, %v7213_v48 }
 0x1c2   : > { %v2166_v8 = vmul.f32 %v5891_v12, %v2165_v28  ;;  %vm2169_vm4 = vweird.f32 %v5891_v12  ;;  %v2179_v35 = vmul.f32 %v5893_v40, %v7210_v31  ;;  %vm2198_vm5 = vweird.f32 %v7213_v48 }
 0x1c3   : > { %v5895_v57 = vpop.eup %5894  ;;  %v2156_v47 = vsel %vm7453_vm3, %v5889_v58, %v2152_v23  ;;  %v2190_v25 = vor.u32 1.1754944e-38, %v2189_v27  ;;  %v2217_v60 = vand.u32 2147483647, %v7217_v6  ;;  %5898 = vrcp.f32 %v7220_v2  ;;  %vm7473_vm7 = vmor %vm2168_vm13, %vm2169_vm4 }
 0x1c4   : > { %v7464_v62 = vmul.f32 %v2146_v50, %v7163_v41  ;;  %v2167_v5 = vadd.f32 %v5891_v12, %v2166_v8  ;;  %v2180_v56 = vsub.f32 1.0, %v2179_v35  ;;  %vm7466_vm6 = vcmp.eq.f32.partialorder %v2187_v7, 8.507059e+37 }
 0x1c5   : > { %v2194_v53 = vmul.f32 %v5895_v57, %v7213_v48  ;;  %vm2184_vm8 = vweird.f32 %v5893_v40  ;;  %vm7477_vm9 = vcmp.eq.f32.partialorder %v2202_v4, 8.507059e+37  ;;  %v2205_v41 = vor.u32 1.1754944e-38, %v2204_v14 }
 0x1c6   : > { %vm2213_vm10 = vweird.f32 %v7217_v6  ;;  %v2219_v26 = vand.u32 2147483648, %v7217_v6  ;;  %v5897_v38 = vpop.eup %5896  ;;  %v2161_v51 = vsel %vm7428_vm15, %v2160_v17, %v2156_v47  ;;  %v2171_v61 = vsel %vm7473_vm7, %v5891_v12, %v2167_v5  ;;  %vm7502_vm13 = vmor %vm2183_vm2, %vm2184_vm8 }
 0x1c7   : > { %v2181_v3 = vmul.f32 %v5893_v40, %v2180_v56  ;;  %v2195_v52 = vsub.f32 1.0, %v2194_v53  ;;  %vm2199_vm11 = vweird.f32 %v5895_v57  ;;  %v2209_v24 = vmul.f32 %v5897_v38, %v7217_v6 }
 0x1c8   : > { %vm7488_vm12 = vcmp.eq.f32.partialorder %v2217_v60, 8.507059e+37  ;;  %v2232_v32 = vand.u32 2147483647, %v7220_v2  ;;  %v2176_v27 = vsel %vm7439_vm1, %v2175_v9, %v2171_v61  ;;  %v2234_v17 = vand.u32 2147483648, %v7220_v2  ;;  %vm2200_vm15 = vmor %vm2198_vm5, %vm2199_vm11 }
 0x1c9   : > { %v2182_v28 = vadd.f32 %v5893_v40, %v2181_v3  ;;  %v2196_v63 = vmul.f32 %v5895_v57, %v2195_v52  ;;  %v5899_v7 = vpop.eup %5898  ;;  %v7497_v12 = vmul.f32 %v2161_v51, %v7165_v1  ;;  %v2210_v23 = vsub.f32 1.0, %v2209_v24 }
 0x1ca   : > { %v2220_v4 = vor.u32 1.1754944e-38, %v2219_v26  ;;  %5900 = vrcp.f32 %v7226_v42  ;;  %v2224_v14 = vmul.f32 %v5899_v7, %v7220_v2  ;;  %vm2228_vm14 = vweird.f32 %v7220_v2 }
 0x1cb   : > { %v2186_v10 = vsel %vm7502_vm13, %v5893_v40, %v2182_v28  ;;  %v2197_v9 = vadd.f32 %v5895_v57, %v2196_v63  ;;  %v7512_v1 = vmul.f32 %v2176_v27, %v7167_v33  ;;  %v2211_v31 = vmul.f32 %v5897_v38, %v2210_v23 }
 0x1cc   : > { %vm2214_vm0 = vweird.f32 %v5897_v38  ;;  %vm7517_vm1 = vcmp.eq.f32.partialorder %v2232_v32, 8.507059e+37  ;;  %v2225_v40 = vsub.f32 1.0, %v2224_v14  ;;  %v2235_v35 = vor.u32 1.1754944e-38, %v2234_v17 }
 0x1cd   : > { %v2201_v8 = vsel %vm2200_vm15, %v5895_v57, %v2197_v9  ;;  %5902 = vrcp.f32 %v7229_v15  ;;  %v2191_v47 = vsel %vm7466_vm6, %v2190_v25, %v2186_v10  ;;  %v2212_v33 = vadd.f32 %v5897_v38, %v2211_v31  ;;  %vm2215_vm2 = vmor %vm2213_vm10, %vm2214_vm0 }
 0x1ce   : > { %v2247_v60 = vand.u32 2147483647, %v7226_v42  ;;  %v2249_v48 = vand.u32 2147483648, %v7226_v42  ;;  %v2206_v5 = vsel %vm7477_vm9, %v2205_v41, %v2201_v8  ;;  %v2226_v56 = vmul.f32 %v5899_v7, %v2225_v40 }
 0x1cf   : > { %vm2229_vm3 = vweird.f32 %v5899_v7  ;;  %vm2243_vm4 = vweird.f32 %v7226_v42  ;;  %v2216_v53 = vsel %vm2215_vm2, %v5897_v38, %v2212_v33  ;;  %v2262_v30 = vand.u32 2147483647, %v7229_v15  ;;  %v10383_v38 = vld [vmem:[#allocation50_spill] sm:$0xff] }
 0x1d0   : > { %v5901_v57 = vpop.eup %5900  ;;  %v2264_v25 = vand.u32 2147483648, %v7229_v15  ;;  %5904 = vrcp.f32 %v7237_v18  ;;  %v2192_v58 = vmul.f32 %v2191_v47, %v7169_v49  ;;  %v2221_v46 = vsel %vm7488_vm12, %v2220_v4, %v2216_v53  ;;  %vm2230_vm5 = vmor %vm2228_vm14, %vm2229_vm3  ;;  %v10379_v53 = vld [vmem:[#allocation48_spill] sm:$0xff] }
 0x1d1   : > { %v2227_v41 = vadd.f32 %v5899_v7, %v2226_v56  ;;  %v2239_v6 = vmul.f32 %v5901_v57, %v7226_v42  ;;  %v2207_v26 = vmul.f32 %v2206_v5, %v7171_v37  ;;  %vm7541_vm6 = vcmp.eq.f32.partialorder %v2247_v60, 8.507059e+37  ;;  %v10377_v60 = vld [vmem:[#allocation46_spill] sm:$0xff]  ;;  %v10378_v56 = vld [vmem:[#allocation47_spill] sm:$0xff] }
 0x1d2   : > { %v2250_v51 = vor.u32 1.1754944e-38, %v2249_v48  ;;  %vm2258_vm7 = vweird.f32 %v7229_v15  ;;  %vm2244_vm8 = vweird.f32 %v5901_v57  ;;  %vm10201_vm9 = vcmask 1041409   ;;  %v10388_v37 = vld [vmem:[#allocation38_spill] sm:$0xff] }
 0x1d3   : > { %v5903_v61 = vpop.eup %5902  ;;  %v2231_v49 = vsel %vm2230_vm5, %v5899_v7, %v2227_v41  ;;  %v2240_v3 = vsub.f32 1.0, %v2239_v6  ;;  %v2222_v52 = vmul.f32 %v2221_v46, %v7177_v36  ;;  %vm7548_vm10 = vcmp.eq.f32.partialorder %v2262_v30, 8.507059e+37  ;;  %vm2245_vm15 = vmor %vm2243_vm4, %vm2244_vm8  ;;  %v10380_v46 = vld [vmem:[#allocation72_spill] sm:$0xff]  ;;  %v10381_v41 = vld [vmem:[#allocation49_spill] sm:$0xff] }
 0x1d4   : > { %v2254_v24 = vmul.f32 %v5903_v61, %v7229_v15  ;;  %v2265_v2 = vor.u32 1.1754944e-38, %v2264_v25  ;;  %v2236_v11 = vsel %vm7517_vm1, %v2235_v35, %v2231_v49  ;;  %vm2273_vm11 = vweird.f32 %v7237_v18  ;;  %v10385_v49 = vld [vmem:[#allocation94_spill] sm:$0xff] }
 0x1d5   : > { %v2241_v32 = vmul.f32 %v5901_v57, %v2240_v3  ;;  %v2277_v27 = vand.u32 2147483647, %v7237_v18  ;;  %v3068_v28 = vsel %vm10201_vm9, %v7378_v59, %v7365_v34  ;;  %vm10200_vm12 = vcmask 1042434   ;;  %v10387_v3 = vld [vmem:[#allocation51_spill] sm:$0xff] }
 0x1d6   : > { %v5905_v36 = vpop.eup %5904  ;;  %v2255_v63 = vsub.f32 1.0, %v2254_v24  ;;  %vm10188_vm13 = vcmask 1043459   ;;  %vm10187_vm14 = vcmask 1044484   ;;  %v2279_v50 = vand.u32 2147483648, %v7237_v18 }
 0x1d7   : > { %v2242_v17 = vadd.f32 %v5901_v57, %v2241_v32  ;;  %v2269_v7 = vmul.f32 %v5905_v36, %v7237_v18  ;;  %v3070_v23 = vsel %vm10200_vm12, %v7393_v21, %v3068_v28  ;;  %vm2259_vm0 = vweird.f32 %v5903_v61  ;;  %v10389_v32 = vld [vmem:[#allocation23_spill] sm:$0xff] }
 0x1d8   : > { %v2256_v4 = vmul.f32 %v5903_v61, %v2255_v63  ;;  %v3072_v34 = vsel %vm10188_vm13, %v7414_v0, %v3070_v23  ;;  %vm10186_vm1 = vcmask 1045509   ;;  %v2237_v59 = vmul.f32 %v2236_v11, %v7179_v16  ;;  %vm2260_vm3 = vmor %vm2258_vm7, %vm2259_vm0  ;;  %v6141_v28 = vld [vmem:[%s6665_s22] sm:$0xff]  ;;  %v6142_v63 = vld [vmem:[%s6665_s22 + $0x8] sm:$0xff] }
 0x1d9   : > { %v2246_v10 = vsel %vm2245_vm15, %v5901_v57, %v2242_v17  ;;  %v2270_v9 = vsub.f32 1.0, %v2269_v7  ;;  %v3074_v14 = vsel %vm10187_vm14, %v7420_v43, %v3072_v34  ;;  %vm2274_vm2 = vweird.f32 %v5905_v36  ;;  %v10392_v23 = vld [vmem:[#allocation71_spill] sm:$0xff] }
 0x1da   : > { %v2251_v21 = vsel %vm7541_vm6, %v2250_v51, %v2246_v10  ;;  %v2257_v31 = vadd.f32 %v5903_v61, %v2256_v4  ;;  %v3081_v42 = vsel %vm10201_vm9, %v2192_v58, %v7512_v1  ;;  %v3076_v16 = vsel %vm10186_vm1, %v7434_v44, %v3074_v14  ;;  %vm2275_vm6 = vmor %vm2273_vm11, %vm2274_vm2  ;;  %v10393_v4 = vld [vmem:[#allocation52_spill] sm:$0xff] }
 0x1db   : > { %v2271_v0 = vmul.f32 %v5905_v36, %v2270_v9  ;;  %vm10183_vm4 = vcmask 1046534   ;;  %v3082_v54 = vsel %vm10200_vm12, %v2207_v26, %v3081_v42  ;;  %v2252_v43 = vmul.f32 %v2251_v21, %v7184_v13  ;;  %v10382_v26 = vld [vmem:[#allocation63_spill] sm:$0xff] }
 0x1dc   : > { %v2261_v8 = vsel %vm2260_vm3, %v5903_v61, %v2257_v31  ;;  %v2280_v40 = vor.u32 1.1754944e-38, %v2279_v50  ;;  %v3083_v35 = vsel %vm10188_vm13, %v2222_v52, %v3082_v54  ;;  %vm10182_vm5 = vcmask 1047559   ;;  %v10384_v61 = vld [vmem:[#allocation86_spill] sm:$0xff]  ;;  %v10396_v54 = vld [vmem:[#allocation88_spill] sm:$0xff] }
 0x1dd   : > { %v2266_v47 = vsel %vm7548_vm10, %v2265_v2, %v2261_v8  ;;  %v2272_v1 = vadd.f32 %v5905_v36, %v2271_v0  ;;  %v3084_v15 = vsel %vm10187_vm14, %v2237_v59, %v3083_v35  ;;  %v3078_v13 = vsel %vm10183_vm4, %v7464_v62, %v3076_v16  ;;  %v10394_v0 = vld [vmem:[#allocation87_spill] sm:$0xff] }
 0x1de   : > { %v2267_v33 = vmul.f32 %v2266_v47, %v7186_v19  ;;  %v3085_v44 = vsel %vm10186_vm1, %v2252_v43, %v3084_v15  ;;  %v1547_v48 = vmul.f32 %v10377_v60, %v6944_v20  ;;  %vm2278_vm7 = vcmp.eq.f32.partialorder %v2277_v27, 8.507059e+37  ;;  %v10399_v35 = vld [vmem:[#allocation39_spill] sm:$0xff] }
 0x1df   : > { %v2276_v5 = vsel %vm2275_vm6, %v5905_v36, %v2272_v1  ;;  %v1548_v57 = vmul.f32 %v10378_v56, %v6940_v55  ;;  %v1549_v19 = vmul.f32 %v10379_v53, %v6972_v29  ;;  %5906 = vtanh.f32 %v7072_v45  ;;  %v10400_v1 = vld [vmem:[#allocation40_spill] sm:$0xff] }
 0x1e0   : > { %v1332_v18 = vmul.f32 5.0, %v7109_v39  ;;  %v2281_v30 = vsel %vm2278_vm7, %v2280_v40, %v2276_v5  ;;  %v3086_v62 = vsel %vm10183_vm4, %v2267_v33, %v3085_v44  ;;  %v3080_v58 = vsel %vm10182_vm5, %v7497_v12, %v3078_v13  ;;  %v10386_v39 = vld [vmem:[#allocation62_spill] sm:$0xff]  ;;  %v10402_v13 = vld [vmem:[#allocation67_spill] sm:$0xff]  ;;  %v10403_v44 = vld [vmem:[#allocation53_spill] sm:$0xff] }
 0x1e1   : > { %v2282_v25 = vmul.f32 %v2281_v30, %v7193_v22  ;;  %v1550_v6 = vmul.f32 %v10381_v41, %v10380_v46  ;;  %v1551_v51 = vmul.f32 %v10383_v38, %v10382_v26  ;;  %v1211_v45 = vmul.f32 0.2, %v10384_v61  ;;  %v10408_v61 = vld [vmem:[#allocation56_spill] sm:$0xff] }
 0x1e2   : > { %5908 = vtanh.f32 %v10385_v49  ;;  %v1552_v52 = vmul.f32 %v10387_v3, %v10386_v39  ;;  %v1691_v24 = vrot.slane %v1547_v48, 4  ;;  %v1333_v2 = vmul.f32 5.0, %v10388_v37  ;;  %v10410_v49 = vld [vmem:[#allocation58_spill] sm:$0xff]  ;;  %v10412_v37 = vld [vmem:[#allocation59_spill] sm:$0xff] }
 0x1e3   : > { %v3087_v22 = vsel %vm10182_vm5, %v2282_v25, %v3086_v62  ;;  %v1697_v11 = vrot.slane %v1548_v57, 4  ;;  %v1703_v12 = vrot.slane %v1549_v19, 4  ;;  %v1334_v27 = vmul.f32 5.0, %v10389_v32  ;;  %v10406_v62 = vld [vmem:[#allocation54_spill] sm:$0xff] }
 0x1e4   : > { %v7616_v36 = vmul.f32 %v6141_v28, %v3080_v58  ;;  %v7619_v17 = vmul.f32 %v6142_v63, %v3087_v22  ;;  %v1692_v7 = vadd.f32 %v1691_v24, %v1547_v48  ;;  %v1515_v50 = vmul.f32 1.442695, %v1332_v18  ;;  %v10407_v58 = vld [vmem:[#allocation55_spill] sm:$0xff]  ;;  %v10413_v63 = vld [vmem:[#allocation74_spill] sm:$0xff] }
 0x1e5   : > { %v1553_v34 = vmul.f32 %v10393_v4, %v10392_v23  ;;  %v1709_v59 = vrot.slane %v1550_v6, 4  ;;  %v1715_v10 = vrot.slane %v1551_v51, 4  ;;  %v5907_v9 = vpop.eup %5906  ;;  %v1698_v21 = vadd.f32 %v1697_v11, %v1548_v57 }
 0x1e6   : > { %10390 = vst [vmem:[#allocation41_spill] sm:$0xff] %v7616_v36  ;;  %v3178_v14 = vpack.c.bf16 %v7619_v17, %v7616_v36  ;;  %v1704_v31 = vadd.f32 %v1703_v12, %v1549_v19  ;;  %v1721_v42 = vrot.slane %v1552_v52, 4  ;;  %v7627_v16 = vmul.f32 %v10394_v0, %v6944_v20 }
 0x1e7   : > { %10391 = vst [vmem:[#allocation33_spill] sm:$0xff] %v7619_v17  ;;  %v7631_v43 = vmul.f32 %v10396_v54, %v6940_v55  ;;  %5910 = vtanh.f32 %v1211_v45  ;;  %v1693_v8 = vrot.slane %v1692_v7, 2  ;;  %v7636_v47 = vmul.f32 5.0, %v10399_v35 }
 0x1e8   : > { %10395 = vst [vmem:[#allocation42_spill] sm:$0xff] %v7627_v16  ;;  %v7633_v40 = vpop.eup %5908  ;;  %v7639_v15 = vmul.f32 5.0, %v10400_v1  ;;  %v7641_v33 = vmul.f32 1.442695, %v1333_v2  ;;  %3318 = vmatmul.bf16.vlgmr.msrb.gmra.mxu0 %v3178_v14  ;;  %3347 = vmatmul.bf16.vlgmr.msrb.gmra.mxu1 %v3178_v14  ;;  %v1554_v60 = vmul.f32 %v10403_v44, %v10402_v13  ;;  %5912 = vpow2.f32 %v1515_v50 }
 0x1e9   : > { %10397 = vst [vmem:[#allocation43_spill] sm:$0xff] %v7631_v43  ;;  %3376 = vmatmul.bf16.vlgmr.msrb.gmra.mxu2 %v3178_v14  ;;  %v1710_v48 = vadd.f32 %v1709_v59, %v1550_v6  ;;  %v1716_v5 = vadd.f32 %v1715_v10, %v1551_v51  ;;  %v1727_v56 = vrot.slane %v1553_v34, 4  ;;  %v7645_v57 = vmul.f32 1.442695, %v1334_v27  ;;  %v10409_v6 = vld [vmem:[#allocation57_spill] sm:$0xff]  ;;  %v10415_v59 = vld [vmem:[#allocation75_spill] sm:$0xff] }
 0x1ea   : > { %10398 = vst [vmem:[#allocation44_spill] sm:$0xff] %v7633_v40  ;;  %v1699_v53 = vrot.slane %v1698_v21, 2  ;;  %v1705_v19 = vrot.slane %v1704_v31, 2  ;;  %v1722_v18 = vadd.f32 %v1721_v42, %v1552_v52  ;;  %v7647_v30 = vmul.f32 5.0, %v5907_v9 }
 0x1eb   : > { %10401 = vst [vmem:[#allocation20_spill] sm:$0xff] %v7639_v15  ;;  %v1557_v25 = vmul.f32 %v10406_v62, %v6972_v29  ;;  %v1558_v41 = vmul.f32 %v10407_v58, %v10380_v46  ;;  %v1694_v38 = vadd.f32 %v1693_v8, %v1692_v7  ;;  %v1559_v45 = vmul.f32 %v10408_v61, %v10382_v26 }
 0x1ec   : > { %10404 = vst [vmem:[#allocation25_spill] sm:$0xff] %v7645_v57  ;;  %v1560_v51 = vmul.f32 %v10409_v6, %v10386_v39  ;;  %v1561_v3 = vmul.f32 %v10410_v49, %v10392_v23  ;;  %v1733_v24 = vrot.slane %v1554_v60, 4  ;;  %v1562_v2 = vmul.f32 %v10412_v37, %v10402_v13 }
 0x1ed   : > { %10405 = vst [vmem:[#allocation45_spill] sm:$0xff] %v7647_v30  ;;  %v7659_v52 = vpop.eup %5910  ;;  %v1711_v22 = vrot.slane %v1710_v48, 2  ;;  %v1717_v11 = vrot.slane %v1716_v5, 2  ;;  %v1728_v12 = vadd.f32 %v1727_v56, %v1553_v34  ;;  %v1700_v32 = vadd.f32 %v1699_v53, %v1698_v21 }
 0x1ee   : > { %10411 = vst [vmem:[#allocation21_spill] sm:$0xff] %v7659_v52  ;;  %v1706_v27 = vadd.f32 %v1705_v19, %v1704_v31  ;;  %v1723_v28 = vrot.slane %v1722_v18, 2  ;;  %v1739_v7 = vrot.slane %v10413_v63, 4  ;;  %v7664_v50 = vpop.eup %5912  ;;  %v1695_v4 = vrot.slane %v1694_v38, 1 }
 0x1ef   : > { %10414 = vst [vmem:[#allocation27_spill] sm:$0xff] %v7664_v50  ;;  %v1745_v10 = vrot.slane %v10415_v59, 4  ;;  %v1751_v9 = vrot.slane %v1557_v25, 4  ;;  %v1757_v14 = vrot.slane %v1558_v41, 4  ;;  %v1734_v42 = vadd.f32 %v1733_v24, %v1554_v60 }
 0x1f0   : > { %v1740_v0 = vadd.f32 %v1739_v7, %v10413_v63  ;;  %v1763_v54 = vrot.slane %v1559_v45, 4  ;;  %v1769_v8 = vrot.slane %v1560_v51, 4  ;;  %v1775_v31 = vrot.slane %v1561_v3, 4 }
 0x1f1   : > { %v1746_v35 = vadd.f32 %v1745_v10, %v10415_v59  ;;  %v1752_v34 = vadd.f32 %v1751_v9, %v1557_v25  ;;  %v1758_v21 = vadd.f32 %v1757_v14, %v1558_v41  ;;  %v1712_v1 = vadd.f32 %v1711_v22, %v1710_v48 }
 0x1f2   : > { %v1729_v44 = vrot.slane %v1728_v12, 2  ;;  %v1764_v56 = vadd.f32 %v1763_v54, %v1559_v45  ;;  %v1770_v53 = vadd.f32 %v1769_v8, %v1560_v51  ;;  %v1701_v19 = vrot.slane %v1700_v32, 1 }
 0x1f3   : > { %v1718_v62 = vadd.f32 %v1717_v11, %v1716_v5  ;;  %v1724_v58 = vadd.f32 %v1723_v28, %v1722_v18  ;;  %v1776_v61 = vadd.f32 %v1775_v31, %v1561_v3  ;;  %v1735_v6 = vrot.slane %v1734_v42, 2 }
 0x1f4   : > { %v1741_v49 = vrot.slane %v1740_v0, 2  ;;  %v1747_v60 = vrot.slane %v1746_v35, 2  ;;  %v1781_v24 = vrot.slane %v1562_v2, 4  ;;  %v7669_v37 = vadd.f32 %v1695_v4, %v1694_v38 }
 0x1f5   : > { %v1707_v63 = vrot.slane %v1706_v27, 1  ;;  %v1753_v7 = vrot.slane %v1752_v34, 2  ;;  %v1759_v59 = vrot.slane %v1758_v21, 2  ;;  %v1765_v25 = vrot.slane %v1764_v56, 2 }
 0x1f6   : > { %v1771_v41 = vrot.slane %v1770_v53, 2  ;;  %v1777_v10 = vrot.slane %v1776_v61, 2  ;;  %v1782_v48 = vadd.f32 %v1781_v24, %v1562_v2  ;;  %v7671_v22 = vadd.f32 %v1701_v19, %v1700_v32 }
 0x1f7   : > { %v1713_v45 = vrot.slane %v1712_v1, 1  ;;  %v1719_v51 = vrot.slane %v1718_v62, 1  ;;  %v1730_v5 = vadd.f32 %v1729_v44, %v1728_v12  ;;  %v1736_v18 = vadd.f32 %v1735_v6, %v1734_v42 }
 0x1f8   : > { %v1742_v3 = vadd.f32 %v1741_v49, %v1740_v0  ;;  %v1748_v11 = vadd.f32 %v1747_v60, %v1746_v35  ;;  %v1783_v28 = vrot.slane %v1782_v48, 2  ;;  %v7673_v9 = vadd.f32 %v1707_v63, %v1706_v27 }
 0x1f9   : > { %v1725_v38 = vrot.slane %v1724_v58, 1  ;;  %v1754_v4 = vadd.f32 %v1753_v7, %v1752_v34  ;;  %v1760_v14 = vadd.f32 %v1759_v59, %v1758_v21  ;;  %v1766_v54 = vadd.f32 %v1765_v25, %v1764_v56 }
 0x1fa   : > { %v1772_v8 = vadd.f32 %v1771_v41, %v1770_v53  ;;  %v1778_v31 = vadd.f32 %v1777_v10, %v1776_v61  ;;  %v7676_v36 = vmax.f32 %v7669_v37, 1e-30  ;;  %v7678_v2 = vadd.f32 %v1713_v45, %v1712_v1 }
 0x1fb   : > { %v1731_v32 = vrot.slane %v1730_v5, 1  ;;  %v1784_v19 = vadd.f32 %v1783_v28, %v1782_v48  ;;  %v7681_v12 = vmax.f32 %v7671_v22, 1e-30  ;;  %v1737_v42 = vrot.slane %v1736_v18, 1 }
 0x1fc   : > { %v1743_v0 = vrot.slane %v1742_v3, 1  ;;  %v1749_v27 = vrot.slane %v1748_v11, 1  ;;  %5914 = vrcp.f32 %v7676_v36  ;;  %v7685_v35 = vadd.f32 %v1719_v51, %v1718_v62 }
 0x1fd   : > { %5916 = vpow2.f32 %v7641_v33  ;;  %v1755_v34 = vrot.slane %v1754_v4, 1  ;;  %v7688_v21 = vmax.f32 %v7673_v9, 1e-30  ;;  %v1761_v1 = vrot.slane %v1760_v14, 1 }
 0x1fe   : > { %v1767_v44 = vrot.slane %v1766_v54, 1  ;;  %v1773_v56 = vrot.slane %v1772_v8, 1  ;;  %v1779_v53 = vrot.slane %v1778_v31, 1  ;;  %v7690_v61 = vadd.f32 %v1725_v38, %v1724_v58 }
 0x1ff   : > { %v7692_v6 = vadd.f32 %v1731_v32, %v1730_v5  ;;  %v1785_v49 = vrot.slane %v1784_v19, 1  ;;  %5918 = vrcp.f32 %v7681_v12  ;;  %v7695_v60 = vadd.f32 %v1737_v42, %v1736_v18 }
 0x200   : > { %v7697_v33 = vadd.f32 %v1743_v0, %v1742_v3  ;;  %v7699_v62 = vadd.f32 %v1749_v27, %v1748_v11  ;;  %v7702_v24 = vmax.f32 %v7678_v2, 1e-30  ;;  %v7705_v63 = vmul.f32 1.442695, %v7636_v47 }
 0x201   : > { %v7707_v7 = vadd.f32 %v1755_v34, %v1754_v4  ;;  %v7710_v58 = vmax.f32 %v7685_v35, 1e-30  ;;  %5920 = vrcp.f32 %v7688_v21  ;;  %v7715_v25 = vadd.f32 %v1761_v1, %v1760_v14 }
 0x202   : > { %10416 = vst [vmem:[#allocation22_spill] sm:$0xff] %v7705_v63  ;;  %v7713_v59 = vpop.eup %5914  ;;  %v7717_v41 = vadd.f32 %v1767_v44, %v1766_v54  ;;  %v7719_v10 = vadd.f32 %v1773_v56, %v1772_v8  ;;  %v7721_v48 = vadd.f32 %v1779_v53, %v1778_v31  ;;  %v7725_v47 = vadd.f32 %v1785_v49, %v1784_v19 }
 0x203   : > { %v7723_v45 = vpop.eup %5916  ;;  %v7728_v51 = vmax.f32 %v7690_v61, 1e-30  ;;  %v7731_v5 = vmax.f32 %v7692_v6, 1e-30  ;;  %v2284_v18 = vmul.f32 %v7713_v59, %v7676_v36  ;;  %v7736_v3 = vmax.f32 %v7695_v60, 1e-30 }
 0x204   : > { %10417 = vst [vmem:[#allocation29_spill] sm:$0xff] %v7721_v48  ;;  %v7739_v11 = vmax.f32 %v7697_v33, 1e-30  ;;  %v7742_v28 = vmax.f32 %v7699_v62, 1e-30  ;;  %5922 = vrcp.f32 %v7702_v24  ;;  %vm2288_vm8 = vweird.f32 %v7676_v36 }
 0x205   : > { %10418 = vst [vmem:[#allocation24_spill] sm:$0xff] %v7723_v45  ;;  %v7745_v38 = vpop.eup %5918  ;;  %v7748_v4 = vmax.f32 %v7707_v7, 1e-30  ;;  %v2285_v14 = vsub.f32 1.0, %v2284_v18  ;;  %v2292_v54 = vand.u32 2147483647, %v7676_v36  ;;  %5924 = vrcp.f32 %v7710_v58 }
 0x206   : > { %10419 = vst [vmem:[#allocation31_spill] sm:$0xff] %v7725_v47  ;;  %v7754_v8 = vmax.f32 %v7715_v25, 1e-30  ;;  %v7757_v31 = vmax.f32 %v7717_v41, 1e-30  ;;  %v2299_v19 = vmul.f32 %v7745_v38, %v7681_v12  ;;  %v2294_v1 = vand.u32 2147483648, %v7676_v36 }
 0x207   : > { %v7760_v32 = vmax.f32 %v7719_v10, 1e-30  ;;  %v7764_v42 = vpop.eup %5920  ;;  %v7767_v0 = vmax.f32 %v7721_v48, 1e-30  ;;  %v7770_v27 = vmax.f32 %v7725_v47, 1e-30  ;;  %v2286_v34 = vmul.f32 %v7713_v59, %v2285_v14 }
 0x208   : > { %v2300_v44 = vsub.f32 1.0, %v2299_v19  ;;  %v2307_v56 = vand.u32 2147483647, %v7681_v12  ;;  %v2309_v53 = vand.u32 2147483648, %v7681_v12  ;;  %v2314_v49 = vmul.f32 %v7764_v42, %v7688_v21 }
 0x209   : > { %vm7778_vm10 = vcmp.eq.f32.partialorder %v2292_v54, 8.507059e+37  ;;  %vm2303_vm11 = vweird.f32 %v7681_v12  ;;  %v2322_v17 = vand.u32 2147483647, %v7688_v21  ;;  %v2324_v14 = vand.u32 2147483648, %v7688_v21 }
 0x20a   : > { %5926 = vrcp.f32 %v7728_v51  ;;  %v7786_v19 = vpop.eup %5922  ;;  %vm2289_vm15 = vweird.f32 %v7713_v59  ;;  %v2315_v45 = vsub.f32 1.0, %v2314_v49  ;;  %vm2318_vm0 = vweird.f32 %v7688_v21 }
 0x20b   : > { %v2337_v54 = vand.u32 2147483647, %v7702_v24  ;;  %v2339_v55 = vand.u32 2147483648, %v7702_v24  ;;  %v7792_v50 = vpop.eup %5924  ;;  %v2287_v20 = vadd.f32 %v7713_v59, %v2286_v34  ;;  %v2301_v43 = vmul.f32 %v7745_v38, %v2300_v44  ;;  %vm7812_vm3 = vmor %vm2288_vm8, %vm2289_vm15 }
 0x20c   : > { %v2329_v16 = vmul.f32 %v7786_v19, %v7702_v24  ;;  %5928 = vrcp.f32 %v7731_v5  ;;  %v2295_v30 = vor.u32 1.1754944e-38, %v2294_v1  ;;  %v2310_v13 = vor.u32 1.1754944e-38, %v2309_v53 }
 0x20d   : > { %v2316_v49 = vmul.f32 %v7764_v42, %v2315_v45  ;;  %v2344_v63 = vmul.f32 %v7792_v50, %v7710_v58  ;;  %vm7802_vm2 = vcmp.eq.f32.partialorder %v2307_v56, 8.507059e+37  ;;  %v2325_v23 = vor.u32 1.1754944e-38, %v2324_v14 }
 0x20e   : > { %v2330_v34 = vsub.f32 1.0, %v2329_v16  ;;  %v2352_v44 = vand.u32 2147483647, %v7710_v58  ;;  %v2354_v15 = vand.u32 2147483648, %v7710_v58  ;;  %vm2304_vm6 = vweird.f32 %v7745_v38 }
 0x20f   : > { %vm7817_vm7 = vcmp.eq.f32.partialorder %v2322_v17, 8.507059e+37  ;;  %vm2333_vm5 = vweird.f32 %v7702_v24  ;;  %v2345_v16 = vsub.f32 1.0, %v2344_v63  ;;  %vm2348_vm4 = vweird.f32 %v7710_v58  ;;  %vm7851_vm14 = vmor %vm2303_vm11, %vm2304_vm6 }
 0x210   : > { %v5927_v56 = vpop.eup %5926  ;;  %v2291_v36 = vsel %vm7812_vm3, %v7713_v59, %v2287_v20  ;;  %v2302_v53 = vadd.f32 %v7745_v38, %v2301_v43  ;;  %v2331_v14 = vmul.f32 %v7786_v19, %v2330_v34  ;;  %vm7828_vm8 = vcmp.eq.f32.partialorder %v2337_v54, 8.507059e+37 }
 0x211   : > { %v2340_v17 = vor.u32 1.1754944e-38, %v2339_v55  ;;  %v2317_v40 = vadd.f32 %v7764_v42, %v2316_v49  ;;  %vm2319_vm15 = vweird.f32 %v7764_v42  ;;  %v2346_v63 = vmul.f32 %v7792_v50, %v2345_v16 }
 0x212   : > { %v2359_v47 = vmul.f32 %v5927_v56, %v7728_v51  ;;  %v7836_v48 = vpop.eup %5928  ;;  %v2332_v20 = vadd.f32 %v7786_v19, %v2331_v14  ;;  %vm2334_vm3 = vweird.f32 %v7786_v19  ;;  %vm7840_vm1 = vcmp.eq.f32.partialorder %v2352_v44, 8.507059e+37 }
 0x213   : > { %v2355_v59 = vor.u32 1.1754944e-38, %v2354_v15  ;;  %v2367_v55 = vand.u32 2147483647, %v7728_v51  ;;  %v2296_v54 = vsel %vm7778_vm10, %v2295_v30, %v2291_v36  ;;  %vm2363_vm13 = vweird.f32 %v7728_v51  ;;  %vm7865_vm10 = vmor %vm2318_vm0, %vm2319_vm15 }
 0x214   : > { %v2360_v34 = vsub.f32 1.0, %v2359_v47  ;;  %v2374_v44 = vmul.f32 %v7836_v48, %v7731_v5  ;;  %v2306_v15 = vsel %vm7851_vm14, %v7745_v38, %v2302_v53  ;;  %v2347_v12 = vadd.f32 %v7792_v50, %v2346_v63  ;;  %vm7879_vm14 = vmor %vm2333_vm5, %vm2334_vm3 }
 0x215   : > { %vm2349_vm11 = vweird.f32 %v7792_v50  ;;  %5930 = vrcp.f32 %v7736_v3  ;;  %v2321_v47 = vsel %vm7865_vm10, %v7764_v42, %v2317_v40  ;;  %vm2364_vm0 = vweird.f32 %v5927_v56 }
 0x216   : > { %v2361_v38 = vmul.f32 %v5927_v56, %v2360_v34  ;;  %v2375_v18 = vsub.f32 1.0, %v2374_v44  ;;  %v7884_v1 = vmul.f32 %v2296_v54, %v7669_v37  ;;  %v2336_v16 = vsel %vm7879_vm14, %v7786_v19, %v2332_v20  ;;  %vm7898_vm5 = vmor %vm2348_vm4, %vm2349_vm11 }
 0x217   : > { %vm7889_vm6 = vcmp.eq.f32.partialorder %v2367_v55, 8.507059e+37  ;;  %v2369_v24 = vand.u32 2147483648, %v7728_v51  ;;  %v2311_v42 = vsel %vm7802_vm2, %v2310_v13, %v2306_v15  ;;  %v2382_v19 = vand.u32 2147483647, %v7731_v5  ;;  %vm7911_vm2 = vmor %vm2363_vm13, %vm2364_vm0 }
 0x218   : > { %v2362_v37 = vadd.f32 %v5927_v56, %v2361_v38  ;;  %v2376_v53 = vmul.f32 %v7836_v48, %v2375_v18  ;;  %v2326_v14 = vsel %vm7817_vm7, %v2325_v23, %v2321_v47  ;;  %v2351_v63 = vsel %vm7898_vm5, %v7792_v50, %v2347_v12 }
 0x219   : > { %v2384_v52 = vand.u32 2147483648, %v7731_v5  ;;  %5932 = vrcp.f32 %v7739_v11  ;;  %v2341_v58 = vsel %vm7828_vm8, %v2340_v17, %v2336_v16  ;;  %vm2379_vm4 = vweird.f32 %v7836_v48 }
 0x21a   : > { %v2366_v23 = vsel %vm7911_vm2, %v5927_v56, %v2362_v37  ;;  %v2377_v45 = vadd.f32 %v7836_v48, %v2376_v53  ;;  %v7926_v51 = vmul.f32 %v2311_v42, %v7671_v22  ;;  %v2370_v20 = vor.u32 1.1754944e-38, %v2369_v24 }
 0x21b   : > { %v7923_v50 = vpop.eup %5930  ;;  %vm2378_vm13 = vweird.f32 %v7731_v5  ;;  %5934 = vrcp.f32 %v7742_v28  ;;  %v2356_v57 = vsel %vm7840_vm1, %v2355_v59, %v2351_v63  ;;  %vm7932_vm7 = vcmp.eq.f32.partialorder %v2382_v19, 8.507059e+37 }
 0x21c   : > { %v2389_v56 = vmul.f32 %v7923_v50, %v7736_v3  ;;  %v2399_v55 = vand.u32 2147483648, %v7736_v3  ;;  %v7940_v22 = vmul.f32 %v2326_v14, %v7673_v9  ;;  %v7943_v54 = vmul.f32 %v2341_v58, %v7678_v2  ;;  %vm7947_vm8 = vmor %vm2378_vm13, %vm2379_vm4 }
 0x21d   : > { %v2371_v5 = vsel %vm7889_vm6, %v2370_v20, %v2366_v23  ;;  %v2385_v59 = vor.u32 1.1754944e-38, %v2384_v52  ;;  %v2381_v49 = vsel %vm7947_vm8, %v7836_v48, %v2377_v45  ;;  %v2397_v44 = vand.u32 2147483647, %v7736_v3 }
 0x21e   : > { %v2390_v34 = vsub.f32 1.0, %v2389_v56  ;;  %5936 = vrcp.f32 %v7748_v4  ;;  %v7959_v2 = vmul.f32 %v2356_v57, %v7685_v35  ;;  %vm2393_vm1 = vweird.f32 %v7736_v3 }
 0x21f   : > { %v7956_v9 = vpop.eup %5932  ;;  %v2412_v15 = vand.u32 2147483647, %v7739_v11  ;;  %v2414_v30 = vand.u32 2147483648, %v7739_v11  ;;  %v7965_v12 = vmul.f32 %v2371_v5, %v7690_v61  ;;  %v2400_v47 = vor.u32 1.1754944e-38, %v2399_v55 }
 0x220   : > { %v2391_v48 = vmul.f32 %v7923_v50, %v2390_v34  ;;  %v2404_v21 = vmul.f32 %v7956_v9, %v7739_v11  ;;  %v2386_v35 = vsel %vm7932_vm7, %v2385_v59, %v2381_v49  ;;  %vm2394_vm15 = vweird.f32 %v7923_v50  ;;  %v10487_v34 = vld [vmem:[#allocation20_spill] sm:$0xff] }
 0x221   : > { %v5935_v38 = vpop.eup %5934  ;;  %v2427_v18 = vand.u32 2147483647, %v7742_v28  ;;  %5938 = vrcp.f32 %v7754_v8  ;;  %vm7975_vm3 = vcmp.eq.f32.partialorder %v2397_v44, 8.507059e+37  ;;  %vm2408_vm10 = vweird.f32 %v7739_v11  ;;  %vm8010_vm13 = vmor %vm2393_vm1, %vm2394_vm15 }
 0x222   : > { %v2405_v61 = vsub.f32 1.0, %v2404_v21  ;;  %v2419_v40 = vmul.f32 %v5935_v38, %v7742_v28  ;;  %v2429_v24 = vand.u32 2147483648, %v7742_v28  ;;  %v2442_v42 = vand.u32 2147483647, %v7748_v4 }
 0x223   : > { %v2415_v36 = vor.u32 1.1754944e-38, %v2414_v30  ;;  %vm2423_vm11 = vweird.f32 %v7742_v28  ;;  %v2444_v37 = vand.u32 2147483648, %v7748_v4  ;;  %5940 = vrcp.f32 %v7757_v31 }
 0x224   : > { %v5937_v53 = vpop.eup %5936  ;;  %v7987_v19 = vmul.f32 %v2386_v35, %v7692_v6  ;;  %v2392_v14 = vadd.f32 %v7923_v50, %v2391_v48  ;;  %v2406_v63 = vmul.f32 %v7956_v9, %v2405_v61  ;;  %v2420_v13 = vsub.f32 1.0, %v2419_v40 }
 0x225   : > { %vm2409_vm14 = vweird.f32 %v7956_v9  ;;  %vm7992_vm0 = vcmp.eq.f32.partialorder %v2427_v18, 8.507059e+37  ;;  %v2434_v58 = vmul.f32 %v5937_v53, %v7748_v4  ;;  %vm2438_vm6 = vweird.f32 %v7748_v4 }
 0x226   : > { %vm7998_vm5 = vcmp.eq.f32.partialorder %v2412_v15, 8.507059e+37  ;;  %v2421_v6 = vmul.f32 %v5935_v38, %v2420_v13  ;;  %vm2424_vm2 = vweird.f32 %v5935_v38  ;;  %v2430_v45 = vor.u32 1.1754944e-38, %v2429_v24 }
 0x227   : > { %vm8002_vm4 = vcmp.eq.f32.partialorder %v2442_v42, 8.507059e+37  ;;  %v5939_v57 = vpop.eup %5938  ;;  %v2435_v56 = vsub.f32 1.0, %v2434_v58  ;;  %v2445_v55 = vor.u32 1.1754944e-38, %v2444_v37  ;;  %vm2453_vm7 = vweird.f32 %v7754_v8  ;;  %vm8023_vm8 = vmor %vm2423_vm11, %vm2424_vm2 }
 0x228   : > { %5942 = vrcp.f32 %v7760_v32  ;;  %v2396_v5 = vsel %vm8010_vm13, %v7923_v50, %v2392_v14  ;;  %v2407_v43 = vadd.f32 %v7956_v9, %v2406_v63  ;;  %v2422_v59 = vadd.f32 %v5935_v38, %v2421_v6  ;;  %vm8039_vm11 = vmor %vm2408_vm10, %vm2409_vm14 }
 0x229   : > { %v2449_v49 = vmul.f32 %v5939_v57, %v7754_v8  ;;  %v5941_v3 = vpop.eup %5940  ;;  %v2436_v44 = vmul.f32 %v5937_v53, %v2435_v56  ;;  %vm2439_vm1 = vweird.f32 %v5937_v53  ;;  %v2457_v15 = vand.u32 2147483647, %v7754_v8 }
 0x22a   : > { %v2459_v30 = vand.u32 2147483648, %v7754_v8  ;;  %v2426_v50 = vsel %vm8023_vm8, %v5935_v38, %v2422_v59  ;;  %v2464_v21 = vmul.f32 %v5941_v3, %v7757_v31  ;;  %vm2468_vm15 = vweird.f32 %v7757_v31 }
 0x22b   : > { %v2450_v48 = vsub.f32 1.0, %v2449_v49  ;;  %v2401_v28 = vsel %vm7975_vm3, %v2400_v47, %v2396_v5  ;;  %v2437_v18 = vadd.f32 %v5937_v53, %v2436_v44  ;;  %v2472_v61 = vand.u32 2147483647, %v7757_v31  ;;  %vm2440_vm3 = vmor %vm2438_vm6, %vm2439_vm1 }
 0x22c   : > { %v2474_v38 = vand.u32 2147483648, %v7757_v31  ;;  %v2411_v40 = vsel %vm8039_vm11, %v7956_v9, %v2407_v43  ;;  %vm2454_vm2 = vweird.f32 %v5939_v57  ;;  %v2465_v16 = vsub.f32 1.0, %v2464_v21 }
 0x22d   : > { %v2451_v47 = vmul.f32 %v5939_v57, %v2450_v48  ;;  %v2431_v24 = vsel %vm7992_vm0, %v2430_v45, %v2426_v50  ;;  %v2441_v42 = vsel %vm2440_vm3, %v5937_v53, %v2437_v18  ;;  %vm2469_vm10 = vweird.f32 %v5941_v3  ;;  %vm2455_vm14 = vmor %vm2453_vm7, %vm2454_vm2 }
 0x22e   : > { %v5943_v11 = vpop.eup %5942  ;;  %5944 = vrcp.f32 %v7767_v0  ;;  %v2446_v37 = vsel %vm8002_vm4, %v2445_v55, %v2441_v42  ;;  %v2466_v63 = vmul.f32 %v5941_v3, %v2465_v16  ;;  %v2416_v4 = vsel %vm7998_vm5, %v2415_v36, %v2411_v40  ;;  %vm8069_vm5 = vmor %vm2468_vm15, %vm2469_vm10 }
 0x22f   : > { %v2452_v14 = vadd.f32 %v5939_v57, %v2451_v47  ;;  %v2479_v9 = vmul.f32 %v5943_v11, %v7760_v32  ;;  %vm2458_vm6 = vcmp.eq.f32.partialorder %v2457_v15, 8.507059e+37  ;;  %v2460_v13 = vor.u32 1.1754944e-38, %v2459_v30 }
 0x230   : > { %vm8060_vm0 = vcmp.eq.f32.partialorder %v2472_v61, 8.507059e+37  ;;  %v2467_v58 = vadd.f32 %v5941_v3, %v2466_v63  ;;  %v2475_v6 = vor.u32 1.1754944e-38, %v2474_v38  ;;  %v2432_v20 = vmul.f32 %v2431_v24, %v7699_v62 }
 0x231   : > { %v2456_v52 = vsel %vm2455_vm14, %v5939_v57, %v2452_v14  ;;  %v2480_v45 = vsub.f32 1.0, %v2479_v9  ;;  %v2447_v17 = vmul.f32 %v2446_v37, %v7707_v7  ;;  %vm2483_vm4 = vweird.f32 %v7760_v32  ;;  %v10476_v9 = vld [vmem:[#allocation64_spill] sm:$0xff] }
 0x232   : > { %5946 = vrcp.f32 %v7770_v27  ;;  %v2461_v36 = vsel %vm2458_vm6, %v2460_v13, %v2456_v52  ;;  %v2471_v23 = vsel %vm8069_vm5, %v5941_v3, %v2467_v58  ;;  %vm2484_vm13 = vweird.f32 %v5943_v11  ;;  %v10479_v58 = vld [vmem:[#allocation29_spill] sm:$0xff] }
 0x233   : > { %v2481_v57 = vmul.f32 %v5943_v11, %v2480_v45  ;;  %v2417_v7 = vmul.f32 %v2416_v4, %v7697_v33  ;;  %v2487_v56 = vand.u32 2147483647, %v7760_v32  ;;  %v2489_v31 = vand.u32 2147483648, %v7760_v32  ;;  %vm8091_vm7 = vmor %vm2483_vm4, %vm2484_vm13 }
 0x234   : > { %v5945_v62 = vpop.eup %5944  ;;  %v3088_v55 = vsel %vm10201_vm9, %v7926_v51, %v7884_v1  ;;  %v2502_v59 = vand.u32 2147483647, %v7767_v0  ;;  %v2504_v49 = vand.u32 2147483648, %v7767_v0  ;;  %v2462_v3 = vmul.f32 %v2461_v36, %v7715_v25 }
 0x235   : > { %v2482_v5 = vadd.f32 %v5943_v11, %v2481_v57  ;;  %v2494_v43 = vmul.f32 %v5945_v62, %v7767_v0  ;;  %v2476_v33 = vsel %vm8060_vm0, %v2475_v6, %v2471_v23  ;;  %v3089_v1 = vsel %vm10200_vm12, %v7940_v22, %v3088_v55 }
 0x236   : > { %v3095_v51 = vsel %vm10201_vm9, %v2432_v20, %v2417_v7  ;;  %vm10468_vm8 = vcmask 1043459   ;;  %v2402_v32 = vmul.f32 %v2401_v28, %v7695_v60  ;;  %vm2488_vm1 = vcmp.eq.f32.partialorder %v2487_v56, 8.507059e+37  ;;  %v10480_v20 = vld [vmem:[#allocation76_spill] sm:$0xff] }
 0x237   : > { %v2486_v44 = vsel %vm8091_vm7, %v5943_v11, %v2482_v5  ;;  %v2495_v15 = vsub.f32 1.0, %v2494_v43  ;;  %v3090_v25 = vsel %vm10468_vm8, %v7943_v54, %v3089_v1  ;;  %v3096_v30 = vsel %vm10200_vm12, %v2447_v17, %v3095_v51  ;;  %vm10470_vm3 = vmmov %vm10468_vm8  ;;  %v10473_v11 = vld [vmem:[#allocation60_spill] sm:$0xff]  ;;  %v10481_v17 = vld [vmem:[#allocation82_spill] sm:$0xff] }
 0x238   : > { %v5947_v50 = vpop.eup %5946  ;;  %v2490_v48 = vor.u32 1.1754944e-38, %v2489_v31  ;;  %vm10469_vm15 = vcmask 1044484   ;;  %vm2499_vm11 = vweird.f32 %v5945_v62  ;;  %v3097_v18 = vsel %vm10470_vm3, %v2462_v3, %v3096_v30  ;;  %v10484_v31 = vld [vmem:[#allocation31_spill] sm:$0xff] }
 0x239   : > { %v3091_v21 = vsel %vm10469_vm15, %v7959_v2, %v3090_v25  ;;  %v2496_v22 = vmul.f32 %v5945_v62, %v2495_v15  ;;  %v2509_v35 = vmul.f32 %v5947_v50, %v7770_v27  ;;  %v2477_v61 = vmul.f32 %v2476_v33, %v7717_v41  ;;  %vm10472_vm0 = vmmov %vm10469_vm15  ;;  %v10486_v33 = vld [vmem:[#allocation25_spill] sm:$0xff]  ;;  %v10488_v51 = vld [vmem:[#allocation71_spill] sm:$0xff] }
 0x23a   : > { %v2491_v38 = vsel %vm2488_vm1, %v2490_v48, %v2486_v44  ;;  %vm2498_vm2 = vweird.f32 %v7767_v0  ;;  %vm2503_vm10 = vcmp.eq.f32.partialorder %v2502_v59, 8.507059e+37  ;;  %v2505_v40 = vor.u32 1.1754944e-38, %v2504_v49  ;;  %v10485_v49 = vld [vmem:[#allocation44_spill] sm:$0xff]  ;;  %v10489_v44 = vld [vmem:[#allocation69_spill] sm:$0xff]  ;;  %v10494_v48 = vld [vmem:[#allocation67_spill] sm:$0xff] }
 0x23b   : > { %v2497_v54 = vadd.f32 %v5945_v62, %v2496_v22  ;;  %v2510_v60 = vsub.f32 1.0, %v2509_v35  ;;  %vm10471_vm14 = vcmask 1045509   ;;  %vm2500_vm6 = vmor %vm2498_vm2, %vm2499_vm11  ;;  %v2517_v2 = vand.u32 2147483647, %v7770_v27  ;;  %v10490_v25 = vld [vmem:[#allocation21_spill] sm:$0xff] }
 0x23c   : > { %v3092_v28 = vsel %vm10471_vm14, %v7965_v12, %v3091_v21  ;;  %v2519_v47 = vand.u32 2147483648, %v7770_v27  ;;  %v3098_v16 = vsel %vm10472_vm0, %v2477_v61, %v3097_v18  ;;  %v1565_v41 = vmul.f32 %v10473_v11, %v6972_v29  ;;  %v10475_v12 = vld [vmem:[#allocation61_spill] sm:$0xff]  ;;  %vm10477_vm7 = vmmov %vm10471_vm14  ;;  %v10495_v21 = vld [vmem:[#allocation70_spill] sm:$0xff] }
 0x23d   : > { %v2492_v24 = vmul.f32 %v2491_v38, %v7719_v10  ;;  %v2501_v0 = vsel %vm2500_vm6, %v5945_v62, %v2497_v54  ;;  %v2511_v42 = vmul.f32 %v5947_v50, %v2510_v60  ;;  %vm2514_vm5 = vweird.f32 %v5947_v50  ;;  %v10478_v10 = vld [vmem:[#allocation68_spill] sm:$0xff]  ;;  %v6143_v35 = vld [vmem:[%s6665_s22 + $0x10] sm:$0xff]  ;;  %v6144_v61 = vld [vmem:[%s6665_s22 + $0x18] sm:$0xff] }
 0x23e   : > { %v2506_v37 = vsel %vm2503_vm10, %v2505_v40, %v2501_v0  ;;  %vm10474_vm4 = vcmask 1046534   ;;  %v1566_v63 = vmul.f32 %v10475_v12, %v10380_v46  ;;  %v1567_v4 = vmul.f32 %v10476_v9, %v10382_v26  ;;  %v10499_v0 = vld [vmem:[#allocation77_spill] sm:$0xff]  ;;  %v10502_v9 = vld [vmem:[#allocation80_spill] sm:$0xff] }
 0x23f   : > { %v3093_v14 = vsel %vm10474_vm4, %v7987_v19, %v3092_v28  ;;  %v2512_v13 = vadd.f32 %v5947_v50, %v2511_v42  ;;  %vm2513_vm13 = vweird.f32 %v7770_v27  ;;  %v3099_v53 = vsel %vm10477_vm7, %v2492_v24, %v3098_v16  ;;  %vm10483_vm11 = vmmov %vm10474_vm4  ;;  %v10498_v16 = vld [vmem:[#allocation45_spill] sm:$0xff] }
 0x240   : > { %v1568_v52 = vmul.f32 %v10478_v10, %v10386_v39  ;;  %v2507_v6 = vmul.f32 %v2506_v37, %v10479_v58  ;;  %vm2515_vm8 = vmor %vm2513_vm13, %vm2514_vm5  ;;  %v2520_v45 = vor.u32 1.1754944e-38, %v2519_v47  ;;  %v1787_v19 = vrot.slane %v10480_v20, 4 }
 0x241   : > { %v1793_v8 = vrot.slane %v10481_v17, 4  ;;  %v2516_v36 = vsel %vm2515_vm8, %v5947_v50, %v2512_v13  ;;  %vm2518_vm1 = vcmp.eq.f32.partialorder %v2517_v2, 8.507059e+37  ;;  %vm10482_vm15 = vcmask 1047559   ;;  %v10492_v50 = vld [vmem:[#allocation22_spill] sm:$0xff] }
 0x242   : > { %v3094_v23 = vsel %vm10482_vm15, %v2402_v32, %v3093_v14  ;;  %v1799_v57 = vrot.slane %v1565_v41, 4  ;;  %v2521_v62 = vsel %vm2518_vm1, %v2520_v45, %v2516_v36  ;;  %v3100_v27 = vsel %vm10483_vm11, %v2507_v6, %v3099_v53  ;;  %vm10493_vm3 = vmmov %vm10482_vm15  ;;  %v10500_v14 = vld [vmem:[#allocation78_spill] sm:$0xff]  ;;  %v10504_v53 = vld [vmem:[#allocation81_spill] sm:$0xff] }
 0x243   : > { %v1805_v7 = vrot.slane %v1566_v63, 4  ;;  %v1811_v56 = vrot.slane %v1567_v4, 4  ;;  %v2522_v55 = vmul.f32 %v2521_v62, %v10484_v31  ;;  %v1788_v5 = vadd.f32 %v1787_v19, %v10480_v20  ;;  %v10507_v62 = vld [vmem:[#allocation85_spill] sm:$0xff] }
 0x244   : > { %v1794_v43 = vadd.f32 %v1793_v8, %v10481_v17  ;;  %v1817_v59 = vrot.slane %v1568_v52, 4  ;;  %v8137_v3 = vmul.f32 5.0, %v10485_v49  ;;  %5948 = vpow2.f32 %v10486_v33 }
 0x245   : > { %v1523_v1 = vmul.f32 1.442695, %v10487_v34  ;;  %v1569_v15 = vmul.f32 %v10489_v44, %v10488_v51  ;;  %v8144_v30 = vmul.f32 5.0, %v10490_v25  ;;  %5950 = vpow2.f32 %v10492_v50 }
 0x246   : > { %v3101_v32 = vsel %vm10493_vm3, %v2522_v55, %v3100_v27  ;;  %v1570_v22 = vmul.f32 %v10495_v21, %v10494_v48  ;;  %v8151_v18 = vmul.f32 %v6143_v35, %v3094_v23  ;;  %v1800_v54 = vadd.f32 %v1799_v57, %v1565_v41  ;;  %v10501_v41 = vld [vmem:[#allocation79_spill] sm:$0xff] }
 0x247   : > { %10491 = vst [vmem:[#allocation34_spill] sm:$0xff] %v8144_v30  ;;  %v8154_v38 = vmul.f32 %v6144_v61, %v3101_v32  ;;  %v1806_v40 = vadd.f32 %v1805_v7, %v1566_v63  ;;  %v1789_v60 = vrot.slane %v1788_v5, 2  ;;  %v1795_v28 = vrot.slane %v1794_v43, 2  ;;  %v10506_v23 = vld [vmem:[#allocation83_spill] sm:$0xff] }
 0x248   : > { %10496 = vst [vmem:[#allocation26_spill] sm:$0xff] %v8151_v18  ;;  %v1812_v2 = vadd.f32 %v1811_v56, %v1567_v4  ;;  %v1818_v47 = vadd.f32 %v1817_v59, %v1568_v52  ;;  %v8157_v11 = vmul.f32 1.442695, %v10498_v16  ;;  %v1573_v42 = vmul.f32 %v10499_v0, %v6972_v29 }
 0x249   : > { %10497 = vst [vmem:[#allocation28_spill] sm:$0xff] %v8154_v38  ;;  %v3179_v24 = vpack.c.bf16 %v8154_v38, %v8151_v18  ;;  %v1823_v37 = vrot.slane %v1569_v15, 4  ;;  %5952 = vpow2.f32 %v1523_v1  ;;  %v1574_v12 = vmul.f32 %v10500_v14, %v10380_v46 }
 0x24a   : > { %v1575_v63 = vmul.f32 %v10501_v41, %v10382_v26  ;;  %v1576_v4 = vmul.f32 %v10502_v9, %v10386_v39  ;;  %v8169_v13 = vpop.eup %5948  ;;  %v1577_v10 = vmul.f32 %v10504_v53, %v10488_v51  ;;  %v1801_v52 = vrot.slane %v1800_v54, 2 }
 0x24b   : > { %10503 = vst [vmem:[#allocation30_spill] sm:$0xff] %v8169_v13  ;;  %3323 = vmatmul.bf16.gmra.mxu0 %v3179_v24  ;;  %3352 = vmatmul.bf16.gmra.mxu1 %v3179_v24  ;;  %v1807_v58 = vrot.slane %v1806_v40, 2  ;;  %v1829_v6 = vrot.slane %v1570_v22, 4  ;;  %v8173_v45 = vpop.eup %5950  ;;  %v1790_v20 = vadd.f32 %v1789_v60, %v1788_v5  ;;  %v1796_v19 = vadd.f32 %v1795_v28, %v1794_v43  ;;  %v10509_v43 = vld [vmem:[#allocation84_spill] sm:$0xff] }
 0x24c   : > { %10505 = vst [vmem:[#allocation32_spill] sm:$0xff] %v8173_v45  ;;  %3381 = vmatmul.bf16.gmra.mxu2 %v3179_v24  ;;  %v1813_v17 = vrot.slane %v1812_v2, 2  ;;  %v1819_v8 = vrot.slane %v1818_v47, 2  ;;  %v1824_v36 = vadd.f32 %v1823_v37, %v1569_v15  ;;  %v1835_v57 = vrot.slane %v10506_v23, 4 }
 0x24d   : > { %v1841_v27 = vrot.slane %v10507_v62, 4  ;;  %v1847_v7 = vrot.slane %v1573_v42, 4  ;;  %v1830_v56 = vadd.f32 %v1829_v6, %v1570_v22  ;;  %v1853_v31 = vrot.slane %v1574_v12, 4 }
 0x24e   : > { %v1859_v55 = vrot.slane %v1575_v63, 4  ;;  %v1865_v59 = vrot.slane %v1576_v4, 4  ;;  %v1802_v49 = vadd.f32 %v1801_v52, %v1800_v54  ;;  %v1836_v33 = vadd.f32 %v1835_v57, %v10506_v23 }
 0x24f   : > { %v1842_v34 = vadd.f32 %v1841_v27, %v10507_v62  ;;  %v1848_v1 = vadd.f32 %v1847_v7, %v1573_v42  ;;  %v8179_v5 = vpop.eup %5952  ;;  %v1578_v44 = vmul.f32 %v10509_v43, %v10494_v48  ;;  %v1808_v15 = vadd.f32 %v1807_v58, %v1806_v40 }
 0x250   : > { %10508 = vst [vmem:[#allocation35_spill] sm:$0xff] %v8179_v5  ;;  %v1854_v25 = vadd.f32 %v1853_v31, %v1574_v12  ;;  %v1860_v50 = vadd.f32 %v1859_v55, %v1575_v63  ;;  %v1791_v32 = vrot.slane %v1790_v20, 1  ;;  %v1814_v21 = vadd.f32 %v1813_v17, %v1812_v2 }
 0x251   : > { %v1825_v22 = vrot.slane %v1824_v36, 2  ;;  %v1866_v35 = vadd.f32 %v1865_v59, %v1576_v4  ;;  %v1831_v61 = vrot.slane %v1830_v56, 2  ;;  %v1837_v60 = vrot.slane %v1836_v33, 2 }
 0x252   : > { %v1843_v54 = vrot.slane %v1842_v34, 2  ;;  %v1871_v28 = vrot.slane %v1577_v10, 4  ;;  %v1797_v16 = vrot.slane %v1796_v19, 1  ;;  %v1803_v24 = vrot.slane %v1802_v49, 1 }
 0x253   : > { %v1820_v0 = vadd.f32 %v1819_v8, %v1818_v47  ;;  %v1849_v42 = vrot.slane %v1848_v1, 2  ;;  %v1809_v37 = vrot.slane %v1808_v15, 1  ;;  %v1855_v14 = vrot.slane %v1854_v25, 2 }
 0x254   : > { %v1861_v41 = vrot.slane %v1860_v50, 2  ;;  %v1872_v9 = vadd.f32 %v1871_v28, %v1577_v10  ;;  %v8183_v53 = vadd.f32 %v1791_v32, %v1790_v20  ;;  %v1815_v40 = vrot.slane %v1814_v21, 1 }
 0x255   : > { %v1826_v12 = vadd.f32 %v1825_v22, %v1824_v36  ;;  %v1867_v63 = vrot.slane %v1866_v35, 2  ;;  %v1832_v2 = vadd.f32 %v1831_v61, %v1830_v56  ;;  %v1838_v52 = vadd.f32 %v1837_v60, %v1836_v33 }
 0x256   : > { %v1844_v4 = vadd.f32 %v1843_v54, %v1842_v34  ;;  %v1873_v58 = vrot.slane %v1872_v9, 2  ;;  %v8185_v6 = vadd.f32 %v1797_v16, %v1796_v19  ;;  %v1821_v17 = vrot.slane %v1820_v0, 1 }
 0x257   : > { %v1850_v23 = vadd.f32 %v1849_v42, %v1848_v1  ;;  %v1877_v57 = vrot.slane %v1578_v44, 4  ;;  %v8187_v47 = vadd.f32 %v1803_v24, %v1802_v49  ;;  %v8189_v8 = vadd.f32 %v1809_v37, %v1808_v15 }
 0x258   : > { %v1856_v62 = vadd.f32 %v1855_v14, %v1854_v25  ;;  %v1862_v10 = vadd.f32 %v1861_v41, %v1860_v50  ;;  %v1827_v20 = vrot.slane %v1826_v12, 1  ;;  %v1868_v27 = vadd.f32 %v1867_v63, %v1866_v35 }
 0x259   : > { %v1878_v7 = vadd.f32 %v1877_v57, %v1578_v44  ;;  %v8192_v36 = vmax.f32 %v8183_v53, 1e-30  ;;  %v1833_v56 = vrot.slane %v1832_v2, 1  ;;  %v1839_v31 = vrot.slane %v1838_v52, 1 }
 0x25a   : > { %v1845_v55 = vrot.slane %v1844_v4, 1  ;;  %v1874_v19 = vadd.f32 %v1873_v58, %v1872_v9  ;;  %v1851_v59 = vrot.slane %v1850_v23, 1  ;;  %v8195_v34 = vmax.f32 %v8185_v6, 1e-30 }
 0x25b   : > { %v1879_v33 = vrot.slane %v1878_v7, 2  ;;  %5954 = vrcp.f32 %v8192_v36  ;;  %v1857_v49 = vrot.slane %v1856_v62, 1  ;;  %v1863_v1 = vrot.slane %v1862_v10, 1 }
 0x25c   : > { %5956 = vpow2.f32 %v8157_v11  ;;  %v8200_v43 = vmax.f32 %v8187_v47, 1e-30  ;;  %v8202_v44 = vadd.f32 %v1815_v40, %v1814_v21  ;;  %v8204_v15 = vadd.f32 %v1821_v17, %v1820_v0 }
 0x25d   : > { %v8206_v25 = vadd.f32 %v1827_v20, %v1826_v12  ;;  %v1869_v50 = vrot.slane %v1868_v27, 1  ;;  %v8208_v32 = vadd.f32 %v1833_v56, %v1832_v2  ;;  %v8210_v22 = vadd.f32 %v1839_v31, %v1838_v52 }
 0x25e   : > { %v1875_v35 = vrot.slane %v1874_v19, 1  ;;  %v1880_v61 = vadd.f32 %v1879_v33, %v1878_v7  ;;  %v8212_v60 = vadd.f32 %v1845_v55, %v1844_v4  ;;  %v8214_v11 = vadd.f32 %v1851_v59, %v1850_v23 }
 0x25f   : > { %v8217_v54 = vmax.f32 %v8189_v8, 1e-30  ;;  %5958 = vrcp.f32 %v8195_v34  ;;  %v8221_v21 = vmul.f32 1.442695, %v8137_v3  ;;  %v8223_v28 = vadd.f32 %v1857_v49, %v1856_v62 }
 0x260   : > { %v8225_v16 = vadd.f32 %v1863_v1, %v1862_v10  ;;  %5960 = vrcp.f32 %v8200_v43  ;;  %v8230_v0 = vadd.f32 %v1869_v50, %v1868_v27  ;;  %v8233_v42 = vmax.f32 %v8202_v44, 1e-30 }
 0x261   : > { %v8228_v24 = vpop.eup %5954  ;;  %v8236_v37 = vmax.f32 %v8204_v15, 1e-30  ;;  %v8239_v14 = vmax.f32 %v8206_v25, 1e-30  ;;  %v8243_v41 = vadd.f32 %v1875_v35, %v1874_v19  ;;  %v1881_v9 = vrot.slane %v1880_v61, 1 }
 0x262   : > { %v8241_v3 = vpop.eup %5956  ;;  %v8246_v40 = vmax.f32 %v8208_v32, 1e-30  ;;  %v2524_v12 = vmul.f32 %v8228_v24, %v8192_v36  ;;  %v8251_v63 = vmax.f32 %v8210_v22, 1e-30  ;;  %v8254_v2 = vmax.f32 %v8212_v60, 1e-30 }
 0x263   : > { %10510 = vst [vmem:[#allocation36_spill] sm:$0xff] %v8241_v3  ;;  %v8257_v52 = vmax.f32 %v8214_v11, 1e-30  ;;  %5962 = vrcp.f32 %v8217_v54  ;;  %v8261_v4 = vmax.f32 %v8223_v28, 1e-30  ;;  %v2534_v23 = vand.u32 2147483648, %v8192_v36 }
 0x264   : > { %v8264_v58 = vmax.f32 %v8225_v16, 1e-30  ;;  %v2525_v17 = vsub.f32 1.0, %v2524_v12  ;;  %v8270_v62 = vmax.f32 %v8230_v0, 1e-30  ;;  %v2549_v20 = vand.u32 2147483648, %v8195_v34 }
 0x265   : > { %v8267_v57 = vpop.eup %5958  ;;  %v2532_v10 = vand.u32 2147483647, %v8192_v36  ;;  %5964 = vrcp.f32 %v8233_v42  ;;  %v8277_v7 = vadd.f32 %v1881_v9, %v1880_v61  ;;  %v8280_v56 = vmax.f32 %v8243_v41, 1e-30 }
 0x266   : > { %v8275_v27 = vpop.eup %5960  ;;  %vm2528_vm2 = vweird.f32 %v8192_v36  ;;  %v2539_v31 = vmul.f32 %v8267_v57, %v8195_v34  ;;  %v2526_v55 = vmul.f32 %v8228_v24, %v2525_v17  ;;  %v2547_v19 = vand.u32 2147483647, %v8195_v34 }
 0x267   : > { %v2554_v59 = vmul.f32 %v8275_v27, %v8200_v43  ;;  %v2564_v33 = vand.u32 2147483648, %v8200_v43  ;;  %v2535_v49 = vor.u32 1.1754944e-38, %v2534_v23  ;;  %vm2543_vm10 = vweird.f32 %v8195_v34 }
 0x268   : > { %v2540_v1 = vsub.f32 1.0, %v2539_v31  ;;  %5966 = vrcp.f32 %v8236_v37  ;;  %vm2529_vm14 = vweird.f32 %v8228_v24  ;;  %vm8295_vm6 = vcmp.eq.f32.partialorder %v2532_v10, 8.507059e+37 }
 0x269   : > { %v8292_v50 = vpop.eup %5962  ;;  %v2550_v61 = vor.u32 1.1754944e-38, %v2549_v20  ;;  %v2555_v9 = vsub.f32 1.0, %v2554_v59  ;;  %v2562_v12 = vand.u32 2147483647, %v8200_v43  ;;  %v8301_v17 = vmax.f32 %v8277_v7, 1e-30  ;;  %vm8331_vm8 = vmor %vm2528_vm2, %vm2529_vm14 }
 0x26a   : > { %v2541_v23 = vmul.f32 %v8267_v57, %v2540_v1  ;;  %vm2558_vm0 = vweird.f32 %v8200_v43  ;;  %v2569_v31 = vmul.f32 %v8292_v50, %v8217_v54  ;;  %v2579_v38 = vand.u32 2147483648, %v8217_v54 }
 0x26b   : > { %v8308_v10 = vpop.eup %5964  ;;  %v2527_v18 = vadd.f32 %v8228_v24, %v2526_v55  ;;  %vm8311_vm5 = vcmp.eq.f32.partialorder %v2547_v19, 8.507059e+37  ;;  %v2565_v59 = vor.u32 1.1754944e-38, %v2564_v33  ;;  %vm2573_vm4 = vweird.f32 %v8217_v54 }
 0x26c   : > { %v2577_v1 = vand.u32 2147483647, %v8217_v54  ;;  %v2556_v3 = vmul.f32 %v8275_v27, %v2555_v9  ;;  %v2570_v5 = vsub.f32 1.0, %v2569_v31  ;;  %v2584_v45 = vmul.f32 %v8308_v10, %v8233_v42 }
 0x26d   : > { %v2592_v13 = vand.u32 2147483647, %v8233_v42  ;;  %v2542_v48 = vadd.f32 %v8267_v57, %v2541_v23  ;;  %vm2544_vm13 = vweird.f32 %v8267_v57  ;;  %vm2588_vm7 = vweird.f32 %v8233_v42 }
 0x26e   : > { %5968 = vrcp.f32 %v8239_v14  ;;  %v8325_v55 = vpop.eup %5966  ;;  %vm2559_vm1 = vweird.f32 %v8275_v27  ;;  %vm8336_vm15 = vcmp.eq.f32.partialorder %v2562_v12, 8.507059e+37  ;;  %v2571_v9 = vmul.f32 %v8292_v50, %v2570_v5  ;;  %vm8356_vm3 = vmor %vm2543_vm10, %vm2544_vm13 }
 0x26f   : > { %v2580_v23 = vor.u32 1.1754944e-38, %v2579_v38  ;;  %v2585_v31 = vsub.f32 1.0, %v2584_v45  ;;  %v2531_v51 = vsel %vm8331_vm8, %v8228_v24, %v2527_v18  ;;  %vm8344_vm11 = vcmp.eq.f32.partialorder %v2577_v1, 8.507059e+37  ;;  %vm8383_vm13 = vmor %vm2558_vm0, %vm2559_vm1 }
 0x270   : > { %v2594_v30 = vand.u32 2147483648, %v8233_v42  ;;  %v2599_v12 = vmul.f32 %v8325_v55, %v8236_v37  ;;  %v2607_v39 = vand.u32 2147483647, %v8236_v37  ;;  %v2557_v18 = vadd.f32 %v8275_v27, %v2556_v3 }
 0x271   : > { %v2586_v45 = vmul.f32 %v8308_v10, %v2585_v31  ;;  %vm8362_vm2 = vcmp.eq.f32.partialorder %v2592_v13, 8.507059e+37  ;;  %v2609_v24 = vand.u32 2147483648, %v8236_v37  ;;  %v2546_v1 = vsel %vm8356_vm3, %v8267_v57, %v2542_v48 }
 0x272   : > { %v2572_v34 = vadd.f32 %v8292_v50, %v2571_v9  ;;  %vm2574_vm10 = vweird.f32 %v8292_v50  ;;  %v2600_v19 = vsub.f32 1.0, %v2599_v12  ;;  %v2536_v3 = vsel %vm8295_vm6, %v2535_v49, %v2531_v51 }
 0x273   : > { %v2587_v31 = vadd.f32 %v8308_v10, %v2586_v45  ;;  %vm2589_vm14 = vweird.f32 %v8308_v10  ;;  %5970 = vrcp.f32 %v8246_v40  ;;  %v2595_v57 = vor.u32 1.1754944e-38, %v2594_v30  ;;  %vm8400_vm0 = vmor %vm2573_vm4, %vm2574_vm10 }
 0x274   : > { %v8377_v13 = vpop.eup %5968  ;;  %v2601_v35 = vmul.f32 %v8325_v55, %v2600_v19  ;;  %vm2603_vm6 = vweird.f32 %v8236_v37  ;;  %vm8389_vm8 = vcmp.eq.f32.partialorder %v2607_v39, 8.507059e+37  ;;  %v2551_v49 = vsel %vm8311_vm5, %v2550_v61, %v2546_v1  ;;  %vm8417_vm5 = vmor %vm2588_vm7, %vm2589_vm14 }
 0x275   : > { %v2561_v43 = vsel %vm8383_vm13, %v8275_v27, %v2557_v18  ;;  %vm2604_vm1 = vweird.f32 %v8325_v55  ;;  %v2614_v39 = vmul.f32 %v8377_v13, %v8239_v14  ;;  %v8408_v30 = vmul.f32 %v2536_v3, %v8183_v53 }
 0x276   : > { %v2576_v61 = vsel %vm8400_vm0, %v8292_v50, %v2572_v34  ;;  %v2602_v27 = vadd.f32 %v8325_v55, %v2601_v35  ;;  %v2610_v20 = vor.u32 1.1754944e-38, %v2609_v24  ;;  %v2591_v53 = vsel %vm8417_vm5, %v8308_v10, %v2587_v31  ;;  %vm8434_vm7 = vmor %vm2603_vm6, %vm2604_vm1 }
 0x277   : > { %v2615_v12 = vsub.f32 1.0, %v2614_v39  ;;  %vm2618_vm4 = vweird.f32 %v8239_v14  ;;  %5972 = vrcp.f32 %v8251_v63  ;;  %v8428_v50 = vmul.f32 %v2551_v49, %v8185_v6 }
 0x278   : > { %v2566_v42 = vsel %vm8336_vm15, %v2565_v59, %v2561_v43  ;;  %v2622_v18 = vand.u32 2147483647, %v8239_v14  ;;  %v2624_v10 = vand.u32 2147483648, %v8239_v14  ;;  %v2581_v24 = vsel %vm8344_vm11, %v2580_v23, %v2576_v61 }
 0x279   : > { %v8440_v45 = vpop.eup %5970  ;;  %v2606_v6 = vsel %vm8434_vm7, %v8325_v55, %v2602_v27  ;;  %v2616_v59 = vmul.f32 %v8377_v13, %v2615_v12  ;;  %5974 = vrcp.f32 %v8254_v2  ;;  %v2596_v37 = vsel %vm8362_vm2, %v2595_v57, %v2591_v53 }
 0x27a   : > { %v2629_v33 = vmul.f32 %v8440_v45, %v8246_v40  ;;  %v2637_v1 = vand.u32 2147483647, %v8246_v40  ;;  %v2639_v34 = vand.u32 2147483648, %v8246_v40  ;;  %v8456_v23 = vmul.f32 %v2566_v42, %v8187_v47 }
 0x27b   : > { %v2617_v36 = vadd.f32 %v8377_v13, %v2616_v59  ;;  %vm2619_vm15 = vweird.f32 %v8377_v13  ;;  %v2654_v55 = vand.u32 2147483648, %v8251_v63  ;;  %v2611_v5 = vsel %vm8389_vm8, %v2610_v20, %v2606_v6 }
 0x27c   : > { %v2630_v19 = vsub.f32 1.0, %v2629_v33  ;;  %vm2633_vm11 = vweird.f32 %v8246_v40  ;;  %5976 = vrcp.f32 %v8257_v52  ;;  %v8468_v31 = vmul.f32 %v2581_v24, %v8189_v8  ;;  %vm8479_vm2 = vmor %vm2618_vm4, %vm2619_vm15 }
 0x27d   : > { %v8465_v3 = vpop.eup %5972  ;;  %v8471_v47 = vmul.f32 %v2596_v37, %v8202_v44  ;;  %vm8473_vm3 = vcmp.eq.f32.partialorder %v2622_v18, 8.507059e+37  ;;  %v2625_v57 = vor.u32 1.1754944e-38, %v2624_v10  ;;  %vm8484_vm10 = vcmp.eq.f32.partialorder %v2637_v1, 8.507059e+37 }
 0x27e   : > { %v2631_v51 = vmul.f32 %v8440_v45, %v2630_v19  ;;  %v2640_v8 = vor.u32 1.1754944e-38, %v2639_v34  ;;  %v2644_v44 = vmul.f32 %v8465_v3, %v8251_v63  ;;  %vm2648_vm14 = vweird.f32 %v8251_v63 }
 0x27f   : > { %v2652_v43 = vand.u32 2147483647, %v8251_v63  ;;  %v8492_v9 = vpop.eup %5974  ;;  %v8495_v14 = vmul.f32 %v2611_v5, %v8204_v15  ;;  %v2621_v39 = vsel %vm8479_vm2, %v8377_v13, %v2617_v36  ;;  %vm2634_vm13 = vweird.f32 %v8440_v45 }
 0x280   : > { %v2655_v61 = vor.u32 1.1754944e-38, %v2654_v55  ;;  %v2632_v54 = vadd.f32 %v8440_v45, %v2631_v51  ;;  %v2645_v27 = vsub.f32 1.0, %v2644_v44  ;;  %v2659_v20 = vmul.f32 %v8492_v9, %v8254_v2  ;;  %vm8523_vm0 = vmor %vm2633_vm11, %vm2634_vm13 }
 0x281   : > { %v2667_v53 = vand.u32 2147483647, %v8254_v2  ;;  %vm2663_vm6 = vweird.f32 %v8254_v2  ;;  %v2669_v15 = vand.u32 2147483648, %v8254_v2  ;;  %v2682_v12 = vand.u32 2147483647, %v8257_v52 }
 0x282   : > { %5978 = vrcp.f32 %v8261_v4  ;;  %v8509_v13 = vpop.eup %5976  ;;  %v2626_v42 = vsel %vm8473_vm3, %v2625_v57, %v2621_v39  ;;  %v2646_v38 = vmul.f32 %v8465_v3, %v2645_v27  ;;  %vm8514_vm8 = vcmp.eq.f32.partialorder %v2652_v43, 8.507059e+37 }
 0x283   : > { %v2660_v10 = vsub.f32 1.0, %v2659_v20  ;;  %5980 = vrcp.f32 %v8264_v58  ;;  %vm2649_vm1 = vweird.f32 %v8465_v3  ;;  %v2674_v6 = vmul.f32 %v8509_v13, %v8257_v52 }
 0x284   : > { %vm2678_vm5 = vweird.f32 %v8257_v52  ;;  %v2684_v59 = vand.u32 2147483648, %v8257_v52  ;;  %v2636_v37 = vsel %vm8523_vm0, %v8440_v45, %v2632_v54  ;;  %v2647_v33 = vadd.f32 %v8465_v3, %v2646_v38  ;;  %vm8561_vm11 = vmor %vm2648_vm14, %vm2649_vm1 }
 0x285   : > { %v2661_v40 = vmul.f32 %v8492_v9, %v2660_v10  ;;  %vm8537_vm4 = vcmp.eq.f32.partialorder %v2667_v53, 8.507059e+37  ;;  %v2697_v34 = vand.u32 2147483647, %v8261_v4  ;;  %v8543_v36 = vmul.f32 %v2626_v42, %v8206_v25 }
 0x286   : > { %v2670_v55 = vor.u32 1.1754944e-38, %v2669_v15  ;;  %v2675_v5 = vsub.f32 1.0, %v2674_v6  ;;  %v2699_v19 = vand.u32 2147483648, %v8261_v4  ;;  %vm2664_vm7 = vweird.f32 %v8492_v9 }
 0x287   : > { %v2662_v48 = vadd.f32 %v8492_v9, %v2661_v40  ;;  %vm8548_vm15 = vcmp.eq.f32.partialorder %v2682_v12, 8.507059e+37  ;;  %5982 = vrcp.f32 %v8270_v62  ;;  %v8555_v35 = vsel %vm8484_vm10, %v2640_v8, %v2636_v37  ;;  %vm8578_vm14 = vmor %vm2663_vm6, %vm2664_vm7 }
 0x288   : > { %v5979_v57 = vpop.eup %5978  ;;  %v2676_v51 = vmul.f32 %v8509_v13, %v2675_v5  ;;  %v2685_v44 = vor.u32 1.1754944e-38, %v2684_v59  ;;  %vm2693_vm3 = vweird.f32 %v8261_v4  ;;  %v2651_v49 = vsel %vm8561_vm11, %v8465_v3, %v2647_v33 }
 0x289   : > { %v5981_v43 = vpop.eup %5980  ;;  %vm2679_vm2 = vweird.f32 %v8509_v13  ;;  %v2689_v8 = vmul.f32 %v5979_v57, %v8261_v4  ;;  %vm8572_vm10 = vcmp.eq.f32.partialorder %v2697_v34, 8.507059e+37  ;;  %v2700_v27 = vor.u32 1.1754944e-38, %v2699_v19 }
 0x28a   : > { %v2677_v54 = vadd.f32 %v8509_v13, %v2676_v51  ;;  %v2704_v20 = vmul.f32 %v5981_v43, %v8264_v58  ;;  %vm2708_vm13 = vweird.f32 %v8264_v58  ;;  %v2666_v3 = vsel %vm8578_vm14, %v8492_v9, %v2662_v48  ;;  %vm8594_vm6 = vmor %vm2678_vm5, %vm2679_vm2  ;;  %v10575_v48 = vld [vmem:[#allocation62_spill] sm:$0xff] }
 0x28b   : > { %v2690_v53 = vsub.f32 1.0, %v2689_v8  ;;  %v2712_v15 = vand.u32 2147483647, %v8264_v58  ;;  %v2714_v2 = vand.u32 2147483648, %v8264_v58  ;;  %v2656_v12 = vsel %vm8514_vm8, %v2655_v61, %v2651_v49 }
 0x28c   : > { %vm2694_vm0 = vweird.f32 %v5979_v57  ;;  %v2705_v38 = vsub.f32 1.0, %v2704_v20  ;;  %vm2723_vm1 = vweird.f32 %v8270_v62  ;;  %5984 = vrcp.f32 %v8280_v56 }
 0x28d   : > { %v5983_v9 = vpop.eup %5982  ;;  %v2681_v10 = vsel %vm8594_vm6, %v8509_v13, %v2677_v54  ;;  %v2691_v24 = vmul.f32 %v5979_v57, %v2690_v53  ;;  %v2727_v61 = vand.u32 2147483647, %v8270_v62  ;;  %v2729_v52 = vand.u32 2147483648, %v8270_v62 }
 0x28e   : > { %v2671_v18 = vsel %vm8537_vm4, %v2670_v55, %v2666_v3  ;;  %v2706_v6 = vmul.f32 %v5981_v43, %v2705_v38  ;;  %vm2709_vm8 = vweird.f32 %v5981_v43  ;;  %v2719_v59 = vmul.f32 %v5983_v9, %v8270_v62  ;;  %vm2695_vm4 = vmor %vm2693_vm3, %vm2694_vm0 }
 0x28f   : > { %v2692_v37 = vadd.f32 %v5979_v57, %v2691_v24  ;;  %vm8608_vm5 = vcmp.eq.f32.partialorder %v2712_v15, 8.507059e+37  ;;  %v2715_v40 = vor.u32 1.1754944e-38, %v2714_v2  ;;  %5986 = vrcp.f32 %v8301_v17  ;;  %vm2710_vm7 = vmor %vm2708_vm13, %vm2709_vm8 }
 0x290   : > { %v2657_v13 = vmul.f32 %v2656_v12, %v8210_v22  ;;  %v2686_v34 = vsel %vm8548_vm15, %v2685_v44, %v2681_v10  ;;  %v2707_v1 = vadd.f32 %v5981_v43, %v2706_v6  ;;  %v2720_v55 = vsub.f32 1.0, %v2719_v59 }
 0x291   : > { %v2672_v5 = vmul.f32 %v2671_v18, %v8212_v60  ;;  %v2696_v19 = vsel %vm2695_vm4, %v5979_v57, %v2692_v37  ;;  %vm8622_vm11 = vcmp.eq.f32.partialorder %v2727_v61, 8.507059e+37  ;;  %v2730_v22 = vor.u32 1.1754944e-38, %v2729_v52 }
 0x292   : > { %v5985_v25 = vpop.eup %5984  ;;  %v2701_v45 = vsel %vm8572_vm10, %v2700_v27, %v2696_v19  ;;  %v2711_v51 = vsel %vm2710_vm7, %v5981_v43, %v2707_v1  ;;  %v2721_v4 = vmul.f32 %v5983_v9, %v2720_v55  ;;  %vm2724_vm15 = vweird.f32 %v5983_v9  ;;  %v10573_v55 = vld [vmem:[#allocation43_spill] sm:$0xff] }
 0x293   : > { %v2687_v44 = vmul.f32 %v2686_v34, %v8214_v11  ;;  %v2716_v60 = vsel %vm8608_vm5, %v2715_v40, %v2711_v51  ;;  %v2734_v58 = vmul.f32 %v5985_v25, %v8280_v56  ;;  %v2742_v57 = vand.u32 2147483647, %v8280_v56  ;;  %vm2725_vm3 = vmor %vm2723_vm1, %vm2724_vm15  ;;  %v10577_v51 = vld [vmem:[#allocation34_spill] sm:$0xff] }
 0x294   : > { %v2702_v49 = vmul.f32 %v2701_v45, %v8223_v28  ;;  %v2722_v8 = vadd.f32 %v5983_v9, %v2721_v4  ;;  %v2744_v39 = vand.u32 2147483648, %v8280_v56  ;;  %v3102_v43 = vsel %vm10201_vm9, %v8428_v50, %v8408_v30 }
 0x295   : > { %v5987_v63 = vpop.eup %5986  ;;  %v2735_v11 = vsub.f32 1.0, %v2734_v58  ;;  %vm2739_vm2 = vweird.f32 %v5985_v25  ;;  %v3103_v54 = vsel %vm10200_vm12, %v8456_v23, %v3102_v43  ;;  %v3109_v27 = vsel %vm10201_vm9, %v2672_v5, %v2657_v13  ;;  %v10571_v13 = vld [vmem:[#allocation42_spill] sm:$0xff]  ;;  %v10580_v43 = vld [vmem:[#allocation37_spill] sm:$0xff] }
 0x296   : > { %v2717_v28 = vmul.f32 %v2716_v60, %v8225_v16  ;;  %v2726_v20 = vsel %vm2725_vm3, %v5983_v9, %v2722_v8  ;;  %v2749_v3 = vmul.f32 %v5987_v63, %v8301_v17  ;;  %vm10561_vm10 = vcmask 1043459   ;;  %v6146_v8 = vld [vmem:[%s6665_s22 + $0x28] sm:$0xff] }
 0x297   : > { %v3104_v53 = vsel %vm10561_vm10, %v8468_v31, %v3103_v54  ;;  %v2731_v30 = vsel %vm8622_vm11, %v2730_v22, %v2726_v20  ;;  %v2736_v62 = vmul.f32 %v5985_v25, %v2735_v11  ;;  %vm10562_vm14 = vcmask 1044484   ;;  %vm10563_vm6 = vmmov %vm10561_vm10  ;;  %v10576_v22 = vld [vmem:[#allocation92_spill] sm:$0xff] }
 0x298   : > { %v3105_v50 = vsel %vm10562_vm14, %v8471_v47, %v3104_v53  ;;  %v3110_v15 = vsel %vm10200_vm12, %v2687_v44, %v3109_v27  ;;  %vm2738_vm13 = vweird.f32 %v8280_v56  ;;  %v2750_v23 = vsub.f32 1.0, %v2749_v3  ;;  %vm10564_vm0 = vmmov %vm10562_vm14  ;;  %v10581_v3 = vld [vmem:[#allocation67_spill] sm:$0xff]  ;;  %v10582_v53 = vld [vmem:[#allocation93_spill] sm:$0xff] }
 0x299   : > { %v2757_v16 = vand.u32 2147483647, %v8301_v17  ;;  %v3111_v2 = vsel %vm10563_vm6, %v2702_v49, %v3110_v15  ;;  %v2737_v12 = vadd.f32 %v5985_v25, %v2736_v62  ;;  %v2745_v42 = vor.u32 1.1754944e-38, %v2744_v39  ;;  %vm2740_vm1 = vmor %vm2738_vm13, %vm2739_vm2  ;;  %v10583_v62 = vld [vmem:[#allocation66_spill] sm:$0xff] }
 0x29a   : > { %v2759_v31 = vand.u32 2147483648, %v8301_v17  ;;  %v3112_v38 = vsel %vm10564_vm0, %v2717_v28, %v3111_v2  ;;  %v2732_v9 = vmul.f32 %v2731_v30, %v8230_v0  ;;  %v2751_v47 = vmul.f32 %v5987_v63, %v2750_v23  ;;  %v10567_v0 = vld [vmem:[#allocation89_spill] sm:$0xff] }
 0x29b   : > { %vm2754_vm8 = vweird.f32 %v5987_v63  ;;  %vm10565_vm5 = vcmask 1045509   ;;  %v2642_v10 = vmul.f32 %v8555_v35, %v8208_v32  ;;  %v2741_v24 = vsel %vm2740_vm1, %v5985_v25, %v2737_v12  ;;  %v10569_v35 = vld [vmem:[#allocation90_spill] sm:$0xff]  ;;  %v10585_v12 = vld [vmem:[#allocation65_spill] sm:$0xff] }
 0x29c   : > { %v3106_v56 = vsel %vm10565_vm5, %v8495_v14, %v3105_v50  ;;  %vm2743_vm4 = vcmp.eq.f32.partialorder %v2742_v57, 8.507059e+37  ;;  %vm2753_vm7 = vweird.f32 %v8301_v17  ;;  %v2752_v52 = vadd.f32 %v5987_v63, %v2751_v47  ;;  %vm10566_vm11 = vmmov %vm10565_vm5  ;;  %v10570_v17 = vld [vmem:[#allocation91_spill] sm:$0xff] }
 0x29d   : > { %v2746_v61 = vsel %vm2743_vm4, %v2745_v42, %v2741_v24  ;;  %v3113_v18 = vsel %vm10566_vm11, %v2732_v9, %v3112_v38  ;;  %v1581_v6 = vmul.f32 %v10567_v0, %v6972_v29  ;;  %vm2755_vm15 = vmor %vm2753_vm7, %vm2754_vm8  ;;  %vm2758_vm3 = vcmp.eq.f32.partialorder %v2757_v16, 8.507059e+37  ;;  %v6145_v57 = vld [vmem:[%s6665_s22 + $0x20] sm:$0xff]  ;;  %v10587_v38 = vld [vmem:[#allocation30_spill] sm:$0xff] }
 0x29e   : > { %v2747_v59 = vmul.f32 %v2746_v61, %v8243_v41  ;;  %v2760_v37 = vor.u32 1.1754944e-38, %v2759_v31  ;;  %vm10568_vm2 = vcmask 1046534   ;;  %v2756_v32 = vsel %vm2755_vm15, %v5987_v63, %v2752_v52  ;;  %v10584_v50 = vld [vmem:[#allocation27_spill] sm:$0xff]  ;;  %v10586_v42 = vld [vmem:[#allocation24_spill] sm:$0xff] }
 0x29f   : > { %v3107_v14 = vsel %vm10568_vm2, %v8543_v36, %v3106_v56  ;;  %v1582_v33 = vmul.f32 %v10569_v35, %v10380_v46  ;;  %v1583_v40 = vmul.f32 %v10570_v17, %v10382_v26  ;;  %v1883_v34 = vrot.slane %v10571_v13, 4  ;;  %vm10572_vm10 = vmmov %vm10568_vm2  ;;  %v10589_v61 = vld [vmem:[#allocation35_spill] sm:$0xff] }
 0x2a0   : > { %5988 = vpow2.f32 %v8221_v21  ;;  %v2761_v41 = vsel %vm2758_vm3, %v2760_v37, %v2756_v32  ;;  %v3114_v1 = vsel %vm10572_vm10, %v2747_v59, %v3113_v18  ;;  %v1889_v5 = vrot.slane %v10573_v55, 4 }
 0x2a1   : > { %v2762_v36 = vmul.f32 %v2761_v41, %v8277_v7  ;;  %vm10574_vm14 = vcmask 1047559   ;;  %v1584_v25 = vmul.f32 %v10576_v22, %v10575_v48  ;;  %v1895_v45 = vrot.slane %v1581_v6, 4  ;;  %v10579_v7 = vld [vmem:[#allocation71_spill] sm:$0xff] }
 0x2a2   : > { %v3108_v19 = vsel %vm10574_vm14, %v2642_v10, %v3107_v14  ;;  %v1529_v4 = vmul.f32 1.442695, %v10577_v51  ;;  %vm10578_vm13 = vmmov %vm10574_vm14  ;;  %v1884_v60 = vadd.f32 %v1883_v34, %v10571_v13  ;;  %v1901_v21 = vrot.slane %v1582_v33, 4  ;;  %v10588_v10 = vld [vmem:[#allocation32_spill] sm:$0xff] }
 0x2a3   : > { %v3115_v44 = vsel %vm10578_vm13, %v2762_v36, %v3114_v1  ;;  %v1907_v58 = vrot.slane %v1583_v40, 4  ;;  %v8686_v49 = vmul.f32 %v6145_v57, %v3108_v19  ;;  %v1585_v63 = vmul.f32 %v10580_v43, %v10579_v7 }
 0x2a4   : > { %v8689_v39 = vmul.f32 %v6146_v8, %v3115_v44  ;;  %v1890_v11 = vadd.f32 %v1889_v5, %v10573_v55  ;;  %v1896_v54 = vadd.f32 %v1895_v45, %v1581_v6  ;;  %v1913_v27 = vrot.slane %v1584_v25, 4  ;;  %v10590_v6 = vld [vmem:[#allocation36_spill] sm:$0xff] }
 0x2a5   : > { %5990 = vpow2.f32 %v1529_v4  ;;  %v1586_v30 = vmul.f32 %v10582_v53, %v10581_v3  ;;  %v1587_v15 = vmul.f32 %v10584_v50, %v10583_v62  ;;  %v1885_v23 = vrot.slane %v1884_v60, 2 }
 0x2a6   : > { %v5989_v28 = vpop.eup %5988  ;;  %v3180_v20 = vpack.c.bf16 %v8689_v39, %v8686_v49  ;;  %v1902_v16 = vadd.f32 %v1901_v21, %v1582_v33  ;;  %v1908_v2 = vadd.f32 %v1907_v58, %v1583_v40  ;;  %v1588_v31 = vmul.f32 %v10586_v42, %v10585_v12 }
 0x2a7   : > { %v1589_v9 = vmul.f32 %v10587_v38, %v6972_v29  ;;  %v1891_v47 = vrot.slane %v1890_v11, 2  ;;  %v1919_v56 = vrot.slane %v1585_v63, 4  ;;  %v1590_v24 = vmul.f32 %v10588_v10, %v10380_v46 }
 0x2a8   : > { %3328 = vmatmul.bf16.gmra.mxu0 %v3180_v20  ;;  %3357 = vmatmul.bf16.gmra.mxu1 %v3180_v20  ;;  %v1591_v52 = vmul.f32 %v10589_v61, %v10382_v26  ;;  %v1897_v18 = vrot.slane %v1896_v54, 2  ;;  %v1914_v0 = vadd.f32 %v1913_v27, %v1584_v25  ;;  %v1592_v59 = vmul.f32 %v10590_v6, %v10575_v48 }
 0x2a9   : > { %3386 = vmatmul.bf16.gmra.mxu2 %v3180_v20  ;;  %v1593_v37 = vmul.f32 %v5989_v28, %v10579_v7  ;;  %v1925_v14 = vrot.slane %v1586_v30, 4  ;;  %v1886_v32 = vadd.f32 %v1885_v23, %v1884_v60  ;;  %v1903_v35 = vrot.slane %v1902_v16, 2 }
 0x2aa   : > { %v1909_v33 = vrot.slane %v1908_v2, 2  ;;  %v1931_v17 = vrot.slane %v1587_v15, 4  ;;  %v1892_v13 = vadd.f32 %v1891_v47, %v1890_v11  ;;  %v1920_v34 = vadd.f32 %v1919_v56, %v1585_v63 }
 0x2ab   : > { %v5991_v40 = vpop.eup %5990  ;;  %v1937_v41 = vrot.slane %v1588_v31, 4  ;;  %v1943_v1 = vrot.slane %v1589_v9, 4  ;;  %v1898_v55 = vadd.f32 %v1897_v18, %v1896_v54  ;;  %v1915_v5 = vrot.slane %v1914_v0, 2 }
 0x2ac   : > { %v1949_v36 = vrot.slane %v1590_v24, 4  ;;  %v1955_v19 = vrot.slane %v1591_v52, 4  ;;  %v1926_v22 = vadd.f32 %v1925_v14, %v1586_v30  ;;  %v1932_v25 = vadd.f32 %v1931_v17, %v1587_v15 }
 0x2ad   : > { %v1938_v45 = vadd.f32 %v1937_v41, %v1588_v31  ;;  %v1961_v51 = vrot.slane %v1592_v59, 4  ;;  %v1887_v4 = vrot.slane %v1886_v32, 1  ;;  %v1904_v44 = vadd.f32 %v1903_v35, %v1902_v16 }
 0x2ae   : > { %v1944_v21 = vadd.f32 %v1943_v1, %v1589_v9  ;;  %v1967_v60 = vrot.slane %v1593_v37, 4  ;;  %v1594_v58 = vmul.f32 %v5991_v40, %v10581_v3  ;;  %v1950_v57 = vadd.f32 %v1949_v36, %v1590_v24 }
 0x2af   : > { %v1956_v8 = vadd.f32 %v1955_v19, %v1591_v52  ;;  %v1962_v43 = vadd.f32 %v1961_v51, %v1592_v59  ;;  %v1893_v63 = vrot.slane %v1892_v13, 1  ;;  %v1910_v11 = vadd.f32 %v1909_v33, %v1908_v2 }
 0x2b0   : > { %v1921_v27 = vrot.slane %v1920_v34, 2  ;;  %v1968_v54 = vadd.f32 %v1967_v60, %v1593_v37  ;;  %v1899_v28 = vrot.slane %v1898_v55, 1  ;;  %v1927_v20 = vrot.slane %v1926_v22, 2 }
 0x2b1   : > { %v1933_v53 = vrot.slane %v1932_v25, 2  ;;  %v1939_v30 = vrot.slane %v1938_v45, 2  ;;  %v8712_v50 = vadd.f32 %v1887_v4, %v1886_v32  ;;  %v1905_v15 = vrot.slane %v1904_v44, 1 }
 0x2b2   : > { %v1916_v23 = vadd.f32 %v1915_v5, %v1914_v0  ;;  %v1945_v16 = vrot.slane %v1944_v21, 2  ;;  %v1951_v42 = vrot.slane %v1950_v57, 2  ;;  %v1957_v31 = vrot.slane %v1956_v8, 2 }
 0x2b3   : > { %v1963_v38 = vrot.slane %v1962_v43, 2  ;;  %v1973_v9 = vrot.slane %v1594_v58, 4  ;;  %v8714_v47 = vadd.f32 %v1893_v63, %v1892_v13  ;;  %v1911_v56 = vrot.slane %v1910_v11, 1 }
 0x2b4   : > { %v1922_v10 = vadd.f32 %v1921_v27, %v1920_v34  ;;  %v1969_v2 = vrot.slane %v1968_v54, 2  ;;  %v1928_v24 = vadd.f32 %v1927_v20, %v1926_v22  ;;  %v1934_v61 = vadd.f32 %v1933_v53, %v1932_v25 }
 0x2b5   : > { %v1940_v52 = vadd.f32 %v1939_v30, %v1938_v45  ;;  %v1974_v18 = vadd.f32 %v1973_v9, %v1594_v58  ;;  %v8716_v6 = vadd.f32 %v1899_v28, %v1898_v55  ;;  %v1917_v59 = vrot.slane %v1916_v23, 1 }
 0x2b6   : > { %v1946_v37 = vadd.f32 %v1945_v16, %v1944_v21  ;;  %v8719_v0 = vmax.f32 %v8712_v50, 1e-30  ;;  %v1952_v14 = vadd.f32 %v1951_v42, %v1950_v57  ;;  %v1958_v32 = vadd.f32 %v1957_v31, %v1956_v8 }
 0x2b7   : > { %v1964_v35 = vadd.f32 %v1963_v38, %v1962_v43  ;;  %v1975_v33 = vrot.slane %v1974_v18, 2  ;;  %v8721_v17 = vadd.f32 %v1905_v15, %v1904_v44  ;;  %v1923_v40 = vrot.slane %v1922_v10, 1 }
 0x2b8   : > { %v1970_v13 = vadd.f32 %v1969_v2, %v1968_v54  ;;  %v8724_v34 = vmax.f32 %v8714_v47, 1e-30  ;;  %v8726_v41 = vadd.f32 %v1911_v56, %v1910_v11  ;;  %v1929_v1 = vrot.slane %v1928_v24, 1 }
 0x2b9   : > { %v1935_v55 = vrot.slane %v1934_v61, 1  ;;  %v1941_v5 = vrot.slane %v1940_v52, 1  ;;  %v8728_v36 = vadd.f32 %v1917_v59, %v1916_v23  ;;  %v1976_v19 = vadd.f32 %v1975_v33, %v1974_v18 }
 0x2ba   : > { %v8731_v22 = vmax.f32 %v8716_v6, 1e-30  ;;  %5992 = vrcp.f32 %v8719_v0  ;;  %v1947_v25 = vrot.slane %v1946_v37, 1  ;;  %v1953_v45 = vrot.slane %v1952_v14, 1 }
 0x2bb   : > { %v1959_v51 = vrot.slane %v1958_v32, 1  ;;  %v1965_v4 = vrot.slane %v1964_v35, 1  ;;  %v8734_v44 = vadd.f32 %v1923_v40, %v1922_v10  ;;  %v1971_v21 = vrot.slane %v1970_v13, 1 }
 0x2bc   : > { %v8737_v60 = vmax.f32 %v8721_v17, 1e-30  ;;  %5994 = vrcp.f32 %v8724_v34  ;;  %v8740_v58 = vadd.f32 %v1929_v1, %v1928_v24  ;;  %v8742_v57 = vadd.f32 %v1935_v55, %v1934_v61 }
 0x2bd   : > { %v8744_v8 = vadd.f32 %v1941_v5, %v1940_v52  ;;  %v1977_v43 = vrot.slane %v1976_v19, 1  ;;  %v8747_v63 = vmax.f32 %v8726_v41, 1e-30  ;;  %5996 = vrcp.f32 %v8731_v22 }
 0x2be   : > { %v8750_v11 = vadd.f32 %v1947_v25, %v1946_v37  ;;  %v8752_v27 = vadd.f32 %v1953_v45, %v1952_v14  ;;  %v8754_v54 = vadd.f32 %v1959_v51, %v1958_v32  ;;  %v8756_v28 = vadd.f32 %v1965_v4, %v1964_v35 }
 0x2bf   : > { %v8760_v53 = vadd.f32 %v1971_v21, %v1970_v13  ;;  %v8763_v30 = vmax.f32 %v8728_v36, 1e-30  ;;  %v8766_v15 = vmax.f32 %v8734_v44, 1e-30  ;;  %5998 = vrcp.f32 %v8737_v60 }
 0x2c0   : > { %v8758_v20 = vpop.eup %5992  ;;  %v8770_v23 = vmax.f32 %v8740_v58, 1e-30  ;;  %v8773_v16 = vmax.f32 %v8742_v57, 1e-30  ;;  %v8776_v42 = vmax.f32 %v8744_v8, 1e-30  ;;  %v8782_v9 = vadd.f32 %v1977_v43, %v1976_v19 }
 0x2c1   : > { %v2764_v31 = vmul.f32 %v8758_v20, %v8719_v0  ;;  %v2774_v56 = vand.u32 2147483648, %v8719_v0  ;;  %v2789_v10 = vand.u32 2147483648, %v8724_v34  ;;  %6000 = vrcp.f32 %v8747_v63 }
 0x2c2   : > { %v8780_v38 = vpop.eup %5994  ;;  %v8788_v2 = vmax.f32 %v8750_v11, 1e-30  ;;  %v8791_v24 = vmax.f32 %v8752_v27, 1e-30  ;;  %v8798_v59 = vmax.f32 %v8754_v54, 1e-30  ;;  %6002 = vrcp.f32 %v8763_v30 }
 0x2c3   : > { %v2765_v61 = vsub.f32 1.0, %v2764_v31  ;;  %v2779_v52 = vmul.f32 %v8780_v38, %v8724_v34  ;;  %v8795_v18 = vpop.eup %5996  ;;  %v8801_v37 = vmax.f32 %v8756_v28, 1e-30  ;;  %v8804_v14 = vmax.f32 %v8760_v53, 1e-30 }
 0x2c4   : > { %vm2768_vm6 = vweird.f32 %v8719_v0  ;;  %v2772_v32 = vand.u32 2147483647, %v8719_v0  ;;  %v2787_v33 = vand.u32 2147483647, %v8724_v34  ;;  %v2794_v40 = vmul.f32 %v8795_v18, %v8731_v22 }
 0x2c5   : > { %v2780_v35 = vsub.f32 1.0, %v2779_v52  ;;  %v8812_v13 = vpop.eup %5998  ;;  %v8815_v1 = vmax.f32 %v8782_v9, 1e-30  ;;  %v8817_v55 = vor.u32 1.1754944e-38, %v2774_v56  ;;  %vm2783_vm0 = vweird.f32 %v8724_v34 }
 0x2c6   : > { %v8820_v5 = vor.u32 1.1754944e-38, %v2789_v10  ;;  %v2804_v19 = vand.u32 2147483648, %v8731_v22  ;;  %v2766_v25 = vmul.f32 %v8758_v20, %v2765_v61  ;;  %v2795_v45 = vsub.f32 1.0, %v2794_v40 }
 0x2c7   : > { %vm2798_vm1 = vweird.f32 %v8731_v22  ;;  %v2802_v51 = vand.u32 2147483647, %v8731_v22  ;;  %v2809_v4 = vmul.f32 %v8812_v13, %v8737_v60  ;;  %v8828_v21 = vpop.eup %6000  ;;  %v2781_v43 = vmul.f32 %v8780_v38, %v2780_v35 }
 0x2c8   : > { %v2817_v31 = vand.u32 2147483647, %v8737_v60  ;;  %v2819_v56 = vand.u32 2147483648, %v8737_v60  ;;  %6004 = vrcp.f32 %v8766_v15  ;;  %vm2769_vm8 = vweird.f32 %v8758_v20  ;;  %v8837_v52 = vpop.eup %6002 }
 0x2c9   : > { %v2796_v10 = vmul.f32 %v8795_v18, %v2795_v45  ;;  %v2810_v61 = vsub.f32 1.0, %v2809_v4  ;;  %vm2813_vm5 = vweird.f32 %v8737_v60  ;;  %vm8839_vm4 = vcmp.eq.f32.partialorder %v2772_v32, 8.507059e+37  ;;  %vm8876_vm13 = vmor %vm2768_vm6, %vm2769_vm8 }
 0x2ca   : > { %vm2784_vm7 = vweird.f32 %v8780_v38  ;;  %vm8844_vm11 = vcmp.eq.f32.partialorder %v2787_v33, 8.507059e+37  ;;  %v2805_v3 = vor.u32 1.1754944e-38, %v2804_v19  ;;  %v2824_v7 = vmul.f32 %v8828_v21, %v8747_v63 }
 0x2cb   : > { %vm2828_vm15 = vweird.f32 %v8747_v63  ;;  %v2767_v45 = vadd.f32 %v8758_v20, %v2766_v25  ;;  %vm8852_vm3 = vcmp.eq.f32.partialorder %v2802_v51, 8.507059e+37  ;;  %v2811_v32 = vmul.f32 %v8812_v13, %v2810_v61  ;;  %vm8890_vm9 = vmor %vm2783_vm0, %vm2784_vm7 }
 0x2cc   : > { %v2832_v48 = vand.u32 2147483647, %v8747_v63  ;;  %v2834_v33 = vand.u32 2147483648, %v8747_v63  ;;  %v2782_v26 = vadd.f32 %v8780_v38, %v2781_v43  ;;  %vm8860_vm2 = vcmp.eq.f32.partialorder %v2817_v31, 8.507059e+37 }
 0x2cd   : > { %v2820_v46 = vor.u32 1.1754944e-38, %v2819_v56  ;;  %v2825_v29 = vsub.f32 1.0, %v2824_v7  ;;  %v2839_v25 = vmul.f32 %v8837_v52, %v8763_v30  ;;  %v2797_v51 = vadd.f32 %v8795_v18, %v2796_v10 }
 0x2ce   : > { %vm2799_vm10 = vweird.f32 %v8795_v18  ;;  %vm2843_vm14 = vweird.f32 %v8763_v30  ;;  %v2847_v61 = vand.u32 2147483647, %v8763_v30  ;;  %v8870_v12 = vpop.eup %6004  ;;  %v2812_v7 = vadd.f32 %v8812_v13, %v2811_v32 }
 0x2cf   : > { %vm2814_vm12 = vweird.f32 %v8812_v13  ;;  %v2826_v31 = vmul.f32 %v8828_v21, %v2825_v29  ;;  %v2840_v56 = vsub.f32 1.0, %v2839_v25  ;;  %v2771_v10 = vsel %vm8876_vm13, %v8758_v20, %v2767_v45  ;;  %vm8907_vm0 = vmor %vm2798_vm1, %vm2799_vm10 }
 0x2d0   : > { %vm8894_vm6 = vcmp.eq.f32.partialorder %v2832_v48, 8.507059e+37  ;;  %v2835_v32 = vor.u32 1.1754944e-38, %v2834_v33  ;;  %v2854_v29 = vmul.f32 %v8870_v12, %v8766_v15  ;;  %v2786_v20 = vsel %vm8890_vm9, %v8780_v38, %v2782_v26  ;;  %vm8919_vm9 = vmor %vm2813_vm5, %vm2814_vm12 }
 0x2d1   : > { %v2827_v48 = vadd.f32 %v8828_v21, %v2826_v31  ;;  %vm2829_vm8 = vweird.f32 %v8828_v21  ;;  %v2841_v45 = vmul.f32 %v8837_v52, %v2840_v56  ;;  %v2801_v33 = vsel %vm8907_vm0, %v8795_v18, %v2797_v51 }
 0x2d2   : > { %v2849_v22 = vand.u32 2147483648, %v8763_v30  ;;  %v2855_v38 = vsub.f32 1.0, %v2854_v29  ;;  %6006 = vrcp.f32 %v8770_v23  ;;  %v2816_v25 = vsel %vm8919_vm9, %v8812_v13, %v2812_v7  ;;  %vm8942_vm12 = vmor %vm2828_vm15, %vm2829_vm8 }
 0x2d3   : > { %v2842_v43 = vadd.f32 %v8837_v52, %v2841_v45  ;;  %vm2844_vm1 = vweird.f32 %v8837_v52  ;;  %vm8930_vm7 = vcmp.eq.f32.partialorder %v2847_v61, 8.507059e+37  ;;  %v2776_v60 = vsel %vm8839_vm4, %v8817_v55, %v2771_v10 }
 0x2d4   : > { %v2791_v51 = vsel %vm8844_vm11, %v8820_v5, %v2786_v20  ;;  %v2856_v7 = vmul.f32 %v8870_v12, %v2855_v38  ;;  %6008 = vrcp.f32 %v8773_v16  ;;  %v2806_v61 = vsel %vm8852_vm3, %v2805_v3, %v2801_v33  ;;  %vm8959_vm4 = vmor %vm2843_vm14, %vm2844_vm1 }
 0x2d5   : > { %v2831_v55 = vsel %vm8942_vm12, %v8828_v21, %v2827_v48  ;;  %vm2859_vm5 = vweird.f32 %v8870_v12  ;;  %v2862_v5 = vand.u32 2147483647, %v8766_v15  ;;  %v2821_v63 = vsel %vm8860_vm2, %v2820_v46, %v2816_v25 }
 0x2d6   : > { %v2850_v35 = vor.u32 1.1754944e-38, %v2849_v22  ;;  %v2857_v3 = vadd.f32 %v8870_v12, %v2856_v7  ;;  %v2864_v4 = vand.u32 2147483648, %v8766_v15  ;;  %v8966_v21 = vmul.f32 %v2776_v60, %v8712_v50 }
 0x2d7   : > { %v2846_v31 = vsel %vm8959_vm4, %v8837_v52, %v2842_v43  ;;  %vm2858_vm11 = vweird.f32 %v8766_v15  ;;  %6010 = vrcp.f32 %v8776_v42  ;;  %v8976_v30 = vmul.f32 %v2791_v51, %v8714_v47 }
 0x2d8   : > { %v8973_v46 = vpop.eup %6006  ;;  %v8979_v19 = vmul.f32 %v2806_v61, %v8716_v6  ;;  %v2836_v50 = vsel %vm8894_vm6, %v2835_v32, %v2831_v55  ;;  %vm8985_vm15 = vmor %vm2858_vm11, %vm2859_vm5  ;;  %v2879_v15 = vand.u32 2147483648, %v8770_v23  ;;  %v8991_v52 = vmul.f32 %v2821_v63, %v8721_v17 }
 0x2d9   : > { %v2861_v47 = vsel %vm8985_vm15, %v8870_v12, %v2857_v3  ;;  %vm2863_vm3 = vcmp.eq.f32.partialorder %v2862_v5, 8.507059e+37  ;;  %v2869_v62 = vmul.f32 %v8973_v46, %v8770_v23  ;;  %v2851_v10 = vsel %vm8930_vm7, %v2850_v35, %v2846_v31 }
 0x2da   : > { %v8998_v6 = vpop.eup %6008  ;;  %v2865_v0 = vor.u32 1.1754944e-38, %v2864_v4  ;;  %v2894_v32 = vand.u32 2147483648, %v8773_v16  ;;  %6012 = vrcp.f32 %v8788_v2  ;;  %v9005_v17 = vmul.f32 %v2836_v50, %v8726_v41 }
 0x2db   : > { %v2877_v29 = vand.u32 2147483647, %v8770_v23  ;;  %v2884_v12 = vmul.f32 %v8998_v6, %v8773_v16  ;;  %v2907_v20 = vand.u32 2147483647, %v8776_v42  ;;  %v2870_v48 = vsub.f32 1.0, %v2869_v62 }
 0x2dc   : > { %v2866_v34 = vsel %vm2863_vm3, %v2865_v0, %v2861_v47  ;;  %v9011_v45 = vor.u32 1.1754944e-38, %v2879_v15  ;;  %6014 = vrcp.f32 %v8791_v24  ;;  %v9015_v26 = vmul.f32 %v2851_v10, %v8728_v36  ;;  %v9061_v0 = vpop.f32.mrf.mxu2 }
 0x2dd   : > { %v6011_v33 = vpop.eup %6010  ;;  %v2885_v22 = vsub.f32 1.0, %v2884_v12  ;;  %vm2888_vm2 = vweird.f32 %v8773_v16  ;;  %v2892_v41 = vand.u32 2147483647, %v8773_v16  ;;  %v2909_v38 = vand.u32 2147483648, %v8776_v42 }
 0x2de   : > { %vm2874_vm10 = vweird.f32 %v8973_v46  ;;  %v2895_v25 = vor.u32 1.1754944e-38, %v2894_v32  ;;  %v2899_v43 = vmul.f32 %v6011_v33, %v8776_v42  ;;  %vm2903_vm14 = vweird.f32 %v8776_v42  ;;  %v5462_v32 = vld [vmem:[#allocation10 + $0x38] sm:$0xff] }
 0x2df   : > { %v9024_v18 = vmul.f32 %v2866_v34, %v8734_v44  ;;  %v2886_v36 = vmul.f32 %v8998_v6, %v2885_v22  ;;  %vm9027_vm13 = vcmp.eq.f32.partialorder %v2907_v20, 8.507059e+37  ;;  %v2922_v51 = vand.u32 2147483647, %v8788_v2  ;;  %3489 = vmatpush.bf16.msrb.mxu3 %v5462_v32 }
 0x2e0   : > { %v9032_v13 = vpop.eup %6012  ;;  %v2871_v7 = vmul.f32 %v8973_v46, %v2870_v48  ;;  %vm2873_vm6 = vweird.f32 %v8770_v23  ;;  %v2900_v61 = vsub.f32 1.0, %v2899_v43  ;;  %v2924_v55 = vand.u32 2147483648, %v8788_v2 }
 0x2e1   : > { %6016 = vrcp.f32 %v8798_v59  ;;  %vm2889_vm0 = vweird.f32 %v8998_v6  ;;  %vm9039_vm8 = vcmp.eq.f32.partialorder %v2892_v41, 8.507059e+37  ;;  %v2910_v5 = vor.u32 1.1754944e-38, %v2909_v38 }
 0x2e2   : > { %v2914_v63 = vmul.f32 %v9032_v13, %v8788_v2  ;;  %vm2918_vm9 = vweird.f32 %v8788_v2  ;;  %v9046_v40 = vpop.eup %6014  ;;  %v2901_v35 = vmul.f32 %v6011_v33, %v2900_v61  ;;  %vm2904_vm1 = vweird.f32 %v6011_v33  ;;  %vm9078_vm11 = vmor %vm2888_vm2, %vm2889_vm0 }
 0x2e3   : > { %v2937_v3 = vand.u32 2147483647, %v8791_v24  ;;  %v2939_v4 = vand.u32 2147483648, %v8791_v24  ;;  %v2887_v31 = vadd.f32 %v8998_v6, %v2886_v36  ;;  %v2929_v56 = vmul.f32 %v9046_v40, %v8791_v24  ;;  %vm9065_vm5 = vmor %vm2903_vm14, %vm2904_vm1  ;;  %v5461_v36 = vld [vmem:[#allocation10 + $0x30] sm:$0xff] }
 0x2e4   : > { %v2915_v50 = vsub.f32 1.0, %v2914_v63  ;;  %vm2933_vm7 = vweird.f32 %v8791_v24  ;;  %v9055_v15 = vadd.f32 %v8973_v46, %v2871_v7  ;;  %v2902_v47 = vadd.f32 %v6011_v33, %v2901_v35  ;;  %vm9113_vm0 = vmor %vm2873_vm6, %vm2874_vm10  ;;  %3490 = vmatpush.bf16.msrb.mxu3 %v5461_v36 }
 0x2e5   : > { %vm9057_vm12 = vcmp.eq.f32.partialorder %v2922_v51, 8.507059e+37  ;;  %v2925_v10 = vor.u32 1.1754944e-38, %v2924_v55  ;;  %vm2919_vm4 = vweird.f32 %v9032_v13  ;;  %v2930_v34 = vsub.f32 1.0, %v2929_v56 }
 0x2e6   : > { %v2916_v20 = vmul.f32 %v9032_v13, %v2915_v50  ;;  %6018 = vrcp.f32 %v8801_v37  ;;  %v2906_v42 = vsel %vm9065_vm5, %v6011_v33, %v2902_v47  ;;  %vm9084_vm15 = vcmp.eq.f32.partialorder %v2937_v3, 8.507059e+37  ;;  %vm9102_vm3 = vmor %vm2918_vm9, %vm2919_vm4  ;;  %v5460_v50 = vld [vmem:[#allocation10 + $0x28] sm:$0xff] }
 0x2e7   : > { %v9072_v48 = vpop.eup %6016  ;;  %v2940_v38 = vor.u32 1.1754944e-38, %v2939_v4  ;;  %v2952_v43 = vand.u32 2147483647, %v8798_v59  ;;  %v2891_v16 = vsel %vm9078_vm11, %v8998_v6, %v2887_v31  ;;  %v2931_v7 = vmul.f32 %v9046_v40, %v2930_v34 }
 0x2e8   : > { %v2917_v51 = vadd.f32 %v9032_v13, %v2916_v20  ;;  %v2944_v33 = vmul.f32 %v9072_v48, %v8798_v59  ;;  %v2911_v61 = vsel %vm9027_vm13, %v2910_v5, %v2906_v42  ;;  %vm2934_vm2 = vweird.f32 %v9046_v40  ;;  %v9152_v20 = vpop.f32.mrf.mxu2  ;;  %3491 = vmatpush.bf16.msrb.mxu3 %v5460_v50 }
 0x2e9   : > { %vm2948_vm14 = vweird.f32 %v8798_v59  ;;  %v2954_v6 = vand.u32 2147483648, %v8798_v59  ;;  %v2932_v5 = vadd.f32 %v9046_v40, %v2931_v7  ;;  %6020 = vrcp.f32 %v8804_v14  ;;  %vm9134_vm10 = vmor %vm2933_vm7, %vm2934_vm2 }
 0x2ea   : > { %v2921_v2 = vsel %vm9102_vm3, %v9032_v13, %v2917_v51  ;;  %v2945_v63 = vsub.f32 1.0, %v2944_v33  ;;  %v2876_v35 = vsel %vm9113_vm0, %v8973_v46, %v9055_v15  ;;  %v2896_v3 = vsel %vm9039_vm8, %v2895_v25, %v2891_v16 }
 0x2eb   : > { %v2967_v4 = vand.u32 2147483647, %v8801_v37  ;;  %v2969_v31 = vand.u32 2147483648, %v8801_v37  ;;  %vm2949_vm13 = vweird.f32 %v9072_v48  ;;  %vm9140_vm6 = vcmp.eq.f32.partialorder %v2952_v43, 8.507059e+37 }
 0x2ec   : > { %v6019_v13 = vpop.eup %6018  ;;  %v2946_v47 = vmul.f32 %v9072_v48, %v2945_v63  ;;  %6022 = vrcp.f32 %v8815_v1  ;;  %v2912_v44 = vmul.f32 %v2911_v61, %v8744_v8  ;;  %v2926_v32 = vsel %vm9057_vm12, %v2925_v10, %v2921_v2  ;;  %vm9165_vm1 = vmor %vm2948_vm14, %vm2949_vm13 }
 0x2ed   : > { %v2936_v24 = vsel %vm9134_vm10, %v9046_v40, %v2932_v5  ;;  %v2959_v12 = vmul.f32 %v6019_v13, %v8801_v37  ;;  %v2897_v34 = vmul.f32 %v2896_v3, %v8742_v57  ;;  %v2955_v42 = vor.u32 1.1754944e-38, %v2954_v6  ;;  %v5458_v6 = vld [vmem:[#allocation10 + $0x18] sm:$0xff]  ;;  %v3348_v57 = vpop.f32.mrf.mxu1 }
 0x2ee   : > { %v2947_v22 = vadd.f32 %v9072_v48, %v2946_v47  ;;  %vm2963_vm8 = vweird.f32 %v8801_v37  ;;  %vm9159_vm9 = vcmp.eq.f32.partialorder %v2877_v29, 8.507059e+37  ;;  %vm9169_vm7 = vcmp.eq.f32.partialorder %v2967_v4, 8.507059e+37  ;;  %v5459_v29 = vld [vmem:[#allocation10 + $0x20] sm:$0xff] }
 0x2ef   : > { %v2960_v62 = vsub.f32 1.0, %v2959_v12  ;;  %v2970_v10 = vor.u32 1.1754944e-38, %v2969_v31  ;;  %vm10643_vm12 = vcmask 1041409   ;;  %v6021_v43 = vpop.eup %6020  ;;  %v2927_v36 = vmul.f32 %v2926_v32, %v8750_v11  ;;  %3492 = vmatpush.bf16.msrb.mxu3 %v5459_v29  ;;  %v6148_v29 = vld [vmem:[%s6665_s22 + $0x38] sm:$0xff] }
 0x2f0   : > { %v3116_v23 = vsel %vm10643_vm12, %v8976_v30, %v8966_v21  ;;  %v2941_v59 = vsel %vm9084_vm15, %v2940_v38, %v2936_v24  ;;  %v2951_v16 = vsel %vm9165_vm1, %v9072_v48, %v2947_v22  ;;  %vm10644_vm5 = vcmask 1042434   ;;  %vm10645_vm11 = vmmov %vm10643_vm12  ;;  %v9202_v50 = vpop.f32.mrf.mxu2 }
 0x2f1   : > { %v3117_v51 = vsel %vm10644_vm5, %v8979_v19, %v3116_v23  ;;  %v2961_v7 = vmul.f32 %v6019_v13, %v2960_v62  ;;  %vm2964_vm4 = vweird.f32 %v6019_v13  ;;  %v2974_v33 = vmul.f32 %v6021_v43, %v8804_v14  ;;  %vm10648_vm10 = vmmov %vm10644_vm5  ;;  %v3319_v62 = vpop.f32.mrf.mxu0 }
 0x2f2   : > { %v3123_v21 = vsel %vm10645_vm11, %v2912_v44, %v2897_v34  ;;  %v6023_v30 = vpop.eup %6022  ;;  %vm2978_vm3 = vweird.f32 %v8804_v14  ;;  %v2982_v11 = vand.u32 2147483647, %v8804_v14  ;;  %v2984_v41 = vand.u32 2147483648, %v8804_v14  ;;  %vm2965_vm2 = vmor %vm2963_vm8, %vm2964_vm4 }
 0x2f3   : > { %vm10646_vm15 = vcmask 1043459   ;;  %v2956_v48 = vsel %vm9140_vm6, %v2955_v42, %v2951_v16  ;;  %v2962_v19 = vadd.f32 %v6019_v13, %v2961_v7  ;;  %v2975_v61 = vsub.f32 1.0, %v2974_v33  ;;  %3493 = vmatpush.bf16.msrb.mxu3 %v5458_v6 }
 0x2f4   : > { %v3118_v38 = vsel %vm10646_vm15, %v8991_v52, %v3117_v51  ;;  %v2989_v55 = vmul.f32 %v6023_v30, %v8815_v1  ;;  %v2942_v2 = vmul.f32 %v2941_v59, %v8752_v27  ;;  %v2997_v5 = vand.u32 2147483647, %v8815_v1  ;;  %vm10649_vm6 = vmmov %vm10646_vm15  ;;  %v5455_v51 = vld [vmem:[#allocation10] sm:$0xff] }
 0x2f5   : > { %vm10647_vm14 = vcmask 1044484   ;;  %v3124_v63 = vsel %vm10648_vm10, %v2927_v36, %v3123_v21  ;;  %v2966_v3 = vsel %vm2965_vm2, %v6019_v13, %v2962_v19  ;;  %v2976_v4 = vmul.f32 %v6021_v43, %v2975_v61  ;;  %v5457_v13 = vld [vmem:[#allocation10 + $0x10] sm:$0xff]  ;;  %v3350_v7 = vpop.f32.mrf.mxu1 }
 0x2f6   : > { %v3119_v52 = vsel %vm10647_vm14, %v9005_v17, %v3118_v38  ;;  %vm2979_vm13 = vweird.f32 %v6021_v43  ;;  %v2990_v31 = vsub.f32 1.0, %v2989_v55  ;;  %v2957_v56 = vmul.f32 %v2956_v48, %v8754_v54  ;;  %vm10651_vm12 = vmmov %vm10647_vm14 }
 0x2f7   : > { %v2971_v27 = vsel %vm9169_vm7, %v2970_v10, %v2966_v3  ;;  %v2999_v37 = vand.u32 2147483648, %v8815_v1  ;;  %v3125_v47 = vsel %vm10649_vm6, %v2942_v2, %v3124_v63  ;;  %v2977_v25 = vadd.f32 %v6021_v43, %v2976_v4  ;;  %vm2980_vm7 = vmor %vm2978_vm3, %vm2979_vm13  ;;  %3494 = vmatpush.bf16.msrb.mxu3 %v5457_v13  ;;  %v6147_v10 = vld [vmem:[%s6665_s22 + $0x30] sm:$0xff]  ;;  %v804_v63 = vpop.f32.mrf.mxu3 }
 0x2f8   : > { %v2991_v44 = vmul.f32 %v6023_v30, %v2990_v31  ;;  %vm2994_vm8 = vweird.f32 %v6023_v30  ;;  %vm10650_vm1 = vcmask 1045509   ;;  %v2881_v54 = vsel %vm9159_vm9, %v9011_v45, %v2876_v35  ;;  %v782_v40 = vpop.f32.mrf.mxu2 }
 0x2f9   : > { %v3120_v17 = vsel %vm10650_vm1, %v9015_v26, %v3119_v52  ;;  %v2972_v32 = vmul.f32 %v2971_v27, %v8756_v28  ;;  %v2985_v24 = vor.u32 1.1754944e-38, %v2984_v41  ;;  %v3126_v26 = vsel %vm10651_vm12, %v2957_v56, %v3125_v47  ;;  %vm10653_vm9 = vmmov %vm10650_vm1 }
 0x2fa   : > { %v2981_v12 = vsel %vm2980_vm7, %v6021_v43, %v2977_v25  ;;  %vm2983_vm5 = vcmp.eq.f32.partialorder %v2982_v11, 8.507059e+37  ;;  %v2992_v34 = vadd.f32 %v6023_v30, %v2991_v44  ;;  %vm2993_vm4 = vweird.f32 %v8815_v1 }
 0x2fb   : > { %v2986_v60 = vsel %vm2983_vm5, %v2985_v24, %v2981_v12  ;;  %vm2995_vm0 = vmor %vm2993_vm4, %vm2994_vm8  ;;  %v3000_v46 = vor.u32 1.1754944e-38, %v2999_v37  ;;  %vm10652_vm11 = vcmask 1046534   ;;  %v3127_v28 = vsel %vm10653_vm9, %v2972_v32, %v3126_v26 }
 0x2fc   : > { %v3121_v45 = vsel %vm10652_vm11, %v9024_v18, %v3120_v17  ;;  %v2882_v15 = vmul.f32 %v2881_v54, %v8740_v58  ;;  %v2987_v14 = vmul.f32 %v2986_v60, %v8760_v53  ;;  %v2996_v35 = vsel %vm2995_vm0, %v6023_v30, %v2992_v34  ;;  %vm10655_vm2 = vmmov %vm10652_vm11  ;;  %v5456_v18 = vld [vmem:[#allocation10 + $0x8] sm:$0xff] }
 0x2fd   : > { %vm2998_vm3 = vcmp.eq.f32.partialorder %v2997_v5, 8.507059e+37  ;;  %vm10654_vm15 = vcmask 1047559   ;;  %3495 = vmatpush.bf16.msrb.mxu3 %v5456_v18  ;;  %v9235_v53 = vadd.f32 %v3348_v57, %v9061_v0  ;;  %v3321_v0 = vpop.f32.mrf.mxu0  ;;  %v9250_v21 = vadd.f32 %v3350_v7, %v9152_v20  ;;  %v3353_v19 = vpop.f32.mrf.mxu1 }
 0x2fe   : > { %v3001_v22 = vsel %vm2998_vm3, %v3000_v46, %v2996_v35  ;;  %v3122_v42 = vsel %vm10654_vm15, %v2882_v15, %v3121_v45  ;;  %v3128_v8 = vsel %vm10655_vm2, %v2987_v14, %v3127_v28  ;;  %vm10656_vm14 = vmmov %vm10654_vm15  ;;  %v9255_v61 = vadd.f32 %v3353_v19, %v9202_v50 }
 0x2ff   : > { %v3002_v1 = vmul.f32 %v3001_v22, %v8782_v9  ;;  %10657 = vst [vmem:[#allocation46_spill] sm:$0xff] %v9235_v53  ;;  %v9238_v23 = vmul.f32 %v6147_v10, %v3122_v42  ;;  %v9243_v9 = vld [vmem:[#allocation8] ss:$0 sm:$0xff]  ;;  %v806_v27 = vpop.f32.mrf.mxu3 }
 0x300   : > { %v785_v59 = vpop.f32.mrf.mxu2  ;;  %v3401_v16 = vadd.f32 %v9243_v9, %v3319_v62  ;;  %v3402_v33 = vadd.f32 %v9243_v9, %v3321_v0  ;;  %10658 = vst [vmem:[#allocation47_spill] sm:$0xff] %v9250_v21 }
 0x301   : > { %v3129_v58 = vsel %vm10656_vm14, %v3002_v1, %v3128_v8  ;;  %3496 = vmatpush.bf16.msrb.mxu3 %v5455_v51  ;;  %10659 = vst [vmem:[#allocation48_spill] sm:$0xff] %v9255_v61 }
 0x302   : > { %v9241_v43 = vmul.f32 %v6148_v29, %v3129_v58  ;;  %v3409_v30 = vmax.f32 %v3401_v16, 0.0  ;;  %v3410_v11 = vmax.f32 %v3402_v33, 0.0 }
 0x304   : > { %v3181_v36 = vpack.c.bf16 %v9241_v43, %v9238_v23  ;;  %v3433_v41 = vpack.c.bf16 %v3410_v11, %v3409_v30  ;;  %v9290_v30 = vld [vmem:[%s10130_s6] ss:$0 sm:$0xff] }
 0x305   : > { %v3324_v48 = vpop.f32.mrf.mxu0  ;;  %v3355_v2 = vpop.f32.mrf.mxu1 }
 0x306   : > { %3333 = vmatmul.bf16.gmra.mxu0 %v3181_v36  ;;  %3362 = vmatmul.bf16.gmra.mxu1 %v3181_v36  ;;  %v9260_v20 = vadd.f32 %v3355_v2, %v782_v40  ;;  %v3403_v52 = vadd.f32 %v9243_v9, %v3324_v48 }
 0x307   : > { %3391 = vmatmul.bf16.gmra.mxu2 %v3181_v36  ;;  %3497 = vmatmul.bf16.vlgmr.msrb.gmra.mxu3 %v3433_v41  ;;  %v809_v13 = vpop.f32.mrf.mxu3 }
 0x308   : > { %v9252_v38 = vpop.f32.mrf.mxu2  ;;  %10660 = vst [vmem:[#allocation49_spill] sm:$0xff] %v9260_v20  ;;  %v3411_v4 = vmax.f32 %v3403_v52, 0.0 }
 0x30d   : > { %v3326_v6 = vpop.f32.mrf.mxu0 }
 0x30e   : > { %v3404_v5 = vadd.f32 %v9243_v9, %v3326_v6 }
 0x30f   : > { %v811_v28 = vpop.f32.mrf.mxu3 }
 0x310   : > { %v9257_v55 = vpop.f32.mrf.mxu2  ;;  %v3412_v3 = vmax.f32 %v3404_v5, 0.0 }
 0x312   : > { %v3434_v56 = vpack.c.bf16 %v3412_v3, %v3411_v4 }
 0x317   : > { %3502 = vmatmul.bf16.gmra.mxu3 %v3434_v56  ;;  %v814_v35 = vpop.f32.mrf.mxu3 }
 0x318   : > { %v9263_v31 = vpop.f32.mrf.mxu2 }
 0x319   : > { %10661 = vst [vmem:[#allocation50_spill] sm:$0xff] %v9263_v31 }
 0x31f   : > { %v816_v42 = vpop.f32.mrf.mxu3 }
 0x320   : > { %v3377_v50 = vpop.f32.mrf.mxu2 }
 0x321   : > { %v9265_v37 = vadd.f32 %v3377_v50, %v804_v63 }
 0x325   : > { %v3329_v47 = vpop.f32.mrf.mxu0  ;;  %v3358_v25 = vpop.f32.mrf.mxu1 }
 0x326   : > { %v9267_v44 = vadd.f32 %v3358_v25, %v785_v59  ;;  %v3405_v54 = vadd.f32 %v9243_v9, %v3329_v47 }
 0x327   : > { %v819_v62 = vpop.f32.mrf.mxu3 }
 0x328   : > { %10662 = vst [vmem:[#allocation86_spill] sm:$0xff] %v9267_v44  ;;  %v3379_v17 = vpop.f32.mrf.mxu2  ;;  %v3413_v12 = vmax.f32 %v3405_v54, 0.0 }
 0x329   : > { %v9270_v32 = vadd.f32 %v3379_v17, %v806_v27 }
 0x32d   : > { %v3331_v24 = vpop.f32.mrf.mxu0 }
 0x32e   : > { %v3406_v26 = vadd.f32 %v9243_v9, %v3331_v24 }
 0x32f   : > { %v9285_v0 = vpop.f32.mrf.mxu3 }
 0x330   : > { %v3414_v34 = vmax.f32 %v3406_v26, 0.0  ;;  %v3382_v46 = vpop.f32.mrf.mxu2 }
 0x331   : > { %v9273_v45 = vadd.f32 %v3382_v46, %v809_v13 }
 0x332   : > { %v3435_v60 = vpack.c.bf16 %v3414_v34, %v3413_v12 }
 0x334   : > { %3507 = vmatmul.bf16.gmra.mxu3 %v3435_v60 }
 0x338   : > { %v3384_v15 = vpop.f32.mrf.mxu2 }
 0x339   : > { %v9275_v14 = vadd.f32 %v3384_v15, %v811_v28 }
 0x340   : > { %v3387_v22 = vpop.f32.mrf.mxu2 }
 0x341   : > { %v9277_v1 = vadd.f32 %v3387_v22, %v814_v35 }
 0x348   : > { %v3389_v8 = vpop.f32.mrf.mxu2 }
 0x349   : > { %v9279_v40 = vadd.f32 %v3389_v8, %v816_v42 }
 0x383   : > { %v3334_v18 = vpop.f32.mrf.mxu0 }
 0x384   : > { %v3407_v57 = vadd.f32 %v9243_v9, %v3334_v18 }
 0x386   : > { %v3415_v59 = vmax.f32 %v3407_v57, 0.0 }
 0x38a   : > { %v3392_v58 = vpop.f32.mrf.mxu2  ;;  %v3498_v7 = vpop.f32.mrf.mxu3 }
 0x38b   : > { %v9282_v10 = vadd.f32 %v3392_v58, %v819_v62  ;;  %v3336_v29 = vpop.f32.mrf.mxu0  ;;  %v3499_v41 = vadd.f32 %v9290_v30, %v3498_v7 }
 0x38c   : > { %v3408_v36 = vadd.f32 %v9243_v9, %v3336_v29 }
 0x38d   : > { %v3518_v19 = vrot.slane %v3499_v41, 4 }
 0x38e   : > { %v3416_v16 = vmax.f32 %v3408_v36, 0.0 }
 0x38f   : > { %v3519_v6 = vmax.f32 %v3499_v41, %v3518_v19 }
 0x390   : > { %v3436_v51 = vpack.c.bf16 %v3416_v16, %v3415_v59 }
 0x391   : > { %v3520_v5 = vrot.slane %v3519_v6, 2 }
 0x392   : > { %3512 = vmatmul.bf16.gmra.mxu3 %v3436_v51  ;;  %v3500_v33 = vpop.f32.mrf.mxu3 }
 0x393   : > { %v3501_v11 = vadd.f32 %v9290_v30, %v3500_v33  ;;  %v3521_v3 = vmax.f32 %v3519_v6, %v3520_v5 }
 0x395   : > { %v3524_v48 = vrot.slane %v3501_v11, 4  ;;  %v3522_v50 = vrot.slane %v3521_v3, 1 }
 0x397   : > { %v3525_v9 = vmax.f32 %v3501_v11, %v3524_v48  ;;  %v3523_v13 = vmax.f32 %v3521_v3, %v3522_v50 }
 0x399   : > { %v3526_v2 = vrot.slane %v3525_v9, 2  ;;  %v3566_v60 = vsub.f32 %v3499_v41, %v3523_v13 }
 0x39a   : > { %v3503_v63 = vpop.f32.mrf.mxu3 }
 0x39b   : > { %v3527_v52 = vmax.f32 %v3525_v9, %v3526_v2  ;;  %v3504_v4 = vadd.f32 %v9290_v30, %v3503_v63  ;;  %v3574_v22 = vmul.f32 1.442695, %v3566_v60 }
 0x39d   : > { %v3528_v56 = vrot.slane %v3527_v52, 1  ;;  %v3530_v27 = vrot.slane %v3504_v4, 4 }
 0x39f   : > { %v3531_v47 = vmax.f32 %v3504_v4, %v3530_v27  ;;  %v3529_v25 = vmax.f32 %v3527_v52, %v3528_v56 }
 0x3a1   : > { %v3532_v17 = vrot.slane %v3531_v47, 2  ;;  %v3567_v26 = vsub.f32 %v3501_v11, %v3529_v25 }
 0x3a2   : > { %v3505_v54 = vpop.f32.mrf.mxu3 }
 0x3a3   : > { %v3506_v24 = vadd.f32 %v9290_v30, %v3505_v54  ;;  %v3533_v12 = vmax.f32 %v3531_v47, %v3532_v17  ;;  %v3576_v28 = vmul.f32 1.442695, %v3567_v26 }
 0x3a5   : > { %v3536_v34 = vrot.slane %v3506_v24, 4  ;;  %v3534_v15 = vrot.slane %v3533_v12, 1  ;;  %6024 = vpow2.f32 %v3576_v28 }
 0x3a6   : > { %6026 = vpow2.f32 %v3574_v22 }
 0x3a7   : > { %v3537_v46 = vmax.f32 %v3506_v24, %v3536_v34  ;;  %v3535_v62 = vmax.f32 %v3533_v12, %v3534_v15 }
 0x3a9   : > { %v3538_v35 = vrot.slane %v3537_v46, 2  ;;  %v3568_v59 = vsub.f32 %v3504_v4, %v3535_v62 }
 0x3ab   : > { %v3539_v8 = vmax.f32 %v3537_v46, %v3538_v35  ;;  %v9297_v7 = vpop.eup %6024  ;;  %v3578_v19 = vmul.f32 1.442695, %v3568_v59 }
 0x3ac   : > { %v9300_v48 = vpop.eup %6026  ;;  %v3596_v9 = vrot.slane %v9297_v7, 4 }
 0x3ad   : > { %v3540_v57 = vrot.slane %v3539_v8, 1  ;;  %v3590_v52 = vrot.slane %v9300_v48, 4  ;;  %6028 = vpow2.f32 %v3578_v19 }
 0x3ae   : > { %v3597_v4 = vadd.f32 %v9297_v7, %v3596_v9 }
 0x3af   : > { %v3541_v29 = vmax.f32 %v3539_v8, %v3540_v57  ;;  %v3591_v50 = vadd.f32 %v9300_v48, %v3590_v52 }
 0x3b0   : > { %v3598_v17 = vrot.slane %v3597_v4, 2 }
 0x3b1   : > { %v3569_v16 = vsub.f32 %v3506_v24, %v3541_v29  ;;  %v3592_v26 = vrot.slane %v3591_v50, 2 }
 0x3b2   : > { %v3599_v34 = vadd.f32 %v3598_v17, %v3597_v4 }
 0x3b3   : > { %v3580_v6 = vmul.f32 1.442695, %v3569_v16  ;;  %v9306_v54 = vpop.eup %6028  ;;  %v3593_v35 = vadd.f32 %v3592_v26, %v3591_v50 }
 0x3b4   : > { %v3602_v60 = vrot.slane %v9306_v54, 4  ;;  %v3600_v8 = vrot.slane %v3599_v34, 1 }
 0x3b5   : > { %6030 = vpow2.f32 %v3580_v6  ;;  %v3594_v57 = vrot.slane %v3593_v35, 1 }
 0x3b6   : > { %v9318_v29 = vadd.f32 %v3600_v8, %v3599_v34 }
 0x3b7   : > { %v3508_v42 = vpop.f32.mrf.mxu3  ;;  %v9320_v16 = vadd.f32 %v3594_v57, %v3593_v35 }
 0x3b8   : > { %v3509_v18 = vadd.f32 %v9290_v30, %v3508_v42  ;;  %vm3658_vm6 = vweird.f32 %v9318_v29 }
 0x3b9   : > { %vm3643_vm13 = vweird.f32 %v9320_v16 }
 0x3ba   : > { %v3542_v58 = vrot.slane %v3509_v18, 4 }
 0x3bb   : > { %v9308_v24 = vpop.eup %6030 }
 0x3bc   : > { %v3543_v36 = vmax.f32 %v3509_v18, %v3542_v58  ;;  %v3608_v46 = vrot.slane %v9308_v24, 4 }
 0x3be   : > { %v3544_v51 = vrot.slane %v3543_v36, 2  ;;  %v3609_v62 = vadd.f32 %v9308_v24, %v3608_v46 }
 0x3bf   : > { %v3510_v33 = vpop.f32.mrf.mxu3 }
 0x3c0   : > { %v3545_v11 = vmax.f32 %v3543_v36, %v3544_v51  ;;  %v3511_v41 = vadd.f32 %v9290_v30, %v3510_v33  ;;  %v3610_v59 = vrot.slane %v3609_v62, 2 }
 0x3c2   : > { %v3546_v2 = vrot.slane %v3545_v11, 1  ;;  %v3548_v5 = vrot.slane %v3511_v41, 4 }
 0x3c4   : > { %v3547_v63 = vmax.f32 %v3545_v11, %v3546_v2  ;;  %v3549_v3 = vmax.f32 %v3511_v41, %v3548_v5 }
 0x3c6   : > { %v3570_v56 = vsub.f32 %v3509_v18, %v3547_v63  ;;  %v3550_v27 = vrot.slane %v3549_v3, 2  ;;  %v3603_v18 = vadd.f32 %v9306_v54, %v3602_v60 }
 0x3c8   : > { %v3582_v47 = vmul.f32 1.442695, %v3570_v56  ;;  %v3551_v25 = vmax.f32 %v3549_v3, %v3550_v27  ;;  %v3604_v36 = vrot.slane %v3603_v18, 2 }
 0x3ca   : > { %6032 = vpow2.f32 %v3582_v47  ;;  %v3552_v13 = vrot.slane %v3551_v25, 1  ;;  %v3605_v11 = vadd.f32 %v3604_v36, %v3603_v18 }
 0x3cc   : > { %v3553_v12 = vmax.f32 %v3551_v25, %v3552_v13  ;;  %v3606_v5 = vrot.slane %v3605_v11, 1 }
 0x3ce   : > { %v3571_v28 = vsub.f32 %v3511_v41, %v3553_v12  ;;  %v3611_v41 = vadd.f32 %v3610_v59, %v3609_v62  ;;  %v9333_v25 = vadd.f32 %v3606_v5, %v3605_v11 }
 0x3d0   : > { %v9312_v15 = vpop.eup %6032  ;;  %v3584_v42 = vmul.f32 1.442695, %v3571_v28  ;;  %v3612_v52 = vrot.slane %v3611_v41, 1  ;;  %vm3673_vm4 = vweird.f32 %v9333_v25 }
 0x3d1   : > { %v3614_v22 = vrot.slane %v9312_v15, 4 }
 0x3d2   : > { %6034 = vpow2.f32 %v3584_v42  ;;  %v9337_v13 = vadd.f32 %v3612_v52, %v3611_v41  ;;  %v3664_v52 = vand.u32 2147483648, %v9318_v29 }
 0x3d3   : > { %v3615_v58 = vadd.f32 %v9312_v15, %v3614_v22  ;;  %6036 = vrcp.f32 %v9318_v29 }
 0x3d4   : > { %6038 = vrcp.f32 %v9320_v16  ;;  %vm3688_vm9 = vweird.f32 %v9337_v13 }
 0x3d5   : > { %v3616_v51 = vrot.slane %v3615_v58, 2  ;;  %6040 = vrcp.f32 %v9333_v25 }
 0x3d6   : > { %6042 = vrcp.f32 %v9337_v13 }
 0x3d7   : > { %v3617_v9 = vadd.f32 %v3616_v51, %v3615_v58 }
 0x3d8   : > { %v9322_v33 = vpop.eup %6034 }
 0x3d9   : > { %v3620_v19 = vrot.slane %v9322_v33, 4  ;;  %v9329_v4 = vpop.eup %6036  ;;  %v3618_v56 = vrot.slane %v3617_v9, 1 }
 0x3da   : > { %v9331_v47 = vpop.eup %6038  ;;  %v3654_v17 = vmul.f32 %v9329_v4, %v9318_v29  ;;  %vm3659_vm10 = vweird.f32 %v9329_v4 }
 0x3db   : > { %v3621_v6 = vadd.f32 %v9322_v33, %v3620_v19  ;;  %v9339_v34 = vadd.f32 %v3618_v56, %v3617_v9  ;;  %v3639_v60 = vmul.f32 %v9331_v47, %v9320_v16  ;;  %v9351_v36 = vpop.eup %6040  ;;  %vm3644_vm8 = vweird.f32 %v9331_v47  ;;  %vm9374_vm1 = vmor %vm3658_vm6, %vm3659_vm10 }
 0x3dc   : > { %v3655_v42 = vsub.f32 1.0, %v3654_v17  ;;  %v9353_v51 = vpop.eup %6042  ;;  %vm9387_vm7 = vmor %vm3643_vm13, %vm3644_vm8  ;;  %vm3674_vm0 = vweird.f32 %v9351_v36 }
 0x3dd   : > { %v3622_v63 = vrot.slane %v3621_v6, 2  ;;  %6044 = vrcp.f32 %v9339_v34  ;;  %v3640_v18 = vsub.f32 1.0, %v3639_v60  ;;  %vm3689_vm3 = vweird.f32 %v9353_v51  ;;  %vm9423_vm2 = vmor %vm3673_vm4, %vm3674_vm0 }
 0x3de   : > { %v3656_v57 = vmul.f32 %v9329_v4, %v3655_v42  ;;  %v3647_v42 = vand.u32 2147483647, %v9320_v16  ;;  %vm9437_vm10 = vmor %vm3688_vm9, %vm3689_vm3  ;;  %vm3703_vm13 = vweird.f32 %v9339_v34 }
 0x3df   : > { %v3623_v27 = vadd.f32 %v3622_v63, %v3621_v6  ;;  %v3641_v41 = vmul.f32 %v9331_v47, %v3640_v18  ;;  %v3684_v63 = vmul.f32 %v9353_v51, %v9337_v13 }
 0x3e0   : > { %v3657_v6 = vadd.f32 %v9329_v4, %v3656_v57  ;;  %vm3648_vm5 = vcmp.eq.f32.partialorder %v3647_v42, 8.507059e+37  ;;  %v5477_v57 = vld [vmem:[#allocation11 + $0x70] sm:$0xff] }
 0x3e1   : > { %v3624_v26 = vrot.slane %v3623_v27, 1  ;;  %v3685_v18 = vsub.f32 1.0, %v3684_v63 }
 0x3e3   : > { %v9344_v28 = vadd.f32 %v3624_v26, %v3623_v27  ;;  %v3662_v27 = vand.u32 2147483647, %v9318_v29  ;;  %v3642_v26 = vadd.f32 %v9331_v47, %v3641_v41  ;;  %v3661_v29 = vsel %vm9374_vm1, %v9329_v4, %v3657_v6 }
 0x3e5   : > { %6046 = vrcp.f32 %v9344_v28  ;;  %vm3663_vm12 = vcmp.eq.f32.partialorder %v3662_v27, 8.507059e+37  ;;  %vm3718_vm8 = vweird.f32 %v9344_v28 }
 0x415   : > { %v3513_v2 = vpop.f32.mrf.mxu3 }
 0x416   : > { %v3514_v3 = vadd.f32 %v9290_v30, %v3513_v2  ;;  %v3669_v2 = vmul.f32 %v9351_v36, %v9333_v25 }
 0x418   : > { %v3554_v50 = vrot.slane %v3514_v3, 4 }
 0x41a   : > { %v3555_v12 = vmax.f32 %v3514_v3, %v3554_v50 }
 0x41c   : > { %v3556_v35 = vrot.slane %v3555_v12, 2 }
 0x41d   : > { %v3515_v46 = vpop.f32.mrf.mxu3 }
 0x41e   : > { %v3516_v22 = vadd.f32 %v9290_v30, %v3515_v46  ;;  %v3557_v8 = vmax.f32 %v3555_v12, %v3556_v35  ;;  %v9355_v30 = vpop.eup %6044  ;;  %v3649_v46 = vand.u32 2147483648, %v9320_v16  ;;  %v3670_v35 = vsub.f32 1.0, %v3669_v2 }
 0x41f   : > { %v9358_v9 = vpop.eup %6046  ;;  %v3699_v50 = vmul.f32 %v9355_v30, %v9339_v34  ;;  %v3677_v2 = vand.u32 2147483647, %v9333_v25  ;;  %v3679_v16 = vand.u32 2147483648, %v9333_v25  ;;  %vm3704_vm15 = vweird.f32 %v9355_v30 }
 0x420   : > { %v3560_v62 = vrot.slane %v3516_v22, 4  ;;  %v3558_v58 = vrot.slane %v3557_v8, 1  ;;  %v3714_v12 = vmul.f32 %v9358_v9, %v9344_v28  ;;  %v3671_v6 = vmul.f32 %v9351_v36, %v3670_v35  ;;  %vm9451_vm6 = vmor %vm3703_vm13, %vm3704_vm15 }
 0x421   : > { %vm9409_vm11 = vcmp.eq.f32.partialorder %v3677_v2, 8.507059e+37  ;;  %vm3719_vm14 = vweird.f32 %v9358_v9  ;;  %vm10682_vm13 = vcmask 1042434  }
 0x422   : > { %v3561_v59 = vmax.f32 %v3516_v22, %v3560_v62  ;;  %v3559_v11 = vmax.f32 %v3557_v8, %v3558_v58  ;;  %v3665_v8 = vor.u32 1.1754944e-38, %v3664_v52  ;;  %v3700_v58 = vsub.f32 1.0, %v3699_v50 }
 0x424   : > { %v3562_v19 = vrot.slane %v3561_v59, 2  ;;  %v3572_v5 = vsub.f32 %v3514_v3, %v3559_v11  ;;  %v3666_v4 = vsel %vm3663_vm12, %v3665_v8, %v3661_v29  ;;  %v3715_v11 = vsub.f32 1.0, %v3714_v12 }
 0x425   : > { %v9401_v27 = vmul.f32 %v9297_v7, %v3666_v4  ;;  %v3680_v3 = vor.u32 1.1754944e-38, %v3679_v16  ;;  %v3694_v29 = vand.u32 2147483648, %v9337_v13  ;;  %v3709_v8 = vand.u32 2147483648, %v9339_v34 }
 0x426   : > { %v3563_v56 = vmax.f32 %v3561_v59, %v3562_v19  ;;  %v3586_v17 = vmul.f32 1.442695, %v3572_v5  ;;  %v3646_v59 = vsel %vm9387_vm7, %v9331_v47, %v3642_v26  ;;  %v3650_v19 = vor.u32 1.1754944e-38, %v3649_v46  ;;  %vm9462_vm7 = vmor %vm3718_vm8, %vm3719_vm14 }
 0x427   : > { %v3686_v5 = vmul.f32 %v9353_v51, %v3685_v18  ;;  %v3701_v47 = vmul.f32 %v9355_v30, %v3700_v58  ;;  %v3692_v46 = vand.u32 2147483647, %v9337_v13  ;;  %v3724_v4 = vand.u32 2147483648, %v9344_v28 }
 0x428   : > { %v3564_v60 = vrot.slane %v3563_v56, 1  ;;  %6048 = vpow2.f32 %v3586_v17  ;;  %v3672_v17 = vadd.f32 %v9351_v36, %v3671_v6  ;;  %vm10684_vm8 = vcmask 1044484  }
 0x429   : > { %v3687_v7 = vadd.f32 %v9353_v51, %v3686_v5  ;;  %v3702_v35 = vadd.f32 %v9355_v30, %v3701_v47  ;;  %vm3693_vm1 = vcmp.eq.f32.partialorder %v3692_v46, 8.507059e+37  ;;  %v3710_v5 = vor.u32 1.1754944e-38, %v3709_v8  ;;  %v5476_v47 = vld [vmem:[#allocation11 + $0x68] sm:$0xff] }
 0x42a   : > { %v3565_v62 = vmax.f32 %v3563_v56, %v3564_v60  ;;  %v3651_v56 = vsel %vm3648_vm5, %v3650_v19, %v3646_v59  ;;  %v5478_v60 = vld [vmem:[#allocation11 + $0x78] sm:$0xff]  ;;  %v3676_v58 = vsel %vm9423_vm2, %v9351_v36, %v3672_v17  ;;  %v3707_v59 = vand.u32 2147483647, %v9339_v34 }
 0x42b   : > { %4233 = vmatpush.bf16.msra.mxu2 %v5478_v60  ;;  %v3691_v36 = vsel %vm9437_vm10, %v9353_v51, %v3687_v7  ;;  %v3695_v34 = vor.u32 1.1754944e-38, %v3694_v29  ;;  %v3706_v6 = vsel %vm9451_vm6, %v9355_v30, %v3702_v35  ;;  %v3681_v16 = vsel %vm9409_vm11, %v3680_v3, %v3676_v58  ;;  %v10677_v29 = vld [vmem:[#allocation33_spill] sm:$0xff] }
 0x42c   : > { %v3573_v41 = vsub.f32 %v3516_v22, %v3565_v62  ;;  %v3716_v22 = vmul.f32 %v9358_v9, %v3715_v11  ;;  %vm3708_vm12 = vcmp.eq.f32.partialorder %v3707_v59, 8.507059e+37  ;;  %v3652_v60 = vmul.f32 %v9300_v48, %v3651_v56  ;;  %v10679_v58 = vld [vmem:[#allocation41_spill] sm:$0xff]  ;;  %v10680_v59 = vld [vmem:[#allocation28_spill] sm:$0xff] }
 0x42d   : > { %v3696_v30 = vsel %vm3693_vm1, %v3695_v34, %v3691_v36  ;;  %v3711_v17 = vsel %vm3708_vm12, %v3710_v5, %v3706_v6  ;;  %v3759_v35 = vmul.f32 %v9401_v27, %v10677_v29  ;;  %v5473_v34 = vld [vmem:[#allocation11 + $0x50] sm:$0xff]  ;;  %vm10681_vm10 = vcmask 1041409  }
 0x42e   : > { %v3588_v52 = vmul.f32 1.442695, %v3573_v41  ;;  %v9398_v63 = vpop.eup %6048  ;;  %v3717_v18 = vadd.f32 %v9358_v9, %v3716_v22  ;;  %v3722_v41 = vand.u32 2147483647, %v9344_v28  ;;  %v3725_v22 = vor.u32 1.1754944e-38, %v3724_v4 }
 0x42f   : > { %v3626_v50 = vrot.slane %v9398_v63, 4  ;;  %4234 = vmatpush.bf16.msra.mxu2 %v5477_v57  ;;  %v3697_v46 = vmul.f32 %v9308_v24, %v3696_v30  ;;  %v3712_v42 = vmul.f32 %v9312_v15, %v3711_v17  ;;  %v3758_v25 = vmul.f32 %v3652_v60, %v10679_v58  ;;  %v5474_v24 = vld [vmem:[#allocation11 + $0x58] sm:$0xff] }
 0x430   : > { %6050 = vpow2.f32 %v3588_v52  ;;  %v3721_v28 = vsel %vm9462_vm7, %v9358_v9, %v3717_v18  ;;  %vm3723_vm5 = vcmp.eq.f32.partialorder %v3722_v41, 8.507059e+37  ;;  %v5475_v9 = vld [vmem:[#allocation11 + $0x60] sm:$0xff]  ;;  %v3772_v56 = vrot.slane %v3759_v35, 4 }
 0x431   : > { %v3627_v12 = vadd.f32 %v9398_v63, %v3626_v50  ;;  %v3726_v26 = vsel %vm3723_vm5, %v3725_v22, %v3721_v28  ;;  %v3761_v48 = vmul.f32 %v3697_v46, %v10680_v59  ;;  %v3762_v4 = vmul.f32 %v3712_v42, %v8686_v49 }
 0x432   : > { %v3727_v18 = vmul.f32 %v9322_v33, %v3726_v26  ;;  %v3766_v33 = vrot.slane %v3758_v25, 4  ;;  %v3773_v6 = vadd.f32 %v3772_v56, %v3759_v35  ;;  %vm10683_vm6 = vcmask 1043459  }
 0x433   : > { %v3628_v62 = vrot.slane %v3627_v12, 2  ;;  %4235 = vmatpush.bf16.msra.mxu2 %v5476_v47  ;;  %v3790_v51 = vrot.slane %v3762_v4, 4  ;;  %vm10685_vm1 = vcmask 1045509   ;;  %vm10686_vm7 = vcmask 1046534  }
 0x434   : > { %v3763_v15 = vmul.f32 %v3727_v18, %v8689_v39  ;;  %v3767_v47 = vadd.f32 %v3766_v33, %v3758_v25  ;;  %v5472_v39 = vld [vmem:[#allocation11 + $0x48] sm:$0xff]  ;;  %v5471_v18 = vld [vmem:[#allocation11 + $0x40] sm:$0xff]  ;;  %vm10687_vm12 = vcmask 1047559  }
 0x435   : > { %v3629_v19 = vadd.f32 %v3628_v62, %v3627_v12  ;;  %v3682_v12 = vmul.f32 %v9306_v54, %v3681_v16  ;;  %v10678_v62 = vld [vmem:[#allocation26_spill] sm:$0xff]  ;;  %v3791_v17 = vadd.f32 %v3790_v51, %v3762_v4 }
 0x436   : > { %v9444_v11 = vpop.eup %6050  ;;  %v3796_v16 = vrot.slane %v3763_v15, 4  ;;  %v3768_v29 = vrot.slane %v3767_v47, 2 }
 0x437   : > { %v3632_v2 = vrot.slane %v9444_v11, 4  ;;  %v3630_v52 = vrot.slane %v3629_v19, 1  ;;  %v3760_v57 = vmul.f32 %v3682_v12, %v10678_v62  ;;  %4236 = vmatpush.bf16.msra.mxu2 %v5475_v9 }
 0x438   : > { %v3797_v60 = vadd.f32 %v3796_v16, %v3763_v15  ;;  %v3769_v56 = vadd.f32 %v3768_v29, %v3767_v47 }
 0x439   : > { %v3633_v50 = vadd.f32 %v9444_v11, %v3632_v2  ;;  %v3631_v7 = vadd.f32 %v3630_v52, %v3629_v19  ;;  %v3778_v13 = vrot.slane %v3760_v57, 4  ;;  %v3784_v19 = vrot.slane %v3761_v48, 4 }
 0x43a   : > { %v3798_v59 = vrot.slane %v3797_v60, 2 }
 0x43b   : > { %v3634_v3 = vrot.slane %v3633_v50, 2  ;;  %6052 = vrcp.f32 %v3631_v7  ;;  %4237 = vmatpush.bf16.msra.mxu2 %v5474_v24  ;;  %v3739_v5 = vand.u32 2147483648, %v3631_v7  ;;  %v3779_v28 = vadd.f32 %v3778_v13, %v3760_v57 }
 0x43c   : > { %v3737_v52 = vand.u32 2147483647, %v3631_v7  ;;  %v3785_v30 = vadd.f32 %v3784_v19, %v3761_v48  ;;  %vm3733_vm0 = vweird.f32 %v3631_v7  ;;  %v3792_v57 = vrot.slane %v3791_v17, 2 }
 0x43d   : > { %v3635_v8 = vadd.f32 %v3634_v3, %v3633_v50  ;;  %v3774_v50 = vrot.slane %v3773_v6, 2  ;;  %v3740_v26 = vor.u32 1.1754944e-38, %v3739_v5  ;;  %v3780_v46 = vrot.slane %v3779_v28, 2 }
 0x43e   : > { %vm3738_vm9 = vcmp.eq.f32.partialorder %v3737_v52, 8.507059e+37  ;;  %v3786_v35 = vrot.slane %v3785_v30, 2  ;;  %v3793_v13 = vadd.f32 %v3792_v57, %v3791_v17  ;;  %v3799_v19 = vadd.f32 %v3798_v59, %v3797_v60 }
 0x43f   : > { %v3636_v54 = vrot.slane %v3635_v8, 1  ;;  %4238 = vmatpush.bf16.msra.mxu2 %v5473_v34  ;;  %v3775_v62 = vadd.f32 %v3774_v50, %v3773_v6  ;;  %v3781_v48 = vadd.f32 %v3780_v46, %v3779_v28 }
 0x440   : > { %v3787_v4 = vadd.f32 %v3786_v35, %v3785_v30  ;;  %v3794_v5 = vrot.slane %v3793_v13, 1  ;;  %v3800_v52 = vrot.slane %v3799_v19, 1 }
 0x441   : > { %v9484_v36 = vadd.f32 %v3636_v54, %v3635_v8  ;;  %v6053_v27 = vpop.eup %6052  ;;  %v3782_v34 = vrot.slane %v3781_v48, 1 }
 0x442   : > { %v3729_v41 = vmul.f32 %v6053_v27, %v3631_v7  ;;  %vm3734_vm4 = vweird.f32 %v6053_v27  ;;  %v3788_v16 = vrot.slane %v3787_v4, 1  ;;  %v9504_v17 = vadd.f32 %v3794_v5, %v3793_v13 }
 0x443   : > { %6054 = vrcp.f32 %v9484_v36  ;;  %vm3735_vm11 = vmor %vm3733_vm0, %vm3734_vm4  ;;  %4239 = vmatpush.bf16.msra.mxu2 %v5472_v39  ;;  %v3754_v7 = vand.u32 2147483648, %v9484_v36  ;;  %v3752_v25 = vand.u32 2147483647, %v9484_v36  ;;  %vm3748_vm15 = vweird.f32 %v9484_v36 }
 0x444   : > { %v3730_v2 = vsub.f32 1.0, %v3729_v41  ;;  %v3776_v41 = vrot.slane %v3775_v62, 1  ;;  %v9498_v47 = vadd.f32 %v3782_v34, %v3781_v48  ;;  %v3818_v35 = vpack.c.bf16 %v9504_v17, %v9504_v17 }
 0x445   : > { %v3755_v15 = vor.u32 1.1754944e-38, %v3754_v7  ;;  %vm3753_vm14 = vcmp.eq.f32.partialorder %v3752_v25, 8.507059e+37 }
 0x446   : > { %v3731_v49 = vmul.f32 %v6053_v27, %v3730_v2  ;;  %v3770_v2 = vrot.slane %v3769_v56, 1  ;;  %v3834_v25 = vunpack.c.l.b16 %v3818_v35 }
 0x447   : > { %4240 = vmatpush.bf16.msra.mxu2 %v5471_v18 }
 0x448   : > { %v3732_v12 = vadd.f32 %v6053_v27, %v3731_v49  ;;  %v9495_v49 = vadd.f32 %v3776_v41, %v3775_v62  ;;  %v9500_v39 = vadd.f32 %v3770_v2, %v3769_v56 }
 0x449   : > { %v6055_v22 = vpop.eup %6054 }
 0x44a   : > { %v3744_v3 = vmul.f32 %v6055_v22, %v9484_v36  ;;  %v3736_v9 = vsel %vm3735_vm11, %v6053_v27, %v3732_v12  ;;  %vm3749_vm3 = vweird.f32 %v6055_v22 }
 0x44b   : > { %v3741_v42 = vsel %vm3738_vm9, %v3740_v26, %v3736_v9  ;;  %vm3750_vm2 = vmor %vm3748_vm15, %vm3749_vm3  ;;  %v3814_v9 = vpack.c.bf16 %v9500_v39, %v9500_v39 }
 0x44c   : > { %v3745_v8 = vsub.f32 1.0, %v3744_v3  ;;  %v3742_v54 = vmul.f32 %v9398_v63, %v3741_v42  ;;  %v3815_v3 = vpack.c.bf16 %v9495_v49, %v9495_v49 }
 0x44d   : > { %v3830_v7 = vunpack.c.l.b16 %v3814_v9 }
 0x44e   : > { %v3746_v58 = vmul.f32 %v6055_v22, %v3745_v8  ;;  %v3764_v24 = vmul.f32 %v3742_v54, %v9238_v23  ;;  %v3831_v18 = vunpack.c.l.b16 %v3815_v3 }
 0x450   : > { %v3747_v27 = vadd.f32 %v6055_v22, %v3746_v58  ;;  %v3802_v63 = vrot.slane %v3764_v24, 4 }
 0x452   : > { %v3751_v33 = vsel %vm3750_vm2, %v6055_v22, %v3747_v27  ;;  %v3803_v51 = vadd.f32 %v3802_v63, %v3764_v24  ;;  %v9502_v22 = vadd.f32 %v3788_v16, %v3787_v4  ;;  %v3838_v24 = vsel %vm10681_vm10, %v3831_v18, %v3830_v7 }
 0x453   : > { %v3756_v6 = vsel %vm3753_vm14, %v3755_v15, %v3751_v33 }
 0x454   : > { %v3757_v23 = vmul.f32 %v9444_v11, %v3756_v6  ;;  %v3804_v28 = vrot.slane %v3803_v51, 2  ;;  %v9506_v11 = vadd.f32 %v3800_v52, %v3799_v19  ;;  %v3817_v29 = vpack.c.bf16 %v9502_v22, %v9502_v22  ;;  %v9535_v6 = vpop.f32.mrf.mxu1 }
 0x456   : > { %v3765_v36 = vmul.f32 %v3757_v23, %v9241_v43  ;;  %v3805_v30 = vadd.f32 %v3804_v28, %v3803_v51  ;;  %v3816_v43 = vpack.c.bf16 %v9498_v47, %v9498_v47  ;;  %v3819_v8 = vpack.c.bf16 %v9506_v11, %v9506_v11  ;;  %v9541_v23 = vpop.f32.mrf.mxu2 }
 0x457   : > { %v3833_v58 = vunpack.c.l.b16 %v3817_v29 }
 0x458   : > { %v3808_v50 = vrot.slane %v3765_v36, 4  ;;  %v3806_v12 = vrot.slane %v3805_v30, 1  ;;  %v3832_v57 = vunpack.c.l.b16 %v3816_v43  ;;  %v3835_v48 = vunpack.c.l.b16 %v3819_v8 }
 0x45a   : > { %v3809_v26 = vadd.f32 %v3808_v50, %v3765_v36  ;;  %v9510_v60 = vadd.f32 %v3806_v12, %v3805_v30  ;;  %v3839_v4 = vsel %vm10682_vm13, %v3832_v57, %v3838_v24  ;;  %v5470_v50 = vld [vmem:[#allocation11 + $0x38] sm:$0xff] }
 0x45b   : > { %v3840_v15 = vsel %vm10683_vm6, %v3833_v58, %v3839_v4  ;;  %4319 = vmatpush.bf16.msra.mxu3 %v5470_v50  ;;  %v6149_v4 = vld [vmem:[%s10126_s2] ss:$0 sm:$0xff] }
 0x45c   : > { %v3810_v46 = vrot.slane %v3809_v26, 2  ;;  %v3820_v62 = vpack.c.bf16 %v9510_v60, %v9510_v60  ;;  %v3841_v13 = vsel %vm10684_vm8, %v3834_v25, %v3840_v15  ;;  %v9537_v51 = vpop.f32.mrf.mxu1 }
 0x45d   : > { %v3842_v41 = vsel %vm10685_vm1, %v3835_v48, %v3841_v13  ;;  %10688 = vst [vmem:[#allocation94_spill] sm:$0xff] %v9537_v51 }
 0x45e   : > { %v3811_v42 = vadd.f32 %v3810_v46, %v3809_v26  ;;  %v3836_v56 = vunpack.c.l.b16 %v3820_v62 }
 0x460   : > { %v3812_v54 = vrot.slane %v3811_v42, 1  ;;  %v3843_v33 = vsel %vm10686_vm7, %v3836_v56, %v3842_v41 }
 0x462   : > { %v9524_v59 = vadd.f32 %v3812_v54, %v3811_v42  ;;  %v5469_v42 = vld [vmem:[#allocation11 + $0x30] sm:$0xff] }
 0x463   : > { %4320 = vmatpush.bf16.msra.mxu3 %v5469_v42 }
 0x464   : > { %v3821_v27 = vpack.c.bf16 %v9524_v59, %v9524_v59  ;;  %v9539_v2 = vpop.f32.mrf.mxu1 }
 0x465   : > { %10689 = vst [vmem:[#allocation51_spill] sm:$0xff] %v9539_v2 }
 0x466   : > { %v3837_v63 = vunpack.c.l.b16 %v3821_v27 }
 0x468   : > { %v3844_v19 = vsel %vm10687_vm12, %v3837_v63, %v3843_v33 }
 0x469   : > { %v3845_v34 = vpack.c.b16 %v3844_v19, %v3844_v19  ;;  %v5468_v19 = vld [vmem:[#allocation11 + $0x28] sm:$0xff] }
 0x46a   : > { %4321 = vmatpush.bf16.msra.mxu3 %v5468_v19 }
 0x46b   : > { %3855 = vmatmul.bf16.vlgmr.msra.gmra.mxu0 %v3845_v34  ;;  %3868 = vmatmul.bf16.vlgmr.msra.gmra.mxu1 %v3845_v34 }
 0x46c   : > { %4241 = vmatmul.bf16.vlgmr.msra.gmra.mxu2 %v3845_v34 }
 0x4e8   : > { %v3856_v16 = vpop.f32.mrf.mxu0  ;;  %v3869_v5 = vpop.f32.mrf.mxu1 }
 0x4e9   : > { %v3874_v28 = vrot.slane %v3856_v16, 1  ;;  %v3875_v36 = vrot.slane %v3856_v16, 2  ;;  %v3876_v52 = vrot.slane %v3856_v16, 3  ;;  %v3877_v30 = vrot.slane %v3856_v16, 4 }
 0x4ea   : > { %v3878_v12 = vrot.slane %v3856_v16, 5  ;;  %v3879_v26 = vrot.slane %v3856_v16, 6  ;;  %v3880_v3 = vrot.slane %v3856_v16, 7  ;;  %v3881_v43 = vperm.slane %v3856_v16, 0 }
 0x4eb   : > { %v3882_v46 = vperm.slane %v3874_v28, 0  ;;  %v3883_v9 = vperm.slane %v3875_v36, 0  ;;  %v3884_v29 = vperm.slane %v3876_v52, 0  ;;  %v3885_v35 = vperm.slane %v3877_v30, 0 }
 0x4ec   : > { %v3886_v8 = vperm.slane %v3878_v12, 0  ;;  %v3887_v18 = vperm.slane %v3879_v26, 0  ;;  %v3888_v62 = vperm.slane %v3880_v3, 0  ;;  %v3897_v57 = vadd.f32 %v3881_v43, %v3869_v5  ;;  %v5467_v43 = vld [vmem:[#allocation11 + $0x20] sm:$0xff] }
 0x4ed   : > { %v3898_v54 = vadd.f32 %v3882_v46, %v3869_v5  ;;  %v3899_v7 = vadd.f32 %v3883_v9, %v3869_v5  ;;  %v3900_v58 = vadd.f32 %v3884_v29, %v3869_v5  ;;  %v3901_v25 = vadd.f32 %v3885_v35, %v3869_v5  ;;  %4322 = vmatpush.bf16.msra.mxu3 %v5467_v43  ;;  %v5466_v35 = vld [vmem:[#allocation11 + $0x18] sm:$0xff] }
 0x4ee   : > { %v3902_v48 = vadd.f32 %v3886_v8, %v3869_v5  ;;  %v3903_v24 = vadd.f32 %v3887_v18, %v3869_v5  ;;  %v3904_v56 = vadd.f32 %v3888_v62, %v3869_v5  ;;  %v3905_v27 = vadd.f32 %v6149_v4, %v3897_v57 }
 0x4ef   : > { %v3906_v15 = vadd.f32 %v6149_v4, %v3898_v54  ;;  %v3907_v13 = vadd.f32 %v6149_v4, %v3899_v7  ;;  %v3908_v63 = vadd.f32 %v6149_v4, %v3900_v58  ;;  %v3909_v41 = vadd.f32 %v6149_v4, %v3901_v25  ;;  %v9546_v33 = vpop.f32.mrf.mxu2  ;;  %v5465_v25 = vld [vmem:[#allocation11 + $0x10] sm:$0xff] }
 0x4f0   : > { %v3910_v34 = vadd.f32 %v6149_v4, %v3902_v48  ;;  %v3911_v16 = vadd.f32 %v6149_v4, %v3903_v24  ;;  %v3913_v28 = vmul.f32 0.2, %v3905_v27  ;;  %v3858_v36 = vpop.f32.mrf.mxu0  ;;  %v3871_v52 = vpop.f32.mrf.mxu1  ;;  %v3912_v30 = vadd.f32 %v6149_v4, %v3904_v56 }
 0x4f1   : > { %v3914_v5 = vmul.f32 0.2, %v3906_v15  ;;  %v3915_v50 = vmul.f32 0.2, %v3907_v13  ;;  %v3916_v12 = vmul.f32 0.2, %v3908_v63  ;;  %4323 = vmatpush.bf16.msra.mxu3 %v5466_v35 }
 0x4f2   : > { %v3917_v26 = vmul.f32 0.2, %v3909_v41  ;;  %6056 = vtanh.f32 %v3913_v28  ;;  %v3918_v3 = vmul.f32 0.2, %v3910_v34  ;;  %v3919_v46 = vmul.f32 0.2, %v3911_v16 }
 0x4f3   : > { %6058 = vtanh.f32 %v3914_v5  ;;  %v3920_v9 = vmul.f32 0.2, %v3912_v30  ;;  %v5464_v28 = vld [vmem:[#allocation11 + $0x8] sm:$0xff] }
 0x4f4   : > { %6060 = vtanh.f32 %v3915_v50 }
 0x4f5   : > { %6062 = vtanh.f32 %v3916_v12  ;;  %4324 = vmatpush.bf16.msra.mxu3 %v5465_v25  ;;  %v5463_v12 = vld [vmem:[#allocation11] sm:$0xff] }
 0x4f6   : > { %6064 = vtanh.f32 %v3917_v26 }
 0x4f7   : > { %6066 = vtanh.f32 %v3918_v3  ;;  %v4244_v29 = vpop.f32.mrf.mxu2  ;;  %v10690_v3 = vld [vmem:[#allocation66_spill] sm:$0xff] }
 0x4f8   : > { %v6057_v42 = vpop.eup %6056  ;;  %6068 = vtanh.f32 %v3919_v46 }
 0x4f9   : > { %v6059_v8 = vpop.eup %6058  ;;  %6070 = vtanh.f32 %v3920_v9  ;;  %v3929_v18 = vmul.f32 5.0, %v6057_v42  ;;  %4325 = vmatpush.bf16.msra.mxu3 %v5464_v28  ;;  %v10691_v9 = vld [vmem:[#allocation65_spill] sm:$0xff] }
 0x4fa   : > { %v6061_v62 = vpop.eup %6060  ;;  %v3930_v57 = vmul.f32 5.0, %v6059_v8  ;;  %v10692_v42 = vld [vmem:[#allocation73_spill] sm:$0xff] }
 0x4fb   : > { %v6063_v54 = vpop.eup %6062  ;;  %v3931_v7 = vmul.f32 5.0, %v6061_v62  ;;  %v3937_v58 = vmul.f32 1.442695, %v3929_v18 }
 0x4fc   : > { %v6065_v48 = vpop.eup %6064  ;;  %v3932_v24 = vmul.f32 5.0, %v6063_v54  ;;  %v3939_v56 = vmul.f32 1.442695, %v3930_v57  ;;  %v10693_v57 = vld [vmem:[#allocation72_spill] sm:$0xff] }
 0x4fd   : > { %v6067_v4 = vpop.eup %6066  ;;  %v3933_v27 = vmul.f32 5.0, %v6065_v48  ;;  %6072 = vpow2.f32 %v3937_v58  ;;  %v3941_v15 = vmul.f32 1.442695, %v3931_v7  ;;  %4326 = vmatpush.bf16.msra.mxu3 %v5463_v12 }
 0x4fe   : > { %v6069_v13 = vpop.eup %6068  ;;  %v3934_v63 = vmul.f32 5.0, %v6067_v4  ;;  %6074 = vpow2.f32 %v3939_v56  ;;  %v3943_v41 = vmul.f32 1.442695, %v3932_v24  ;;  %v10694_v24 = vld [vmem:[#allocation63_spill] sm:$0xff] }
 0x4ff   : > { %v6071_v19 = vpop.eup %6070  ;;  %v3935_v34 = vmul.f32 5.0, %v6069_v13  ;;  %6076 = vpow2.f32 %v3941_v15  ;;  %v3945_v16 = vmul.f32 1.442695, %v3933_v27  ;;  %v10695_v15 = vld [vmem:[#allocation62_spill] sm:$0xff] }
 0x500   : > { %v3936_v36 = vmul.f32 5.0, %v6071_v19  ;;  %6078 = vpow2.f32 %v3943_v41  ;;  %v3947_v52 = vmul.f32 1.442695, %v3934_v63  ;;  %v10696_v19 = vld [vmem:[#allocation71_spill] sm:$0xff] }
 0x501   : > { %6080 = vpow2.f32 %v3945_v16  ;;  %v3949_v30 = vmul.f32 1.442695, %v3935_v34 }
 0x502   : > { %6082 = vpow2.f32 %v3947_v52  ;;  %v3951_v5 = vmul.f32 1.442695, %v3936_v36  ;;  %v10697_v52 = vld [vmem:[#allocation67_spill] sm:$0xff] }
 0x503   : > { %v6073_v50 = vpop.eup %6072  ;;  %6084 = vpow2.f32 %v3949_v30 }
 0x504   : > { %v6075_v26 = vpop.eup %6074  ;;  %6086 = vpow2.f32 %v3951_v5  ;;  %v3953_v43 = vmul.f32 %v6073_v50, %v10690_v3 }
 0x505   : > { %v6077_v46 = vpop.eup %6076  ;;  %v3954_v29 = vmul.f32 %v6075_v26, %v10691_v9 }
 0x506   : > { %v6079_v35 = vpop.eup %6078  ;;  %v3955_v8 = vmul.f32 %v6077_v46, %v10692_v42  ;;  %v3961_v18 = vrot.slane %v3953_v43, 4 }
 0x507   : > { %v6081_v62 = vpop.eup %6080  ;;  %v3956_v54 = vmul.f32 %v6079_v35, %v10693_v57  ;;  %v3967_v7 = vrot.slane %v3954_v29, 4 }
 0x508   : > { %v6083_v58 = vpop.eup %6082  ;;  %v3962_v25 = vadd.f32 %v3961_v18, %v3953_v43  ;;  %v3973_v48 = vrot.slane %v3955_v8, 4  ;;  %v3957_v56 = vmul.f32 %v6081_v62, %v10694_v24 }
 0x509   : > { %v6085_v4 = vpop.eup %6084  ;;  %v3968_v27 = vadd.f32 %v3967_v7, %v3954_v29  ;;  %v3958_v13 = vmul.f32 %v6083_v58, %v10695_v15  ;;  %v3979_v63 = vrot.slane %v3956_v54, 4 }
 0x50a   : > { %v6087_v41 = vpop.eup %6086  ;;  %v3959_v34 = vmul.f32 %v6085_v4, %v10696_v19  ;;  %v3963_v16 = vrot.slane %v3962_v25, 2  ;;  %v3974_v28 = vadd.f32 %v3973_v48, %v3955_v8  ;;  %v3985_v36 = vrot.slane %v3957_v56, 4 }
 0x50b   : > { %v3960_v30 = vmul.f32 %v6087_v41, %v10697_v52  ;;  %v3969_v5 = vrot.slane %v3968_v27, 2  ;;  %v3980_v50 = vadd.f32 %v3979_v63, %v3956_v54  ;;  %v3991_v12 = vrot.slane %v3958_v13, 4 }
 0x50c   : > { %v3964_v26 = vadd.f32 %v3963_v16, %v3962_v25  ;;  %v3975_v3 = vrot.slane %v3974_v28, 2  ;;  %v3986_v43 = vadd.f32 %v3985_v36, %v3957_v56  ;;  %v3997_v46 = vrot.slane %v3959_v34, 4 }
 0x50d   : > { %v3970_v9 = vadd.f32 %v3969_v5, %v3968_v27  ;;  %v3981_v29 = vrot.slane %v3980_v50, 2  ;;  %v3992_v35 = vadd.f32 %v3991_v12, %v3958_v13  ;;  %v4003_v42 = vrot.slane %v3960_v30, 4 }
 0x50e   : > { %v3965_v18 = vrot.slane %v3964_v26, 1  ;;  %v3976_v62 = vadd.f32 %v3975_v3, %v3974_v28  ;;  %v3987_v57 = vrot.slane %v3986_v43, 2  ;;  %v3998_v7 = vadd.f32 %v3997_v46, %v3959_v34 }
 0x50f   : > { %v3971_v58 = vrot.slane %v3970_v9, 1  ;;  %v3982_v8 = vadd.f32 %v3981_v29, %v3980_v50  ;;  %v3993_v48 = vrot.slane %v3992_v35, 2  ;;  %v4004_v24 = vadd.f32 %v4003_v42, %v3960_v30 }
 0x510   : > { %v9556_v4 = vadd.f32 %v3965_v18, %v3964_v26  ;;  %v3977_v54 = vrot.slane %v3976_v62, 1  ;;  %v3988_v15 = vadd.f32 %v3987_v57, %v3986_v43  ;;  %v3999_v25 = vrot.slane %v3998_v7, 2 }
 0x511   : > { %v9558_v63 = vadd.f32 %v3971_v58, %v3970_v9  ;;  %v3983_v56 = vrot.slane %v3982_v8, 1  ;;  %v3994_v27 = vadd.f32 %v3993_v48, %v3992_v35  ;;  %v4005_v41 = vrot.slane %v4004_v24, 2 }
 0x512   : > { %v9560_v13 = vadd.f32 %v3977_v54, %v3976_v62  ;;  %v3989_v19 = vrot.slane %v3988_v15, 1  ;;  %v4000_v16 = vadd.f32 %v3999_v25, %v3998_v7  ;;  %v4009_v34 = vmax.f32 %v9556_v4, 1e-30 }
 0x513   : > { %v9563_v28 = vadd.f32 %v3983_v56, %v3982_v8  ;;  %v3995_v36 = vrot.slane %v3994_v27, 1  ;;  %v4006_v52 = vadd.f32 %v4005_v41, %v4004_v24  ;;  %v9566_v30 = vmax.f32 %v9558_v63, 1e-30 }
 0x514   : > { %v4001_v5 = vrot.slane %v4000_v16, 1  ;;  %6088 = vrcp.f32 %v4009_v34  ;;  %v9568_v50 = vadd.f32 %v3989_v19, %v3988_v15  ;;  %v9571_v26 = vmax.f32 %v9560_v13, 1e-30 }
 0x515   : > { %v4007_v12 = vrot.slane %v4006_v52, 1  ;;  %v9574_v3 = vmax.f32 %v9563_v28, 1e-30  ;;  %v9576_v43 = vadd.f32 %v3995_v36, %v3994_v27  ;;  %6090 = vrcp.f32 %v9566_v30 }
 0x516   : > { %v9579_v46 = vadd.f32 %v4001_v5, %v4000_v16  ;;  %v4026_v9 = vand.u32 2147483647, %v4009_v34  ;;  %v4028_v29 = vand.u32 2147483648, %v4009_v34  ;;  %v9584_v42 = vmax.f32 %v9568_v50, 1e-30 }
 0x517   : > { %v9581_v35 = vadd.f32 %v4007_v12, %v4006_v52  ;;  %6092 = vrcp.f32 %v9571_v26  ;;  %vm4022_vm5 = vweird.f32 %v4009_v34  ;;  %v9589_v62 = vmax.f32 %v9576_v43, 1e-30 }
 0x518   : > { %6094 = vrcp.f32 %v9574_v3  ;;  %v4041_v7 = vand.u32 2147483647, %v9566_v30  ;;  %v4043_v58 = vand.u32 2147483648, %v9566_v30  ;;  %v9594_v8 = vmax.f32 %v9579_v46, 1e-30 }
 0x519   : > { %vm9596_vm4 = vcmp.eq.f32.partialorder %v4026_v9, 8.507059e+37  ;;  %v4029_v24 = vor.u32 1.1754944e-38, %v4028_v29  ;;  %vm4037_vm0 = vweird.f32 %v9566_v30  ;;  %v4056_v54 = vand.u32 2147483647, %v9571_v26 }
 0x51a   : > { %v6089_v18 = vpop.eup %6088  ;;  %v9603_v25 = vmax.f32 %v9581_v35, 1e-30  ;;  %v4058_v27 = vand.u32 2147483648, %v9571_v26  ;;  %6096 = vrcp.f32 %v9584_v42  ;;  %vm4052_vm9 = vweird.f32 %v9571_v26 }
 0x51b   : > { %v4018_v57 = vmul.f32 %v6089_v18, %v4009_v34  ;;  %v6091_v15 = vpop.eup %6090  ;;  %vm4023_vm11 = vweird.f32 %v6089_v18  ;;  %v4071_v19 = vand.u32 2147483647, %v9574_v3  ;;  %v4073_v16 = vand.u32 2147483648, %v9574_v3 }
 0x51c   : > { %v4033_v41 = vmul.f32 %v6091_v15, %v9566_v30  ;;  %vm9611_vm3 = vcmp.eq.f32.partialorder %v4041_v7, 8.507059e+37  ;;  %v4044_v12 = vor.u32 1.1754944e-38, %v4043_v58  ;;  %vm4067_vm15 = vweird.f32 %v9574_v3  ;;  %vm9626_vm10 = vmor %vm4022_vm5, %vm4023_vm11 }
 0x51d   : > { %v4019_v56 = vsub.f32 1.0, %v4018_v57  ;;  %v6093_v36 = vpop.eup %6092  ;;  %6098 = vrcp.f32 %v9589_v62  ;;  %vm9618_vm2 = vcmp.eq.f32.partialorder %v4056_v54, 8.507059e+37  ;;  %v4086_v20 = vand.u32 2147483647, %v9584_v42 }
 0x51e   : > { %v6095_v9 = vpop.eup %6094  ;;  %v4034_v29 = vsub.f32 1.0, %v4033_v41  ;;  %v4048_v57 = vmul.f32 %v6093_v36, %v9571_v26  ;;  %vm4038_vm14 = vweird.f32 %v6091_v15  ;;  %v4059_v7 = vor.u32 1.1754944e-38, %v4058_v27 }
 0x51f   : > { %v4020_v52 = vmul.f32 %v6089_v18, %v4019_v56  ;;  %v4063_v61 = vmul.f32 %v6095_v9, %v9574_v3  ;;  %vm9630_vm13 = vcmp.eq.f32.partialorder %v4071_v19, 8.507059e+37  ;;  %v4074_v53 = vor.u32 1.1754944e-38, %v4073_v16  ;;  %vm4039_vm7 = vmor %vm4037_vm0, %vm4038_vm14 }
 0x520   : > { %v4035_v41 = vmul.f32 %v6091_v15, %v4034_v29  ;;  %v4049_v21 = vsub.f32 1.0, %v4048_v57  ;;  %vm4082_vm6 = vweird.f32 %v9584_v42  ;;  %v4088_v34 = vand.u32 2147483648, %v9584_v42 }
 0x521   : > { %v4021_v56 = vadd.f32 %v6089_v18, %v4020_v52  ;;  %v6097_v52 = vpop.eup %6096  ;;  %v4064_v2 = vsub.f32 1.0, %v4063_v61  ;;  %6100 = vrcp.f32 %v9594_v8  ;;  %vm4053_vm8 = vweird.f32 %v6093_v36 }
 0x522   : > { %v4036_v31 = vadd.f32 %v6091_v15, %v4035_v41  ;;  %v4050_v51 = vmul.f32 %v6093_v36, %v4049_v21  ;;  %v4078_v19 = vmul.f32 %v6097_v52, %v9584_v42  ;;  %vm9640_vm1 = vcmp.eq.f32.partialorder %v4086_v20, 8.507059e+37  ;;  %vm4054_vm11 = vmor %vm4052_vm9, %vm4053_vm8 }
 0x523   : > { %v4025_v27 = vsel %vm9626_vm10, %v6089_v18, %v4021_v56  ;;  %v6099_v16 = vpop.eup %6098  ;;  %v4065_v61 = vmul.f32 %v6095_v9, %v4064_v2  ;;  %vm4068_vm12 = vweird.f32 %v6095_v9  ;;  %vm4097_vm5 = vweird.f32 %v9589_v62 }
 0x524   : > { %v4030_v57 = vsel %vm9596_vm4, %v4029_v24, %v4025_v27  ;;  %v4040_v21 = vsel %vm4039_vm7, %v6091_v15, %v4036_v31  ;;  %v4051_v18 = vadd.f32 %v6093_v36, %v4050_v51  ;;  %v4079_v56 = vsub.f32 1.0, %v4078_v19  ;;  %vm4069_vm4 = vmor %vm4067_vm15, %vm4068_vm12 }
 0x525   : > { %v4093_v20 = vmul.f32 %v6099_v16, %v9589_v62  ;;  %v4066_v58 = vadd.f32 %v6095_v9, %v4065_v61  ;;  %vm4083_vm10 = vweird.f32 %v6097_v52  ;;  %v4089_v48 = vor.u32 1.1754944e-38, %v4088_v34 }
 0x526   : > { %v4101_v24 = vand.u32 2147483647, %v9589_v62  ;;  %v4045_v30 = vsel %vm9611_vm3, %v4044_v12, %v4040_v21  ;;  %v4055_v2 = vsel %vm4054_vm11, %v6093_v36, %v4051_v18  ;;  %v4080_v31 = vmul.f32 %v6097_v52, %v4079_v56  ;;  %vm4084_vm9 = vmor %vm4082_vm6, %vm4083_vm10 }
 0x527   : > { %v4094_v51 = vsub.f32 1.0, %v4093_v20  ;;  %v6101_v15 = vpop.eup %6100  ;;  %v4031_v41 = vmul.f32 %v4030_v57, %v9556_v4  ;;  %v4060_v26 = vsel %vm9618_vm2, %v4059_v7, %v4055_v2  ;;  %v4070_v27 = vsel %vm4069_vm4, %v6095_v9, %v4066_v58 }
 0x528   : > { %v4103_v34 = vand.u32 2147483648, %v9589_v62  ;;  %v4075_v19 = vsel %vm9630_vm13, %v4074_v53, %v4070_v27  ;;  %v4081_v5 = vadd.f32 %v6097_v52, %v4080_v31  ;;  %vm4098_vm0 = vweird.f32 %v6099_v16 }
 0x529   : > { %v4095_v12 = vmul.f32 %v6099_v16, %v4094_v51  ;;  %v4046_v3 = vmul.f32 %v4045_v30, %v9558_v63  ;;  %v4061_v36 = vmul.f32 %v4060_v26, %v9560_v13  ;;  %v4108_v44 = vmul.f32 %v6101_v15, %v9594_v8  ;;  %vm4099_vm3 = vmor %vm4097_vm5, %vm4098_vm0 }
 0x52a   : > { %v4116_v4 = vand.u32 2147483647, %v9594_v8  ;;  %v4076_v9 = vmul.f32 %v4075_v19, %v9563_v28  ;;  %v4085_v7 = vsel %vm4084_vm9, %v6097_v52, %v4081_v5  ;;  %6102 = vrcp.f32 %v9603_v25 }
 0x52b   : > { %v4096_v54 = vadd.f32 %v6099_v16, %v4095_v12  ;;  %v4090_v53 = vsel %vm9640_vm1, %v4089_v48, %v4085_v7  ;;  %vm4102_vm15 = vcmp.eq.f32.partialorder %v4101_v24, 8.507059e+37  ;;  %v4104_v63 = vor.u32 1.1754944e-38, %v4103_v34 }
 0x52c   : > { %v4109_v13 = vsub.f32 1.0, %v4108_v44  ;;  %v4091_v42 = vmul.f32 %v4090_v53, %v9568_v50  ;;  %v4118_v61 = vand.u32 2147483648, %v9594_v8  ;;  %v4137_v28 = vmul.f32 %v4031_v41, %v9500_v39 }
 0x52d   : > { %v4100_v57 = vsel %vm4099_vm3, %v6099_v16, %v4096_v54  ;;  %vm4113_vm2 = vweird.f32 %v6101_v15  ;;  %v4138_v18 = vmul.f32 %v4046_v3, %v9495_v49  ;;  %vm4112_vm14 = vweird.f32 %v9594_v8 }
 0x52e   : > { %v4105_v52 = vsel %vm4102_vm15, %v4104_v63, %v4100_v57  ;;  %v4110_v21 = vmul.f32 %v6101_v15, %v4109_v13  ;;  %vm9682_vm13 = vcmp.eq.f32.partialorder %v4116_v4, 8.507059e+37  ;;  %v4139_v29 = vmul.f32 %v4061_v36, %v9498_v47  ;;  %vm4114_vm6 = vmor %vm4112_vm14, %vm4113_vm2 }
 0x52f   : > { %v4140_v50 = vmul.f32 %v4076_v9, %v9502_v22  ;;  %v4106_v16 = vmul.f32 %v4105_v52, %v9576_v43  ;;  %v4177_v20 = vpack.c.bf16 %v4137_v28, %v4137_v28  ;;  %v4178_v58 = vpack.c.bf16 %v4138_v18, %v4138_v18 }
 0x530   : > { %v4111_v56 = vadd.f32 %v6101_v15, %v4110_v21  ;;  %v6103_v48 = vpop.eup %6102  ;;  %v4119_v24 = vor.u32 1.1754944e-38, %v4118_v61  ;;  %v4141_v30 = vmul.f32 %v4091_v42, %v9504_v17  ;;  %v4179_v2 = vpack.c.bf16 %v4139_v29, %v4139_v29 }
 0x531   : > { %vm10712_vm8 = vcmask 1041409   ;;  %v4123_v51 = vmul.f32 %v6103_v48, %v9603_v25  ;;  %v4131_v41 = vand.u32 2147483647, %v9603_v25  ;;  %v4180_v26 = vpack.c.bf16 %v4140_v50, %v4140_v50 }
 0x532   : > { %v4368_v8 = vsel %vm10712_vm8, %v4138_v18, %v4137_v28  ;;  %v4115_v31 = vsel %vm4114_vm6, %v6101_v15, %v4111_v56  ;;  %v4133_v27 = vand.u32 2147483648, %v9603_v25  ;;  %v4254_v34 = vunpack.c.l.b16 %v4177_v20  ;;  %vm10713_vm7 = vmmov %vm10712_vm8 }
 0x533   : > { %v4120_v43 = vsel %vm9682_vm13, %v4119_v24, %v4115_v31  ;;  %v4255_v19 = vunpack.c.l.b16 %v4178_v58  ;;  %v4124_v12 = vsub.f32 1.0, %v4123_v51  ;;  %v4142_v3 = vmul.f32 %v4106_v16, %v9506_v11  ;;  %v5387_v51 = vld [vmem:[#allocation13 + $0x70] sm:$0xf] }
 0x534   : > { %v4121_v5 = vmul.f32 %v4120_v43, %v9579_v46  ;;  %v4256_v36 = vunpack.c.l.b16 %v4179_v2  ;;  %vm4128_vm1 = vweird.f32 %v6103_v48  ;;  %v4181_v15 = vpack.c.bf16 %v4141_v30, %v4141_v30  ;;  %v5389_v43 = vld [vmem:[#allocation13 + $0x78] sm:$0xf0] }
 0x535   : > { %v4262_v44 = vsel %vm10713_vm7, %v4255_v19, %v4254_v34  ;;  %vm10714_vm12 = vcmask 1042434   ;;  %v4125_v9 = vmul.f32 %v6103_v48, %v4124_v12  ;;  %v4257_v7 = vunpack.c.l.b16 %v4180_v26  ;;  %v5379_v34 = vld [vmem:[#allocation13 + $0x60] sm:$0xf]  ;;  %v5492_v19 = vld [vmem:[#allocation13 + $0x64] sm:$0xf0] }
 0x536   : > { %v4369_v4 = vsel %vm10714_vm12, %v4139_v29, %v4368_v8  ;;  %vm10715_vm5 = vmmov %vm10714_vm12  ;;  %vm10716_vm11 = vcmask 1043459   ;;  %vm4127_vm10 = vweird.f32 %v9603_v25  ;;  %v4143_v46 = vmul.f32 %v4121_v5, %v9510_v60  ;;  %v5491_v5 = vld [vmem:[#allocation13 + $0x64] sm:$0xf] }
 0x537   : > { %v4263_v54 = vsel %vm10715_vm5, %v4256_v36, %v4262_v44  ;;  %v4370_v53 = vsel %vm10716_vm11, %v4140_v50, %v4369_v4  ;;  %vm10717_vm4 = vcmask 1044484   ;;  %v4126_v13 = vadd.f32 %v6103_v48, %v4125_v9  ;;  %vm10718_vm0 = vmmov %vm10716_vm11  ;;  %v5490_v44 = vld [vmem:[#allocation13 + $0x54] sm:$0xf0]  ;;  %v5489_v4 = vld [vmem:[#allocation13 + $0x54] sm:$0xf] }
 0x538   : > { %v4371_v63 = vsel %vm10717_vm4, %v4141_v30, %v4370_v53  ;;  %v4182_v42 = vpack.c.bf16 %v4142_v3, %v4142_v3  ;;  %v4264_v57 = vsel %vm10718_vm0, %v4257_v7, %v4263_v54  ;;  %vm10719_vm9 = vcmask 1045509   ;;  %vm4129_vm3 = vmor %vm4127_vm10, %vm4128_vm1  ;;  %v5639_v9 = vld [vmem:[%s10132_s8] ss:$0 sm:$0xff] }
 0x539   : > { %v4372_v61 = vsel %vm10719_vm9, %v4142_v3, %v4371_v63  ;;  %v4134_v28 = vor.u32 1.1754944e-38, %v4133_v27  ;;  %v4258_v52 = vunpack.c.l.b16 %v4181_v15  ;;  %vm10720_vm15 = vcmask 1046534   ;;  %vm10721_vm14 = vmmov %vm10717_vm4  ;;  %v5381_v3 = vld [vmem:[#allocation13 + $0x68] sm:$0xf0]  ;;  %v5371_v15 = vld [vmem:[#allocation13 + $0x50] sm:$0xf] }
 0x53a   : > { %v4373_v21 = vsel %vm10720_vm15, %v4143_v46, %v4372_v61  ;;  %v4130_v18 = vsel %vm4129_vm3, %v6103_v48, %v4126_v13  ;;  %vm4132_vm2 = vcmp.eq.f32.partialorder %v4131_v41, 8.507059e+37  ;;  %v4183_v25 = vpack.c.bf16 %v4143_v46, %v4143_v46  ;;  %vm10722_vm13 = vmmov %vm10719_vm9  ;;  %v5494_v41 = vld [vmem:[#allocation13 + $0x74] sm:$0xf0]  ;;  %v5373_v54 = vld [vmem:[#allocation13 + $0x58] sm:$0xf0] }
 0x53b   : > { %v4135_v62 = vsel %vm4132_vm2, %v4134_v28, %v4130_v18  ;;  %v4265_v29 = vsel %vm10721_vm14, %v4258_v52, %v4264_v57  ;;  %v4259_v16 = vunpack.c.l.b16 %v4182_v42  ;;  %vm10723_vm6 = vcmask 1047559   ;;  %vm10724_vm8 = vmmov %vm10720_vm15  ;;  %v5363_v13 = vld [vmem:[#allocation13 + $0x40] sm:$0xf]  ;;  %v5488_v42 = vld [vmem:[#allocation13 + $0x44] sm:$0xf0] }
 0x53c   : > { %v4136_v50 = vmul.f32 %v4135_v62, %v9581_v35  ;;  %v4260_v58 = vunpack.c.l.b16 %v4183_v25  ;;  %vm10725_vm1 = vmmov %vm10723_vm6  ;;  %v5493_v35 = vld [vmem:[#allocation13 + $0x74] sm:$0xf]  ;;  %v5388_v26 = vor.u32 %v5494_v41, %v5387_v51  ;;  %v5380_v12 = vor.u32 %v5492_v19, %v5379_v34  ;;  %v5487_v57 = vld [vmem:[#allocation13 + $0x44] sm:$0xf] }
 0x53d   : > { %v4266_v20 = vsel %vm10722_vm13, %v4259_v16, %v4265_v29  ;;  %v5392_v27 = vor.u32 %v5493_v35, %v5389_v43  ;;  %v5384_v36 = vor.u32 %v5491_v5, %v5381_v3  ;;  %v5372_v7 = vor.u32 %v5490_v44, %v5371_v15  ;;  %v5365_v52 = vld [vmem:[#allocation13 + $0x48] sm:$0xf0]  ;;  %v5355_v62 = vld [vmem:[#allocation13 + $0x30] sm:$0xf]  ;;  %v5486_v25 = vld [vmem:[#allocation13 + $0x34] sm:$0xf0] }
 0x53e   : > { %v4144_v56 = vmul.f32 %v4136_v50, %v9524_v59  ;;  %v4267_v2 = vsel %vm10724_vm8, %v4260_v58, %v4266_v20  ;;  %4499 = vmatpush.bf16.msrb.mxu0 %v5388_v26  ;;  %v5376_v46 = vor.u32 %v5489_v4, %v5373_v54  ;;  %v5364_v28 = vor.u32 %v5488_v42, %v5363_v13  ;;  %v5485_v29 = vld [vmem:[#allocation13 + $0x34] sm:$0xf]  ;;  %v5339_v51 = vld [vmem:[#allocation13 + $0x10] sm:$0xf]  ;;  %v5482_v41 = vld [vmem:[#allocation13 + $0x14] sm:$0xf0] }
 0x53f   : > { %4512 = vmatpush.bf16.msrb.mxu1 %v5392_v27  ;;  %v5356_v16 = vor.u32 %v5486_v25, %v5355_v62  ;;  %v5481_v26 = vld [vmem:[#allocation13 + $0x14] sm:$0xf]  ;;  %v5341_v43 = vld [vmem:[#allocation13 + $0x18] sm:$0xf0]  ;;  %v5340_v27 = vor.u32 %v5482_v41, %v5339_v51  ;;  %v5331_v19 = vld [vmem:[#allocation13] sm:$0xf] }
 0x540   : > { %v4184_v24 = vpack.c.bf16 %v4144_v56, %v4144_v56  ;;  %v9714_v30 = vsel %vm10723_vm6, %v4144_v56, %v4373_v21  ;;  %v5368_v21 = vor.u32 %v5487_v57, %v5365_v52  ;;  %v5344_v34 = vor.u32 %v5481_v26, %v5341_v43  ;;  %v5480_v5 = vld [vmem:[#allocation13 + $0x4] sm:$0xf0]  ;;  %v5333_v3 = vld [vmem:[#allocation13 + $0x8] sm:$0xf0]  ;;  %vm10728_vm3 = vmmov %vm10721_vm14 }
 0x541   : > { %v5332_v15 = vor.u32 %v5480_v5, %v5331_v19  ;;  %vm10726_vm10 = vcmask 1041409   ;;  %vm10727_vm4 = vcmask 1042434   ;;  %vm10729_vm15 = vmmov %vm10722_vm13  ;;  %vm4544_vm13 = vcmask 1040384  }
 0x542   : > { %v4261_v48 = vunpack.c.l.b16 %v4184_v24  ;;  %4500 = vmatpush.bf16.msrb.mxu0 %v5380_v12  ;;  %v5347_v24 = vld [vmem:[#allocation13 + $0x20] sm:$0xf]  ;;  %v5479_v12 = vld [vmem:[#allocation13 + $0x4] sm:$0xf]  ;;  %vm10730_vm2 = vmmov %vm10724_vm8  ;;  %vm4558_vm6 = vcmask 1046528  }
 0x543   : > { %4513 = vmatpush.bf16.msrb.mxu1 %v5384_v36  ;;  %v5336_v4 = vor.u32 %v5479_v12, %v5333_v3  ;;  %vm10731_vm14 = vmmov %vm10725_vm1 }
 0x544   : > { %v4268_v8 = vsel %vm10725_vm1, %v4261_v48, %v4267_v2  ;;  %v5484_v2 = vld [vmem:[#allocation13 + $0x24] sm:$0xf0]  ;;  %v5483_v48 = vld [vmem:[#allocation13 + $0x24] sm:$0xf]  ;;  %vm10733_vm8 = vmmov %vm10726_vm10 }
 0x545   : > { %v4269_v31 = vpack.c.b16 %v4268_v8, %v4268_v8  ;;  %v5348_v8 = vor.u32 %v5484_v2, %v5347_v24  ;;  %vm10734_vm1 = vmmov %vm10727_vm4 }
 0x546   : > { %4501 = vmatpush.bf16.msrb.mxu0 %v5372_v7 }
 0x547   : > { %4327 = vmatmul.bf16.vlgmr.msra.gmra.mxu3 %v4269_v31  ;;  %4514 = vmatpush.bf16.msrb.mxu1 %v5376_v46  ;;  %v5349_v31 = vld [vmem:[#allocation13 + $0x28] sm:$0xf0] }
 0x548   : > { %v5352_v35 = vor.u32 %v5483_v48, %v5349_v31 }
 0x54a   : > { %4502 = vmatpush.bf16.msrb.mxu0 %v5364_v28  ;;  %v4386_v28 = vsel %vm10726_vm10, %v9495_v49, %v9500_v39 }
 0x54b   : > { %4515 = vmatpush.bf16.msrb.mxu1 %v5368_v21  ;;  %v4387_v21 = vsel %vm10727_vm4, %v9498_v47, %v4386_v28 }
 0x54c   : > { %v4388_v62 = vsel %vm10718_vm0, %v9502_v22, %v4387_v21 }
 0x54d   : > { %v4389_v25 = vsel %vm10728_vm3, %v9504_v17, %v4388_v62  ;;  %v4413_v17 = vld [vmem:[%s10732_s5] sm:$0x3] }
 0x54e   : > { %4503 = vmatpush.bf16.msrb.mxu0 %v5356_v16 }
 0x552   : > { %4504 = vmatpush.bf16.msrb.mxu0 %v5348_v8 }
 0x556   : > { %4505 = vmatpush.bf16.msrb.mxu0 %v5340_v27 }
 0x55a   : > { %4506 = vmatpush.bf16.msrb.mxu0 %v5332_v15 }
 0x5ca   : > { %v4328_v53 = vpop.f32.mrf.mxu3 }
 0x5cb   : > { %v4329_v63 = vadd.f32 %v4328_v53, %v9546_v33  ;;  %v5357_v33 = vld [vmem:[#allocation13 + $0x38] sm:$0xf0] }
 0x5cc   : > { %v5360_v20 = vor.u32 %v5485_v29, %v5357_v33 }
 0x5cd   : > { %v9722_v61 = vadd.f32 %v5639_v9, %v4329_v63 }
 0x5ce   : > { %4516 = vmatpush.bf16.msrb.mxu1 %v5360_v20 }
 0x5cf   : > { %v4337_v18 = vand.u32 2147483647, %v9722_v61  ;;  %vm4357_vm9 = vcmp.ge.f32.partialorder %v9722_v61, 0.0  ;;  %v4416_v61 = vperm.slane %v4413_v17, 1 }
 0x5d1   : > { %v4338_v50 = vsub.f32 0.0, %v4337_v18 }
 0x5d2   : > { %v4330_v56 = vpop.f32.mrf.mxu3  ;;  %4517 = vmatpush.bf16.msrb.mxu1 %v5352_v35 }
 0x5d3   : > { %v4339_v58 = vmul.f32 1.442695, %v4338_v50  ;;  %v4390_v50 = vsel %vm10729_vm15, %v9506_v11, %v4389_v25  ;;  %v4415_v11 = vperm.slane %v4413_v17, 0 }
 0x5d4   : > { %v4391_v49 = vsel %vm10730_vm2, %v9510_v60, %v4390_v50 }
 0x5d5   : > { %6104 = vpow2.f32 %v4339_v58  ;;  %v4392_v47 = vsel %vm10731_vm14, %v9524_v59, %v4391_v49 }
 0x5d6   : > { %4518 = vmatpush.bf16.msrb.mxu1 %v5344_v34 }
 0x5da   : > { %4519 = vmatpush.bf16.msrb.mxu1 %v5336_v4 }
 0x5db   : > { %v6105_v36 = vpop.eup %6104 }
 0x5dc   : > { %v4341_v44 = vadd.f32 1.0, %v6105_v36 }
 0x5de   : > { %6106 = vrcp.f32 %v4341_v44  ;;  %v4353_v53 = vand.u32 2147483648, %v4341_v44  ;;  %v4351_v63 = vand.u32 2147483647, %v4341_v44  ;;  %vm4347_vm12 = vweird.f32 %v4341_v44 }
 0x5e0   : > { %v4354_v42 = vor.u32 1.1754944e-38, %v4353_v53  ;;  %vm4352_vm11 = vcmp.eq.f32.partialorder %v4351_v63, 8.507059e+37 }
 0x5e4   : > { %v6107_v9 = vpop.eup %6106 }
 0x5e5   : > { %v4343_v7 = vmul.f32 %v6107_v9, %v4341_v44  ;;  %vm4348_vm7 = vweird.f32 %v6107_v9 }
 0x5e6   : > { %vm4349_vm5 = vmor %vm4347_vm12, %vm4348_vm7 }
 0x5e7   : > { %v4344_v54 = vsub.f32 1.0, %v4343_v7  ;;  %vm10735_vm7 = vmmov %vm10718_vm0 }
 0x5e8   : > { %vm10736_vm12 = vmmov %vm10728_vm3 }
 0x5e9   : > { %v4345_v46 = vmul.f32 %v6107_v9, %v4344_v54 }
 0x5eb   : > { %v4346_v13 = vadd.f32 %v6107_v9, %v4345_v46 }
 0x5ed   : > { %v4350_v57 = vsel %vm4349_vm5, %v6107_v9, %v4346_v13  ;;  %vm10737_vm5 = vmmov %vm10729_vm15  ;;  %v4540_v13 = vadd.f32 %v9541_v23, %v9285_v0 }
 0x5ee   : > { %v4355_v52 = vsel %vm4352_vm11, %v4354_v42, %v4350_v57  ;;  %vm10738_vm11 = vmmov %vm10730_vm2 }
 0x5ef   : > { %v4358_v18 = vmul.f32 %v6105_v36, %v4355_v52 }
 0x5f1   : > { %v4359_v29 = vsel %vm4357_vm9, %v4355_v52, %v4358_v18 }
 0x5f2   : > { %v4377_v16 = vsub.f32 1.0, %v4359_v29  ;;  %v4376_v39 = vmul.f32 %v9714_v30, %v4359_v29 }
 0x5f4   : > { %v4394_v33 = vmul.f32 %v4392_v47, %v4377_v16 }
 0x5f6   : > { %v4395_v22 = vadd.f32 %v4394_v33, %v4376_v39 }
 0x5f8   : > { %v4412_v56 = vpack.c.bf16 %v4395_v22, %v4395_v22 }
 0x5fa   : > { %4507 = vmatmul.bf16.vlgmr.msrb.gmra.mxu0 %v4412_v56  ;;  %4520 = vmatmul.bf16.vlgmr.msrb.gmra.mxu1 %v4412_v56 }
 0x677   : > { %v4508_v20 = vpop.f32.mrf.mxu0  ;;  %v4521_v58 = vpop.f32.mrf.mxu1 }
 0x678   : > { %v4522_v24 = vadd.f32 %v4521_v58, %v4416_v61  ;;  %v4509_v60 = vadd.f32 %v4508_v20, %v4415_v11 }
 0x67a   : > { %v4543_v2 = vrot.slane %v4522_v24, 7 }
 0x67c   : > { %v4546_v59 = vsel %vm10733_vm8, %v4509_v60, %v4543_v2  ;;  %v4548_v30 = vsel %vm10734_vm1, %v4509_v60, %v4543_v2  ;;  %v4550_v48 = vsel %vm10735_vm7, %v4509_v60, %v4543_v2  ;;  %v9748_v8 = vsel %vm4544_vm13, %v4509_v60, %v4543_v2 }
 0x67d   : > { %v4547_v31 = vrot.slane %v4546_v59, 1  ;;  %v4549_v51 = vrot.slane %v4548_v30, 2  ;;  %v4552_v41 = vsel %vm10736_vm12, %v4509_v60, %v4543_v2  ;;  %v4551_v35 = vrot.slane %v4550_v48, 3 }
 0x67e   : > { %v4554_v26 = vsel %vm10737_vm5, %v4509_v60, %v4543_v2  ;;  %v4556_v43 = vsel %vm10738_vm11, %v4509_v60, %v4543_v2  ;;  %v9753_v27 = vsel %vm4558_vm6, %v4543_v2, %v4509_v60  ;;  %v4553_v34 = vrot.slane %v4552_v41, 4 }
 0x67f   : > { %v4555_v19 = vrot.slane %v4554_v26, 5  ;;  %v4557_v5 = vrot.slane %v4556_v43, 6  ;;  %v4510_v12 = vpop.f32.mrf.mxu0  ;;  %v4523_v3 = vpop.f32.mrf.mxu1  ;;  %v4560_v36 = vrot.slane %v9753_v27, 7  ;;  %v4562_v15 = vperm.slane %v9748_v8, 1  ;;  %v10739_v27 = vld [vmem:[#allocation94_spill] sm:$0xff] }
 0x680   : > { %v4564_v44 = vperm.slane %v4547_v31, 1  ;;  %v4566_v4 = vperm.slane %v4549_v51, 1  ;;  %v4568_v9 = vperm.slane %v4551_v35, 1  ;;  %v4570_v7 = vperm.slane %v4553_v34, 1  ;;  %v10740_v12 = vld [vmem:[#allocation50_spill] sm:$0xff] }
 0x681   : > { %v4572_v54 = vperm.slane %v4555_v19, 1  ;;  %v4574_v53 = vperm.slane %v4557_v5, 1  ;;  %v4576_v46 = vperm.slane %v4560_v36, 1  ;;  %v9758_v63 = vadd.f32 %v4562_v15, %v9265_v37  ;;  %v10742_v15 = vld [vmem:[#allocation46_spill] sm:$0xff] }
 0x682   : > { %v9763_v42 = vadd.f32 %v4564_v44, %v9270_v32  ;;  %v9766_v57 = vadd.f32 %v4566_v4, %v9273_v45  ;;  %v9769_v28 = vadd.f32 %v4568_v9, %v9275_v14  ;;  %v9772_v52 = vadd.f32 %v4570_v7, %v9277_v1  ;;  %v10743_v44 = vld [vmem:[#allocation47_spill] sm:$0xff] }
 0x683   : > { %v9775_v21 = vadd.f32 %v4572_v54, %v9279_v40  ;;  %v9778_v37 = vadd.f32 %v4574_v53, %v9282_v10  ;;  %v9780_v18 = vadd.f32 %v4576_v46, %v4540_v13  ;;  %v4617_v32 = vand.u32 2147483647, %v9758_v63 }
 0x684   : > { %v4618_v0 = vand.u32 2147483647, %v9763_v42  ;;  %v4619_v45 = vand.u32 2147483647, %v9766_v57  ;;  %v4620_v14 = vand.u32 2147483647, %v9769_v28  ;;  %v4535_v48 = vadd.f32 %v9535_v6, %v9252_v38 }
 0x685   : > { %v4621_v23 = vand.u32 2147483647, %v9772_v52  ;;  %v4622_v1 = vand.u32 2147483647, %v9775_v21  ;;  %v4623_v40 = vand.u32 2147483647, %v9778_v37 }
 0x686   : > { %v4624_v62 = vand.u32 2147483647, %v9780_v18  ;;  %v4625_v10 = vsub.f32 0.0, %v4617_v32  ;;  %v4626_v25 = vsub.f32 0.0, %v4618_v0  ;;  %v4627_v29 = vsub.f32 0.0, %v4619_v45  ;;  %v10744_v38 = vld [vmem:[#allocation48_spill] sm:$0xff] }
 0x687   : > { %v4628_v50 = vsub.f32 0.0, %v4620_v14  ;;  %v4629_v16 = vsub.f32 0.0, %v4621_v23  ;;  %v4630_v49 = vsub.f32 0.0, %v4622_v1  ;;  %v4631_v33 = vsub.f32 0.0, %v4623_v40 }
 0x688   : > { %v4633_v47 = vmul.f32 1.442695, %v4625_v10  ;;  %v4635_v39 = vmul.f32 1.442695, %v4626_v25  ;;  %v4637_v22 = vmul.f32 1.442695, %v4627_v29 }
 0x689   : > { %v4639_v56 = vmul.f32 1.442695, %v4628_v50  ;;  %v4632_v17 = vsub.f32 0.0, %v4624_v62  ;;  %v4641_v61 = vmul.f32 1.442695, %v4629_v16  ;;  %v4561_v20 = vperm.slane %v9748_v8, 0 }
 0x68a   : > { %6108 = vpow2.f32 %v4633_v47  ;;  %v4643_v11 = vmul.f32 1.442695, %v4630_v49  ;;  %v4563_v58 = vperm.slane %v4547_v31, 0  ;;  %v4565_v24 = vperm.slane %v4549_v51, 0  ;;  %v10741_v31 = vld [vmem:[#allocation51_spill] sm:$0xff] }
 0x68b   : > { %6110 = vpow2.f32 %v4635_v39  ;;  %v4645_v60 = vmul.f32 1.442695, %v4631_v33  ;;  %v4567_v2 = vperm.slane %v4551_v35, 0  ;;  %v4569_v59 = vperm.slane %v4553_v34, 0 }
 0x68c   : > { %6112 = vpow2.f32 %v4637_v22  ;;  %v4647_v30 = vmul.f32 1.442695, %v4632_v17  ;;  %v4571_v41 = vperm.slane %v4555_v19, 0  ;;  %v4573_v26 = vperm.slane %v4557_v5, 0  ;;  %v10745_v5 = vld [vmem:[#allocation49_spill] sm:$0xff] }
 0x68d   : > { %6114 = vpow2.f32 %v4639_v56  ;;  %v4537_v8 = vadd.f32 %v10739_v27, %v9257_v55  ;;  %v4539_v51 = vadd.f32 %v10741_v31, %v10740_v12  ;;  %v4575_v3 = vperm.slane %v4560_v36, 0  ;;  %v10746_v36 = vld [vmem:[#allocation86_spill] sm:$0xff] }
 0x68e   : > { %6116 = vpow2.f32 %v4641_v61  ;;  %v9800_v35 = vadd.f32 %v4561_v20, %v10742_v15  ;;  %v9805_v4 = vadd.f32 %v4563_v58, %v10743_v44  ;;  %v9808_v6 = vadd.f32 %v4565_v24, %v10744_v38 }
 0x68f   : > { %6118 = vpow2.f32 %v4643_v11  ;;  %v9816_v9 = vadd.f32 %v4567_v2, %v10745_v5  ;;  %v9819_v7 = vadd.f32 %v4569_v59, %v10746_v36  ;;  %v9826_v46 = vadd.f32 %v4571_v41, %v4535_v48 }
 0x690   : > { %v9793_v43 = vpop.eup %6108  ;;  %6120 = vpow2.f32 %v4645_v60  ;;  %v9828_v13 = vadd.f32 %v4573_v26, %v4537_v8  ;;  %v9842_v23 = vadd.f32 %v4575_v3, %v4539_v51  ;;  %v4609_v1 = vmax.f32 %v9800_v35, 0.0 }
 0x691   : > { %v9802_v34 = vpop.eup %6110  ;;  %v9811_v19 = vadd.f32 1.0, %v9793_v43  ;;  %6122 = vpow2.f32 %v4647_v30  ;;  %v4610_v10 = vmax.f32 %v9805_v4, 0.0  ;;  %v4611_v25 = vmax.f32 %v9808_v6, 0.0 }
 0x692   : > { %v9813_v55 = vpop.eup %6112  ;;  %v9822_v54 = vadd.f32 1.0, %v9802_v34  ;;  %v4612_v16 = vmax.f32 %v9816_v9, 0.0  ;;  %v10771_v4 = vmax.f32 %v9819_v7, 0.0 }
 0x693   : > { %v9824_v53 = vpop.eup %6114  ;;  %v9831_v32 = vadd.f32 1.0, %v9813_v55  ;;  %6124 = vrcp.f32 %v9811_v19  ;;  %v4668_v62 = vand.u32 2147483648, %v9811_v19  ;;  %vm4662_vm10 = vweird.f32 %v9811_v19 }
 0x694   : > { %v9834_v0 = vpop.eup %6116  ;;  %v9837_v45 = vadd.f32 1.0, %v9824_v53  ;;  %6126 = vrcp.f32 %v9822_v54  ;;  %v4683_v29 = vand.u32 2147483648, %v9822_v54  ;;  %v4666_v56 = vand.u32 2147483647, %v9811_v19 }
 0x695   : > { %v9840_v14 = vpop.eup %6118  ;;  %v9846_v40 = vadd.f32 1.0, %v9834_v0  ;;  %6128 = vrcp.f32 %v9831_v32  ;;  %v9869_v61 = vor.u32 1.1754944e-38, %v4668_v62  ;;  %vm4677_vm4 = vweird.f32 %v9822_v54 }
 0x696   : > { %v9853_v50 = vpop.eup %6120  ;;  %v9862_v22 = vadd.f32 1.0, %v9840_v14  ;;  %6130 = vrcp.f32 %v9837_v45  ;;  %v4681_v11 = vand.u32 2147483647, %v9822_v54  ;;  %v4698_v20 = vand.u32 2147483648, %v9831_v32 }
 0x697   : > { %v9859_v33 = vpop.eup %6122  ;;  %6132 = vrcp.f32 %v9846_v40  ;;  %v9878_v24 = vadd.f32 1.0, %v9853_v50  ;;  %v9882_v2 = vor.u32 1.1754944e-38, %v4683_v29  ;;  %v4713_v59 = vand.u32 2147483648, %v9837_v45 }
 0x698   : > { %v9886_v30 = vadd.f32 1.0, %v9859_v33  ;;  %vm4692_vm0 = vweird.f32 %v9831_v32  ;;  %v4696_v41 = vand.u32 2147483647, %v9831_v32  ;;  %v4711_v26 = vand.u32 2147483647, %v9837_v45 }
 0x699   : > { %v9867_v17 = vpop.eup %6124  ;;  %vm9896_vm3 = vcmp.eq.f32.partialorder %v4666_v56, 8.507059e+37  ;;  %v4726_v31 = vand.u32 2147483647, %v9846_v40  ;;  %6134 = vrcp.f32 %v9862_v22  ;;  %vm9902_vm15 = vcmp.eq.f32.partialorder %v4681_v11, 8.507059e+37 }
 0x69a   : > { %v9875_v58 = vpop.eup %6126  ;;  %v4658_v60 = vmul.f32 %v9867_v17, %v9811_v19  ;;  %vm4663_vm9 = vweird.f32 %v9867_v17  ;;  %v9908_v44 = vor.u32 1.1754944e-38, %v4698_v20  ;;  %vm4707_vm2 = vweird.f32 %v9837_v45 }
 0x69b   : > { %v4673_v48 = vmul.f32 %v9875_v58, %v9822_v54  ;;  %v9893_v27 = vpop.eup %6128  ;;  %v4728_v38 = vand.u32 2147483648, %v9846_v40  ;;  %vm4678_vm14 = vweird.f32 %v9875_v58  ;;  %v4714_v62 = vor.u32 1.1754944e-38, %v4713_v59  ;;  %vm9937_vm12 = vmor %vm4662_vm10, %vm4663_vm9 }
 0x69c   : > { %v4659_v8 = vsub.f32 1.0, %v4658_v60  ;;  %v4688_v15 = vmul.f32 %v9893_v27, %v9831_v32  ;;  %v6131_v5 = vpop.eup %6130  ;;  %vm4722_vm13 = vweird.f32 %v9846_v40  ;;  %vm4693_vm6 = vweird.f32 %v9893_v27  ;;  %vm9952_vm5 = vmor %vm4677_vm4, %vm4678_vm14 }
 0x69d   : > { %v4674_v51 = vsub.f32 1.0, %v4673_v48  ;;  %v6133_v29 = vpop.eup %6132  ;;  %vm9917_vm8 = vcmp.eq.f32.partialorder %v4696_v41, 8.507059e+37  ;;  %v4703_v60 = vmul.f32 %v6131_v5, %v9837_v45  ;;  %vm9922_vm1 = vcmp.eq.f32.partialorder %v4711_v26, 8.507059e+37  ;;  %vm9968_vm9 = vmor %vm4692_vm0, %vm4693_vm6 }
 0x69e   : > { %v4660_v36 = vmul.f32 %v9867_v17, %v4659_v8  ;;  %v4689_v11 = vsub.f32 1.0, %v4688_v15  ;;  %v4718_v8 = vmul.f32 %v6133_v29, %v9846_v40  ;;  %vm9928_vm7 = vcmp.eq.f32.partialorder %v4726_v31, 8.507059e+37 }
 0x69f   : > { %v4675_v56 = vmul.f32 %v9875_v58, %v4674_v51  ;;  %v4741_v51 = vand.u32 2147483647, %v9862_v22  ;;  %v4729_v47 = vor.u32 1.1754944e-38, %v4728_v38  ;;  %v9943_v31 = vpop.eup %6134  ;;  %vm4708_vm11 = vweird.f32 %v6131_v5 }
 0x6a0   : > { %v4661_v59 = vadd.f32 %v9867_v17, %v4660_v36  ;;  %v4690_v15 = vmul.f32 %v9893_v27, %v4689_v11  ;;  %v4704_v36 = vsub.f32 1.0, %v4703_v60  ;;  %vm4737_vm10 = vweird.f32 %v9862_v22  ;;  %vm4709_vm6 = vmor %vm4707_vm2, %vm4708_vm11 }
 0x6a1   : > { %v4676_v26 = vadd.f32 %v9875_v58, %v4675_v56  ;;  %v4719_v56 = vsub.f32 1.0, %v4718_v8  ;;  %6136 = vrcp.f32 %v9878_v24  ;;  %v4743_v60 = vand.u32 2147483648, %v9862_v22 }
 0x6a2   : > { %v4665_v49 = vsel %vm9937_vm12, %v9867_v17, %v4661_v59  ;;  %v4691_v17 = vadd.f32 %v9893_v27, %v4690_v15  ;;  %v4705_v11 = vmul.f32 %v6131_v5, %v4704_v36  ;;  %vm4723_vm14 = vweird.f32 %v6133_v29 }
 0x6a3   : > { %v4680_v38 = vsel %vm9952_vm5, %v9875_v58, %v4676_v26  ;;  %v4720_v59 = vmul.f32 %v6133_v29, %v4719_v56  ;;  %v4733_v58 = vmul.f32 %v9943_v31, %v9862_v22  ;;  %vm9974_vm12 = vcmp.eq.f32.partialorder %v4741_v51, 8.507059e+37 }
 0x6a4   : > { %vm4778_vm5 = vcmp.ge.f32.partialorder %v9763_v42, 0.0  ;;  %vm4779_vm4 = vcmp.ge.f32.partialorder %v9766_v57, 0.0  ;;  %v4670_v32 = vsel %vm9896_vm3, %v9869_v61, %v4665_v49  ;;  %v4695_v41 = vsel %vm9968_vm9, %v9893_v27, %v4691_v17  ;;  %vm4724_vm9 = vmor %vm4722_vm13, %vm4723_vm14 }
 0x6a5   : > { %v4706_v26 = vadd.f32 %v6131_v5, %v4705_v11  ;;  %v4756_v15 = vand.u32 2147483647, %v9878_v24  ;;  %v4685_v51 = vsel %vm9902_vm15, %v9882_v2, %v4680_v38  ;;  %v4721_v36 = vadd.f32 %v6133_v29, %v4720_v59 }
 0x6a6   : > { %v4734_v12 = vsub.f32 1.0, %v4733_v58  ;;  %v4758_v49 = vand.u32 2147483648, %v9878_v24  ;;  %vm4781_vm3 = vcmp.ge.f32.partialorder %v9772_v52, 0.0  ;;  %vm4738_vm0 = vweird.f32 %v9943_v31 }
 0x6a7   : > { %v4710_v61 = vsel %vm4709_vm6, %v6131_v5, %v4706_v26  ;;  %v4744_v27 = vor.u32 1.1754944e-38, %v4743_v60  ;;  %vm4752_vm15 = vweird.f32 %v9878_v24  ;;  %6138 = vrcp.f32 %v9886_v30  ;;  %v6137_v45 = vpop.eup %6136 }
 0x6a8   : > { %vm4782_vm2 = vcmp.ge.f32.partialorder %v9775_v21, 0.0  ;;  %v4700_v2 = vsel %vm9917_vm8, %v9908_v44, %v4695_v41  ;;  %v4715_v3 = vsel %vm9922_vm1, %v4714_v62, %v4710_v61  ;;  %v4725_v5 = vsel %vm4724_vm9, %v6133_v29, %v4721_v36  ;;  %vm4739_vm8 = vmor %vm4737_vm10, %vm4738_vm0  ;;  %v6151_v61 = vld [vmem:[%s6665_s22 + $0x8] sm:$0xff] }
 0x6a9   : > { %v4735_v40 = vmul.f32 %v9943_v31, %v4734_v12  ;;  %v4730_v19 = vsel %vm9928_vm7, %v4729_v47, %v4725_v5  ;;  %v4748_v56 = vmul.f32 %v6137_v45, %v9878_v24  ;;  %vm10012_vm13 = vcmp.eq.f32.partialorder %v4756_v15, 8.507059e+37 }
 0x6aa   : > { %v4759_v17 = vor.u32 1.1754944e-38, %v4758_v49  ;;  %v4771_v11 = vand.u32 2147483647, %v9886_v30  ;;  %v4773_v20 = vand.u32 2147483648, %v9886_v30  ;;  %v4785_v62 = vmul.f32 %v9793_v43, %v4670_v32 }
 0x6ab   : > { %v4736_v44 = vadd.f32 %v9943_v31, %v4735_v40  ;;  %v4786_v29 = vmul.f32 %v9802_v34, %v4685_v51  ;;  %v4749_v47 = vsub.f32 1.0, %v4748_v56  ;;  %vm4753_vm1 = vweird.f32 %v6137_v45  ;;  %v6154_v40 = vld [vmem:[%s6665_s22 + $0x20] sm:$0xff]  ;;  %v6155_v56 = vld [vmem:[%s6665_s22 + $0x28] sm:$0xff] }
 0x6ac   : > { %v4787_v39 = vmul.f32 %v9813_v55, %v4700_v2  ;;  %v4788_v48 = vmul.f32 %v9824_v53, %v4715_v3  ;;  %vm4767_vm7 = vweird.f32 %v9886_v30  ;;  %v4774_v54 = vor.u32 1.1754944e-38, %v4773_v20 }
 0x6ad   : > { %v4740_v60 = vsel %vm4739_vm8, %v9943_v31, %v4736_v44  ;;  %vm4783_vm11 = vcmp.ge.f32.partialorder %v9778_v37, 0.0  ;;  %v4789_v43 = vmul.f32 %v9834_v0, %v4730_v19  ;;  %vm10767_vm14 = vcmp.ge.f32.partialorder %v9758_v63, 0.0  ;;  %v6139_v22 = vpop.eup %6138 }
 0x6ae   : > { %v4793_v34 = vsel %vm10767_vm14, %v4670_v32, %v4785_v62  ;;  %v4745_v59 = vsel %vm9974_vm12, %v4744_v27, %v4740_v60  ;;  %v4750_v58 = vmul.f32 %v6137_v45, %v4749_v47  ;;  %v4794_v55 = vsel %vm4778_vm5, %v4685_v51, %v4786_v29 }
 0x6af   : > { %v4795_v53 = vsel %vm4779_vm4, %v4700_v2, %v4787_v39  ;;  %v4763_v31 = vmul.f32 %v6139_v22, %v9886_v30  ;;  %vm4768_vm10 = vweird.f32 %v6139_v22  ;;  %vm10040_vm0 = vcmp.eq.f32.partialorder %v4771_v11, 8.507059e+37  ;;  %vm4754_vm4 = vmor %vm4752_vm15, %vm4753_vm1 }
 0x6b0   : > { %v4790_v63 = vmul.f32 %v9840_v14, %v4745_v59  ;;  %vm10770_vm6 = vcmp.ge.f32.partialorder %v9769_v28, 0.0  ;;  %v4751_v8 = vadd.f32 %v6137_v45, %v4750_v58  ;;  %v4797_v42 = vsel %vm4781_vm3, %v4730_v19, %v4789_v43  ;;  %vm4769_vm12 = vmor %vm4767_vm7, %vm4768_vm10  ;;  %v6157_v58 = vld [vmem:[%s6665_s22 + $0x38] sm:$0xff] }
 0x6b1   : > { %v4796_v0 = vsel %vm10770_vm6, %v4715_v3, %v4788_v48  ;;  %v4801_v57 = vmul.f32 %v4793_v34, %v4609_v1  ;;  %v4802_v32 = vmul.f32 %v4794_v55, %v4610_v10  ;;  %v4764_v26 = vsub.f32 1.0, %v4763_v31  ;;  %v6156_v48 = vld [vmem:[%s6665_s22 + $0x30] sm:$0xff] }
 0x6b2   : > { %v4798_v14 = vsel %vm4782_vm2, %v4745_v59, %v4790_v63  ;;  %v4803_v28 = vmul.f32 %v4795_v53, %v4611_v25  ;;  %v4804_v52 = vmul.f32 %v4796_v0, %v4612_v16  ;;  %v4755_v35 = vsel %vm4754_vm4, %v6137_v45, %v4751_v8  ;;  %v6152_v45 = vld [vmem:[%s6665_s22 + $0x10] sm:$0xff] }
 0x6b3   : > { %v4805_v1 = vmul.f32 %v4797_v42, %v10771_v4  ;;  %v10772_v10 = vmax.f32 %v9826_v46, 0.0  ;;  %v4809_v15 = vsub.f32 1.0, %v4793_v34  ;;  %v4760_v21 = vsel %vm10012_vm13, %v4759_v17, %v4755_v35  ;;  %v6150_v46 = vld [vmem:[%s6665_s22] sm:$0xff] }
 0x6b4   : > { %v4765_v51 = vmul.f32 %v6139_v22, %v4764_v26  ;;  %v4810_v6 = vsub.f32 1.0, %v4794_v55  ;;  %v4811_v25 = vsub.f32 1.0, %v4795_v53  ;;  %v4791_v9 = vmul.f32 %v9853_v50, %v4760_v21  ;;  %v6153_v50 = vld [vmem:[%s6665_s22 + $0x18] sm:$0xff] }
 0x6b5   : > { %v4806_v24 = vmul.f32 %v4798_v14, %v10772_v10  ;;  %v4812_v16 = vsub.f32 1.0, %v4796_v0  ;;  %v4813_v36 = vsub.f32 1.0, %v4797_v42  ;;  %v4814_v7 = vsub.f32 1.0, %v4798_v14 }
 0x6b6   : > { %v4766_v12 = vadd.f32 %v6139_v22, %v4765_v51  ;;  %v4817_v49 = vmul.f32 %v6150_v46, %v4809_v15  ;;  %v4818_v27 = vmul.f32 %v6151_v61, %v4810_v6  ;;  %v4819_v2 = vmul.f32 %v6152_v45, %v4811_v25 }
 0x6b7   : > { %v4799_v3 = vsel %vm4783_vm11, %v4760_v21, %v4791_v9  ;;  %v4820_v5 = vmul.f32 %v6153_v50, %v4812_v16  ;;  %v4821_v19 = vmul.f32 %v6154_v40, %v4813_v36  ;;  %v4822_v38 = vmul.f32 %v6155_v56, %v4814_v7 }
 0x6b8   : > { %v4770_v17 = vsel %vm4769_vm12, %v6139_v22, %v4766_v12  ;;  %v10773_v11 = vmax.f32 %v9828_v13, 0.0  ;;  %v4815_v20 = vsub.f32 1.0, %v4799_v3  ;;  %v4825_v62 = vadd.f32 %v4817_v49, %v4801_v57 }
 0x6b9   : > { %v4775_v30 = vsel %vm10040_vm0, %v4774_v54, %v4770_v17  ;;  %v4826_v37 = vadd.f32 %v4818_v27, %v4802_v32  ;;  %v4827_v29 = vadd.f32 %v4819_v2, %v4803_v28  ;;  %v4828_v47 = vadd.f32 %v4820_v5, %v4804_v52 }
 0x6ba   : > { %v4807_v44 = vmul.f32 %v4799_v3, %v10773_v11  ;;  %v4792_v39 = vmul.f32 %v9859_v33, %v4775_v30  ;;  %v4823_v60 = vmul.f32 %v6156_v48, %v4815_v20  ;;  %v4829_v43 = vadd.f32 %v4821_v19, %v4805_v1  ;;  %4833 = vst [vmem:[%s503_s24] sm:$0xff] %v4825_v62 }
 0x6bb   : > { %v4830_v34 = vadd.f32 %v4822_v38, %v4806_v24  ;;  %vm4784_vm5 = vcmp.ge.f32.partialorder %v9780_v18, 0.0  ;;  %4834 = vst [vmem:[%s503_s24 + $0x8] sm:$0xff] %v4826_v37  ;;  %v4616_v33 = vmax.f32 %v9842_v23, 0.0 }
 0x6bc   : > { %v4800_v13 = vsel %vm4784_vm5, %v4775_v30, %v4792_v39  ;;  %v4831_v54 = vadd.f32 %v4823_v60, %v4807_v44  ;;  %4835 = vst [vmem:[%s503_s24 + $0x10] sm:$0xff] %v4827_v29 }
 0x6bd   : > { %v4816_v22 = vsub.f32 1.0, %v4800_v13  ;;  %4836 = vst [vmem:[%s503_s24 + $0x18] sm:$0xff] %v4828_v47  ;;  %v4808_v59 = vmul.f32 %v4800_v13, %v4616_v33 }
 0x6be   : > { %4837 = vst [vmem:[%s503_s24 + $0x20] sm:$0xff] %v4829_v43 }
 0x6bf   : > { %v4824_v55 = vmul.f32 %v6157_v58, %v4816_v22  ;;  %4838 = vst [vmem:[%s503_s24 + $0x28] sm:$0xff] %v4830_v34 }
 0x6c0   : > { %4839 = vst [vmem:[%s503_s24 + $0x30] sm:$0xff] %v4831_v54 }
 0x6c1   : > { %v4832_v18 = vadd.f32 %v4824_v55, %v4808_v59 }
 0x6c3   : > { %4840 = vst [vmem:[%s503_s24 + $0x38] sm:$0xff] %v4832_v18 }
 0x6c4   : > { %6395 = shalt.err (!%p6392_p9)
}
 0x6c5   : > { %s6463_s10 = smov 128   ;;  %s6464_s25 = smov 8  }
 0x6c6   : > { %5522 = dma.vmem_to_hbm [thread:$0]  (%p6625_p4), %s4855_s30, 1024, %s4857_s26, %s4842_s3, %s6463_s10, %s6463_s10, %s6464_s25  }
 0x6c7 PF: > { %s4871_s24 = sand.u32 1, %s6434_s17   ;;  %p10775_p10 = scmp.ge.s32.totalorder %s6446_s20, 2 }
 0x6c8   : > { %s4872_s23 = scalar_lea.sflag [#allocation4], %s4871_s24 }
 0x6c9   : > { %p5548_p13 = pnand %p10775_p10, %p6629_p6 }
 0x6cb   : > { %p5549_p11 = pneg %p5548_p13 }
 0x6cd   : > { %6429 = dma.done.wait (%p5549_p11), %s4872_s23, 1024  }
 0x6ce   : > { %6431 = vsyncadd (%p5549_p11), %s4872_s23, 4294966272  ;;  %p27_p0 = scmp.ge.s32.totalorder %s6599_s14, 4   ;;  %s10776_s17 = smov %s6438_s18 }
 0x6cf   : > { %s10777_s18 = smov %s6442_s19  ;;  %s10778_s19 = smov %s6610_s15 }
 0x6d0   : > { %s10779_s20 = smov %s6599_s14  ;;  %29 = sbr.rel (!%p27_p0) target bundleno = 15 (0xf), region = 133 }
 0x6d5   :  { %4878 = vsyncpa [#allocation3], 1 }
 0x6d6   :  { %4880 = vsyncpa [#allocation3 + $0x1], 1 }
 0x6d7   :  { %4881 = vsyncpa [#allocation6], 1 }
 0x6d8   :  { %4882 = vsyncpa [#allocation9], 1 }
 0x6d9   :  { %4883 = vsyncpa [#allocation12], 1 }
 0x6da   :  { %4884 = vsyncpa [#allocation4], 1 }
 0x6db   :  { %4886 = vsyncpa [#allocation4 + $0x1], 1 }

</bundles_post_ra>
